<compile_context>
chip_gen: v7x
topology: tpu7x:2x2x1
jax: 0.10.0
libtpu: 0.0.40
codegen_flags: <defaults>
</compile_context>

<pallas_src>
import functools

import jax
import jax.numpy as jnp
from jax.experimental import pallas as pl
from jax.experimental.pallas import tpu as pltpu


def _round_up(a, b):
    return (a + b - 1) // b * b


# ----------------------------- Pallas kernel --------------------------------

def _fused_kernel(w_ref, p_ref, cb_ref, sbm_ref, o_ref, *, use_bf16_exp):
    # w_ref  : (Cout, KK)  bf16 — flipped conv-transpose weight as a matrix (LHS)
    # p_ref  : (KK, TM)    bf16 — im2col patch columns (RHS), output rows on lanes
    # cb_ref : (Cout, 1)   f32  — conv bias
    # sbm_ref: (1, 1)      f32  — min over channels of the subtraction bias
    # o_ref  : (1, TM)     f32  — fused, lane-dense output
    acc = jnp.dot(w_ref[...], p_ref[...], preferred_element_type=jnp.float32)
    acc = acc + cb_ref[...]                                   # (Cout, TM) f32

    # logsumexp over the channel axis (sublanes), keepdims -> (1, TM)
    m = jnp.max(acc, axis=0, keepdims=True)
    z = acc - m
    if use_bf16_exp:
        # bf16 EUP (v6e/v7x): exp in bf16, accumulate the sum in f32.
        e = jnp.exp(z.astype(jnp.bfloat16))
        s = jnp.sum(e, axis=0, keepdims=True, dtype=jnp.float32)
    else:
        s = jnp.sum(jnp.exp(z), axis=0, keepdims=True)
    lse = m + jnp.log(s)                                      # (1, TM)

    # hardswish-like gate: x * sigmoid(x + 3) / 6
    hs = lse * jax.nn.sigmoid(lse + 3.0) * (1.0 / 6.0)

    # max_c clamp(hs - b_c, -1, 1) == clamp(hs - min_c b_c, -1, 1)
    # (clamp is monotone; hs has a singleton channel dim after the logsumexp)
    o_ref[...] = jnp.clip(hs - sbm_ref[...], -1.0, 1.0)


# ------------------------------ host wrapper ---------------------------------

@functools.partial(jax.jit,
                   static_argnames=("stride", "padding", "device_kind"))
def _forward_impl(x, conv_w, conv_b, sub_b, *, stride, padding, device_kind):
    B, Cin, D, H, W = x.shape
    Cout = conv_w.shape[1]
    K = conv_w.shape[2]
    assert conv_w.shape == (Cin, Cout, K, K, K), conv_w.shape
    # required by the min-bias fold (bias broadcasts only along the channel dim)
    assert sub_b.shape == (Cout, 1, 1, 1), sub_b.shape

    Do = (D - 1) * stride - 2 * padding + K
    Ho = (H - 1) * stride - 2 * padding + K
    Wo = (W - 1) * stride - 2 * padding + K

    pad = K - 1 - padding
    assert pad >= 0, "padding > kernel_size - 1 not supported by this wrapper"

    Dd = (D - 1) * stride + 1
    Hd = (H - 1) * stride + 1
    Wd = (W - 1) * stride + 1
    Dp, Hp, Wp = Dd + 2 * pad, Hd + 2 * pad, Wd + 2 * pad

    # --- glue: conv_transpose == zero-dilate + pad + correlate flipped kernel ---
    # Channel-leading layout + early bf16 cast; dilation and padding merged into a
    # single strided scatter (one HBM pass, no separate x_dil / jnp.pad).
    x_cl = jnp.transpose(x, (1, 0, 2, 3, 4)).astype(jnp.bfloat16)   # (Cin,B,D,H,W)
    x_pad = jnp.zeros((Cin, B, Dp, Hp, Wp), jnp.bfloat16)
    x_pad = x_pad.at[:, :, pad:pad + Dd:stride,
                           pad:pad + Hd:stride,
                           pad:pad + Wd:stride].set(x_cl)

    M = B * Do * Ho * Wo
    KK = K * K * K * Cin

    # im2col built directly in (KK, M) layout: taps (kd,kh,kw) outer, ci inner —
    # matches the weight-matrix column order, so no big transpose is needed.
    taps = []
    for kd in range(K):
        for kh in range(K):
            for kw in range(K):
                taps.append(
                    x_pad[:, :, kd:kd + Do, kh:kh + Ho, kw:kw + Wo].reshape(Cin, M))
    P_T = jnp.concatenate(taps, axis=0)                     # (KK, M) bf16

    # --- per-generation row tiling -------------------------------------------
    # v7x: 2 TensorCores -> 4 tiles (2 per core, still double-buffered).
    # v5e/v6e: single core -> 2 bigger tiles (per-grid-step overhead dominates).
    want_tiles = 4 if ("v7" in device_kind or "tpu7" in device_kind) else 2
    TM = min(8192, _round_up(max(1, pl.cdiv(M, want_tiles)), 512))
    num_tiles = pl.cdiv(M, TM)
    num_tiles = max(2, num_tiles + (num_tiles % 2))          # even, >= 2
    M_pad = num_tiles * TM

    P_T = jnp.pad(P_T, ((0, 0), (0, M_pad - M)))             # bf16, lane-padded tail

    # Flipped kernel -> (Cout, KK) matrix, column order (kd,kh,kw,ci), bf16.
    w_flip = conv_w[:, :, ::-1, ::-1, ::-1]                  # (Cin,Cout,K,K,K)
    w_T = jnp.transpose(w_flip, (1, 2, 3, 4, 0)).reshape(Cout, KK).astype(jnp.bfloat16)

    cb = conv_b.reshape(Cout, 1).astype(jnp.float32)
    sbm = jnp.min(sub_b).reshape(1, 1).astype(jnp.float32)   # scalar min-bias

    use_bf16_exp = "v5" not in device_kind                   # v5e: no bf16 EUP

    out = pl.pallas_call(
        functools.partial(_fused_kernel, use_bf16_exp=use_bf16_exp),
        out_shape=jax.ShapeDtypeStruct((1, M_pad), jnp.float32),
        grid_spec=pltpu.PrefetchScalarGridSpec(
            num_scalar_prefetch=0,
            grid=(num_tiles,),
            in_specs=[
                pl.BlockSpec((Cout, KK), lambda i: (0, 0)),
                pl.BlockSpec((KK, TM), lambda i: (0, i)),
                pl.BlockSpec((Cout, 1), lambda i: (0, 0)),
                pl.BlockSpec((1, 1), lambda i: (0, 0)),
            ],
            out_specs=pl.BlockSpec((1, TM), lambda i: (0, i)),
        ),
        compiler_params=pltpu.CompilerParams(
            dimension_semantics=("parallel",)),
    )(w_T, P_T, cb, sbm)

    out = out[0, :M].reshape(B, Do, Ho, Wo)                  # (B,Do,Ho,Wo)
    return out[:, None, :, :, :]                             # (B,1,Do,Ho,Wo) NCDHW


def model_forward(x, conv_w, conv_b, sub_b, *, stride, padding):
    try:
        kind = jax.devices()[0].device_kind.lower()
    except Exception:
        kind = ""
    return _forward_impl(x, conv_w, conv_b, sub_b, stride=stride, padding=padding,
                         device_kind=kind)


# --------------------------- pure-JAX reference -------------------------------

def _reference(x, conv_w, conv_b, sub_b, *, stride, padding):
    Cin, Cout, K = conv_w.shape[0], conv_w.shape[1], conv_w.shape[2]
    # conv_transpose3d == lhs-dilated correlation with the spatially flipped kernel
    rhs = jnp.transpose(conv_w[:, :, ::-1, ::-1, ::-1], (1, 0, 2, 3, 4))  # (Cout,Cin,K,K,K)
    pad = K - 1 - padding
    y = jax.lax.conv_general_dilated(
        x, rhs, window_strides=(1, 1, 1),
        padding=[(pad, pad)] * 3,
        lhs_dilation=(stride, stride, stride),
        dimension_numbers=("NCDHW", "OIDHW", "NCDHW"))
    y = y + conv_b.reshape(1, Cout, 1, 1, 1)
    lse = jax.scipy.special.logsumexp(y, axis=1, keepdims=True)
    hs = lse * jax.nn.sigmoid(lse + 3.0) / 6.0
    z = jnp.clip(hs - sub_b[None], -1.0, 1.0)                # (B,Cout,Do,Ho,Wo)
    return jnp.max(z, axis=1, keepdims=True)


# ---------------------------------- main --------------------------------------

if __name__ == "__main__":
    in_channels = 3
    out_channels = 16
    kernel_size = 3
    stride = 2
    padding = 1

    B, D, H, W = 2, 8, 8, 8

    key = jax.random.PRNGKey(0)
    k1, k2, k3, k4 = jax.random.split(key, 4)

    x = jax.random.normal(k1, (B, in_channels, D, H, W), jnp.float32)
    # ConvTranspose3d weight layout: (in_channels, out_channels, kD, kH, kW)
    conv_w = jax.random.normal(
        k2, (in_channels, out_channels, kernel_size, kernel_size, kernel_size),
        jnp.float32) * 0.1
    conv_b = jax.random.normal(k3, (out_channels,), jnp.float32) * 0.1
    sub_b = jax.random.normal(k4, (out_channels, 1, 1, 1), jnp.float32) * 0.02

    y = model_forward(x, conv_w, conv_b, sub_b, stride=stride, padding=padding)
    jax.block_until_ready(y)

    expected = (B, 1, (D - 1) * stride - 2 * padding + kernel_size,
                (H - 1) * stride - 2 * padding + kernel_size,
                (W - 1) * stride - 2 * padding + kernel_size)
    assert y.shape == expected, (y.shape, expected)
    assert bool(jnp.all(jnp.isfinite(y)))

    y_ref = _reference(x, conv_w, conv_b, sub_b, stride=stride, padding=padding)
    max_err = float(jnp.max(jnp.abs(y - y_ref)))
    assert max_err < 5e-2, f"max abs error vs reference: {max_err}"

    print("KERNEL_OK")
</pallas_src>

<mosaic_0001>
module attributes {stable_mosaic.version = 11 : i64} {
  func.func @_fused_kernel(%arg0: i32, %arg1: memref<16x81xbf16, #tpu.memory_space<vmem>>, %arg2: memref<81x3584xbf16, #tpu.memory_space<vmem>>, %arg3: memref<16x1xf32, #tpu.memory_space<vmem>>, %arg4: memref<1x1xf32, #tpu.memory_space<vmem>>, %arg5: memref<1x3584xf32, #tpu.memory_space<vmem>>) attributes {dimension_semantics = [#tpu.dimension_semantics<parallel>], iteration_bounds = array<i64: 2>, scalar_prefetch = 0 : i64, scratch_operands = 0 : i64, tpu.core_type = #tpu.core_type<tc>, window_params = [{pipeline_mode = #tpu.pipeline_mode<synchronous>, transform_indices = @transform_0, window_bounds = array<i64: 16, 81>}, {transform_indices = @transform_1, window_bounds = array<i64: 81, 3584>}, {pipeline_mode = #tpu.pipeline_mode<synchronous>, transform_indices = @transform_2, window_bounds = array<i64: 16, 1>}, {pipeline_mode = #tpu.pipeline_mode<synchronous>, transform_indices = @transform_3, window_bounds = array<i64: 1, 1>}, {transform_indices = @transform_4, window_bounds = array<i64: 1, 3584>}]} {
    %c0 = arith.constant 0 : index
    %c0_0 = arith.constant 0 : index
    %0 = vector.load %arg1[%c0, %c0_0] : memref<16x81xbf16, #tpu.memory_space<vmem>>, vector<16x81xbf16>
    %c0_1 = arith.constant 0 : index
    %c0_2 = arith.constant 0 : index
    %1 = vector.load %arg2[%c0_1, %c0_2] : memref<81x3584xbf16, #tpu.memory_space<vmem>>, vector<81x3584xbf16>
    %cst = arith.constant dense<0.000000e+00> : vector<16x3584xf32>
    %2 = tpu.matmul %0, %1, %cst {dimension_numbers = #tpu.dot_dimension_numbers<[1], [0], [0], [1], [0, 0, 1, 1], [], []>} : vector<16x81xbf16>, vector<81x3584xbf16>, vector<16x3584xf32> -> vector<16x3584xf32>
    %c0_3 = arith.constant 0 : index
    %c0_4 = arith.constant 0 : index
    %3 = vector.load %arg3[%c0_3, %c0_4] : memref<16x1xf32, #tpu.memory_space<vmem>>, vector<16x1xf32>
    %4 = vector.broadcast %3 : vector<16x1xf32> to vector<16x3584xf32>
    %5 = arith.addf %2, %4 : vector<16x3584xf32>
    %cst_5 = arith.constant dense<0xFF800000> : vector<3584xf32>
    %6 = vector.multi_reduction <maximumf>, %5, %cst_5 [0] : vector<16x3584xf32> to vector<3584xf32>
    %7 = vector.shape_cast %6 : vector<3584xf32> to vector<1x3584xf32>
    %8 = vector.broadcast %7 : vector<1x3584xf32> to vector<16x3584xf32>
    %9 = arith.subf %5, %8 : vector<16x3584xf32>
    %10 = arith.truncf %9 : vector<16x3584xf32> to vector<16x3584xbf16>
    %11 = math.exp %10 : vector<16x3584xbf16>
    %12 = arith.extf %11 : vector<16x3584xbf16> to vector<16x3584xf32>
    %cst_6 = arith.constant dense<0.000000e+00> : vector<3584xf32>
    %13 = vector.multi_reduction <add>, %12, %cst_6 [0] : vector<16x3584xf32> to vector<3584xf32>
    %14 = vector.shape_cast %13 : vector<3584xf32> to vector<1x3584xf32>
    %15 = math.log %14 : vector<1x3584xf32>
    %16 = arith.addf %7, %15 : vector<1x3584xf32>
    %cst_7 = arith.constant 3.000000e+00 : f32
    %17 = vector.broadcast %cst_7 : f32 to vector<1x3584xf32>
    %18 = arith.addf %16, %17 : vector<1x3584xf32>
    %19 = arith.negf %18 : vector<1x3584xf32>
    %20 = math.exp %19 : vector<1x3584xf32>
    %cst_8 = arith.constant 1.000000e+00 : f32
    %21 = vector.broadcast %cst_8 : f32 to vector<1x3584xf32>
    %22 = arith.addf %21, %20 : vector<1x3584xf32>
    %23 = arith.divf %21, %22 : vector<1x3584xf32>
    %24 = arith.mulf %16, %23 : vector<1x3584xf32>
    %cst_9 = arith.constant 0.166666672 : f32
    %25 = vector.broadcast %cst_9 : f32 to vector<1x3584xf32>
    %26 = arith.mulf %24, %25 : vector<1x3584xf32>
    %c0_10 = arith.constant 0 : index
    %c0_11 = arith.constant 0 : index
    %27 = vector.load %arg4[%c0_10, %c0_11] : memref<1x1xf32, #tpu.memory_space<vmem>>, vector<1x1xf32>
    %28 = vector.broadcast %27 : vector<1x1xf32> to vector<1x3584xf32>
    %29 = arith.subf %26, %28 : vector<1x3584xf32>
    %cst_12 = arith.constant -1.000000e+00 : f32
    %cst_13 = arith.constant 1.000000e+00 : f32
    %30 = vector.broadcast %cst_12 : f32 to vector<1x3584xf32>
    %31 = arith.maximumf %30, %29 : vector<1x3584xf32>
    %32 = vector.broadcast %cst_13 : f32 to vector<1x3584xf32>
    %33 = arith.minimumf %32, %31 : vector<1x3584xf32>
    %c0_14 = arith.constant 0 : index
    %c0_15 = arith.constant 0 : index
    %34 = vector.load %arg5[%c0_14, %c0_15] : memref<1x3584xf32, #tpu.memory_space<vmem>>, vector<1x3584xf32>
    tpu.vector_store %arg5[%c0_14, %c0_15], %33 {strides = array<i32>} : memref<1x3584xf32, #tpu.memory_space<vmem>>, vector<1x3584xf32>,
    return
  }
  func.func @transform_0(%arg0: i32) -> (i32, i32) {
    %c0_i32 = arith.constant 0 : i32
    %c0_i32_0 = arith.constant 0 : i32
    %c0_i32_1 = arith.constant 0 : i32
    return %c0_i32, %c0_i32_0 : i32, i32
  }
  func.func @transform_1(%arg0: i32) -> (i32, i32) {
    %c0_i32 = arith.constant 0 : i32
    %c0_i32_0 = arith.constant 0 : i32
    return %c0_i32, %arg0 : i32, i32
  }
  func.func @transform_2(%arg0: i32) -> (i32, i32) {
    %c0_i32 = arith.constant 0 : i32
    %c0_i32_0 = arith.constant 0 : i32
    %c0_i32_1 = arith.constant 0 : i32
    return %c0_i32, %c0_i32_0 : i32, i32
  }
  func.func @transform_3(%arg0: i32) -> (i32, i32) {
    %c0_i32 = arith.constant 0 : i32
    %c0_i32_0 = arith.constant 0 : i32
    %c0_i32_1 = arith.constant 0 : i32
    return %c0_i32, %c0_i32_0 : i32, i32
  }
  func.func @transform_4(%arg0: i32) -> (i32, i32) {
    %c0_i32 = arith.constant 0 : i32
    %c0_i32_0 = arith.constant 0 : i32
    return %c0_i32, %arg0 : i32, i32
  }
}

</mosaic_0001>

<bundles_post_ra>
// kernel: squeeze.0
= control target key start
LH: loop header
LB: loop body
LE: loop exit
PB: predicated region body
PF: predicated region fallthrough
CT: control target
= control target key end

     0   :  { %s5141_s8 = smov 127   ;;  %s5142_s11 = smov 125   ;;  %s6230_s0 = inlined_call_operand.vmem [shape: f32[6750], index: 0, kind: input, shape index: {}]   ;;  %s6231_s1 = inlined_call_operand.hbm [shape: f32[2,1,15,15,15], index: 1, kind: output, shape index: {}]  }
   0x1   :  { %v4856_v0 = vld [vmem:[%s6230_s0 + $0xd] ss:$15 sm:$0x7]   ;;  %v4858_v1 = vld [vmem:[%s6230_s0 + $0x9] ss:$15 sm:$0x7]  }
   0x2   :  { %14 = vrot.lane.b32.xlu0 %v4856_v0, %s5141_s8  ;;  %36 = vrot.lane.b32.xlu1 %v4858_v1, %s5142_s11  ;;  %v4857_v2 = vld [vmem:[%s6230_s0 + $0xb] ss:$15 sm:$0x7]   ;;  %v4859_v3 = vld [vmem:[%s6230_s0 + $0x7] ss:$15 sm:$0xf]  }
   0x3   :  { %s5143_s16 = smov 126   ;;  %s5144_s17 = smov 124   ;;  %v4860_v4 = vld [vmem:[%s6230_s0 + $0x5] ss:$15 sm:$0xf]  }
   0x4   :  { %v4861_v5 = vld [vmem:[%s6230_s0 + $0x3] ss:$15 sm:$0xf]   ;;  %s5145_s22 = smov 123   ;;  %s5146_s23 = smov 122  }
   0x5   :  { %v4862_v6 = vld [vmem:[%s6230_s0 + $0x1] ss:$15 sm:$0xf]   ;;  %s5147_s28 = smov 121   ;;  %s5148_s29 = smov 120  }
   0x6   :  { %25 = vrot.lane.b32.xlu0 %v4857_v2, %s5143_s16  ;;  %47 = vrot.lane.b32.xlu1 %v4859_v3, %s5144_s17  ;;  %v4863_v7 = vld [vmem:[%s6230_s0 + $0xe] ss:$15 sm:$0x7]   ;;  %v4865_v9 = vld [vmem:[%s6230_s0 + $0xa] ss:$15 sm:$0x7]  }
   0x7   :  { %v4864_v8 = vld [vmem:[%s6230_s0 + $0xc] ss:$15 sm:$0x7]   ;;  %s5149_s5 = smov 119   ;;  %s5150_s6 = smov 118  }
   0x8   :  { %v4866_v10 = vld [vmem:[%s6230_s0 + $0x8] ss:$15 sm:$0x7]   ;;  %s5151_s11 = smov 117   ;;  %s5152_s12 = smov 116  }
   0x9   :  { %v4867_v11 = vld [vmem:[%s6230_s0 + $0x6] ss:$15 sm:$0xf]   ;;  %v4869_v13 = vld [vmem:[%s6230_s0 + $0x2] ss:$15 sm:$0xf]  }
   0xa   :  { %60 = vrot.lane.b32.xlu0 %v4860_v4, %s5145_s22  ;;  %73 = vrot.lane.b32.xlu1 %v4861_v5, %s5146_s23  ;;  %v4868_v12 = vld [vmem:[%s6230_s0 + $0x4] ss:$15 sm:$0xf]   ;;  %s5153_s17 = smov 115   ;;  %s5154_s18 = smov 114  }
   0xb   :  { %v180_v14 = vld [vmem:[%s6230_s0] ss:$15 sm:$0xf]   ;;  %s5155_s23 = smov 113   ;;  %s5156_s24 = smov 112  }
   0xc   :  { %v4870_v15 = vld [vmem:[%s6230_s0 + $0xd] ss:$15 sm:$0x7]   ;;  %v4872_v17 = vld [vmem:[%s6230_s0 + $0x9] ss:$15 sm:$0x7]  }
   0xd   :  { %v4871_v16 = vld [vmem:[%s6230_s0 + $0xb] ss:$15 sm:$0x7]   ;;  %s5158_s30 = smov 110   ;;  %s5160_s7 = smov 108  }
   0xe   :  { %86 = vrot.lane.b32.xlu0 %v4862_v6, %s5147_s28  ;;  %99 = vrot.lane.b32.xlu1 %v4863_v7, %s5148_s29  ;;  %s5157_s29 = smov 111   ;;  %v4873_v18 = vld [vmem:[%s6230_s0 + $0x7] ss:$15 sm:$0xf]   ;;  %s5162_s13 = smov 106  }
   0xf   :  { %v4874_v19 = vld [vmem:[%s6230_s0 + $0x5] ss:$15 sm:$0xf]   ;;  %v4876_v21 = vld [vmem:[%s6230_s0 + $0x1] ss:$15 sm:$0xf]  }
  0x10   :  { %v4875_v20 = vld [vmem:[%s6230_s0 + $0x3] ss:$15 sm:$0xf]   ;;  %v4877_v22 = vld [vmem:[%s6230_s0 + $0xe] ss:$15 sm:$0x7]  }
  0x11   :  { %v4878_v23 = vld [vmem:[%s6230_s0 + $0xc] ss:$15 sm:$0x7]   ;;  %s5164_s19 = smov 104   ;;  %s5166_s25 = smov 102  }
  0x12   :  { %110 = vrot.lane.b32.xlu0 %v4864_v8, %s5149_s5  ;;  %121 = vrot.lane.b32.xlu1 %v4865_v9, %s5150_s6  ;;  %s5159_s6 = smov 109   ;;  %v4879_v24 = vld [vmem:[%s6230_s0 + $0xa] ss:$15 sm:$0x7]   ;;  %s5168_s2 = smov 100  }
  0x13   :  { %v4880_v25 = vld [vmem:[%s6230_s0 + $0x8] ss:$15 sm:$0x7]   ;;  %v4882_v27 = vld [vmem:[%s6230_s0 + $0x4] ss:$15 sm:$0xf]  }
  0x14   :  { %v4881_v26 = vld [vmem:[%s6230_s0 + $0x6] ss:$15 sm:$0xf]   ;;  %v4883_v28 = vld [vmem:[%s6230_s0 + $0x2] ss:$15 sm:$0xf]  }
  0x15   :  { %v360_v29 = vld [vmem:[%s6230_s0] ss:$15 sm:$0xf]   ;;  %s5170_s8 = smov 98   ;;  %s5172_s14 = smov 96  }
  0x16   :  { %132 = vrot.lane.b32.xlu0 %v4866_v10, %s5151_s11  ;;  %143 = vrot.lane.b32.xlu1 %v4867_v11, %s5152_s12  ;;  %s5161_s12 = smov 107   ;;  %v4884_v30 = vld [vmem:[%s6230_s0 + $0xd] ss:$15 sm:$0x7]   ;;  %s5174_s20 = smov 94  }
  0x17   :  { %v4885_v31 = vld [vmem:[%s6230_s0 + $0xb] ss:$15 sm:$0x7]   ;;  %v4887_v33 = vld [vmem:[%s6230_s0 + $0x7] ss:$15 sm:$0xf]  }
  0x18   :  { %v4886_v32 = vld [vmem:[%s6230_s0 + $0x9] ss:$15 sm:$0x7]   ;;  %v4888_v34 = vld [vmem:[%s6230_s0 + $0x5] ss:$15 sm:$0xf]  }
  0x19   :  { %v4889_v35 = vld [vmem:[%s6230_s0 + $0x3] ss:$15 sm:$0xf]   ;;  %s5176_s26 = smov 92   ;;  %s5178_s3 = smov 90  }
  0x1a   :  { %156 = vrot.lane.b32.xlu0 %v4868_v12, %s5153_s17  ;;  %169 = vrot.lane.b32.xlu1 %v4869_v13, %s5154_s18  ;;  %s5163_s18 = smov 105   ;;  %v4890_v36 = vld [vmem:[%s6230_s0 + $0x1] ss:$15 sm:$0xf]   ;;  %s5180_s9 = smov 88  }
  0x1b   :  { %v4891_v37 = vld [vmem:[%s6230_s0 + $0xe] ss:$15 sm:$0x7]   ;;  %v4893_v39 = vld [vmem:[%s6230_s0 + $0xa] ss:$15 sm:$0x7]  }
  0x1c   :  { %v4892_v38 = vld [vmem:[%s6230_s0 + $0xc] ss:$15 sm:$0x7]   ;;  %v4894_v40 = vld [vmem:[%s6230_s0 + $0x8] ss:$15 sm:$0x7]  }
  0x1d   :  { %v4895_v41 = vld [vmem:[%s6230_s0 + $0x6] ss:$15 sm:$0xf]   ;;  %s5182_s15 = smov 86   ;;  %s5184_s21 = smov 84  }
  0x1e   :  { %181 = vrot.lane.b32.xlu0 %v180_v14, %s5155_s23  ;;  %194 = vrot.lane.b32.xlu1 %v4870_v15, %s5156_s24  ;;  %s5165_s24 = smov 103   ;;  %v4896_v42 = vld [vmem:[%s6230_s0 + $0x4] ss:$15 sm:$0xf]  }
  0x1f   :  { %v4897_v43 = vld [vmem:[%s6230_s0 + $0x2] ss:$15 sm:$0xf]   ;;  %v4898_v45 = vld [vmem:[%s6230_s0 + $0xd] ss:$15 sm:$0x7]  }
  0x20   :  { %v540_v44 = vld [vmem:[%s6230_s0] ss:$15 sm:$0xf]  }
  0x22   :  { %205 = vrot.lane.b32.xlu0 %v4871_v16, %s5157_s29  ;;  %216 = vrot.lane.b32.xlu1 %v4872_v17, %s5158_s30  ;;  %s5167_s30 = smov 101  }
  0x26   :  { %227 = vrot.lane.b32.xlu0 %v4873_v18, %s5159_s6  ;;  %240 = vrot.lane.b32.xlu1 %v4874_v19, %s5160_s7  ;;  %s5169_s7 = smov 99  }
  0x2a   :  { %253 = vrot.lane.b32.xlu0 %v4875_v20, %s5161_s12  ;;  %266 = vrot.lane.b32.xlu1 %v4876_v21, %s5162_s13  ;;  %s5171_s13 = smov 97  }
  0x2e   :  { %279 = vrot.lane.b32.xlu0 %v4877_v22, %s5163_s18  ;;  %290 = vrot.lane.b32.xlu1 %v4878_v23, %s5164_s19  ;;  %s5173_s19 = smov 95  }
  0x32   :  { %301 = vrot.lane.b32.xlu0 %v4879_v24, %s5165_s24  ;;  %312 = vrot.lane.b32.xlu1 %v4880_v25, %s5166_s25  ;;  %s5175_s25 = smov 93  }
  0x36   :  { %323 = vrot.lane.b32.xlu0 %v4881_v26, %s5167_s30  ;;  %336 = vrot.lane.b32.xlu1 %v4882_v27, %s5168_s2  ;;  %s5177_s2 = smov 91  }
  0x3a   :  { %349 = vrot.lane.b32.xlu0 %v4883_v28, %s5169_s7  ;;  %361 = vrot.lane.b32.xlu1 %v360_v29, %s5170_s8  ;;  %s5179_s8 = smov 89  }
  0x3e   :  { %374 = vrot.lane.b32.xlu0 %v4884_v30, %s5171_s13  ;;  %385 = vrot.lane.b32.xlu1 %v4885_v31, %s5172_s14  ;;  %s5181_s14 = smov 87  }
  0x42   :  { %396 = vrot.lane.b32.xlu0 %v4886_v32, %s5173_s19  ;;  %407 = vrot.lane.b32.xlu1 %v4887_v33, %s5174_s20  ;;  %s5183_s20 = smov 85  }
  0x46   :  { %420 = vrot.lane.b32.xlu0 %v4888_v34, %s5175_s25  ;;  %433 = vrot.lane.b32.xlu1 %v4889_v35, %s5176_s26 }
  0x4a   :  { %446 = vrot.lane.b32.xlu0 %v4890_v36, %s5177_s2  ;;  %459 = vrot.lane.b32.xlu1 %v4891_v37, %s5178_s3 }
  0x4e   :  { %470 = vrot.lane.b32.xlu0 %v4892_v38, %s5179_s8  ;;  %481 = vrot.lane.b32.xlu1 %v4893_v39, %s5180_s9 }
  0x52   :  { %492 = vrot.lane.b32.xlu0 %v4894_v40, %s5181_s14  ;;  %503 = vrot.lane.b32.xlu1 %v4895_v41, %s5182_s15 }
  0x56   :  { %516 = vrot.lane.b32.xlu0 %v4896_v42, %s5183_s20  ;;  %529 = vrot.lane.b32.xlu1 %v4897_v43, %s5184_s21 }
  0x57   :  { %2 = vsyncpa [#allocation1], 0  ;;  %s5185_s26 = smov 83   ;;  %s5186_s27 = smov 82   ;;  %vm4_vm0 = vcmask 121856   ;;  %vm1368_vm1 = vcmask 932864  }
  0x58   :  { %v4899_v46 = vld [vmem:[%s6230_s0 + $0xb] ss:$15 sm:$0x7]   ;;  %s5187_s3 = smov 81   ;;  %s5188_s4 = smov 80   ;;  %vm1390_vm2 = vcmask 941056  }
  0x59   :  { %v4900_v47 = vld [vmem:[%s6230_s0 + $0x9] ss:$15 sm:$0x7]   ;;  %v4902_v49 = vld [vmem:[%s6230_s0 + $0x5] ss:$15 sm:$0xf]  }
  0x5a   :  { %541 = vrot.lane.b32.xlu0 %v540_v44, %s5185_s26  ;;  %554 = vrot.lane.b32.xlu1 %v4898_v45, %s5186_s27  ;;  %v4901_v48 = vld [vmem:[%s6230_s0 + $0x7] ss:$15 sm:$0xf]   ;;  %s5189_s9 = smov 79   ;;  %s5190_s10 = smov 78   ;;  %vm1412_vm3 = vcmask 949248  }
  0x5b   :  { %v4903_v50 = vld [vmem:[%s6230_s0 + $0x3] ss:$15 sm:$0xf]   ;;  %s5191_s15 = smov 77   ;;  %s5192_s16 = smov 76   ;;  %vm1434_vm4 = vcmask 957440  }
  0x5c   :  { %v4904_v51 = vld [vmem:[%s6230_s0 + $0x1] ss:$15 sm:$0xf]   ;;  %v4906_v53 = vld [vmem:[%s6230_s0 + $0xc] ss:$15 sm:$0x7]  }
  0x5d   :  { %v4905_v52 = vld [vmem:[%s6230_s0 + $0xe] ss:$15 sm:$0x7]   ;;  %s5193_s21 = smov 75   ;;  %s5194_s22 = smov 74   ;;  %vm1460_vm5 = vcmask 965632  }
  0x5e   :  { %565 = vrot.lane.b32.xlu0 %v4899_v46, %s5187_s3  ;;  %576 = vrot.lane.b32.xlu1 %v4900_v47, %s5188_s4  ;;  %v4907_v54 = vld [vmem:[%s6230_s0 + $0xa] ss:$15 sm:$0x7]   ;;  %s5195_s27 = smov 73   ;;  %s5196_s28 = smov 72   ;;  %vm1486_vm6 = vcmask 973824  }
  0x5f   :  { %v4908_v55 = vld [vmem:[%s6230_s0 + $0x8] ss:$15 sm:$0x7]   ;;  %v4910_v57 = vld [vmem:[%s6230_s0 + $0x4] ss:$15 sm:$0xf]  }
  0x60   :  { %v4909_v56 = vld [vmem:[%s6230_s0 + $0x6] ss:$15 sm:$0xf]   ;;  %s5197_s4 = smov 71   ;;  %s5198_s5 = smov 70   ;;  %vm1511_vm7 = vcmask 982016  }
  0x61   :  { %v4911_v58 = vld [vmem:[%s6230_s0 + $0x2] ss:$15 sm:$0xf]   ;;  %s5200_s11 = smov 68   ;;  %s5202_s19 = smov 66   ;;  %vm1537_vm8 = vcmask 990208  }
  0x62   :  { %587 = vrot.lane.b32.xlu0 %v4901_v48, %s5189_s9  ;;  %600 = vrot.lane.b32.xlu1 %v4902_v49, %s5190_s10  ;;  %v720_v60 = vld [vmem:[%s6230_s0] ss:$15 sm:$0xf]   ;;  %s5199_s10 = smov 69   ;;  %s5204_s25 = smov 64   ;;  %vm1559_vm9 = vcmask 998400  }
  0x63   :  { %v4912_v62 = vld [vmem:[%s6230_s0 + $0xd] ss:$15 sm:$0x7]   ;;  %v4914_v2 = vld [vmem:[%s6230_s0 + $0x9] ss:$15 sm:$0x7]  }
  0x64   :  { %v4913_v0 = vld [vmem:[%s6230_s0 + $0xb] ss:$15 sm:$0x7]   ;;  %v4915_v3 = vld [vmem:[%s6230_s0 + $0x7] ss:$15 sm:$0xf]  }
  0x65   :  { %v4916_v12 = vld [vmem:[%s6230_s0 + $0x5] ss:$15 sm:$0xf]   ;;  %v4918_v23 = vld [vmem:[%s6230_s0 + $0x1] ss:$15 sm:$0xf]  }
  0x66   :  { %613 = vrot.lane.b32.xlu0 %v4903_v50, %s5191_s15  ;;  %626 = vrot.lane.b32.xlu1 %v4904_v51, %s5192_s16  ;;  %s5201_s16 = smov 67   ;;  %v4917_v13 = vld [vmem:[%s6230_s0 + $0x3] ss:$15 sm:$0xf]   ;;  %s5206_s2 = smov 62   ;;  %vm1581_vm10 = vcmask 1006592  }
  0x67   :  { %v4919_v24 = vld [vmem:[%s6230_s0 + $0xe] ss:$15 sm:$0x7]   ;;  %s5207_s7 = smov 61   ;;  %s5208_s8 = smov 60   ;;  %vm1603_vm11 = vcmask 1014784  }
  0x68   :  { %v4920_v33 = vld [vmem:[%s6230_s0 + $0xc] ss:$15 sm:$0x7]   ;;  %v4922_v46 = vld [vmem:[%s6230_s0 + $0x8] ss:$15 sm:$0x7]  }
  0x69   :  { %v4921_v36 = vld [vmem:[%s6230_s0 + $0xa] ss:$15 sm:$0x7]   ;;  %s5210_s14 = smov 58   ;;  %s5211_s17 = smov 57   ;;  %vm1625_vm12 = vcmask 1022976  }
  0x6a   :  { %639 = vrot.lane.b32.xlu0 %v4905_v52, %s5193_s21  ;;  %650 = vrot.lane.b32.xlu1 %v4906_v53, %s5194_s22  ;;  %s5203_s22 = smov 65   ;;  %v4923_v47 = vld [vmem:[%s6230_s0 + $0x6] ss:$15 sm:$0xf]   ;;  %s5212_s20 = smov 56   ;;  %vm1651_vm13 = vcmask 1031168  }
  0x6b   :  { %s5213_s23 = smov 55   ;;  %s5214_s26 = smov 54   ;;  %vm1677_vm14 = vcmask 1039360   ;;  %vm1372_vm15 = vcmask 113664  }
  0x6c   :  { %s5216_s3 = smov 52   ;;  %s5217_s6 = smov 51  }
  0x6d   :  { %s5218_s9 = smov 50   ;;  %s5219_s12 = smov 49  }
  0x6e   :  { %661 = vrot.lane.b32.xlu0 %v4907_v54, %s5195_s27  ;;  %672 = vrot.lane.b32.xlu1 %v4908_v55, %s5196_s28  ;;  %s5205_s28 = smov 63   ;;  %s5220_s15 = smov 48  }
  0x6f   :  { %s5222_s21 = smov 46   ;;  %s5224_s27 = smov 44  }
  0x70   :  { %s5225_s30 = smov 43   ;;  %s5230_s18 = smov 38  }
  0x71   :  { %s5254_s29 = smov 28  }
  0x72   :  { %683 = vrot.lane.b32.xlu0 %v4909_v56, %s5197_s4  ;;  %696 = vrot.lane.b32.xlu1 %v4910_v57, %s5198_s5  ;;  %v4924_v56 = vld [vmem:[%s6230_s0 + $0x4] ss:$15 sm:$0xf]   ;;  %s5226_s4 = smov 42   ;;  %s5246_s5 = smov 2  }
  0x73   :  { %v4925_v57 = vld [vmem:[%s6230_s0 + $0x2] ss:$15 sm:$0xf]  }
  0x74   :  { %v15_v59 = vpop.permute.xlu0 %14   ;;  %v37_v61 = vpop.permute.xlu1 %36  }
  0x75   :  { %18 = vst.msk [vmem:[#allocation2 + $0x378] sm:$0x1] %vm4_vm0, %v15_v59   ;;  %20 = vst.msk [vmem:[#allocation2 + $0x777] sm:$0x2] %vm4_vm0, %v15_v59  }
  0x76   :  { %22 = vst.msk [vmem:[#allocation2 + $0xb76] sm:$0x4] %vm4_vm0, %v15_v59   ;;  %709 = vrot.lane.b32.xlu0 %v4911_v58, %s5199_s10  ;;  %40 = vst.msk [vmem:[#allocation2 + $0x268] sm:$0x1] %vm4_vm0, %v37_v61   ;;  %721 = vrot.lane.b32.xlu1 %v720_v60, %s5200_s11  ;;  %s5209_s11 = smov 59   ;;  %s5228_s10 = smov 40  }
  0x77   :  { %42 = vst.msk [vmem:[#allocation2 + $0x667] sm:$0x2] %vm4_vm0, %v37_v61   ;;  %44 = vst.msk [vmem:[#allocation2 + $0xa66] sm:$0x4] %vm4_vm0, %v37_v61  }
  0x78   :  { %v26_v63 = vpop.permute.xlu0 %25   ;;  %v48_v1 = vpop.permute.xlu1 %47  }
  0x79   :  { %29 = vst.msk [vmem:[#allocation2 + $0x2f0] sm:$0x1] %vm4_vm0, %v26_v63   ;;  %31 = vst.msk [vmem:[#allocation2 + $0x6ef] sm:$0x2] %vm4_vm0, %v26_v63  }
  0x7a   :  { %33 = vst.msk [vmem:[#allocation2 + $0xaee] sm:$0x4] %vm4_vm0, %v26_v63   ;;  %734 = vrot.lane.b32.xlu0 %v4912_v62, %s5201_s16  ;;  %51 = vst.msk [vmem:[#allocation2 + $0x1e0] sm:$0x1] %vm4_vm0, %v48_v1   ;;  %745 = vrot.lane.b32.xlu1 %v4913_v0, %s5202_s19  ;;  %s5235_s16 = smov 13  }
  0x7b   :  { %53 = vst.msk [vmem:[#allocation2 + $0x5df] sm:$0x2] %vm4_vm0, %v48_v1   ;;  %55 = vst.msk [vmem:[#allocation2 + $0x9de] sm:$0x4] %vm4_vm0, %v48_v1  }
  0x7c   :  { %57 = vst.msk [vmem:[#allocation2 + $0xddd] sm:$0x8] %vm4_vm0, %v48_v1   ;;  %v2365_v4 = vld [vmem:[#allocation2 + $0x378] sm:$0x1]  ;;  %v61_v7 = vpop.permute.xlu0 %60   ;;  %v74_v11 = vpop.permute.xlu1 %73  }
  0x7d   :  { %v3133_v5 = vld [vmem:[#allocation2 + $0x778] sm:$0x1]  ;;  %2369 = vst [vmem:[#allocation0 + $0x6f] sm:$0x1] %v2365_v4  ;;  %v2161_v8 = vld [vmem:[#allocation2 + $0x268] sm:$0x1] }
  0x7e   :  { %v3901_v6 = vld [vmem:[#allocation2 + $0xb78] sm:$0x1]  ;;  %3137 = vst [vmem:[#allocation0 + $0xef] sm:$0x1] %v3133_v5  ;;  %v2929_v9 = vld [vmem:[#allocation2 + $0x668] sm:$0x1]  ;;  %756 = vrot.lane.b32.xlu0 %v4914_v2, %s5203_s22  ;;  %767 = vrot.lane.b32.xlu1 %v4915_v3, %s5204_s25 }
  0x7f   :  { %3905 = vst [vmem:[#allocation0 + $0x16f] sm:$0x1] %v3901_v6  ;;  %v3697_v10 = vld [vmem:[#allocation2 + $0xa68] sm:$0x1]  ;;  %64 = vst.msk [vmem:[#allocation2 + $0x158] sm:$0x1] %vm4_vm0, %v61_v7  }
  0x80   :  { %66 = vst.msk [vmem:[#allocation2 + $0x557] sm:$0x2] %vm4_vm0, %v61_v7   ;;  %68 = vst.msk [vmem:[#allocation2 + $0x956] sm:$0x4] %vm4_vm0, %v61_v7   ;;  %v2263_v14 = vld [vmem:[#allocation2 + $0x2f0] sm:$0x1]  ;;  %v87_v17 = vpop.permute.xlu0 %86   ;;  %v100_v21 = vpop.permute.xlu1 %99  }
  0x81   :  { %70 = vst.msk [vmem:[#allocation2 + $0xd55] sm:$0x8] %vm4_vm0, %v61_v7   ;;  %2165 = vst [vmem:[#allocation0 + $0x4d] sm:$0x1] %v2161_v8  ;;  %v3031_v15 = vld [vmem:[#allocation2 + $0x6f0] sm:$0x1] }
  0x82   :  { %2933 = vst [vmem:[#allocation0 + $0xcd] sm:$0x1] %v2929_v9  ;;  %3701 = vst [vmem:[#allocation0 + $0x14d] sm:$0x1] %v3697_v10  ;;  %v3799_v16 = vld [vmem:[#allocation2 + $0xaf0] sm:$0x1]  ;;  %780 = vrot.lane.b32.xlu0 %v4916_v12, %s5205_s28  ;;  %793 = vrot.lane.b32.xlu1 %v4917_v13, %s5206_s2 }
  0x83   :  { %77 = vst.msk [vmem:[#allocation2 + $0xd0] sm:$0x1] %vm4_vm0, %v74_v11   ;;  %79 = vst.msk [vmem:[#allocation2 + $0x4cf] sm:$0x2] %vm4_vm0, %v74_v11   ;;  %v2059_v18 = vld [vmem:[#allocation2 + $0x1e0] sm:$0x1] }
  0x84   :  { %81 = vst.msk [vmem:[#allocation2 + $0x8ce] sm:$0x4] %vm4_vm0, %v74_v11   ;;  %83 = vst.msk [vmem:[#allocation2 + $0xccd] sm:$0x8] %vm4_vm0, %v74_v11   ;;  %v2827_v19 = vld [vmem:[#allocation2 + $0x5e0] sm:$0x1]  ;;  %v111_v28 = vpop.permute.xlu0 %110   ;;  %v122_v32 = vpop.permute.xlu1 %121  }
  0x85   :  { %2267 = vst [vmem:[#allocation0 + $0x5e] sm:$0x1] %v2263_v14  ;;  %3035 = vst [vmem:[#allocation0 + $0xde] sm:$0x1] %v3031_v15  ;;  %v3595_v20 = vld [vmem:[#allocation2 + $0x9e0] sm:$0x1] }
  0x86   :  { %3803 = vst [vmem:[#allocation0 + $0x15e] sm:$0x1] %v3799_v16  ;;  %90 = vst.msk [vmem:[#allocation2 + $0x48] sm:$0x1] %vm4_vm0, %v87_v17   ;;  %v4363_v22 = vld [vmem:[#allocation2 + $0xde0] sm:$0x1]  ;;  %806 = vrot.lane.b32.xlu0 %v4918_v23, %s5207_s7  ;;  %819 = vrot.lane.b32.xlu1 %v4919_v24, %s5208_s8 }
  0x87   :  { %92 = vst.msk [vmem:[#allocation2 + $0x447] sm:$0x2] %vm4_vm0, %v87_v17   ;;  %94 = vst.msk [vmem:[#allocation2 + $0x846] sm:$0x4] %vm4_vm0, %v87_v17   ;;  %v1957_v25 = vld [vmem:[#allocation2 + $0x158] sm:$0x1] }
  0x88   :  { %96 = vst.msk [vmem:[#allocation2 + $0xc45] sm:$0x8] %vm4_vm0, %v87_v17   ;;  %2063 = vst [vmem:[#allocation0 + $0x3c] sm:$0x1] %v2059_v18  ;;  %v2725_v26 = vld [vmem:[#allocation2 + $0x558] sm:$0x1]  ;;  %v133_v40 = vpop.permute.xlu0 %132   ;;  %v144_v44 = vpop.permute.xlu1 %143  }
  0x89   :  { %2831 = vst [vmem:[#allocation0 + $0xbc] sm:$0x1] %v2827_v19  ;;  %3599 = vst [vmem:[#allocation0 + $0x13c] sm:$0x1] %v3595_v20  ;;  %v3493_v27 = vld [vmem:[#allocation2 + $0x958] sm:$0x1] }
  0x8a   :  { %103 = vst.msk [vmem:[#allocation2 + $0x3c0] sm:$0x1] %vm4_vm0, %v100_v21   ;;  %105 = vst.msk [vmem:[#allocation2 + $0x7bf] sm:$0x2] %vm4_vm0, %v100_v21   ;;  %v4261_v29 = vld [vmem:[#allocation2 + $0xd58] sm:$0x1]  ;;  %830 = vrot.lane.b32.xlu0 %v4920_v33, %s5209_s11  ;;  %841 = vrot.lane.b32.xlu1 %v4921_v36, %s5210_s14 }
  0x8b   :  { %107 = vst.msk [vmem:[#allocation2 + $0xbbe] sm:$0x4] %vm4_vm0, %v100_v21   ;;  %4367 = vst [vmem:[#allocation0 + $0x1bc] sm:$0x1] %v4363_v22  ;;  %v1855_v30 = vld [vmem:[#allocation2 + $0xd0] sm:$0x1] }
  0x8c   :  { %1961 = vst [vmem:[#allocation0 + $0x2b] sm:$0x1] %v1957_v25  ;;  %2729 = vst [vmem:[#allocation0 + $0xab] sm:$0x1] %v2725_v26  ;;  %v2623_v31 = vld [vmem:[#allocation2 + $0x4d0] sm:$0x1]  ;;  %v157_v51 = vpop.permute.xlu0 %156   ;;  %v170_v55 = vpop.permute.xlu1 %169  }
  0x8d   :  { %3497 = vst [vmem:[#allocation0 + $0x12b] sm:$0x1] %v3493_v27  ;;  %114 = vst.msk [vmem:[#allocation2 + $0x338] sm:$0x1] %vm4_vm0, %v111_v28   ;;  %v3391_v34 = vld [vmem:[#allocation2 + $0x8d0] sm:$0x1] }
  0x8e   :  { %116 = vst.msk [vmem:[#allocation2 + $0x737] sm:$0x2] %vm4_vm0, %v111_v28   ;;  %118 = vst.msk [vmem:[#allocation2 + $0xb36] sm:$0x4] %vm4_vm0, %v111_v28   ;;  %v4159_v35 = vld [vmem:[#allocation2 + $0xcd0] sm:$0x1]  ;;  %852 = vrot.lane.b32.xlu0 %v4922_v46, %s5211_s17  ;;  %863 = vrot.lane.b32.xlu1 %v4923_v47, %s5212_s20 }
  0x8f   :  { %4265 = vst [vmem:[#allocation0 + $0x1ab] sm:$0x1] %v4261_v29  ;;  %1859 = vst [vmem:[#allocation0 + $0x1a] sm:$0x1] %v1855_v30  ;;  %v1753_v37 = vld [vmem:[#allocation2 + $0x48] sm:$0x1] }
  0x90   :  { %2627 = vst [vmem:[#allocation0 + $0x9a] sm:$0x1] %v2623_v31  ;;  %125 = vst.msk [vmem:[#allocation2 + $0x2b0] sm:$0x1] %vm4_vm0, %v122_v32   ;;  %v2521_v38 = vld [vmem:[#allocation2 + $0x448] sm:$0x1]  ;;  %v182_v61 = vpop.permute.xlu0 %181   ;;  %v195_v1 = vpop.permute.xlu1 %194  }
  0x91   :  { %127 = vst.msk [vmem:[#allocation2 + $0x6af] sm:$0x2] %vm4_vm0, %v122_v32   ;;  %129 = vst.msk [vmem:[#allocation2 + $0xaae] sm:$0x4] %vm4_vm0, %v122_v32   ;;  %v3289_v39 = vld [vmem:[#allocation2 + $0x848] sm:$0x1] }
  0x92   :  { %3395 = vst [vmem:[#allocation0 + $0x11a] sm:$0x1] %v3391_v34  ;;  %4163 = vst [vmem:[#allocation0 + $0x19a] sm:$0x1] %v4159_v35  ;;  %v4057_v41 = vld [vmem:[#allocation2 + $0xc48] sm:$0x1]  ;;  %876 = vrot.lane.b32.xlu0 %v4924_v56, %s5213_s23  ;;  %889 = vrot.lane.b32.xlu1 %v4925_v57, %s5214_s26 }
  0x93   :  { %1757 = vst [vmem:[#allocation0 + $0x9] sm:$0x1] %v1753_v37  ;;  %2525 = vst [vmem:[#allocation0 + $0x89] sm:$0x1] %v2521_v38  ;;  %v2419_v42 = vld [vmem:[#allocation2 + $0x3c0] sm:$0x1] }
  0x94   :  { %3293 = vst [vmem:[#allocation0 + $0x109] sm:$0x1] %v3289_v39  ;;  %v3187_v43 = vld [vmem:[#allocation2 + $0x7c0] sm:$0x1]  ;;  %136 = vst.msk [vmem:[#allocation2 + $0x228] sm:$0x1] %vm4_vm0, %v133_v40   ;;  %v206_v8 = vpop.permute.xlu0 %205   ;;  %v217_v12 = vpop.permute.xlu1 %216  }
  0x95   :  { %138 = vst.msk [vmem:[#allocation2 + $0x627] sm:$0x2] %vm4_vm0, %v133_v40   ;;  %140 = vst.msk [vmem:[#allocation2 + $0xa26] sm:$0x4] %vm4_vm0, %v133_v40   ;;  %v3955_v45 = vld [vmem:[#allocation2 + $0xbc0] sm:$0x1] }
  0x96   :  { %4061 = vst [vmem:[#allocation0 + $0x189] sm:$0x1] %v4057_v41  ;;  %2423 = vst [vmem:[#allocation0 + $0x78] sm:$0x1] %v2419_v42  ;;  %v2317_v48 = vld [vmem:[#allocation2 + $0x338] sm:$0x1] }
  0x97   :  { %3191 = vst [vmem:[#allocation0 + $0xf8] sm:$0x1] %v3187_v43  ;;  %147 = vst.msk [vmem:[#allocation2 + $0x1a0] sm:$0x1] %vm4_vm0, %v144_v44   ;;  %v3085_v49 = vld [vmem:[#allocation2 + $0x738] sm:$0x1] }
  0x98   :  { %149 = vst.msk [vmem:[#allocation2 + $0x59f] sm:$0x2] %vm4_vm0, %v144_v44   ;;  %151 = vst.msk [vmem:[#allocation2 + $0x99e] sm:$0x4] %vm4_vm0, %v144_v44   ;;  %v3853_v50 = vld [vmem:[#allocation2 + $0xb38] sm:$0x1]  ;;  %v228_v20 = vpop.permute.xlu0 %227   ;;  %v241_v24 = vpop.permute.xlu1 %240  }
  0x99   :  { %153 = vst.msk [vmem:[#allocation2 + $0xd9d] sm:$0x8] %vm4_vm0, %v144_v44   ;;  %3959 = vst [vmem:[#allocation0 + $0x178] sm:$0x1] %v3955_v45  ;;  %v2215_v52 = vld [vmem:[#allocation2 + $0x2b0] sm:$0x1] }
  0x9a   :  { %2321 = vst [vmem:[#allocation0 + $0x67] sm:$0x1] %v2317_v48  ;;  %3089 = vst [vmem:[#allocation0 + $0xe7] sm:$0x1] %v3085_v49  ;;  %v2983_v53 = vld [vmem:[#allocation2 + $0x6b0] sm:$0x1] }
  0x9b   :  { %3857 = vst [vmem:[#allocation0 + $0x167] sm:$0x1] %v3853_v50  ;;  %v3751_v54 = vld [vmem:[#allocation2 + $0xab0] sm:$0x1]  ;;  %160 = vst.msk [vmem:[#allocation2 + $0x118] sm:$0x1] %vm4_vm0, %v157_v51  }
  0x9c   :  { %162 = vst.msk [vmem:[#allocation2 + $0x517] sm:$0x2] %vm4_vm0, %v157_v51   ;;  %164 = vst.msk [vmem:[#allocation2 + $0x916] sm:$0x4] %vm4_vm0, %v157_v51   ;;  %v2113_v58 = vld [vmem:[#allocation2 + $0x228] sm:$0x1]  ;;  %v254_v31 = vpop.permute.xlu0 %253   ;;  %v267_v35 = vpop.permute.xlu1 %266  }
  0x9d   :  { %166 = vst.msk [vmem:[#allocation2 + $0xd15] sm:$0x8] %vm4_vm0, %v157_v51   ;;  %2219 = vst [vmem:[#allocation0 + $0x56] sm:$0x1] %v2215_v52  ;;  %v2881_v59 = vld [vmem:[#allocation2 + $0x628] sm:$0x1] }
  0x9e   :  { %2987 = vst [vmem:[#allocation0 + $0xd6] sm:$0x1] %v2983_v53  ;;  %3755 = vst [vmem:[#allocation0 + $0x156] sm:$0x1] %v3751_v54  ;;  %v3649_v60 = vld [vmem:[#allocation2 + $0xa28] sm:$0x1] }
  0x9f   :  { %173 = vst.msk [vmem:[#allocation2 + $0x90] sm:$0x1] %vm4_vm0, %v170_v55   ;;  %175 = vst.msk [vmem:[#allocation2 + $0x48f] sm:$0x2] %vm4_vm0, %v170_v55   ;;  %v2011_v62 = vld [vmem:[#allocation2 + $0x1a0] sm:$0x1] }
  0xa0   :  { %177 = vst.msk [vmem:[#allocation2 + $0x88e] sm:$0x4] %vm4_vm0, %v170_v55   ;;  %179 = vst.msk [vmem:[#allocation2 + $0xc8d] sm:$0x8] %vm4_vm0, %v170_v55   ;;  %v2779_v63 = vld [vmem:[#allocation2 + $0x5a0] sm:$0x1]  ;;  %v280_v41 = vpop.permute.xlu0 %279   ;;  %v291_v45 = vpop.permute.xlu1 %290  }
  0xa1   :  { %2117 = vst [vmem:[#allocation0 + $0x45] sm:$0x1] %v2113_v58  ;;  %2885 = vst [vmem:[#allocation0 + $0xc5] sm:$0x1] %v2881_v59  ;;  %v3547_v0 = vld [vmem:[#allocation2 + $0x9a0] sm:$0x1] }
  0xa2   :  { %3653 = vst [vmem:[#allocation0 + $0x145] sm:$0x1] %v3649_v60  ;;  %185 = vst.msk [vmem:[#allocation2 + $0x8] sm:$0x1] %vm4_vm0, %v182_v61   ;;  %v4315_v2 = vld [vmem:[#allocation2 + $0xda0] sm:$0x1] }
  0xa3   :  { %187 = vst.msk [vmem:[#allocation2 + $0x407] sm:$0x2] %vm4_vm0, %v182_v61   ;;  %189 = vst.msk [vmem:[#allocation2 + $0x806] sm:$0x4] %vm4_vm0, %v182_v61   ;;  %v1909_v5 = vld [vmem:[#allocation2 + $0x118] sm:$0x1] }
  0xa4   :  { %191 = vst.msk [vmem:[#allocation2 + $0xc05] sm:$0x8] %vm4_vm0, %v182_v61   ;;  %2015 = vst [vmem:[#allocation0 + $0x34] sm:$0x1] %v2011_v62  ;;  %v2677_v6 = vld [vmem:[#allocation2 + $0x518] sm:$0x1]  ;;  %v302_v53 = vpop.permute.xlu0 %301   ;;  %v313_v57 = vpop.permute.xlu1 %312  }
  0xa5   :  { %2783 = vst [vmem:[#allocation0 + $0xb4] sm:$0x1] %v2779_v63  ;;  %3551 = vst [vmem:[#allocation0 + $0x134] sm:$0x1] %v3547_v0  ;;  %v3445_v7 = vld [vmem:[#allocation2 + $0x918] sm:$0x1] }
  0xa6   :  { %198 = vst.msk [vmem:[#allocation2 + $0x380] sm:$0x1] %vm4_vm0, %v195_v1   ;;  %200 = vst.msk [vmem:[#allocation2 + $0x77f] sm:$0x2] %vm4_vm0, %v195_v1   ;;  %v4213_v9 = vld [vmem:[#allocation2 + $0xd18] sm:$0x1] }
  0xa7   :  { %202 = vst.msk [vmem:[#allocation2 + $0xb7e] sm:$0x4] %vm4_vm0, %v195_v1   ;;  %v900_v3 = vld [vmem:[%s6230_s0] ss:$15 sm:$0xf]   ;;  %s5215_s2 = smov 53  }
  0xa8   :  { %4319 = vst [vmem:[#allocation0 + $0x1b4] sm:$0x1] %v4315_v2  ;;  %v4926_v4 = vld [vmem:[%s6230_s0 + $0xd] ss:$15 sm:$0x7]   ;;  %901 = vrot.lane.b32.xlu0 %v900_v3, %s5215_s2  ;;  %s5221_s20 = smov 47   ;;  %v324_v1 = vpop.permute.xlu0 %323  }
  0xa9   :  { %1913 = vst [vmem:[#allocation0 + $0x23] sm:$0x1] %v1909_v5  ;;  %2681 = vst [vmem:[#allocation0 + $0xa3] sm:$0x1] %v2677_v6  ;;  %v1807_v10 = vld [vmem:[#allocation2 + $0x90] sm:$0x1]  ;;  %914 = vrot.lane.b32.xlu1 %v4926_v4, %s5216_s3  ;;  %v337_v5 = vpop.permute.xlu1 %336  }
  0xaa   :  { %3449 = vst [vmem:[#allocation0 + $0x123] sm:$0x1] %v3445_v7  ;;  %v2575_v11 = vld [vmem:[#allocation2 + $0x490] sm:$0x1]  ;;  %209 = vst.msk [vmem:[#allocation2 + $0x2f8] sm:$0x1] %vm4_vm0, %v206_v8  }
  0xab   :  { %211 = vst.msk [vmem:[#allocation2 + $0x6f7] sm:$0x2] %vm4_vm0, %v206_v8   ;;  %213 = vst.msk [vmem:[#allocation2 + $0xaf6] sm:$0x4] %vm4_vm0, %v206_v8   ;;  %v3343_v14 = vld [vmem:[#allocation2 + $0x890] sm:$0x1] }
  0xac   :  { %v4927_v13 = vld [vmem:[%s6230_s0 + $0xb] ss:$15 sm:$0x7]   ;;  %4217 = vst [vmem:[#allocation0 + $0x1a3] sm:$0x1] %v4213_v9  ;;  %s5223_s26 = smov 45  }
  0xad   :  { %1811 = vst [vmem:[#allocation0 + $0x12] sm:$0x1] %v1807_v10  ;;  %2579 = vst [vmem:[#allocation0 + $0x92] sm:$0x1] %v2575_v11  ;;  %v4111_v15 = vld [vmem:[#allocation2 + $0xc90] sm:$0x1]  ;;  %925 = vrot.lane.b32.xlu0 %v4927_v13, %s5217_s6  ;;  %v350_v11 = vpop.permute.xlu0 %349  }
  0xae   :  { %220 = vst.msk [vmem:[#allocation2 + $0x270] sm:$0x1] %vm4_vm0, %v217_v12   ;;  %222 = vst.msk [vmem:[#allocation2 + $0x66f] sm:$0x2] %vm4_vm0, %v217_v12   ;;  %v1706_v17 = vld [vmem:[#allocation2 + $0x8] sm:$0x1] }
  0xaf   :  { %224 = vst.msk [vmem:[#allocation2 + $0xa6e] sm:$0x4] %vm4_vm0, %v217_v12   ;;  %3347 = vst [vmem:[#allocation0 + $0x112] sm:$0x1] %v3343_v14  ;;  %v2473_v18 = vld [vmem:[#allocation2 + $0x408] sm:$0x1] }
  0xb0   :  { %4115 = vst [vmem:[#allocation0 + $0x192] sm:$0x1] %v4111_v15  ;;  %v4928_v16 = vld [vmem:[%s6230_s0 + $0x9] ss:$15 sm:$0x7]   ;;  %v362_v15 = vpop.permute.xlu1 %361   ;;  %s5227_s7 = smov 41  }
  0xb1   :  { %v3241_v19 = vld [vmem:[#allocation2 + $0x808] sm:$0x1]  ;;  %1709 = vst [vmem:[#allocation0 + $0x1] sm:$0x1] %v1706_v17  ;;  %2477 = vst [vmem:[#allocation0 + $0x81] sm:$0x1] %v2473_v18  ;;  %936 = vrot.lane.b32.xlu1 %v4928_v16, %s5218_s9 }
  0xb2   :  { %3245 = vst [vmem:[#allocation0 + $0x101] sm:$0x1] %v3241_v19  ;;  %v4009_v21 = vld [vmem:[#allocation2 + $0xc08] sm:$0x1]  ;;  %v2371_v22 = vld [vmem:[#allocation2 + $0x380] sm:$0x1] }
  0xb3   :  { %v3139_v23 = vld [vmem:[#allocation2 + $0x780] sm:$0x1]  ;;  %231 = vst.msk [vmem:[#allocation2 + $0x1e8] sm:$0x1] %vm4_vm0, %v228_v20   ;;  %233 = vst.msk [vmem:[#allocation2 + $0x5e7] sm:$0x2] %vm4_vm0, %v228_v20  }
  0xb4   :  { %235 = vst.msk [vmem:[#allocation2 + $0x9e6] sm:$0x4] %vm4_vm0, %v228_v20   ;;  %237 = vst.msk [vmem:[#allocation2 + $0xde5] sm:$0x8] %vm4_vm0, %v228_v20   ;;  %v3907_v25 = vld [vmem:[#allocation2 + $0xb80] sm:$0x1] }
  0xb5   :  { %4013 = vst [vmem:[#allocation0 + $0x181] sm:$0x1] %v4009_v21  ;;  %2375 = vst [vmem:[#allocation0 + $0x70] sm:$0x1] %v2371_v22  ;;  %v2269_v28 = vld [vmem:[#allocation2 + $0x2f8] sm:$0x1]  ;;  %v375_v21 = vpop.permute.xlu0 %374  }
  0xb6   :  { %3143 = vst [vmem:[#allocation0 + $0xf0] sm:$0x1] %v3139_v23  ;;  %244 = vst.msk [vmem:[#allocation2 + $0x160] sm:$0x1] %vm4_vm0, %v241_v24   ;;  %v3037_v29 = vld [vmem:[#allocation2 + $0x6f8] sm:$0x1] }
  0xb7   :  { %246 = vst.msk [vmem:[#allocation2 + $0x55f] sm:$0x2] %vm4_vm0, %v241_v24   ;;  %248 = vst.msk [vmem:[#allocation2 + $0x95e] sm:$0x4] %vm4_vm0, %v241_v24   ;;  %v3805_v30 = vld [vmem:[#allocation2 + $0xaf8] sm:$0x1] }
  0xb8   :  { %250 = vst.msk [vmem:[#allocation2 + $0xd5d] sm:$0x8] %vm4_vm0, %v241_v24   ;;  %v4929_v26 = vld [vmem:[%s6230_s0 + $0x7] ss:$15 sm:$0xf]   ;;  %s5231_s25 = smov 37  }
  0xb9   :  { %3911 = vst [vmem:[#allocation0 + $0x170] sm:$0x1] %v3907_v25  ;;  %v4930_v27 = vld [vmem:[%s6230_s0 + $0x5] ss:$15 sm:$0xf]   ;;  %947 = vrot.lane.b32.xlu0 %v4929_v26, %s5219_s12  ;;  %v386_v25 = vpop.permute.xlu1 %385   ;;  %s5233_s6 = smov 35  }
  0xba   :  { %2273 = vst [vmem:[#allocation0 + $0x5f] sm:$0x1] %v2269_v28  ;;  %3041 = vst [vmem:[#allocation0 + $0xdf] sm:$0x1] %v3037_v29  ;;  %v2167_v32 = vld [vmem:[#allocation2 + $0x270] sm:$0x1]  ;;  %960 = vrot.lane.b32.xlu1 %v4930_v27, %s5220_s15 }
  0xbb   :  { %3809 = vst [vmem:[#allocation0 + $0x15f] sm:$0x1] %v3805_v30  ;;  %v2935_v33 = vld [vmem:[#allocation2 + $0x670] sm:$0x1]  ;;  %257 = vst.msk [vmem:[#allocation2 + $0xd8] sm:$0x1] %vm4_vm0, %v254_v31  }
  0xbc   :  { %v3703_v34 = vld [vmem:[#allocation2 + $0xa70] sm:$0x1]  ;;  %259 = vst.msk [vmem:[#allocation2 + $0x4d7] sm:$0x2] %vm4_vm0, %v254_v31   ;;  %261 = vst.msk [vmem:[#allocation2 + $0x8d6] sm:$0x4] %vm4_vm0, %v254_v31  }
  0xbd   :  { %263 = vst.msk [vmem:[#allocation2 + $0xcd5] sm:$0x8] %vm4_vm0, %v254_v31   ;;  %2171 = vst [vmem:[#allocation0 + $0x4e] sm:$0x1] %v2167_v32  ;;  %v2065_v38 = vld [vmem:[#allocation2 + $0x1e8] sm:$0x1] }
  0xbe   :  { %2939 = vst [vmem:[#allocation0 + $0xce] sm:$0x1] %v2935_v33  ;;  %3707 = vst [vmem:[#allocation0 + $0x14e] sm:$0x1] %v3703_v34  ;;  %v2833_v39 = vld [vmem:[#allocation2 + $0x5e8] sm:$0x1] }
  0xbf   :  { %270 = vst.msk [vmem:[#allocation2 + $0x50] sm:$0x1] %vm4_vm0, %v267_v35   ;;  %272 = vst.msk [vmem:[#allocation2 + $0x44f] sm:$0x2] %vm4_vm0, %v267_v35   ;;  %v3601_v40 = vld [vmem:[#allocation2 + $0x9e8] sm:$0x1] }
  0xc0   :  { %274 = vst.msk [vmem:[#allocation2 + $0x84e] sm:$0x4] %vm4_vm0, %v267_v35   ;;  %276 = vst.msk [vmem:[#allocation2 + $0xc4d] sm:$0x8] %vm4_vm0, %v267_v35   ;;  %v4369_v42 = vld [vmem:[#allocation2 + $0xde8] sm:$0x1]  ;;  %v397_v35 = vpop.permute.xlu0 %396  }
  0xc1   :  { %v4931_v36 = vld [vmem:[%s6230_s0 + $0x3] ss:$15 sm:$0xf]   ;;  %2069 = vst [vmem:[#allocation0 + $0x3d] sm:$0x1] %v2065_v38  ;;  %s5229_s15 = smov 39  }
  0xc2   :  { %v4932_v37 = vld [vmem:[%s6230_s0 + $0x1] ss:$15 sm:$0xf]   ;;  %2837 = vst [vmem:[#allocation0 + $0xbd] sm:$0x1] %v2833_v39  ;;  %973 = vrot.lane.b32.xlu0 %v4931_v36, %s5221_s20  ;;  %v408_v39 = vpop.permute.xlu1 %407   ;;  %s5234_s11 = smov 14  }
  0xc3   :  { %3605 = vst [vmem:[#allocation0 + $0x13d] sm:$0x1] %v3601_v40  ;;  %v1963_v43 = vld [vmem:[#allocation2 + $0x160] sm:$0x1]  ;;  %283 = vst.msk [vmem:[#allocation2 + $0x3c8] sm:$0x1] %vm4_vm0, %v280_v41   ;;  %986 = vrot.lane.b32.xlu1 %v4932_v37, %s5222_s21 }
  0xc4   :  { %v2731_v44 = vld [vmem:[#allocation2 + $0x560] sm:$0x1]  ;;  %285 = vst.msk [vmem:[#allocation2 + $0x7c7] sm:$0x2] %vm4_vm0, %v280_v41   ;;  %287 = vst.msk [vmem:[#allocation2 + $0xbc6] sm:$0x4] %vm4_vm0, %v280_v41  }
  0xc5   :  { %v4933_v46 = vld [vmem:[%s6230_s0 + $0xe] ss:$15 sm:$0x7]   ;;  %4373 = vst [vmem:[#allocation0 + $0x1bd] sm:$0x1] %v4369_v42  ;;  %s5236_s21 = smov 12  }
  0xc6   :  { %1967 = vst [vmem:[#allocation0 + $0x2c] sm:$0x1] %v1963_v43  ;;  %2735 = vst [vmem:[#allocation0 + $0xac] sm:$0x1] %v2731_v44  ;;  %v3499_v47 = vld [vmem:[#allocation2 + $0x960] sm:$0x1]  ;;  %999 = vrot.lane.b32.xlu0 %v4933_v46, %s5223_s26 }
  0xc7   :  { %v4267_v48 = vld [vmem:[#allocation2 + $0xd60] sm:$0x1]  ;;  %294 = vst.msk [vmem:[#allocation2 + $0x340] sm:$0x1] %vm4_vm0, %v291_v45   ;;  %296 = vst.msk [vmem:[#allocation2 + $0x73f] sm:$0x2] %vm4_vm0, %v291_v45  }
  0xc8   :  { %298 = vst.msk [vmem:[#allocation2 + $0xb3e] sm:$0x4] %vm4_vm0, %v291_v45   ;;  %3503 = vst [vmem:[#allocation0 + $0x12c] sm:$0x1] %v3499_v47  ;;  %v1861_v50 = vld [vmem:[#allocation2 + $0xd8] sm:$0x1] }
  0xc9   :  { %4271 = vst [vmem:[#allocation0 + $0x1ac] sm:$0x1] %v4267_v48  ;;  %v4934_v49 = vld [vmem:[%s6230_s0 + $0xc] ss:$15 sm:$0x7]   ;;  %s5237_s26 = smov 11  }
  0xca   :  { %v2629_v51 = vld [vmem:[#allocation2 + $0x4d8] sm:$0x1]  ;;  %1865 = vst [vmem:[#allocation0 + $0x1b] sm:$0x1] %v1861_v50  ;;  %v1759_v55 = vld [vmem:[#allocation2 + $0x50] sm:$0x1]  ;;  %1010 = vrot.lane.b32.xlu1 %v4934_v49, %s5224_s27  ;;  %v421_v50 = vpop.permute.xlu0 %420  }
  0xcb   :  { %v3397_v52 = vld [vmem:[#allocation2 + $0x8d8] sm:$0x1]  ;;  %2633 = vst [vmem:[#allocation0 + $0x9b] sm:$0x1] %v2629_v51  ;;  %v2527_v56 = vld [vmem:[#allocation2 + $0x450] sm:$0x1] }
  0xcc   :  { %3401 = vst [vmem:[#allocation0 + $0x11b] sm:$0x1] %v3397_v52  ;;  %v4165_v54 = vld [vmem:[#allocation2 + $0xcd8] sm:$0x1]  ;;  %305 = vst.msk [vmem:[#allocation2 + $0x2b8] sm:$0x1] %vm4_vm0, %v302_v53  }
  0xcd   :  { %307 = vst.msk [vmem:[#allocation2 + $0x6b7] sm:$0x2] %vm4_vm0, %v302_v53   ;;  %309 = vst.msk [vmem:[#allocation2 + $0xab6] sm:$0x4] %vm4_vm0, %v302_v53   ;;  %v3295_v59 = vld [vmem:[#allocation2 + $0x850] sm:$0x1] }
  0xce   :  { %v4935_v58 = vld [vmem:[%s6230_s0 + $0xa] ss:$15 sm:$0x7]   ;;  %4169 = vst [vmem:[#allocation0 + $0x19b] sm:$0x1] %v4165_v54  ;;  %s5238_s2 = smov 10  }
  0xcf   :  { %1763 = vst [vmem:[#allocation0 + $0xa] sm:$0x1] %v1759_v55  ;;  %2531 = vst [vmem:[#allocation0 + $0x8a] sm:$0x1] %v2527_v56  ;;  %v4063_v60 = vld [vmem:[#allocation2 + $0xc50] sm:$0x1]  ;;  %1021 = vrot.lane.b32.xlu0 %v4935_v58, %s5225_s30  ;;  %v434_v55 = vpop.permute.xlu1 %433  }
  0xd0   :  { %316 = vst.msk [vmem:[#allocation2 + $0x230] sm:$0x1] %vm4_vm0, %v313_v57   ;;  %318 = vst.msk [vmem:[#allocation2 + $0x62f] sm:$0x2] %vm4_vm0, %v313_v57   ;;  %v2425_v62 = vld [vmem:[#allocation2 + $0x3c8] sm:$0x1] }
  0xd1   :  { %320 = vst.msk [vmem:[#allocation2 + $0xa2e] sm:$0x4] %vm4_vm0, %v313_v57   ;;  %3299 = vst [vmem:[#allocation0 + $0x10a] sm:$0x1] %v3295_v59  ;;  %v3193_v63 = vld [vmem:[#allocation2 + $0x7c8] sm:$0x1] }
  0xd2   :  { %4067 = vst [vmem:[#allocation0 + $0x18a] sm:$0x1] %v4063_v60  ;;  %v4936_v61 = vld [vmem:[%s6230_s0 + $0x8] ss:$15 sm:$0x7]   ;;  %s5232_s30 = smov 36  }
  0xd3   :  { %v3961_v0 = vld [vmem:[#allocation2 + $0xbc8] sm:$0x1]  ;;  %2429 = vst [vmem:[#allocation0 + $0x79] sm:$0x1] %v2425_v62  ;;  %3197 = vst [vmem:[#allocation0 + $0xf9] sm:$0x1] %v3193_v63  ;;  %1032 = vrot.lane.b32.xlu1 %v4936_v61, %s5226_s4 }
  0xd4   :  { %3965 = vst [vmem:[#allocation0 + $0x179] sm:$0x1] %v3961_v0  ;;  %v2323_v2 = vld [vmem:[#allocation2 + $0x340] sm:$0x1]  ;;  %327 = vst.msk [vmem:[#allocation2 + $0x1a8] sm:$0x1] %vm4_vm0, %v324_v1   ;;  %v447_v0 = vpop.permute.xlu0 %446  }
  0xd5   :  { %v3091_v3 = vld [vmem:[#allocation2 + $0x740] sm:$0x1]  ;;  %329 = vst.msk [vmem:[#allocation2 + $0x5a7] sm:$0x2] %vm4_vm0, %v324_v1   ;;  %331 = vst.msk [vmem:[#allocation2 + $0x9a6] sm:$0x4] %vm4_vm0, %v324_v1  }
  0xd6   :  { %v3859_v4 = vld [vmem:[#allocation2 + $0xb40] sm:$0x1]  ;;  %333 = vst.msk [vmem:[#allocation2 + $0xda5] sm:$0x8] %vm4_vm0, %v324_v1   ;;  %2327 = vst [vmem:[#allocation0 + $0x68] sm:$0x1] %v2323_v2 }
  0xd7   :  { %3095 = vst [vmem:[#allocation0 + $0xe8] sm:$0x1] %v3091_v3  ;;  %3863 = vst [vmem:[#allocation0 + $0x168] sm:$0x1] %v3859_v4  ;;  %v2221_v8 = vld [vmem:[#allocation2 + $0x2b8] sm:$0x1] }
  0xd8   :  { %340 = vst.msk [vmem:[#allocation2 + $0x120] sm:$0x1] %vm4_vm0, %v337_v5   ;;  %342 = vst.msk [vmem:[#allocation2 + $0x51f] sm:$0x2] %vm4_vm0, %v337_v5   ;;  %v2989_v9 = vld [vmem:[#allocation2 + $0x6b8] sm:$0x1] }
  0xd9   :  { %344 = vst.msk [vmem:[#allocation2 + $0x91e] sm:$0x4] %vm4_vm0, %v337_v5   ;;  %346 = vst.msk [vmem:[#allocation2 + $0xd1d] sm:$0x8] %vm4_vm0, %v337_v5   ;;  %v3757_v10 = vld [vmem:[#allocation2 + $0xab8] sm:$0x1]  ;;  %v460_v5 = vpop.permute.xlu1 %459  }
  0xda   :  { %v4937_v6 = vld [vmem:[%s6230_s0 + $0x6] ss:$15 sm:$0xf]   ;;  %2225 = vst [vmem:[#allocation0 + $0x57] sm:$0x1] %v2221_v8  ;;  %s5240_s12 = smov 8  }
  0xdb   :  { %v4938_v7 = vld [vmem:[%s6230_s0 + $0x4] ss:$15 sm:$0xf]   ;;  %2993 = vst [vmem:[#allocation0 + $0xd7] sm:$0x1] %v2989_v9  ;;  %1043 = vrot.lane.b32.xlu0 %v4937_v6, %s5227_s7  ;;  %s5239_s7 = smov 9  }
  0xdc   :  { %3761 = vst [vmem:[#allocation0 + $0x157] sm:$0x1] %v3757_v10  ;;  %v2119_v12 = vld [vmem:[#allocation2 + $0x230] sm:$0x1]  ;;  %353 = vst.msk [vmem:[#allocation2 + $0x98] sm:$0x1] %vm4_vm0, %v350_v11   ;;  %1056 = vrot.lane.b32.xlu1 %v4938_v7, %s5228_s10 }
  0xdd   :  { %v2887_v13 = vld [vmem:[#allocation2 + $0x630] sm:$0x1]  ;;  %355 = vst.msk [vmem:[#allocation2 + $0x497] sm:$0x2] %vm4_vm0, %v350_v11   ;;  %357 = vst.msk [vmem:[#allocation2 + $0x896] sm:$0x4] %vm4_vm0, %v350_v11  }
  0xde   :  { %v3655_v14 = vld [vmem:[#allocation2 + $0xa30] sm:$0x1]  ;;  %359 = vst.msk [vmem:[#allocation2 + $0xc95] sm:$0x8] %vm4_vm0, %v350_v11   ;;  %2123 = vst [vmem:[#allocation0 + $0x46] sm:$0x1] %v2119_v12 }
  0xdf   :  { %2891 = vst [vmem:[#allocation0 + $0xc6] sm:$0x1] %v2887_v13  ;;  %3659 = vst [vmem:[#allocation0 + $0x146] sm:$0x1] %v3655_v14  ;;  %v2017_v18 = vld [vmem:[#allocation2 + $0x1a8] sm:$0x1] }
  0xe0   :  { %365 = vst.msk [vmem:[#allocation2 + $0x10] sm:$0x1] %vm4_vm0, %v362_v15   ;;  %367 = vst.msk [vmem:[#allocation2 + $0x40f] sm:$0x2] %vm4_vm0, %v362_v15   ;;  %v2785_v19 = vld [vmem:[#allocation2 + $0x5a8] sm:$0x1] }
  0xe1   :  { %369 = vst.msk [vmem:[#allocation2 + $0x80e] sm:$0x4] %vm4_vm0, %v362_v15   ;;  %371 = vst.msk [vmem:[#allocation2 + $0xc0d] sm:$0x8] %vm4_vm0, %v362_v15   ;;  %v3553_v20 = vld [vmem:[#allocation2 + $0x9a8] sm:$0x1]  ;;  %v471_v15 = vpop.permute.xlu0 %470  }
  0xe2   :  { %v4939_v16 = vld [vmem:[%s6230_s0 + $0x2] ss:$15 sm:$0xf]   ;;  %2021 = vst [vmem:[#allocation0 + $0x35] sm:$0x1] %v2017_v18  ;;  %s5241_s17 = smov 7  }
  0xe3   :  { %v1080_v17 = vld [vmem:[%s6230_s0] ss:$15 sm:$0xf]   ;;  %2789 = vst [vmem:[#allocation0 + $0xb5] sm:$0x1] %v2785_v19  ;;  %1069 = vrot.lane.b32.xlu0 %v4939_v16, %s5229_s15  ;;  %s5242_s22 = smov 6  }
  0xe4   :  { %3557 = vst [vmem:[#allocation0 + $0x135] sm:$0x1] %v3553_v20  ;;  %v4321_v22 = vld [vmem:[#allocation2 + $0xda8] sm:$0x1]  ;;  %v1915_v23 = vld [vmem:[#allocation2 + $0x120] sm:$0x1]  ;;  %1081 = vrot.lane.b32.xlu1 %v1080_v17, %s5230_s18  ;;  %v482_v20 = vpop.permute.xlu1 %481  }
  0xe5   :  { %v2683_v24 = vld [vmem:[#allocation2 + $0x520] sm:$0x1]  ;;  %378 = vst.msk [vmem:[#allocation2 + $0x388] sm:$0x1] %vm4_vm0, %v375_v21   ;;  %380 = vst.msk [vmem:[#allocation2 + $0x787] sm:$0x2] %vm4_vm0, %v375_v21  }
  0xe6   :  { %382 = vst.msk [vmem:[#allocation2 + $0xb86] sm:$0x4] %vm4_vm0, %v375_v21   ;;  %v4940_v26 = vld [vmem:[%s6230_s0 + $0xd] ss:$15 sm:$0x7]   ;;  %s5243_s27 = smov 5  }
  0xe7   :  { %4325 = vst [vmem:[#allocation0 + $0x1b5] sm:$0x1] %v4321_v22  ;;  %1919 = vst [vmem:[#allocation0 + $0x24] sm:$0x1] %v1915_v23  ;;  %v3451_v27 = vld [vmem:[#allocation2 + $0x920] sm:$0x1]  ;;  %1094 = vrot.lane.b32.xlu0 %v4940_v26, %s5231_s25 }
  0xe8   :  { %2687 = vst [vmem:[#allocation0 + $0xa4] sm:$0x1] %v2683_v24  ;;  %v4219_v28 = vld [vmem:[#allocation2 + $0xd20] sm:$0x1]  ;;  %389 = vst.msk [vmem:[#allocation2 + $0x300] sm:$0x1] %vm4_vm0, %v386_v25  }
  0xe9   :  { %391 = vst.msk [vmem:[#allocation2 + $0x6ff] sm:$0x2] %vm4_vm0, %v386_v25   ;;  %393 = vst.msk [vmem:[#allocation2 + $0xafe] sm:$0x4] %vm4_vm0, %v386_v25   ;;  %v1813_v32 = vld [vmem:[#allocation2 + $0x98] sm:$0x1] }
  0xea   :  { %v4941_v29 = vld [vmem:[%s6230_s0 + $0xb] ss:$15 sm:$0x7]   ;;  %3455 = vst [vmem:[#allocation0 + $0x124] sm:$0x1] %v3451_v27  ;;  %s5245_s4 = smov 3  }
  0xeb   :  { %4223 = vst [vmem:[#allocation0 + $0x1a4] sm:$0x1] %v4219_v28  ;;  %v4962_v30 = vld [vmem:[%s6230_s0 + $0xc] ss:$15 sm:$0x7]   ;;  %1105 = vrot.lane.b32.xlu1 %v4941_v29, %s5232_s30  ;;  %s5244_s30 = smov 4  }
  0xec   :  { %v4963_v31 = vld [vmem:[%s6230_s0 + $0xd] ss:$15 sm:$0x7]   ;;  %v2581_v33 = vld [vmem:[#allocation2 + $0x498] sm:$0x1]  ;;  %s5247_s8 = smov 1  }
  0xed   :  { %v3349_v34 = vld [vmem:[#allocation2 + $0x898] sm:$0x1]  ;;  %1817 = vst [vmem:[#allocation0 + $0x13] sm:$0x1] %v1813_v32  ;;  %2585 = vst [vmem:[#allocation0 + $0x93] sm:$0x1] %v2581_v33  ;;  %v1369_v51 = vsel %vm1368_vm1, %v4963_v31, %v4962_v30  ;;  %v493_v31 = vpop.permute.xlu0 %492  }
  0xee   :  { %3353 = vst [vmem:[#allocation0 + $0x113] sm:$0x1] %v3349_v34  ;;  %v4117_v36 = vld [vmem:[#allocation2 + $0xc98] sm:$0x1]  ;;  %v1711_v37 = vld [vmem:[#allocation2 + $0x10] sm:$0x1] }
  0xef   :  { %v2479_v38 = vld [vmem:[#allocation2 + $0x410] sm:$0x1]  ;;  %400 = vst.msk [vmem:[#allocation2 + $0x278] sm:$0x1] %vm4_vm0, %v397_v35   ;;  %402 = vst.msk [vmem:[#allocation2 + $0x677] sm:$0x2] %vm4_vm0, %v397_v35   ;;  %1370 = vrot.lane.b32.xlu1 %v1369_v51, %s5234_s11 }
  0xf0   :  { %404 = vst.msk [vmem:[#allocation2 + $0xa76] sm:$0x4] %vm4_vm0, %v397_v35   ;;  %v4942_v40 = vld [vmem:[%s6230_s0 + $0x9] ss:$15 sm:$0x7]   ;;  %s5248_s11 = smov 34  }
  0xf1   :  { %4121 = vst [vmem:[#allocation0 + $0x193] sm:$0x1] %v4117_v36  ;;  %1715 = vst [vmem:[#allocation0 + $0x2] sm:$0x1] %v1711_v37  ;;  %v3247_v41 = vld [vmem:[#allocation2 + $0x810] sm:$0x1]  ;;  %1116 = vrot.lane.b32.xlu0 %v4942_v40, %s5233_s6  ;;  %v504_v36 = vpop.permute.xlu1 %503  }
  0xf2   :  { %2483 = vst [vmem:[#allocation0 + $0x82] sm:$0x1] %v2479_v38  ;;  %v4015_v42 = vld [vmem:[#allocation2 + $0xc10] sm:$0x1]  ;;  %411 = vst.msk [vmem:[#allocation2 + $0x1f0] sm:$0x1] %vm4_vm0, %v408_v39  }
  0xf3   :  { %413 = vst.msk [vmem:[#allocation2 + $0x5ef] sm:$0x2] %vm4_vm0, %v408_v39   ;;  %415 = vst.msk [vmem:[#allocation2 + $0x9ee] sm:$0x4] %vm4_vm0, %v408_v39   ;;  %v2377_v47 = vld [vmem:[#allocation2 + $0x388] sm:$0x1] }
  0xf4   :  { %417 = vst.msk [vmem:[#allocation2 + $0xded] sm:$0x8] %vm4_vm0, %v408_v39   ;;  %v4964_v43 = vld [vmem:[%s6230_s0 + $0xa] ss:$15 sm:$0x7]   ;;  %s5249_s14 = smov 33  }
  0xf5   :  { %v4965_v44 = vld [vmem:[%s6230_s0 + $0xb] ss:$15 sm:$0x7]   ;;  %3251 = vst [vmem:[#allocation0 + $0x102] sm:$0x1] %v3247_v41  ;;  %v530_v51 = vpop.permute.xlu1 %529   ;;  %s5252_s23 = smov 30  }
  0xf6   :  { %4019 = vst [vmem:[#allocation0 + $0x182] sm:$0x1] %v4015_v42  ;;  %v4966_v45 = vld [vmem:[%s6230_s0 + $0x8] ss:$15 sm:$0x7]   ;;  %v1391_v58 = vsel %vm1390_vm2, %v4965_v44, %v4964_v43  ;;  %s5253_s28 = smov 29  }
  0xf7   :  { %v4967_v46 = vld [vmem:[%s6230_s0 + $0x9] ss:$15 sm:$0x7]   ;;  %v3145_v48 = vld [vmem:[#allocation2 + $0x788] sm:$0x1]  ;;  %1392 = vrot.lane.b32.xlu0 %v1391_v58, %s5235_s16  ;;  %s5255_s3 = smov 27  }
  0xf8   :  { %v3913_v49 = vld [vmem:[#allocation2 + $0xb88] sm:$0x1]  ;;  %2381 = vst [vmem:[#allocation0 + $0x71] sm:$0x1] %v2377_v47  ;;  %3149 = vst [vmem:[#allocation0 + $0xf1] sm:$0x1] %v3145_v48  ;;  %v1413_v1 = vsel %vm1412_vm3, %v4967_v46, %v4966_v45  ;;  %v517_v46 = vpop.permute.xlu0 %516  }
  0xf9   :  { %3917 = vst [vmem:[#allocation0 + $0x171] sm:$0x1] %v3913_v49  ;;  %v2275_v52 = vld [vmem:[#allocation2 + $0x300] sm:$0x1]  ;;  %424 = vst.msk [vmem:[#allocation2 + $0x168] sm:$0x1] %vm4_vm0, %v421_v50   ;;  %1414 = vrot.lane.b32.xlu1 %v1413_v1, %s5236_s21  ;;  %v555_v1 = vpop.permute.xlu1 %554  }
  0xfa   :  { %v3043_v53 = vld [vmem:[#allocation2 + $0x700] sm:$0x1]  ;;  %426 = vst.msk [vmem:[#allocation2 + $0x567] sm:$0x2] %vm4_vm0, %v421_v50   ;;  %428 = vst.msk [vmem:[#allocation2 + $0x966] sm:$0x4] %vm4_vm0, %v421_v50  }
  0xfb   :  { %v3811_v54 = vld [vmem:[#allocation2 + $0xb00] sm:$0x1]  ;;  %430 = vst.msk [vmem:[#allocation2 + $0xd65] sm:$0x8] %vm4_vm0, %v421_v50   ;;  %2279 = vst [vmem:[#allocation0 + $0x60] sm:$0x1] %v2275_v52 }
  0xfc   :  { %3047 = vst [vmem:[#allocation0 + $0xe0] sm:$0x1] %v3043_v53  ;;  %3815 = vst [vmem:[#allocation0 + $0x160] sm:$0x1] %v3811_v54  ;;  %v2173_v61 = vld [vmem:[#allocation2 + $0x278] sm:$0x1] }
  0xfd   :  { %437 = vst.msk [vmem:[#allocation2 + $0xe0] sm:$0x1] %vm4_vm0, %v434_v55   ;;  %439 = vst.msk [vmem:[#allocation2 + $0x4df] sm:$0x2] %vm4_vm0, %v434_v55   ;;  %v2941_v62 = vld [vmem:[#allocation2 + $0x678] sm:$0x1] }
  0xfe   :  { %441 = vst.msk [vmem:[#allocation2 + $0x8de] sm:$0x4] %vm4_vm0, %v434_v55   ;;  %443 = vst.msk [vmem:[#allocation2 + $0xcdd] sm:$0x8] %vm4_vm0, %v434_v55   ;;  %v3709_v63 = vld [vmem:[#allocation2 + $0xa78] sm:$0x1] }
  0xff   :  { %v4968_v56 = vld [vmem:[%s6230_s0 + $0x6] ss:$15 sm:$0xf]   ;;  %v4969_v57 = vld [vmem:[%s6230_s0 + $0x7] ss:$15 sm:$0xf]  }
 0x100   :  { %v4970_v59 = vld [vmem:[%s6230_s0 + $0x4] ss:$15 sm:$0xf]   ;;  %v4971_v60 = vld [vmem:[%s6230_s0 + $0x5] ss:$15 sm:$0xf]   ;;  %v1435_v9 = vsel %vm1434_vm4, %v4969_v57, %v4968_v56 }
 0x101   :  { %2177 = vst [vmem:[#allocation0 + $0x4f] sm:$0x1] %v2173_v61  ;;  %2945 = vst [vmem:[#allocation0 + $0xcf] sm:$0x1] %v2941_v62  ;;  %v2071_v2 = vld [vmem:[#allocation2 + $0x1f0] sm:$0x1]  ;;  %v1461_v16 = vsel %vm1460_vm5, %v4971_v60, %v4970_v59  ;;  %1436 = vrot.lane.b32.xlu0 %v1435_v9, %s5237_s26  ;;  %v542_v60 = vpop.permute.xlu0 %541  }
 0x102   :  { %3713 = vst [vmem:[#allocation0 + $0x14f] sm:$0x1] %v3709_v63  ;;  %v2839_v3 = vld [vmem:[#allocation2 + $0x5f0] sm:$0x1]  ;;  %450 = vst.msk [vmem:[#allocation2 + $0x58] sm:$0x1] %vm4_vm0, %v447_v0   ;;  %1462 = vrot.lane.b32.xlu1 %v1461_v16, %s5238_s2 }
 0x103   :  { %v3607_v4 = vld [vmem:[#allocation2 + $0x9f0] sm:$0x1]  ;;  %452 = vst.msk [vmem:[#allocation2 + $0x457] sm:$0x2] %vm4_vm0, %v447_v0   ;;  %454 = vst.msk [vmem:[#allocation2 + $0x856] sm:$0x4] %vm4_vm0, %v447_v0  }
 0x104   :  { %456 = vst.msk [vmem:[#allocation2 + $0xc55] sm:$0x8] %vm4_vm0, %v447_v0   ;;  %2075 = vst [vmem:[#allocation0 + $0x3e] sm:$0x1] %v2071_v2  ;;  %v4375_v6 = vld [vmem:[#allocation2 + $0xdf0] sm:$0x1] }
 0x105   :  { %2843 = vst [vmem:[#allocation0 + $0xbe] sm:$0x1] %v2839_v3  ;;  %3611 = vst [vmem:[#allocation0 + $0x13e] sm:$0x1] %v3607_v4  ;;  %v1969_v12 = vld [vmem:[#allocation2 + $0x168] sm:$0x1]  ;;  %v566_v9 = vpop.permute.xlu0 %565  }
 0x106   :  { %463 = vst.msk [vmem:[#allocation2 + $0x3d0] sm:$0x1] %vm4_vm0, %v460_v5   ;;  %465 = vst.msk [vmem:[#allocation2 + $0x7cf] sm:$0x2] %vm4_vm0, %v460_v5   ;;  %v2737_v13 = vld [vmem:[#allocation2 + $0x568] sm:$0x1] }
 0x107   :  { %467 = vst.msk [vmem:[#allocation2 + $0xbce] sm:$0x4] %vm4_vm0, %v460_v5   ;;  %v4972_v7 = vld [vmem:[%s6230_s0 + $0x2] ss:$15 sm:$0xf]   ;;  %s5256_s6 = smov 26  }
 0x108   :  { %v4973_v8 = vld [vmem:[%s6230_s0 + $0x3] ss:$15 sm:$0xf]   ;;  %4379 = vst [vmem:[#allocation0 + $0x1be] sm:$0x1] %v4375_v6  ;;  %s5257_s9 = smov 25  }
 0x109   :  { %v1508_v10 = vld [vmem:[%s6230_s0] ss:$15 sm:$0xf]   ;;  %v4974_v11 = vld [vmem:[%s6230_s0 + $0x1] ss:$15 sm:$0xf]   ;;  %v1487_v25 = vsel %vm1486_vm6, %v4973_v8, %v4972_v7 }
 0x10a   :  { %v3505_v14 = vld [vmem:[#allocation2 + $0x968] sm:$0x1]  ;;  %1973 = vst [vmem:[#allocation0 + $0x2d] sm:$0x1] %v1969_v12  ;;  %2741 = vst [vmem:[#allocation0 + $0xad] sm:$0x1] %v2737_v13  ;;  %v1512_v32 = vsel %vm1511_vm7, %v4974_v11, %v1508_v10  ;;  %1488 = vrot.lane.b32.xlu0 %v1487_v25, %s5239_s7 }
 0x10b   :  { %3509 = vst [vmem:[#allocation0 + $0x12d] sm:$0x1] %v3505_v14  ;;  %v4273_v17 = vld [vmem:[#allocation2 + $0xd68] sm:$0x1]  ;;  %v1867_v18 = vld [vmem:[#allocation2 + $0xe0] sm:$0x1]  ;;  %1513 = vrot.lane.b32.xlu1 %v1512_v32, %s5240_s12  ;;  %v577_v14 = vpop.permute.xlu1 %576  }
 0x10c   :  { %v2635_v19 = vld [vmem:[#allocation2 + $0x4e0] sm:$0x1]  ;;  %474 = vst.msk [vmem:[#allocation2 + $0x348] sm:$0x1] %vm4_vm0, %v471_v15   ;;  %476 = vst.msk [vmem:[#allocation2 + $0x747] sm:$0x2] %vm4_vm0, %v471_v15  }
 0x10d   :  { %478 = vst.msk [vmem:[#allocation2 + $0xb46] sm:$0x4] %vm4_vm0, %v471_v15   ;;  %4277 = vst [vmem:[#allocation0 + $0x1ad] sm:$0x1] %v4273_v17  ;;  %v3403_v21 = vld [vmem:[#allocation2 + $0x8e0] sm:$0x1] }
 0x10e   :  { %1871 = vst [vmem:[#allocation0 + $0x1c] sm:$0x1] %v1867_v18  ;;  %2639 = vst [vmem:[#allocation0 + $0x9c] sm:$0x1] %v2635_v19  ;;  %v4171_v22 = vld [vmem:[#allocation2 + $0xce0] sm:$0x1] }
 0x10f   :  { %485 = vst.msk [vmem:[#allocation2 + $0x2c0] sm:$0x1] %vm4_vm0, %v482_v20   ;;  %487 = vst.msk [vmem:[#allocation2 + $0x6bf] sm:$0x2] %vm4_vm0, %v482_v20   ;;  %v1765_v28 = vld [vmem:[#allocation2 + $0x58] sm:$0x1] }
 0x110   :  { %489 = vst.msk [vmem:[#allocation2 + $0xabe] sm:$0x4] %vm4_vm0, %v482_v20   ;;  %v4975_v23 = vld [vmem:[%s6230_s0 + $0xd] ss:$15 sm:$0x7]   ;;  %s5258_s12 = smov 24  }
 0x111   :  { %v4976_v24 = vld [vmem:[%s6230_s0 + $0xe] ss:$15 sm:$0x7]   ;;  %3407 = vst [vmem:[#allocation0 + $0x11c] sm:$0x1] %v3403_v21  ;;  %s5260_s18 = smov 22  }
 0x112   :  { %4175 = vst [vmem:[#allocation0 + $0x19c] sm:$0x1] %v4171_v22  ;;  %v4977_v26 = vld [vmem:[%s6230_s0 + $0xb] ss:$15 sm:$0x7]   ;;  %v1538_v40 = vsel %vm1537_vm8, %v4976_v24, %v4975_v23  ;;  %v588_v22 = vpop.permute.xlu0 %587   ;;  %s5262_s26 = smov 20  }
 0x113   :  { %v4978_v27 = vld [vmem:[%s6230_s0 + $0xc] ss:$15 sm:$0x7]   ;;  %v2533_v29 = vld [vmem:[#allocation2 + $0x458] sm:$0x1]  ;;  %1539 = vrot.lane.b32.xlu0 %v1538_v40, %s5241_s17  ;;  %s5250_s17 = smov 32  }
 0x114   :  { %v3301_v30 = vld [vmem:[#allocation2 + $0x858] sm:$0x1]  ;;  %1769 = vst [vmem:[#allocation0 + $0xb] sm:$0x1] %v1765_v28  ;;  %2537 = vst [vmem:[#allocation0 + $0x8b] sm:$0x1] %v2533_v29  ;;  %v1560_v47 = vsel %vm1559_vm9, %v4978_v27, %v4977_v26  ;;  %v601_v26 = vpop.permute.xlu1 %600  }
 0x115   :  { %3305 = vst [vmem:[#allocation0 + $0x10b] sm:$0x1] %v3301_v30  ;;  %v4069_v33 = vld [vmem:[#allocation2 + $0xc58] sm:$0x1]  ;;  %v2431_v34 = vld [vmem:[#allocation2 + $0x3d0] sm:$0x1]  ;;  %1561 = vrot.lane.b32.xlu1 %v1560_v47, %s5242_s22 }
 0x116   :  { %v3199_v35 = vld [vmem:[#allocation2 + $0x7d0] sm:$0x1]  ;;  %496 = vst.msk [vmem:[#allocation2 + $0x238] sm:$0x1] %vm4_vm0, %v493_v31   ;;  %498 = vst.msk [vmem:[#allocation2 + $0x637] sm:$0x2] %vm4_vm0, %v493_v31  }
 0x117   :  { %500 = vst.msk [vmem:[#allocation2 + $0xa36] sm:$0x4] %vm4_vm0, %v493_v31   ;;  %4073 = vst [vmem:[#allocation0 + $0x18b] sm:$0x1] %v4069_v33  ;;  %v3967_v37 = vld [vmem:[#allocation2 + $0xbd0] sm:$0x1]  ;;  %v614_v33 = vpop.permute.xlu0 %613  }
 0x118   :  { %2435 = vst [vmem:[#allocation0 + $0x7a] sm:$0x1] %v2431_v34  ;;  %3203 = vst [vmem:[#allocation0 + $0xfa] sm:$0x1] %v3199_v35  ;;  %v2329_v43 = vld [vmem:[#allocation2 + $0x348] sm:$0x1] }
 0x119   :  { %507 = vst.msk [vmem:[#allocation2 + $0x1b0] sm:$0x1] %vm4_vm0, %v504_v36   ;;  %509 = vst.msk [vmem:[#allocation2 + $0x5af] sm:$0x2] %vm4_vm0, %v504_v36   ;;  %v3097_v44 = vld [vmem:[#allocation2 + $0x748] sm:$0x1] }
 0x11a   :  { %511 = vst.msk [vmem:[#allocation2 + $0x9ae] sm:$0x4] %vm4_vm0, %v504_v36   ;;  %513 = vst.msk [vmem:[#allocation2 + $0xdad] sm:$0x8] %vm4_vm0, %v504_v36   ;;  %v3865_v45 = vld [vmem:[#allocation2 + $0xb48] sm:$0x1] }
 0x11b   :  { %v4979_v38 = vld [vmem:[%s6230_s0 + $0x9] ss:$15 sm:$0x7]   ;;  %v4980_v39 = vld [vmem:[%s6230_s0 + $0xa] ss:$15 sm:$0x7]  }
 0x11c   :  { %3971 = vst [vmem:[#allocation0 + $0x17a] sm:$0x1] %v3967_v37  ;;  %v4981_v41 = vld [vmem:[%s6230_s0 + $0x7] ss:$15 sm:$0x7]   ;;  %v1582_v54 = vsel %vm1581_vm10, %v4980_v39, %v4979_v38  ;;  %v627_v37 = vpop.permute.xlu1 %626   ;;  %s5251_s22 = smov 31  }
 0x11d   :  { %v4982_v42 = vld [vmem:[%s6230_s0 + $0x8] ss:$15 sm:$0x7]   ;;  %2333 = vst [vmem:[#allocation0 + $0x69] sm:$0x1] %v2329_v43  ;;  %1583 = vrot.lane.b32.xlu0 %v1582_v54, %s5243_s27  ;;  %v640_v43 = vpop.permute.xlu0 %639   ;;  %vm1379_vm1 = vcmask 121968  }
 0x11e   :  { %3101 = vst [vmem:[#allocation0 + $0xe9] sm:$0x1] %v3097_v44  ;;  %3869 = vst [vmem:[#allocation0 + $0x169] sm:$0x1] %v3865_v45  ;;  %v2227_v48 = vld [vmem:[#allocation2 + $0x2c0] sm:$0x1]  ;;  %v1604_v61 = vsel %vm1603_vm11, %v4982_v42, %v4981_v41 }
 0x11f   :  { %v2995_v49 = vld [vmem:[#allocation2 + $0x6c0] sm:$0x1]  ;;  %520 = vst.msk [vmem:[#allocation2 + $0x128] sm:$0x1] %vm4_vm0, %v517_v46   ;;  %522 = vst.msk [vmem:[#allocation2 + $0x527] sm:$0x2] %vm4_vm0, %v517_v46   ;;  %1605 = vrot.lane.b32.xlu1 %v1604_v61, %s5244_s30 }
 0x120   :  { %v3763_v50 = vld [vmem:[#allocation2 + $0xac0] sm:$0x1]  ;;  %524 = vst.msk [vmem:[#allocation2 + $0x926] sm:$0x4] %vm4_vm0, %v517_v46   ;;  %526 = vst.msk [vmem:[#allocation2 + $0xd25] sm:$0x8] %vm4_vm0, %v517_v46   ;;  %v651_v47 = vpop.permute.xlu1 %650  }
 0x121   :  { %2231 = vst [vmem:[#allocation0 + $0x58] sm:$0x1] %v2227_v48  ;;  %2999 = vst [vmem:[#allocation0 + $0xd8] sm:$0x1] %v2995_v49  ;;  %v2125_v57 = vld [vmem:[#allocation2 + $0x238] sm:$0x1] }
 0x122   :  { %3767 = vst [vmem:[#allocation0 + $0x158] sm:$0x1] %v3763_v50  ;;  %533 = vst.msk [vmem:[#allocation2 + $0xa0] sm:$0x1] %vm4_vm0, %v530_v51   ;;  %v2893_v58 = vld [vmem:[#allocation2 + $0x638] sm:$0x1] }
 0x123   :  { %535 = vst.msk [vmem:[#allocation2 + $0x49f] sm:$0x2] %vm4_vm0, %v530_v51   ;;  %537 = vst.msk [vmem:[#allocation2 + $0x89e] sm:$0x4] %vm4_vm0, %v530_v51   ;;  %v3661_v59 = vld [vmem:[#allocation2 + $0xa38] sm:$0x1] }
 0x124   :  { %539 = vst.msk [vmem:[#allocation2 + $0xc9d] sm:$0x8] %vm4_vm0, %v530_v51   ;;  %v4983_v52 = vld [vmem:[%s6230_s0 + $0x5] ss:$15 sm:$0xf]   ;;  %vm1394_vm2 = vcmask 105472  }
 0x125   :  { %v4984_v53 = vld [vmem:[%s6230_s0 + $0x6] ss:$15 sm:$0xf]   ;;  %v4985_v55 = vld [vmem:[%s6230_s0 + $0x3] ss:$15 sm:$0xf]  }
 0x126   :  { %v4986_v56 = vld [vmem:[%s6230_s0 + $0x4] ss:$15 sm:$0xf]   ;;  %2129 = vst [vmem:[#allocation0 + $0x47] sm:$0x1] %v2125_v57  ;;  %v1626_v4 = vsel %vm1625_vm12, %v4984_v53, %v4983_v52  ;;  %vm1401_vm3 = vcmask 121960  }
 0x127   :  { %2897 = vst [vmem:[#allocation0 + $0xc7] sm:$0x1] %v2893_v58  ;;  %3665 = vst [vmem:[#allocation0 + $0x147] sm:$0x1] %v3661_v59  ;;  %v2023_v62 = vld [vmem:[#allocation2 + $0x1b0] sm:$0x1]  ;;  %v1652_v10 = vsel %vm1651_vm13, %v4986_v56, %v4985_v55  ;;  %1627 = vrot.lane.b32.xlu0 %v1626_v4, %s5245_s4  ;;  %v662_v55 = vpop.permute.xlu0 %661   ;;  %v673_v59 = vpop.permute.xlu1 %672  }
 0x128   :  { %v2791_v63 = vld [vmem:[#allocation2 + $0x5b0] sm:$0x1]  ;;  %545 = vst.msk [vmem:[#allocation2 + $0x18] sm:$0x1] %vm4_vm0, %v542_v60   ;;  %547 = vst.msk [vmem:[#allocation2 + $0x417] sm:$0x2] %vm4_vm0, %v542_v60   ;;  %1653 = vrot.lane.b32.xlu1 %v1652_v10, %s5246_s5 }
 0x129   :  { %v3559_v0 = vld [vmem:[#allocation2 + $0x9b0] sm:$0x1]  ;;  %549 = vst.msk [vmem:[#allocation2 + $0x816] sm:$0x4] %vm4_vm0, %v542_v60   ;;  %551 = vst.msk [vmem:[#allocation2 + $0xc15] sm:$0x8] %vm4_vm0, %v542_v60  }
 0x12a   :  { %2027 = vst [vmem:[#allocation0 + $0x36] sm:$0x1] %v2023_v62  ;;  %2795 = vst [vmem:[#allocation0 + $0xb6] sm:$0x1] %v2791_v63  ;;  %v4327_v2 = vld [vmem:[#allocation2 + $0xdb0] sm:$0x1] }
 0x12b   :  { %3563 = vst [vmem:[#allocation0 + $0x136] sm:$0x1] %v3559_v0  ;;  %558 = vst.msk [vmem:[#allocation2 + $0x390] sm:$0x1] %vm4_vm0, %v555_v1   ;;  %v1921_v6 = vld [vmem:[#allocation2 + $0x128] sm:$0x1] }
 0x12c   :  { %560 = vst.msk [vmem:[#allocation2 + $0x78f] sm:$0x2] %vm4_vm0, %v555_v1   ;;  %562 = vst.msk [vmem:[#allocation2 + $0xb8e] sm:$0x4] %vm4_vm0, %v555_v1   ;;  %v2689_v7 = vld [vmem:[#allocation2 + $0x528] sm:$0x1] }
 0x12d   :  { %v4987_v3 = vld [vmem:[%s6230_s0 + $0x1] ss:$15 sm:$0xf]   ;;  %4331 = vst [vmem:[#allocation0 + $0x1b6] sm:$0x1] %v4327_v2  ;;  %vm1416_vm4 = vcmask 97280  }
 0x12e   :  { %v4988_v5 = vld [vmem:[%s6230_s0 + $0x2] ss:$15 sm:$0xf]   ;;  %1925 = vst [vmem:[#allocation0 + $0x25] sm:$0x1] %v1921_v6  ;;  %vm1423_vm5 = vcmask 121952  }
 0x12f   :  { %v3457_v8 = vld [vmem:[#allocation2 + $0x928] sm:$0x1]  ;;  %2693 = vst [vmem:[#allocation0 + $0xa5] sm:$0x1] %v2689_v7  ;;  %v1819_v12 = vld [vmem:[#allocation2 + $0xa0] sm:$0x1]  ;;  %v1678_v17 = vsel %vm1677_vm14, %v4988_v5, %v4987_v3  ;;  %v684_v3 = vpop.permute.xlu0 %683   ;;  %v697_v7 = vpop.permute.xlu1 %696  }
 0x130   :  { %3461 = vst [vmem:[#allocation0 + $0x125] sm:$0x1] %v3457_v8  ;;  %v4225_v11 = vld [vmem:[#allocation2 + $0xd28] sm:$0x1]  ;;  %v2587_v13 = vld [vmem:[#allocation2 + $0x4a0] sm:$0x1]  ;;  %1679 = vrot.lane.b32.xlu0 %v1678_v17, %s5247_s8 }
 0x131   :  { %569 = vst.msk [vmem:[#allocation2 + $0x308] sm:$0x1] %vm4_vm0, %v566_v9   ;;  %571 = vst.msk [vmem:[#allocation2 + $0x707] sm:$0x2] %vm4_vm0, %v566_v9   ;;  %v3355_v15 = vld [vmem:[#allocation2 + $0x8a0] sm:$0x1] }
 0x132   :  { %573 = vst.msk [vmem:[#allocation2 + $0xb06] sm:$0x4] %vm4_vm0, %v566_v9   ;;  %4229 = vst [vmem:[#allocation0 + $0x1a5] sm:$0x1] %v4225_v11  ;;  %v4123_v16 = vld [vmem:[#allocation2 + $0xca0] sm:$0x1] }
 0x133   :  { %1823 = vst [vmem:[#allocation0 + $0x14] sm:$0x1] %v1819_v12  ;;  %2591 = vst [vmem:[#allocation0 + $0x94] sm:$0x1] %v2587_v13  ;;  %v1717_v19 = vld [vmem:[#allocation2 + $0x18] sm:$0x1]  ;;  %v710_v13 = vpop.permute.xlu0 %709   ;;  %v722_v17 = vpop.permute.xlu1 %721  }
 0x134   :  { %580 = vst.msk [vmem:[#allocation2 + $0x280] sm:$0x1] %vm4_vm0, %v577_v14   ;;  %582 = vst.msk [vmem:[#allocation2 + $0x67f] sm:$0x2] %vm4_vm0, %v577_v14   ;;  %v2485_v20 = vld [vmem:[#allocation2 + $0x418] sm:$0x1] }
 0x135   :  { %584 = vst.msk [vmem:[#allocation2 + $0xa7e] sm:$0x4] %vm4_vm0, %v577_v14   ;;  %3359 = vst [vmem:[#allocation0 + $0x114] sm:$0x1] %v3355_v15  ;;  %v3253_v21 = vld [vmem:[#allocation2 + $0x818] sm:$0x1] }
 0x136   :  { %4127 = vst [vmem:[#allocation0 + $0x194] sm:$0x1] %v4123_v16  ;;  %v4943_v18 = vld [vmem:[%s6230_s0 + $0x7] ss:$15 sm:$0x7]   ;;  %vm1438_vm6 = vcmask 89088  }
 0x137   :  { %1721 = vst [vmem:[#allocation0 + $0x3] sm:$0x1] %v1717_v19  ;;  %2489 = vst [vmem:[#allocation0 + $0x83] sm:$0x1] %v2485_v20  ;;  %v4021_v23 = vld [vmem:[#allocation2 + $0xc18] sm:$0x1]  ;;  %1127 = vrot.lane.b32.xlu1 %v4943_v18, %s5248_s11 }
 0x138   :  { %3257 = vst [vmem:[#allocation0 + $0x103] sm:$0x1] %v3253_v21  ;;  %v2383_v24 = vld [vmem:[#allocation2 + $0x390] sm:$0x1]  ;;  %591 = vst.msk [vmem:[#allocation2 + $0x1f8] sm:$0x1] %vm4_vm0, %v588_v22  }
 0x139   :  { %v3151_v25 = vld [vmem:[#allocation2 + $0x790] sm:$0x1]  ;;  %593 = vst.msk [vmem:[#allocation2 + $0x5f7] sm:$0x2] %vm4_vm0, %v588_v22   ;;  %595 = vst.msk [vmem:[#allocation2 + $0x9f6] sm:$0x4] %vm4_vm0, %v588_v22  }
 0x13a   :  { %597 = vst.msk [vmem:[#allocation2 + $0xdf5] sm:$0x8] %vm4_vm0, %v588_v22   ;;  %4025 = vst [vmem:[#allocation0 + $0x183] sm:$0x1] %v4021_v23  ;;  %v3919_v27 = vld [vmem:[#allocation2 + $0xb90] sm:$0x1]  ;;  %v735_v23 = vpop.permute.xlu0 %734  }
 0x13b   :  { %2387 = vst [vmem:[#allocation0 + $0x72] sm:$0x1] %v2383_v24  ;;  %3155 = vst [vmem:[#allocation0 + $0xf2] sm:$0x1] %v3151_v25  ;;  %v2281_v30 = vld [vmem:[#allocation2 + $0x308] sm:$0x1] }
 0x13c   :  { %604 = vst.msk [vmem:[#allocation2 + $0x170] sm:$0x1] %vm4_vm0, %v601_v26   ;;  %606 = vst.msk [vmem:[#allocation2 + $0x56f] sm:$0x2] %vm4_vm0, %v601_v26   ;;  %v3049_v31 = vld [vmem:[#allocation2 + $0x708] sm:$0x1] }
 0x13d   :  { %608 = vst.msk [vmem:[#allocation2 + $0x96e] sm:$0x4] %vm4_vm0, %v601_v26   ;;  %610 = vst.msk [vmem:[#allocation2 + $0xd6d] sm:$0x8] %vm4_vm0, %v601_v26   ;;  %v3817_v32 = vld [vmem:[#allocation2 + $0xb08] sm:$0x1] }
 0x13e   :  { %v4944_v28 = vld [vmem:[%s6230_s0 + $0x5] ss:$15 sm:$0xf]   ;;  %3923 = vst [vmem:[#allocation0 + $0x172] sm:$0x1] %v3919_v27  ;;  %v746_v27 = vpop.permute.xlu1 %745   ;;  %vm1447_vm7 = vcmask 121944  }
 0x13f   :  { %v4945_v29 = vld [vmem:[%s6230_s0 + $0x3] ss:$15 sm:$0xf]   ;;  %2285 = vst [vmem:[#allocation0 + $0x61] sm:$0x1] %v2281_v30  ;;  %1138 = vrot.lane.b32.xlu0 %v4944_v28, %s5249_s14  ;;  %vm1464_vm8 = vcmask 80896  }
 0x140   :  { %3053 = vst [vmem:[#allocation0 + $0xe1] sm:$0x1] %v3049_v31  ;;  %3821 = vst [vmem:[#allocation0 + $0x161] sm:$0x1] %v3817_v32  ;;  %v2179_v34 = vld [vmem:[#allocation2 + $0x280] sm:$0x1]  ;;  %1151 = vrot.lane.b32.xlu1 %v4945_v29, %s5250_s17 }
 0x141   :  { %v2947_v35 = vld [vmem:[#allocation2 + $0x680] sm:$0x1]  ;;  %617 = vst.msk [vmem:[#allocation2 + $0xe8] sm:$0x1] %vm4_vm0, %v614_v33   ;;  %619 = vst.msk [vmem:[#allocation2 + $0x4e7] sm:$0x2] %vm4_vm0, %v614_v33  }
 0x142   :  { %v3715_v36 = vld [vmem:[#allocation2 + $0xa80] sm:$0x1]  ;;  %621 = vst.msk [vmem:[#allocation2 + $0x8e6] sm:$0x4] %vm4_vm0, %v614_v33   ;;  %623 = vst.msk [vmem:[#allocation2 + $0xce5] sm:$0x8] %vm4_vm0, %v614_v33  }
 0x143   :  { %2183 = vst [vmem:[#allocation0 + $0x50] sm:$0x1] %v2179_v34  ;;  %2951 = vst [vmem:[#allocation0 + $0xd0] sm:$0x1] %v2947_v35  ;;  %v2077_v40 = vld [vmem:[#allocation2 + $0x1f8] sm:$0x1]  ;;  %v757_v35 = vpop.permute.xlu0 %756  }
 0x144   :  { %3719 = vst [vmem:[#allocation0 + $0x150] sm:$0x1] %v3715_v36  ;;  %630 = vst.msk [vmem:[#allocation2 + $0x60] sm:$0x1] %vm4_vm0, %v627_v37   ;;  %v2845_v41 = vld [vmem:[#allocation2 + $0x5f8] sm:$0x1] }
 0x145   :  { %632 = vst.msk [vmem:[#allocation2 + $0x45f] sm:$0x2] %vm4_vm0, %v627_v37   ;;  %634 = vst.msk [vmem:[#allocation2 + $0x85e] sm:$0x4] %vm4_vm0, %v627_v37   ;;  %v3613_v42 = vld [vmem:[#allocation2 + $0x9f8] sm:$0x1] }
 0x146   :  { %636 = vst.msk [vmem:[#allocation2 + $0xc5d] sm:$0x8] %vm4_vm0, %v627_v37   ;;  %v4946_v38 = vld [vmem:[%s6230_s0 + $0x1] ss:$15 sm:$0xf]   ;;  %s5259_s17 = smov 23  }
 0x147   :  { %v4947_v39 = vld [vmem:[%s6230_s0 + $0xe] ss:$15 sm:$0x7]   ;;  %2081 = vst [vmem:[#allocation0 + $0x3f] sm:$0x1] %v2077_v40  ;;  %1164 = vrot.lane.b32.xlu0 %v4946_v38, %s5251_s22  ;;  %vm1473_vm9 = vcmask 121936  }
 0x148   :  { %2849 = vst [vmem:[#allocation0 + $0xbf] sm:$0x1] %v2845_v41  ;;  %3617 = vst [vmem:[#allocation0 + $0x13f] sm:$0x1] %v3613_v42  ;;  %v4381_v44 = vld [vmem:[#allocation2 + $0xdf8] sm:$0x1]  ;;  %1177 = vrot.lane.b32.xlu1 %v4947_v39, %s5252_s23  ;;  %v768_v39 = vpop.permute.xlu1 %767  }
 0x149   :  { %v1975_v45 = vld [vmem:[#allocation2 + $0x170] sm:$0x1]  ;;  %643 = vst.msk [vmem:[#allocation2 + $0x3d8] sm:$0x1] %vm4_vm0, %v640_v43   ;;  %645 = vst.msk [vmem:[#allocation2 + $0x7d7] sm:$0x2] %vm4_vm0, %v640_v43  }
 0x14a   :  { %v2743_v46 = vld [vmem:[#allocation2 + $0x570] sm:$0x1]  ;;  %647 = vst.msk [vmem:[#allocation2 + $0xbd6] sm:$0x4] %vm4_vm0, %v640_v43   ;;  %4385 = vst [vmem:[#allocation0 + $0x1bf] sm:$0x1] %v4381_v44 }
 0x14b   :  { %v4948_v48 = vld [vmem:[%s6230_s0 + $0xc] ss:$15 sm:$0x7]   ;;  %1979 = vst [vmem:[#allocation0 + $0x2e] sm:$0x1] %v1975_v45  ;;  %s5261_s23 = smov 21  }
 0x14c   :  { %2747 = vst [vmem:[#allocation0 + $0xae] sm:$0x1] %v2743_v46  ;;  %v3511_v49 = vld [vmem:[#allocation2 + $0x970] sm:$0x1]  ;;  %654 = vst.msk [vmem:[#allocation2 + $0x350] sm:$0x1] %vm4_vm0, %v651_v47   ;;  %1188 = vrot.lane.b32.xlu0 %v4948_v48, %s5253_s28  ;;  %v781_v48 = vpop.permute.xlu0 %780  }
 0x14d   :  { %v4279_v50 = vld [vmem:[#allocation2 + $0xd70] sm:$0x1]  ;;  %656 = vst.msk [vmem:[#allocation2 + $0x74f] sm:$0x2] %vm4_vm0, %v651_v47   ;;  %658 = vst.msk [vmem:[#allocation2 + $0xb4e] sm:$0x4] %vm4_vm0, %v651_v47  }
 0x14e   :  { %3515 = vst [vmem:[#allocation0 + $0x12e] sm:$0x1] %v3511_v49  ;;  %4283 = vst [vmem:[#allocation0 + $0x1ae] sm:$0x1] %v4279_v50  ;;  %v1873_v52 = vld [vmem:[#allocation2 + $0xe8] sm:$0x1] }
 0x14f   :  { %v4949_v51 = vld [vmem:[%s6230_s0 + $0xa] ss:$15 sm:$0x7]   ;;  %v2641_v53 = vld [vmem:[#allocation2 + $0x4e8] sm:$0x1]  ;;  %vm1490_vm10 = vcmask 72704  }
 0x150   :  { %v3409_v54 = vld [vmem:[#allocation2 + $0x8e8] sm:$0x1]  ;;  %1877 = vst [vmem:[#allocation0 + $0x1d] sm:$0x1] %v1873_v52  ;;  %2645 = vst [vmem:[#allocation0 + $0x9d] sm:$0x1] %v2641_v53  ;;  %1199 = vrot.lane.b32.xlu1 %v4949_v51, %s5254_s29  ;;  %v794_v52 = vpop.permute.xlu1 %793  }
 0x151   :  { %3413 = vst [vmem:[#allocation0 + $0x11d] sm:$0x1] %v3409_v54  ;;  %v4177_v56 = vld [vmem:[#allocation2 + $0xce8] sm:$0x1]  ;;  %v1771_v57 = vld [vmem:[#allocation2 + $0x60] sm:$0x1] }
 0x152   :  { %v2539_v58 = vld [vmem:[#allocation2 + $0x460] sm:$0x1]  ;;  %665 = vst.msk [vmem:[#allocation2 + $0x2c8] sm:$0x1] %vm4_vm0, %v662_v55   ;;  %667 = vst.msk [vmem:[#allocation2 + $0x6c7] sm:$0x2] %vm4_vm0, %v662_v55  }
 0x153   :  { %669 = vst.msk [vmem:[#allocation2 + $0xac6] sm:$0x4] %vm4_vm0, %v662_v55   ;;  %v4950_v60 = vld [vmem:[%s6230_s0 + $0x8] ss:$15 sm:$0x7]   ;;  %s5263_s29 = smov 19  }
 0x154   :  { %4181 = vst [vmem:[#allocation0 + $0x19d] sm:$0x1] %v4177_v56  ;;  %1775 = vst [vmem:[#allocation0 + $0xc] sm:$0x1] %v1771_v57  ;;  %v3307_v61 = vld [vmem:[#allocation2 + $0x860] sm:$0x1]  ;;  %1210 = vrot.lane.b32.xlu0 %v4950_v60, %s5255_s3 }
 0x155   :  { %2543 = vst [vmem:[#allocation0 + $0x8c] sm:$0x1] %v2539_v58  ;;  %v4075_v62 = vld [vmem:[#allocation2 + $0xc60] sm:$0x1]  ;;  %676 = vst.msk [vmem:[#allocation2 + $0x240] sm:$0x1] %vm4_vm0, %v673_v59   ;;  %v807_v58 = vpop.permute.xlu0 %806  }
 0x156   :  { %678 = vst.msk [vmem:[#allocation2 + $0x63f] sm:$0x2] %vm4_vm0, %v673_v59   ;;  %680 = vst.msk [vmem:[#allocation2 + $0xa3e] sm:$0x4] %vm4_vm0, %v673_v59   ;;  %v2437_v0 = vld [vmem:[#allocation2 + $0x3d8] sm:$0x1] }
 0x157   :  { %3311 = vst [vmem:[#allocation0 + $0x10c] sm:$0x1] %v3307_v61  ;;  %4079 = vst [vmem:[#allocation0 + $0x18c] sm:$0x1] %v4075_v62  ;;  %v3205_v1 = vld [vmem:[#allocation2 + $0x7d8] sm:$0x1]  ;;  %v820_v62 = vpop.permute.xlu1 %819  }
 0x158   :  { %v4951_v63 = vld [vmem:[%s6230_s0 + $0x6] ss:$15 sm:$0xf]   ;;  %v3973_v2 = vld [vmem:[#allocation2 + $0xbd8] sm:$0x1]  ;;  %s5264_s3 = smov 18  }
 0x159   :  { %2441 = vst [vmem:[#allocation0 + $0x7b] sm:$0x1] %v2437_v0  ;;  %3209 = vst [vmem:[#allocation0 + $0xfb] sm:$0x1] %v3205_v1  ;;  %v2335_v4 = vld [vmem:[#allocation2 + $0x350] sm:$0x1]  ;;  %1221 = vrot.lane.b32.xlu1 %v4951_v63, %s5256_s6 }
 0x15a   :  { %3977 = vst [vmem:[#allocation0 + $0x17b] sm:$0x1] %v3973_v2  ;;  %v3103_v5 = vld [vmem:[#allocation2 + $0x750] sm:$0x1]  ;;  %687 = vst.msk [vmem:[#allocation2 + $0x1b8] sm:$0x1] %vm4_vm0, %v684_v3  }
 0x15b   :  { %v3871_v6 = vld [vmem:[#allocation2 + $0xb50] sm:$0x1]  ;;  %689 = vst.msk [vmem:[#allocation2 + $0x5b7] sm:$0x2] %vm4_vm0, %v684_v3   ;;  %691 = vst.msk [vmem:[#allocation2 + $0x9b6] sm:$0x4] %vm4_vm0, %v684_v3  }
 0x15c   :  { %693 = vst.msk [vmem:[#allocation2 + $0xdb5] sm:$0x8] %vm4_vm0, %v684_v3   ;;  %2339 = vst [vmem:[#allocation0 + $0x6a] sm:$0x1] %v2335_v4  ;;  %v2233_v10 = vld [vmem:[#allocation2 + $0x2c8] sm:$0x1] }
 0x15d   :  { %3107 = vst [vmem:[#allocation0 + $0xea] sm:$0x1] %v3103_v5  ;;  %3875 = vst [vmem:[#allocation0 + $0x16a] sm:$0x1] %v3871_v6  ;;  %v3001_v11 = vld [vmem:[#allocation2 + $0x6c8] sm:$0x1] }
 0x15e   :  { %700 = vst.msk [vmem:[#allocation2 + $0x130] sm:$0x1] %vm4_vm0, %v697_v7   ;;  %702 = vst.msk [vmem:[#allocation2 + $0x52f] sm:$0x2] %vm4_vm0, %v697_v7   ;;  %v3769_v12 = vld [vmem:[#allocation2 + $0xac8] sm:$0x1] }
 0x15f   :  { %704 = vst.msk [vmem:[#allocation2 + $0x92e] sm:$0x4] %vm4_vm0, %v697_v7   ;;  %706 = vst.msk [vmem:[#allocation2 + $0xd2d] sm:$0x8] %vm4_vm0, %v697_v7   ;;  %v2131_v14 = vld [vmem:[#allocation2 + $0x240] sm:$0x1]  ;;  %v831_v7 = vpop.permute.xlu0 %830  }
 0x160   :  { %v4952_v8 = vld [vmem:[%s6230_s0 + $0x4] ss:$15 sm:$0xf]   ;;  %2237 = vst [vmem:[#allocation0 + $0x59] sm:$0x1] %v2233_v10  ;;  %s5265_s6 = smov 17  }
 0x161   :  { %v4953_v9 = vld [vmem:[%s6230_s0 + $0x2] ss:$15 sm:$0xf]   ;;  %3005 = vst [vmem:[#allocation0 + $0xd9] sm:$0x1] %v3001_v11  ;;  %1234 = vrot.lane.b32.xlu0 %v4952_v8, %s5257_s9  ;;  %v842_v11 = vpop.permute.xlu1 %841   ;;  %s5267_s9 = smov 15  }
 0x162   :  { %3773 = vst [vmem:[#allocation0 + $0x159] sm:$0x1] %v3769_v12  ;;  %v2899_v15 = vld [vmem:[#allocation2 + $0x640] sm:$0x1]  ;;  %713 = vst.msk [vmem:[#allocation2 + $0xa8] sm:$0x1] %vm4_vm0, %v710_v13   ;;  %1247 = vrot.lane.b32.xlu1 %v4953_v9, %s5258_s12 }
 0x163   :  { %v3667_v16 = vld [vmem:[#allocation2 + $0xa40] sm:$0x1]  ;;  %715 = vst.msk [vmem:[#allocation2 + $0x4a7] sm:$0x2] %vm4_vm0, %v710_v13   ;;  %717 = vst.msk [vmem:[#allocation2 + $0x8a6] sm:$0x4] %vm4_vm0, %v710_v13  }
 0x164   :  { %719 = vst.msk [vmem:[#allocation2 + $0xca5] sm:$0x8] %vm4_vm0, %v710_v13   ;;  %2135 = vst [vmem:[#allocation0 + $0x48] sm:$0x1] %v2131_v14  ;;  %v2029_v20 = vld [vmem:[#allocation2 + $0x1b8] sm:$0x1] }
 0x165   :  { %2903 = vst [vmem:[#allocation0 + $0xc8] sm:$0x1] %v2899_v15  ;;  %3671 = vst [vmem:[#allocation0 + $0x148] sm:$0x1] %v3667_v16  ;;  %v2797_v21 = vld [vmem:[#allocation2 + $0x5b8] sm:$0x1] }
 0x166   :  { %725 = vst.msk [vmem:[#allocation2 + $0x20] sm:$0x1] %vm4_vm0, %v722_v17   ;;  %727 = vst.msk [vmem:[#allocation2 + $0x41f] sm:$0x2] %vm4_vm0, %v722_v17   ;;  %v3565_v22 = vld [vmem:[#allocation2 + $0x9b8] sm:$0x1] }
 0x167   :  { %729 = vst.msk [vmem:[#allocation2 + $0x81e] sm:$0x4] %vm4_vm0, %v722_v17   ;;  %731 = vst.msk [vmem:[#allocation2 + $0xc1d] sm:$0x8] %vm4_vm0, %v722_v17   ;;  %v4333_v24 = vld [vmem:[#allocation2 + $0xdb8] sm:$0x1] }
 0x168   :  { %v1258_v18 = vld [vmem:[%s6230_s0] ss:$15 sm:$0xf]   ;;  %2033 = vst [vmem:[#allocation0 + $0x37] sm:$0x1] %v2029_v20  ;;  %vm1499_vm11 = vcmask 121928  }
 0x169   :  { %v4954_v19 = vld [vmem:[%s6230_s0 + $0xd] ss:$15 sm:$0x7]   ;;  %2801 = vst [vmem:[#allocation0 + $0xb7] sm:$0x1] %v2797_v21  ;;  %1259 = vrot.lane.b32.xlu0 %v1258_v18, %s5259_s17  ;;  %v853_v18 = vpop.permute.xlu0 %852   ;;  %vm1515_vm12 = vcmask 64512  }
 0x16a   :  { %3569 = vst [vmem:[#allocation0 + $0x137] sm:$0x1] %v3565_v22  ;;  %v1927_v25 = vld [vmem:[#allocation2 + $0x130] sm:$0x1]  ;;  %738 = vst.msk [vmem:[#allocation2 + $0x398] sm:$0x1] %vm4_vm0, %v735_v23   ;;  %1272 = vrot.lane.b32.xlu1 %v4954_v19, %s5260_s18  ;;  %v864_v22 = vpop.permute.xlu1 %863  }
 0x16b   :  { %v2695_v26 = vld [vmem:[#allocation2 + $0x530] sm:$0x1]  ;;  %740 = vst.msk [vmem:[#allocation2 + $0x797] sm:$0x2] %vm4_vm0, %v735_v23   ;;  %742 = vst.msk [vmem:[#allocation2 + $0xb96] sm:$0x4] %vm4_vm0, %v735_v23  }
 0x16c   :  { %v4955_v28 = vld [vmem:[%s6230_s0 + $0xb] ss:$15 sm:$0x7]   ;;  %4337 = vst [vmem:[#allocation0 + $0x1b7] sm:$0x1] %v4333_v24  ;;  %vm1524_vm13 = vcmask 121920  }
 0x16d   :  { %1931 = vst [vmem:[#allocation0 + $0x26] sm:$0x1] %v1927_v25  ;;  %2699 = vst [vmem:[#allocation0 + $0xa6] sm:$0x1] %v2695_v26  ;;  %v3463_v29 = vld [vmem:[#allocation2 + $0x930] sm:$0x1]  ;;  %1283 = vrot.lane.b32.xlu0 %v4955_v28, %s5261_s23 }
 0x16e   :  { %v4231_v30 = vld [vmem:[#allocation2 + $0xd30] sm:$0x1]  ;;  %749 = vst.msk [vmem:[#allocation2 + $0x310] sm:$0x1] %vm4_vm0, %v746_v27   ;;  %751 = vst.msk [vmem:[#allocation2 + $0x70f] sm:$0x2] %vm4_vm0, %v746_v27  }
 0x16f   :  { %753 = vst.msk [vmem:[#allocation2 + $0xb0e] sm:$0x4] %vm4_vm0, %v746_v27   ;;  %3467 = vst [vmem:[#allocation0 + $0x126] sm:$0x1] %v3463_v29  ;;  %v1825_v32 = vld [vmem:[#allocation2 + $0xa8] sm:$0x1]  ;;  %v877_v27 = vpop.permute.xlu0 %876  }
 0x170   :  { %4235 = vst [vmem:[#allocation0 + $0x1a6] sm:$0x1] %v4231_v30  ;;  %v4956_v31 = vld [vmem:[%s6230_s0 + $0x9] ss:$15 sm:$0x7]   ;;  %vm1541_vm14 = vcmask 56320  }
 0x171   :  { %v2593_v33 = vld [vmem:[#allocation2 + $0x4a8] sm:$0x1]  ;;  %1829 = vst [vmem:[#allocation0 + $0x15] sm:$0x1] %v1825_v32  ;;  %v1723_v37 = vld [vmem:[#allocation2 + $0x20] sm:$0x1]  ;;  %1294 = vrot.lane.b32.xlu1 %v4956_v31, %s5262_s26  ;;  %v890_v31 = vpop.permute.xlu1 %889  }
 0x172   :  { %v3361_v34 = vld [vmem:[#allocation2 + $0x8a8] sm:$0x1]  ;;  %2597 = vst [vmem:[#allocation0 + $0x95] sm:$0x1] %v2593_v33  ;;  %v2491_v38 = vld [vmem:[#allocation2 + $0x420] sm:$0x1] }
 0x173   :  { %3365 = vst [vmem:[#allocation0 + $0x115] sm:$0x1] %v3361_v34  ;;  %v4129_v36 = vld [vmem:[#allocation2 + $0xca8] sm:$0x1]  ;;  %760 = vst.msk [vmem:[#allocation2 + $0x288] sm:$0x1] %vm4_vm0, %v757_v35  }
 0x174   :  { %762 = vst.msk [vmem:[#allocation2 + $0x687] sm:$0x2] %vm4_vm0, %v757_v35   ;;  %764 = vst.msk [vmem:[#allocation2 + $0xa86] sm:$0x4] %vm4_vm0, %v757_v35   ;;  %v3259_v41 = vld [vmem:[#allocation2 + $0x820] sm:$0x1]  ;;  %v902_v35 = vpop.permute.xlu0 %901  }
 0x175   :  { %v4957_v40 = vld [vmem:[%s6230_s0 + $0x7] ss:$15 sm:$0x7]   ;;  %4133 = vst [vmem:[#allocation0 + $0x195] sm:$0x1] %v4129_v36  ;;  %s5268_s10 = smov [#allocation0]  }
 0x176   :  { %1727 = vst [vmem:[#allocation0 + $0x4] sm:$0x1] %v1723_v37  ;;  %2495 = vst [vmem:[#allocation0 + $0x84] sm:$0x1] %v2491_v38  ;;  %v4027_v42 = vld [vmem:[#allocation2 + $0xc20] sm:$0x1]  ;;  %1305 = vrot.lane.b32.xlu0 %v4957_v40, %s5263_s29 }
 0x177   :  { %771 = vst.msk [vmem:[#allocation2 + $0x200] sm:$0x1] %vm4_vm0, %v768_v39   ;;  %773 = vst.msk [vmem:[#allocation2 + $0x5ff] sm:$0x2] %vm4_vm0, %v768_v39   ;;  %v2389_v45 = vld [vmem:[#allocation2 + $0x398] sm:$0x1] }
 0x178   :  { %775 = vst.msk [vmem:[#allocation2 + $0x9fe] sm:$0x4] %vm4_vm0, %v768_v39   ;;  %777 = vst.msk [vmem:[#allocation2 + $0xdfd] sm:$0x8] %vm4_vm0, %v768_v39   ;;  %v3157_v46 = vld [vmem:[#allocation2 + $0x798] sm:$0x1]  ;;  %v915_v39 = vpop.permute.xlu1 %914  }
 0x179   :  { %v4958_v43 = vld [vmem:[%s6230_s0 + $0x5] ss:$15 sm:$0xf]   ;;  %3263 = vst [vmem:[#allocation0 + $0x104] sm:$0x1] %v3259_v41  ;;  %s4402_s11 = sshll.u32 %s5268_s10, 4  ;;  %s4403_s11 = int_to_ptr.vmem [resolvable:$true] %s4402_s11 }
 0x17a   :  { %4031 = vst [vmem:[#allocation0 + $0x184] sm:$0x1] %v4027_v42  ;;  %v3_v44 = vld [vmem:[%s6230_s0] ss:$15 sm:$0xf]   ;;  %1316 = vrot.lane.b32.xlu1 %v4958_v43, %s5264_s3  ;;  %s5117_s12 = scalar_lea.vmem %s4403_s11, 7200  ;;  %p5122_p1 = scmp.lt.s32.totalorder %s4403_s11, %s4403_s11 }
 0x17b   :  { %v3925_v47 = vld [vmem:[#allocation2 + $0xb98] sm:$0x1]  ;;  %5 = vst.msk [vmem:[#allocation2] sm:$0x1] %vm4_vm0, %v3_v44   ;;  %7 = vst.msk [vmem:[#allocation2 + $0x3ff] sm:$0x2] %vm4_vm0, %v3_v44   ;;  %p5118_p0 = scmp.ne.s32.totalorder %s4403_s11, %s5117_s12  ;;  %p5123_p2 = scmp.lt.s32.totalorder %s5117_s12, %s5117_s12 }
 0x17c   :  { %9 = vst.msk [vmem:[#allocation2 + $0x7fe] sm:$0x4] %vm4_vm0, %v3_v44   ;;  %11 = vst.msk [vmem:[#allocation2 + $0xbfd] sm:$0x8] %vm4_vm0, %v3_v44   ;;  %v2287_v49 = vld [vmem:[#allocation2 + $0x310] sm:$0x1]  ;;  %v926_v44 = vpop.permute.xlu0 %925  }
 0x17d   :  { %2393 = vst [vmem:[#allocation0 + $0x73] sm:$0x1] %v2389_v45  ;;  %3161 = vst [vmem:[#allocation0 + $0xf3] sm:$0x1] %v3157_v46  ;;  %v3055_v50 = vld [vmem:[#allocation2 + $0x710] sm:$0x1]  ;;  %p5124_p3 = por %p5123_p2, %p5122_p1 }
 0x17e   :  { %3929 = vst [vmem:[#allocation0 + $0x173] sm:$0x1] %v3925_v47  ;;  %v3823_v51 = vld [vmem:[#allocation2 + $0xb10] sm:$0x1]  ;;  %784 = vst.msk [vmem:[#allocation2 + $0x178] sm:$0x1] %vm4_vm0, %v781_v48  }
 0x17f   :  { %786 = vst.msk [vmem:[#allocation2 + $0x577] sm:$0x2] %vm4_vm0, %v781_v48   ;;  %788 = vst.msk [vmem:[#allocation2 + $0x976] sm:$0x4] %vm4_vm0, %v781_v48   ;;  %v2185_v55 = vld [vmem:[#allocation2 + $0x288] sm:$0x1]  ;;  %p5125_p4 = pnand %p5124_p3, %p5118_p0 }
 0x180   :  { %790 = vst.msk [vmem:[#allocation2 + $0xd75] sm:$0x8] %vm4_vm0, %v781_v48   ;;  %2291 = vst [vmem:[#allocation0 + $0x62] sm:$0x1] %v2287_v49  ;;  %v2953_v56 = vld [vmem:[#allocation2 + $0x688] sm:$0x1]  ;;  %v937_v48 = vpop.permute.xlu1 %936  }
 0x181   :  { %3059 = vst [vmem:[#allocation0 + $0xe2] sm:$0x1] %v3055_v50  ;;  %3827 = vst [vmem:[#allocation0 + $0x162] sm:$0x1] %v3823_v51  ;;  %v3721_v57 = vld [vmem:[#allocation2 + $0xa88] sm:$0x1] }
 0x182   :  { %797 = vst.msk [vmem:[#allocation2 + $0xf0] sm:$0x1] %vm4_vm0, %v794_v52   ;;  %799 = vst.msk [vmem:[#allocation2 + $0x4ef] sm:$0x2] %vm4_vm0, %v794_v52   ;;  %v2083_v59 = vld [vmem:[#allocation2 + $0x200] sm:$0x1] }
 0x183   :  { %801 = vst.msk [vmem:[#allocation2 + $0x8ee] sm:$0x4] %vm4_vm0, %v794_v52   ;;  %803 = vst.msk [vmem:[#allocation2 + $0xced] sm:$0x8] %vm4_vm0, %v794_v52   ;;  %v2851_v60 = vld [vmem:[#allocation2 + $0x600] sm:$0x1] }
 0x184   :  { %v4959_v53 = vld [vmem:[%s6230_s0 + $0x3] ss:$15 sm:$0xf]   ;;  %2189 = vst [vmem:[#allocation0 + $0x51] sm:$0x1] %v2185_v55 }
 0x185   :  { %v4960_v54 = vld [vmem:[%s6230_s0 + $0x1] ss:$15 sm:$0xf]   ;;  %2957 = vst [vmem:[#allocation0 + $0xd1] sm:$0x1] %v2953_v56  ;;  %1329 = vrot.lane.b32.xlu0 %v4959_v53, %s5265_s6 }
 0x186   :  { %3725 = vst [vmem:[#allocation0 + $0x151] sm:$0x1] %v3721_v57  ;;  %v3619_v61 = vld [vmem:[#allocation2 + $0xa00] sm:$0x1]  ;;  %810 = vst.msk [vmem:[#allocation2 + $0x68] sm:$0x1] %vm4_vm0, %v807_v58  }
 0x187   :  { %812 = vst.msk [vmem:[#allocation2 + $0x467] sm:$0x2] %vm4_vm0, %v807_v58   ;;  %814 = vst.msk [vmem:[#allocation2 + $0x866] sm:$0x4] %vm4_vm0, %v807_v58   ;;  %v4387_v63 = vld [vmem:[#allocation2 + $0xe00] sm:$0x1] }
 0x188   :  { %816 = vst.msk [vmem:[#allocation2 + $0xc65] sm:$0x8] %vm4_vm0, %v807_v58   ;;  %2087 = vst [vmem:[#allocation0 + $0x40] sm:$0x1] %v2083_v59  ;;  %v1702_v1 = vld [vmem:[#allocation2] sm:$0x1]  ;;  %v961_v58 = vpop.permute.xlu1 %960  }
 0x189   :  { %2855 = vst [vmem:[#allocation0 + $0xc0] sm:$0x1] %v2851_v60  ;;  %3623 = vst [vmem:[#allocation0 + $0x140] sm:$0x1] %v3619_v61  ;;  %v2467_v2 = vld [vmem:[#allocation2 + $0x400] sm:$0x1] }
 0x18a   :  { %823 = vst.msk [vmem:[#allocation2 + $0x3e0] sm:$0x1] %vm4_vm0, %v820_v62   ;;  %825 = vst.msk [vmem:[#allocation2 + $0x7df] sm:$0x2] %vm4_vm0, %v820_v62   ;;  %v3235_v3 = vld [vmem:[#allocation2 + $0x800] sm:$0x1] }
 0x18b   :  { %827 = vst.msk [vmem:[#allocation2 + $0xbde] sm:$0x4] %vm4_vm0, %v820_v62   ;;  %v4961_v0 = vld [vmem:[%s6230_s0 + $0xe] ss:$15 sm:$0x7]   ;;  %s5266_s0 = smov 16  }
 0x18c   :  { %4391 = vst [vmem:[#allocation0 + $0x1c0] sm:$0x1] %v4387_v63  ;;  %1342 = vrot.lane.b32.xlu1 %v4960_v54, %s5266_s0  ;;  %v1981_v4 = vld [vmem:[#allocation2 + $0x178] sm:$0x1]  ;;  %1704 = vst [vmem:[#allocation0] sm:$0x1] %v1702_v1  ;;  %1355 = vrot.lane.b32.xlu0 %v4961_v0, %s5267_s9  ;;  %v948_v54 = vpop.permute.xlu0 %947  }
 0x18d   :  { %v2749_v5 = vld [vmem:[#allocation2 + $0x578] sm:$0x1]  ;;  %2471 = vst [vmem:[#allocation0 + $0x80] sm:$0x1] %v2467_v2  ;;  %3239 = vst [vmem:[#allocation0 + $0x100] sm:$0x1] %v3235_v3  ;;  %v987_v3 = vpop.permute.xlu1 %986  }
 0x18e   :  { %v3517_v6 = vld [vmem:[#allocation2 + $0x978] sm:$0x1]  ;;  %1985 = vst [vmem:[#allocation0 + $0x2f] sm:$0x1] %v1981_v4  ;;  %2753 = vst [vmem:[#allocation0 + $0xaf] sm:$0x1] %v2749_v5 }
 0x18f   :  { %3521 = vst [vmem:[#allocation0 + $0x12f] sm:$0x1] %v3517_v6  ;;  %v4285_v8 = vld [vmem:[#allocation2 + $0xd78] sm:$0x1]  ;;  %v1879_v9 = vld [vmem:[#allocation2 + $0xf0] sm:$0x1] }
 0x190   :  { %v2647_v10 = vld [vmem:[#allocation2 + $0x4f0] sm:$0x1]  ;;  %834 = vst.msk [vmem:[#allocation2 + $0x358] sm:$0x1] %vm4_vm0, %v831_v7   ;;  %836 = vst.msk [vmem:[#allocation2 + $0x757] sm:$0x2] %vm4_vm0, %v831_v7   ;;  %v974_v63 = vpop.permute.xlu0 %973  }
 0x191   :  { %838 = vst.msk [vmem:[#allocation2 + $0xb56] sm:$0x4] %vm4_vm0, %v831_v7   ;;  %4289 = vst [vmem:[#allocation0 + $0x1af] sm:$0x1] %v4285_v8  ;;  %v3415_v12 = vld [vmem:[#allocation2 + $0x8f0] sm:$0x1] }
 0x192   :  { %1883 = vst [vmem:[#allocation0 + $0x1e] sm:$0x1] %v1879_v9  ;;  %2651 = vst [vmem:[#allocation0 + $0x9e] sm:$0x1] %v2647_v10  ;;  %v4183_v13 = vld [vmem:[#allocation2 + $0xcf0] sm:$0x1] }
 0x193   :  { %845 = vst.msk [vmem:[#allocation2 + $0x2d0] sm:$0x1] %vm4_vm0, %v842_v11   ;;  %847 = vst.msk [vmem:[#allocation2 + $0x6cf] sm:$0x2] %vm4_vm0, %v842_v11   ;;  %v4003_v14 = vld [vmem:[#allocation2 + $0xc00] sm:$0x1] }
 0x194   :  { %849 = vst.msk [vmem:[#allocation2 + $0xace] sm:$0x4] %vm4_vm0, %v842_v11   ;;  %3419 = vst [vmem:[#allocation0 + $0x11e] sm:$0x1] %v3415_v12  ;;  %v1777_v15 = vld [vmem:[#allocation2 + $0x68] sm:$0x1]  ;;  %v1000_v7 = vpop.permute.xlu0 %999   ;;  %v1011_v11 = vpop.permute.xlu1 %1010  }
 0x195   :  { %4187 = vst [vmem:[#allocation0 + $0x19e] sm:$0x1] %v4183_v13  ;;  %4007 = vst [vmem:[#allocation0 + $0x180] sm:$0x1] %v4003_v14  ;;  %v2545_v16 = vld [vmem:[#allocation2 + $0x468] sm:$0x1] }
 0x196   :  { %v3313_v17 = vld [vmem:[#allocation2 + $0x868] sm:$0x1]  ;;  %1781 = vst [vmem:[#allocation0 + $0xd] sm:$0x1] %v1777_v15  ;;  %2549 = vst [vmem:[#allocation0 + $0x8d] sm:$0x1] %v2545_v16 }
 0x197   :  { %3317 = vst [vmem:[#allocation0 + $0x10d] sm:$0x1] %v3313_v17  ;;  %v4081_v19 = vld [vmem:[#allocation2 + $0xc68] sm:$0x1]  ;;  %v2443_v20 = vld [vmem:[#allocation2 + $0x3e0] sm:$0x1] }
 0x198   :  { %v3211_v21 = vld [vmem:[#allocation2 + $0x7e0] sm:$0x1]  ;;  %856 = vst.msk [vmem:[#allocation2 + $0x248] sm:$0x1] %vm4_vm0, %v853_v18   ;;  %858 = vst.msk [vmem:[#allocation2 + $0x647] sm:$0x2] %vm4_vm0, %v853_v18   ;;  %v1022_v17 = vpop.permute.xlu0 %1021  }
 0x199   :  { %860 = vst.msk [vmem:[#allocation2 + $0xa46] sm:$0x4] %vm4_vm0, %v853_v18   ;;  %4085 = vst [vmem:[#allocation0 + $0x18d] sm:$0x1] %v4081_v19  ;;  %v3979_v23 = vld [vmem:[#allocation2 + $0xbe0] sm:$0x1] }
 0x19a   :  { %2447 = vst [vmem:[#allocation0 + $0x7c] sm:$0x1] %v2443_v20  ;;  %3215 = vst [vmem:[#allocation0 + $0xfc] sm:$0x1] %v3211_v21  ;;  %v2341_v24 = vld [vmem:[#allocation2 + $0x358] sm:$0x1]  ;;  %v1033_v21 = vpop.permute.xlu1 %1032  }
 0x19b   :  { %867 = vst.msk [vmem:[#allocation2 + $0x1c0] sm:$0x1] %vm4_vm0, %v864_v22   ;;  %869 = vst.msk [vmem:[#allocation2 + $0x5bf] sm:$0x2] %vm4_vm0, %v864_v22   ;;  %v3109_v25 = vld [vmem:[#allocation2 + $0x758] sm:$0x1] }
 0x19c   :  { %871 = vst.msk [vmem:[#allocation2 + $0x9be] sm:$0x4] %vm4_vm0, %v864_v22   ;;  %873 = vst.msk [vmem:[#allocation2 + $0xdbd] sm:$0x8] %vm4_vm0, %v864_v22   ;;  %v3877_v26 = vld [vmem:[#allocation2 + $0xb58] sm:$0x1] }
 0x19d   :  { %3983 = vst [vmem:[#allocation0 + $0x17c] sm:$0x1] %v3979_v23  ;;  %2345 = vst [vmem:[#allocation0 + $0x6b] sm:$0x1] %v2341_v24  ;;  %v2239_v28 = vld [vmem:[#allocation2 + $0x2d0] sm:$0x1] }
 0x19e   :  { %3113 = vst [vmem:[#allocation0 + $0xeb] sm:$0x1] %v3109_v25  ;;  %3881 = vst [vmem:[#allocation0 + $0x16b] sm:$0x1] %v3877_v26  ;;  %v3007_v29 = vld [vmem:[#allocation2 + $0x6d0] sm:$0x1] }
 0x19f   :  { %v3775_v30 = vld [vmem:[#allocation2 + $0xad0] sm:$0x1]  ;;  %880 = vst.msk [vmem:[#allocation2 + $0x138] sm:$0x1] %vm4_vm0, %v877_v27   ;;  %882 = vst.msk [vmem:[#allocation2 + $0x537] sm:$0x2] %vm4_vm0, %v877_v27  }
 0x1a0   :  { %884 = vst.msk [vmem:[#allocation2 + $0x936] sm:$0x4] %vm4_vm0, %v877_v27   ;;  %886 = vst.msk [vmem:[#allocation2 + $0xd35] sm:$0x8] %vm4_vm0, %v877_v27   ;;  %v2137_v32 = vld [vmem:[#allocation2 + $0x248] sm:$0x1]  ;;  %v1044_v27 = vpop.permute.xlu0 %1043  }
 0x1a1   :  { %2243 = vst [vmem:[#allocation0 + $0x5a] sm:$0x1] %v2239_v28  ;;  %3011 = vst [vmem:[#allocation0 + $0xda] sm:$0x1] %v3007_v29  ;;  %v2905_v33 = vld [vmem:[#allocation2 + $0x648] sm:$0x1] }
 0x1a2   :  { %3779 = vst [vmem:[#allocation0 + $0x15a] sm:$0x1] %v3775_v30  ;;  %893 = vst.msk [vmem:[#allocation2 + $0xb0] sm:$0x1] %vm4_vm0, %v890_v31   ;;  %v3673_v34 = vld [vmem:[#allocation2 + $0xa48] sm:$0x1] }
 0x1a3   :  { %895 = vst.msk [vmem:[#allocation2 + $0x4af] sm:$0x2] %vm4_vm0, %v890_v31   ;;  %897 = vst.msk [vmem:[#allocation2 + $0x8ae] sm:$0x4] %vm4_vm0, %v890_v31   ;;  %v2035_v36 = vld [vmem:[#allocation2 + $0x1c0] sm:$0x1] }
 0x1a4   :  { %899 = vst.msk [vmem:[#allocation2 + $0xcad] sm:$0x8] %vm4_vm0, %v890_v31   ;;  %2141 = vst [vmem:[#allocation0 + $0x49] sm:$0x1] %v2137_v32  ;;  %v2803_v37 = vld [vmem:[#allocation2 + $0x5c0] sm:$0x1]  ;;  %v1057_v31 = vpop.permute.xlu1 %1056  }
 0x1a5   :  { %2909 = vst [vmem:[#allocation0 + $0xc9] sm:$0x1] %v2905_v33  ;;  %3677 = vst [vmem:[#allocation0 + $0x149] sm:$0x1] %v3673_v34  ;;  %v3571_v38 = vld [vmem:[#allocation2 + $0x9c0] sm:$0x1] }
 0x1a6   :  { %905 = vst.msk [vmem:[#allocation2 + $0x28] sm:$0x1] %vm4_vm0, %v902_v35   ;;  %907 = vst.msk [vmem:[#allocation2 + $0x427] sm:$0x2] %vm4_vm0, %v902_v35   ;;  %v4339_v40 = vld [vmem:[#allocation2 + $0xdc0] sm:$0x1] }
 0x1a7   :  { %909 = vst.msk [vmem:[#allocation2 + $0x826] sm:$0x4] %vm4_vm0, %v902_v35   ;;  %911 = vst.msk [vmem:[#allocation2 + $0xc25] sm:$0x8] %vm4_vm0, %v902_v35   ;;  %v1933_v41 = vld [vmem:[#allocation2 + $0x138] sm:$0x1]  ;;  %v1070_v35 = vpop.permute.xlu0 %1069  }
 0x1a8   :  { %2039 = vst [vmem:[#allocation0 + $0x38] sm:$0x1] %v2035_v36  ;;  %2807 = vst [vmem:[#allocation0 + $0xb8] sm:$0x1] %v2803_v37  ;;  %v2701_v42 = vld [vmem:[#allocation2 + $0x538] sm:$0x1] }
 0x1a9   :  { %3575 = vst [vmem:[#allocation0 + $0x138] sm:$0x1] %v3571_v38  ;;  %918 = vst.msk [vmem:[#allocation2 + $0x3a0] sm:$0x1] %vm4_vm0, %v915_v39   ;;  %v3469_v43 = vld [vmem:[#allocation2 + $0x938] sm:$0x1] }
 0x1aa   :  { %920 = vst.msk [vmem:[#allocation2 + $0x79f] sm:$0x2] %vm4_vm0, %v915_v39   ;;  %922 = vst.msk [vmem:[#allocation2 + $0xb9e] sm:$0x4] %vm4_vm0, %v915_v39   ;;  %v4237_v45 = vld [vmem:[#allocation2 + $0xd38] sm:$0x1]  ;;  %v1082_v39 = vpop.permute.xlu1 %1081  }
 0x1ab   :  { %4343 = vst [vmem:[#allocation0 + $0x1b8] sm:$0x1] %v4339_v40  ;;  %1937 = vst [vmem:[#allocation0 + $0x27] sm:$0x1] %v1933_v41  ;;  %v1831_v46 = vld [vmem:[#allocation2 + $0xb0] sm:$0x1] }
 0x1ac   :  { %2705 = vst [vmem:[#allocation0 + $0xa7] sm:$0x1] %v2701_v42  ;;  %3473 = vst [vmem:[#allocation0 + $0x127] sm:$0x1] %v3469_v43  ;;  %v2599_v47 = vld [vmem:[#allocation2 + $0x4b0] sm:$0x1]  ;;  %v1095_v43 = vpop.permute.xlu0 %1094  }
 0x1ad   :  { %929 = vst.msk [vmem:[#allocation2 + $0x318] sm:$0x1] %vm4_vm0, %v926_v44   ;;  %931 = vst.msk [vmem:[#allocation2 + $0x717] sm:$0x2] %vm4_vm0, %v926_v44   ;;  %v3367_v49 = vld [vmem:[#allocation2 + $0x8b0] sm:$0x1] }
 0x1ae   :  { %933 = vst.msk [vmem:[#allocation2 + $0xb16] sm:$0x4] %vm4_vm0, %v926_v44   ;;  %4241 = vst [vmem:[#allocation0 + $0x1a7] sm:$0x1] %v4237_v45  ;;  %v4135_v50 = vld [vmem:[#allocation2 + $0xcb0] sm:$0x1] }
 0x1af   :  { %1835 = vst [vmem:[#allocation0 + $0x16] sm:$0x1] %v1831_v46  ;;  %2603 = vst [vmem:[#allocation0 + $0x96] sm:$0x1] %v2599_v47  ;;  %v1729_v51 = vld [vmem:[#allocation2 + $0x28] sm:$0x1]  ;;  %v1106_v47 = vpop.permute.xlu1 %1105  }
 0x1b0   :  { %940 = vst.msk [vmem:[#allocation2 + $0x290] sm:$0x1] %vm4_vm0, %v937_v48   ;;  %942 = vst.msk [vmem:[#allocation2 + $0x68f] sm:$0x2] %vm4_vm0, %v937_v48   ;;  %v2497_v52 = vld [vmem:[#allocation2 + $0x428] sm:$0x1] }
 0x1b1   :  { %944 = vst.msk [vmem:[#allocation2 + $0xa8e] sm:$0x4] %vm4_vm0, %v937_v48   ;;  %3371 = vst [vmem:[#allocation0 + $0x116] sm:$0x1] %v3367_v49  ;;  %v3265_v53 = vld [vmem:[#allocation2 + $0x828] sm:$0x1] }
 0x1b2   :  { %4139 = vst [vmem:[#allocation0 + $0x196] sm:$0x1] %v4135_v50  ;;  %1733 = vst [vmem:[#allocation0 + $0x5] sm:$0x1] %v1729_v51  ;;  %v4033_v55 = vld [vmem:[#allocation2 + $0xc28] sm:$0x1] }
 0x1b3   :  { %2501 = vst [vmem:[#allocation0 + $0x85] sm:$0x1] %v2497_v52  ;;  %3269 = vst [vmem:[#allocation0 + $0x105] sm:$0x1] %v3265_v53  ;;  %v2395_v56 = vld [vmem:[#allocation2 + $0x3a0] sm:$0x1]  ;;  %v1117_v53 = vpop.permute.xlu0 %1116  }
 0x1b4   :  { %v3163_v57 = vld [vmem:[#allocation2 + $0x7a0] sm:$0x1]  ;;  %951 = vst.msk [vmem:[#allocation2 + $0x208] sm:$0x1] %vm4_vm0, %v948_v54   ;;  %953 = vst.msk [vmem:[#allocation2 + $0x607] sm:$0x2] %vm4_vm0, %v948_v54  }
 0x1b5   :  { %955 = vst.msk [vmem:[#allocation2 + $0xa06] sm:$0x4] %vm4_vm0, %v948_v54   ;;  %957 = vst.msk [vmem:[#allocation2 + $0xe05] sm:$0x8] %vm4_vm0, %v948_v54   ;;  %v3931_v59 = vld [vmem:[#allocation2 + $0xba0] sm:$0x1] }
 0x1b6   :  { %4037 = vst [vmem:[#allocation0 + $0x185] sm:$0x1] %v4033_v55  ;;  %2399 = vst [vmem:[#allocation0 + $0x74] sm:$0x1] %v2395_v56  ;;  %v2293_v60 = vld [vmem:[#allocation2 + $0x318] sm:$0x1] }
 0x1b7   :  { %3167 = vst [vmem:[#allocation0 + $0xf4] sm:$0x1] %v3163_v57  ;;  %964 = vst.msk [vmem:[#allocation2 + $0x180] sm:$0x1] %vm4_vm0, %v961_v58   ;;  %v3061_v61 = vld [vmem:[#allocation2 + $0x718] sm:$0x1]  ;;  %v1371_v57 = vpop.permute.xlu1 %1370  }
 0x1b8   :  { %966 = vst.msk [vmem:[#allocation2 + $0x57f] sm:$0x2] %vm4_vm0, %v961_v58   ;;  %968 = vst.msk [vmem:[#allocation2 + $0x97e] sm:$0x4] %vm4_vm0, %v961_v58   ;;  %v3829_v62 = vld [vmem:[#allocation2 + $0xb18] sm:$0x1] }
 0x1b9   :  { %970 = vst.msk [vmem:[#allocation2 + $0xd7d] sm:$0x8] %vm4_vm0, %v961_v58   ;;  %3935 = vst [vmem:[#allocation0 + $0x174] sm:$0x1] %v3931_v59  ;;  %v2191_v0 = vld [vmem:[#allocation2 + $0x290] sm:$0x1] }
 0x1ba   :  { %2297 = vst [vmem:[#allocation0 + $0x63] sm:$0x1] %v2293_v60  ;;  %3065 = vst [vmem:[#allocation0 + $0xe3] sm:$0x1] %v3061_v61  ;;  %v2959_v1 = vld [vmem:[#allocation2 + $0x690] sm:$0x1] }
 0x1bb   :  { %3833 = vst [vmem:[#allocation0 + $0x163] sm:$0x1] %v3829_v62  ;;  %v3727_v2 = vld [vmem:[#allocation2 + $0xa90] sm:$0x1]  ;;  %977 = vst.msk [vmem:[#allocation2 + $0xf8] sm:$0x1] %vm4_vm0, %v974_v63  }
 0x1bc   :  { %979 = vst.msk [vmem:[#allocation2 + $0x4f7] sm:$0x2] %vm4_vm0, %v974_v63   ;;  %981 = vst.msk [vmem:[#allocation2 + $0x8f6] sm:$0x4] %vm4_vm0, %v974_v63   ;;  %v2089_v4 = vld [vmem:[#allocation2 + $0x208] sm:$0x1] }
 0x1bd   :  { %983 = vst.msk [vmem:[#allocation2 + $0xcf5] sm:$0x8] %vm4_vm0, %v974_v63   ;;  %2195 = vst [vmem:[#allocation0 + $0x52] sm:$0x1] %v2191_v0  ;;  %v2857_v5 = vld [vmem:[#allocation2 + $0x608] sm:$0x1]  ;;  %v1393_v63 = vpop.permute.xlu0 %1392  }
 0x1be   :  { %2963 = vst [vmem:[#allocation0 + $0xd2] sm:$0x1] %v2959_v1  ;;  %3731 = vst [vmem:[#allocation0 + $0x152] sm:$0x1] %v3727_v2  ;;  %v3625_v6 = vld [vmem:[#allocation2 + $0xa08] sm:$0x1] }
 0x1bf   :  { %990 = vst.msk [vmem:[#allocation2 + $0x70] sm:$0x1] %vm4_vm0, %v987_v3   ;;  %992 = vst.msk [vmem:[#allocation2 + $0x46f] sm:$0x2] %vm4_vm0, %v987_v3   ;;  %v4393_v8 = vld [vmem:[#allocation2 + $0xe08] sm:$0x1] }
 0x1c0   :  { %994 = vst.msk [vmem:[#allocation2 + $0x86e] sm:$0x4] %vm4_vm0, %v987_v3   ;;  %996 = vst.msk [vmem:[#allocation2 + $0xc6d] sm:$0x8] %vm4_vm0, %v987_v3   ;;  %v1987_v9 = vld [vmem:[#allocation2 + $0x180] sm:$0x1]  ;;  %v1415_v3 = vpop.permute.xlu1 %1414  }
 0x1c1   :  { %2093 = vst [vmem:[#allocation0 + $0x41] sm:$0x1] %v2089_v4  ;;  %2861 = vst [vmem:[#allocation0 + $0xc1] sm:$0x1] %v2857_v5  ;;  %v2755_v10 = vld [vmem:[#allocation2 + $0x580] sm:$0x1] }
 0x1c2   :  { %3629 = vst [vmem:[#allocation0 + $0x141] sm:$0x1] %v3625_v6  ;;  %1003 = vst.msk [vmem:[#allocation2 + $0x3e8] sm:$0x1] %vm4_vm0, %v1000_v7   ;;  %v3523_v12 = vld [vmem:[#allocation2 + $0x980] sm:$0x1] }
 0x1c3   :  { %1005 = vst.msk [vmem:[#allocation2 + $0x7e7] sm:$0x2] %vm4_vm0, %v1000_v7   ;;  %1007 = vst.msk [vmem:[#allocation2 + $0xbe6] sm:$0x4] %vm4_vm0, %v1000_v7   ;;  %v4291_v13 = vld [vmem:[#allocation2 + $0xd80] sm:$0x1]  ;;  %v1437_v7 = vpop.permute.xlu0 %1436  }
 0x1c4   :  { %4397 = vst [vmem:[#allocation0 + $0x1c1] sm:$0x1] %v4393_v8  ;;  %1991 = vst [vmem:[#allocation0 + $0x30] sm:$0x1] %v1987_v9  ;;  %v1885_v14 = vld [vmem:[#allocation2 + $0xf8] sm:$0x1]  ;;  %v1463_v8 = vpop.permute.xlu1 %1462  }
 0x1c5   :  { %2759 = vst [vmem:[#allocation0 + $0xb0] sm:$0x1] %v2755_v10  ;;  %1014 = vst.msk [vmem:[#allocation2 + $0x360] sm:$0x1] %vm4_vm0, %v1011_v11   ;;  %v2653_v15 = vld [vmem:[#allocation2 + $0x4f8] sm:$0x1] }
 0x1c6   :  { %1016 = vst.msk [vmem:[#allocation2 + $0x75f] sm:$0x2] %vm4_vm0, %v1011_v11   ;;  %1018 = vst.msk [vmem:[#allocation2 + $0xb5e] sm:$0x4] %vm4_vm0, %v1011_v11   ;;  %v3421_v16 = vld [vmem:[#allocation2 + $0x8f8] sm:$0x1] }
 0x1c7   :  { %3527 = vst [vmem:[#allocation0 + $0x130] sm:$0x1] %v3523_v12  ;;  %4295 = vst [vmem:[#allocation0 + $0x1b0] sm:$0x1] %v4291_v13  ;;  %v4189_v18 = vld [vmem:[#allocation2 + $0xcf8] sm:$0x1]  ;;  %v1489_v12 = vpop.permute.xlu0 %1488  }
 0x1c8   :  { %1889 = vst [vmem:[#allocation0 + $0x1f] sm:$0x1] %v1885_v14  ;;  %2657 = vst [vmem:[#allocation0 + $0x9f] sm:$0x1] %v2653_v15  ;;  %v1783_v19 = vld [vmem:[#allocation2 + $0x70] sm:$0x1] }
 0x1c9   :  { %3425 = vst [vmem:[#allocation0 + $0x11f] sm:$0x1] %v3421_v16  ;;  %v2551_v20 = vld [vmem:[#allocation2 + $0x470] sm:$0x1]  ;;  %1025 = vst.msk [vmem:[#allocation2 + $0x2d8] sm:$0x1] %vm4_vm0, %v1022_v17   ;;  %v1514_v16 = vpop.permute.xlu1 %1513  }
 0x1ca   :  { %1027 = vst.msk [vmem:[#allocation2 + $0x6d7] sm:$0x2] %vm4_vm0, %v1022_v17   ;;  %1029 = vst.msk [vmem:[#allocation2 + $0xad6] sm:$0x4] %vm4_vm0, %v1022_v17   ;;  %v3319_v22 = vld [vmem:[#allocation2 + $0x870] sm:$0x1] }
 0x1cb   :  { %4193 = vst [vmem:[#allocation0 + $0x19f] sm:$0x1] %v4189_v18  ;;  %1787 = vst [vmem:[#allocation0 + $0xe] sm:$0x1] %v1783_v19  ;;  %v4087_v23 = vld [vmem:[#allocation2 + $0xc70] sm:$0x1] }
 0x1cc   :  { %2555 = vst [vmem:[#allocation0 + $0x8e] sm:$0x1] %v2551_v20  ;;  %1036 = vst.msk [vmem:[#allocation2 + $0x250] sm:$0x1] %vm4_vm0, %v1033_v21   ;;  %v2449_v24 = vld [vmem:[#allocation2 + $0x3e8] sm:$0x1]  ;;  %v1540_v20 = vpop.permute.xlu0 %1539  }
 0x1cd   :  { %1038 = vst.msk [vmem:[#allocation2 + $0x64f] sm:$0x2] %vm4_vm0, %v1033_v21   ;;  %1040 = vst.msk [vmem:[#allocation2 + $0xa4e] sm:$0x4] %vm4_vm0, %v1033_v21   ;;  %v3217_v25 = vld [vmem:[#allocation2 + $0x7e8] sm:$0x1] }
 0x1ce   :  { %3323 = vst [vmem:[#allocation0 + $0x10e] sm:$0x1] %v3319_v22  ;;  %4091 = vst [vmem:[#allocation0 + $0x18e] sm:$0x1] %v4087_v23  ;;  %v3985_v26 = vld [vmem:[#allocation2 + $0xbe8] sm:$0x1] }
 0x1cf   :  { %2453 = vst [vmem:[#allocation0 + $0x7d] sm:$0x1] %v2449_v24  ;;  %3221 = vst [vmem:[#allocation0 + $0xfd] sm:$0x1] %v3217_v25  ;;  %v2347_v28 = vld [vmem:[#allocation2 + $0x360] sm:$0x1]  ;;  %v1562_v24 = vpop.permute.xlu1 %1561  }
 0x1d0   :  { %3989 = vst [vmem:[#allocation0 + $0x17d] sm:$0x1] %v3985_v26  ;;  %v3115_v29 = vld [vmem:[#allocation2 + $0x760] sm:$0x1]  ;;  %1047 = vst.msk [vmem:[#allocation2 + $0x1c8] sm:$0x1] %vm4_vm0, %v1044_v27  }
 0x1d1   :  { %v3883_v30 = vld [vmem:[#allocation2 + $0xb60] sm:$0x1]  ;;  %1049 = vst.msk [vmem:[#allocation2 + $0x5c7] sm:$0x2] %vm4_vm0, %v1044_v27   ;;  %1051 = vst.msk [vmem:[#allocation2 + $0x9c6] sm:$0x4] %vm4_vm0, %v1044_v27  }
 0x1d2   :  { %1053 = vst.msk [vmem:[#allocation2 + $0xdc5] sm:$0x8] %vm4_vm0, %v1044_v27   ;;  %2351 = vst [vmem:[#allocation0 + $0x6c] sm:$0x1] %v2347_v28  ;;  %v2245_v32 = vld [vmem:[#allocation2 + $0x2d8] sm:$0x1] }
 0x1d3   :  { %3119 = vst [vmem:[#allocation0 + $0xec] sm:$0x1] %v3115_v29  ;;  %3887 = vst [vmem:[#allocation0 + $0x16c] sm:$0x1] %v3883_v30  ;;  %v3013_v33 = vld [vmem:[#allocation2 + $0x6d8] sm:$0x1]  ;;  %v1584_v30 = vpop.permute.xlu0 %1583  }
 0x1d4   :  { %1060 = vst.msk [vmem:[#allocation2 + $0x140] sm:$0x1] %vm4_vm0, %v1057_v31   ;;  %1062 = vst.msk [vmem:[#allocation2 + $0x53f] sm:$0x2] %vm4_vm0, %v1057_v31   ;;  %v3781_v34 = vld [vmem:[#allocation2 + $0xad8] sm:$0x1] }
 0x1d5   :  { %1064 = vst.msk [vmem:[#allocation2 + $0x93e] sm:$0x4] %vm4_vm0, %v1057_v31   ;;  %1066 = vst.msk [vmem:[#allocation2 + $0xd3d] sm:$0x8] %vm4_vm0, %v1057_v31   ;;  %v2143_v36 = vld [vmem:[#allocation2 + $0x250] sm:$0x1] }
 0x1d6   :  { %2249 = vst [vmem:[#allocation0 + $0x5b] sm:$0x1] %v2245_v32  ;;  %3017 = vst [vmem:[#allocation0 + $0xdb] sm:$0x1] %v3013_v33  ;;  %v2911_v37 = vld [vmem:[#allocation2 + $0x650] sm:$0x1] }
 0x1d7   :  { %3785 = vst [vmem:[#allocation0 + $0x15b] sm:$0x1] %v3781_v34  ;;  %v3679_v38 = vld [vmem:[#allocation2 + $0xa50] sm:$0x1]  ;;  %1073 = vst.msk [vmem:[#allocation2 + $0xb8] sm:$0x1] %vm4_vm0, %v1070_v35   ;;  %v1606_v34 = vpop.permute.xlu1 %1605  }
 0x1d8   :  { %1075 = vst.msk [vmem:[#allocation2 + $0x4b7] sm:$0x2] %vm4_vm0, %v1070_v35   ;;  %1077 = vst.msk [vmem:[#allocation2 + $0x8b6] sm:$0x4] %vm4_vm0, %v1070_v35   ;;  %v2041_v40 = vld [vmem:[#allocation2 + $0x1c8] sm:$0x1] }
 0x1d9   :  { %1079 = vst.msk [vmem:[#allocation2 + $0xcb5] sm:$0x8] %vm4_vm0, %v1070_v35   ;;  %2147 = vst [vmem:[#allocation0 + $0x4a] sm:$0x1] %v2143_v36  ;;  %v2809_v41 = vld [vmem:[#allocation2 + $0x5c8] sm:$0x1] }
 0x1da   :  { %2915 = vst [vmem:[#allocation0 + $0xca] sm:$0x1] %v2911_v37  ;;  %3683 = vst [vmem:[#allocation0 + $0x14a] sm:$0x1] %v3679_v38  ;;  %v3577_v42 = vld [vmem:[#allocation2 + $0x9c8] sm:$0x1] }
 0x1db   :  { %1085 = vst.msk [vmem:[#allocation2 + $0x30] sm:$0x1] %vm4_vm0, %v1082_v39   ;;  %1087 = vst.msk [vmem:[#allocation2 + $0x42f] sm:$0x2] %vm4_vm0, %v1082_v39   ;;  %v4345_v44 = vld [vmem:[#allocation2 + $0xdc8] sm:$0x1] }
 0x1dc   :  { %1089 = vst.msk [vmem:[#allocation2 + $0x82e] sm:$0x4] %vm4_vm0, %v1082_v39   ;;  %1091 = vst.msk [vmem:[#allocation2 + $0xc2d] sm:$0x8] %vm4_vm0, %v1082_v39   ;;  %v1939_v45 = vld [vmem:[#allocation2 + $0x140] sm:$0x1] }
 0x1dd   :  { %2045 = vst [vmem:[#allocation0 + $0x39] sm:$0x1] %v2041_v40  ;;  %2813 = vst [vmem:[#allocation0 + $0xb9] sm:$0x1] %v2809_v41  ;;  %v2707_v46 = vld [vmem:[#allocation2 + $0x540] sm:$0x1]  ;;  %v1628_v40 = vpop.permute.xlu0 %1627  }
 0x1de   :  { %3581 = vst [vmem:[#allocation0 + $0x139] sm:$0x1] %v3577_v42  ;;  %1098 = vst.msk [vmem:[#allocation2 + $0x3a8] sm:$0x1] %vm4_vm0, %v1095_v43   ;;  %v3475_v48 = vld [vmem:[#allocation2 + $0x940] sm:$0x1] }
 0x1df   :  { %1100 = vst.msk [vmem:[#allocation2 + $0x7a7] sm:$0x2] %vm4_vm0, %v1095_v43   ;;  %1102 = vst.msk [vmem:[#allocation2 + $0xba6] sm:$0x4] %vm4_vm0, %v1095_v43   ;;  %v4243_v49 = vld [vmem:[#allocation2 + $0xd40] sm:$0x1] }
 0x1e0   :  { %4349 = vst [vmem:[#allocation0 + $0x1b9] sm:$0x1] %v4345_v44  ;;  %1943 = vst [vmem:[#allocation0 + $0x28] sm:$0x1] %v1939_v45  ;;  %v1837_v50 = vld [vmem:[#allocation2 + $0xb8] sm:$0x1]  ;;  %v1654_v44 = vpop.permute.xlu1 %1653  }
 0x1e1   :  { %2711 = vst [vmem:[#allocation0 + $0xa8] sm:$0x1] %v2707_v46  ;;  %1109 = vst.msk [vmem:[#allocation2 + $0x320] sm:$0x1] %vm4_vm0, %v1106_v47   ;;  %v2605_v51 = vld [vmem:[#allocation2 + $0x4b8] sm:$0x1] }
 0x1e2   :  { %1111 = vst.msk [vmem:[#allocation2 + $0x71f] sm:$0x2] %vm4_vm0, %v1106_v47   ;;  %1113 = vst.msk [vmem:[#allocation2 + $0xb1e] sm:$0x4] %vm4_vm0, %v1106_v47   ;;  %v3373_v52 = vld [vmem:[#allocation2 + $0x8b8] sm:$0x1] }
 0x1e3   :  { %3479 = vst [vmem:[#allocation0 + $0x128] sm:$0x1] %v3475_v48  ;;  %4247 = vst [vmem:[#allocation0 + $0x1a8] sm:$0x1] %v4243_v49  ;;  %v4141_v54 = vld [vmem:[#allocation2 + $0xcb8] sm:$0x1]  ;;  %v1680_v48 = vpop.permute.xlu0 %1679  }
 0x1e4   :  { %1841 = vst [vmem:[#allocation0 + $0x17] sm:$0x1] %v1837_v50  ;;  %2609 = vst [vmem:[#allocation0 + $0x97] sm:$0x1] %v2605_v51  ;;  %v1735_v55 = vld [vmem:[#allocation2 + $0x30] sm:$0x1] }
 0x1e5   :  { %3377 = vst [vmem:[#allocation0 + $0x117] sm:$0x1] %v3373_v52  ;;  %v2503_v56 = vld [vmem:[#allocation2 + $0x430] sm:$0x1]  ;;  %1120 = vst.msk [vmem:[#allocation2 + $0x298] sm:$0x1] %vm4_vm0, %v1117_v53   ;;  %v1128_v52 = vpop.permute.xlu1 %1127  }
 0x1e6   :  { %1122 = vst.msk [vmem:[#allocation2 + $0x697] sm:$0x2] %vm4_vm0, %v1117_v53   ;;  %1124 = vst.msk [vmem:[#allocation2 + $0xa96] sm:$0x4] %vm4_vm0, %v1117_v53   ;;  %v3271_v58 = vld [vmem:[#allocation2 + $0x830] sm:$0x1] }
 0x1e7   :  { %4145 = vst [vmem:[#allocation0 + $0x197] sm:$0x1] %v4141_v54  ;;  %1739 = vst [vmem:[#allocation0 + $0x6] sm:$0x1] %v1735_v55  ;;  %v4039_v59 = vld [vmem:[#allocation2 + $0xc30] sm:$0x1] }
 0x1e8   :  { %2507 = vst [vmem:[#allocation0 + $0x86] sm:$0x1] %v2503_v56  ;;  %1374 = vst.msk [vmem:[#allocation2 + $0x370] sm:$0x1] %vm1372_vm15, %v1371_v57   ;;  %v2401_v60 = vld [vmem:[#allocation2 + $0x3a8] sm:$0x1]  ;;  %v1139_v56 = vpop.permute.xlu0 %1138  }
 0x1e9   :  { %1376 = vst.msk [vmem:[#allocation2 + $0x76f] sm:$0x2] %vm1372_vm15, %v1371_v57   ;;  %1378 = vst.msk [vmem:[#allocation2 + $0xb6e] sm:$0x4] %vm1372_vm15, %v1371_v57   ;;  %v3169_v61 = vld [vmem:[#allocation2 + $0x7a8] sm:$0x1] }
 0x1ea   :  { %3275 = vst [vmem:[#allocation0 + $0x106] sm:$0x1] %v3271_v58  ;;  %4043 = vst [vmem:[#allocation0 + $0x186] sm:$0x1] %v4039_v59  ;;  %v3937_v62 = vld [vmem:[#allocation2 + $0xba8] sm:$0x1] }
 0x1eb   :  { %1381 = vst.msk [vmem:[#allocation2 + $0x370] sm:$0x1] %vm1379_vm1, %v1371_v57   ;;  %1383 = vst.msk [vmem:[#allocation2 + $0x76f] sm:$0x2] %vm1379_vm1, %v1371_v57   ;;  %v2299_v0 = vld [vmem:[#allocation2 + $0x320] sm:$0x1] }
 0x1ec   :  { %1385 = vst.msk [vmem:[#allocation2 + $0xb6e] sm:$0x4] %vm1379_vm1, %v1371_v57   ;;  %2405 = vst [vmem:[#allocation0 + $0x75] sm:$0x1] %v2401_v60  ;;  %v3067_v1 = vld [vmem:[#allocation2 + $0x720] sm:$0x1]  ;;  %v1152_v60 = vpop.permute.xlu1 %1151  }
 0x1ed   :  { %3173 = vst [vmem:[#allocation0 + $0xf5] sm:$0x1] %v3169_v61  ;;  %3941 = vst [vmem:[#allocation0 + $0x175] sm:$0x1] %v3937_v62  ;;  %v3835_v2 = vld [vmem:[#allocation2 + $0xb20] sm:$0x1] }
 0x1ee   :  { %1396 = vst.msk [vmem:[#allocation2 + $0x2e8] sm:$0x1] %vm1394_vm2, %v1393_v63   ;;  %1398 = vst.msk [vmem:[#allocation2 + $0x6e7] sm:$0x2] %vm1394_vm2, %v1393_v63   ;;  %v2197_v4 = vld [vmem:[#allocation2 + $0x298] sm:$0x1] }
 0x1ef   :  { %1400 = vst.msk [vmem:[#allocation2 + $0xae6] sm:$0x4] %vm1394_vm2, %v1393_v63   ;;  %2303 = vst [vmem:[#allocation0 + $0x64] sm:$0x1] %v2299_v0  ;;  %v2965_v5 = vld [vmem:[#allocation2 + $0x698] sm:$0x1] }
 0x1f0   :  { %3071 = vst [vmem:[#allocation0 + $0xe4] sm:$0x1] %v3067_v1  ;;  %3839 = vst [vmem:[#allocation0 + $0x164] sm:$0x1] %v3835_v2  ;;  %v3733_v6 = vld [vmem:[#allocation2 + $0xa98] sm:$0x1]  ;;  %v1165_v2 = vpop.permute.xlu0 %1164  }
 0x1f1   :  { %1403 = vst.msk [vmem:[#allocation2 + $0x2e8] sm:$0x1] %vm1401_vm3, %v1393_v63   ;;  %1405 = vst.msk [vmem:[#allocation2 + $0x6e7] sm:$0x2] %vm1401_vm3, %v1393_v63   ;;  %vm1548_vm15 = vcmask 121912   ;;  %vm1563_vm1 = vcmask 48128  }
 0x1f2   :  { %1407 = vst.msk [vmem:[#allocation2 + $0xae6] sm:$0x4] %vm1401_vm3, %v1393_v63   ;;  %2201 = vst [vmem:[#allocation0 + $0x53] sm:$0x1] %v2197_v4  ;;  %v2359_v9 = vld [vmem:[#allocation2 + $0x370] sm:$0x1] }
 0x1f3   :  { %1418 = vst.msk [vmem:[#allocation2 + $0x260] sm:$0x1] %vm1416_vm4, %v1415_v3   ;;  %1420 = vst.msk [vmem:[#allocation2 + $0x65f] sm:$0x2] %vm1416_vm4, %v1415_v3   ;;  %v3127_v10 = vld [vmem:[#allocation2 + $0x770] sm:$0x1] }
 0x1f4   :  { %1422 = vst.msk [vmem:[#allocation2 + $0xa5e] sm:$0x4] %vm1416_vm4, %v1415_v3   ;;  %2969 = vst [vmem:[#allocation0 + $0xd3] sm:$0x1] %v2965_v5  ;;  %v3895_v11 = vld [vmem:[#allocation2 + $0xb70] sm:$0x1] }
 0x1f5   :  { %1425 = vst.msk [vmem:[#allocation2 + $0x260] sm:$0x1] %vm1423_vm5, %v1415_v3   ;;  %1427 = vst.msk [vmem:[#allocation2 + $0x65f] sm:$0x2] %vm1423_vm5, %v1415_v3   ;;  %vm1570_vm2 = vcmask 121904   ;;  %vm1585_vm3 = vcmask 39936  }
 0x1f6   :  { %1429 = vst.msk [vmem:[#allocation2 + $0xa5e] sm:$0x4] %vm1423_vm5, %v1415_v3   ;;  %3737 = vst [vmem:[#allocation0 + $0x153] sm:$0x1] %v3733_v6  ;;  %vm1592_vm4 = vcmask 121896   ;;  %vm1607_vm5 = vcmask 31744   ;;  %v1178_v6 = vpop.permute.xlu1 %1177  }
 0x1f7   :  { %1440 = vst.msk [vmem:[#allocation2 + $0x1d8] sm:$0x1] %vm1438_vm6, %v1437_v7   ;;  %1442 = vst.msk [vmem:[#allocation2 + $0x5d7] sm:$0x2] %vm1438_vm6, %v1437_v7  }
 0x1f8   :  { %1444 = vst.msk [vmem:[#allocation2 + $0x9d6] sm:$0x4] %vm1438_vm6, %v1437_v7   ;;  %1446 = vst.msk [vmem:[#allocation2 + $0xdd5] sm:$0x8] %vm1438_vm6, %v1437_v7   ;;  %v2257_v13 = vld [vmem:[#allocation2 + $0x2e8] sm:$0x1] }
 0x1f9   :  { %1449 = vst.msk [vmem:[#allocation2 + $0x1d8] sm:$0x1] %vm1447_vm7, %v1437_v7   ;;  %1451 = vst.msk [vmem:[#allocation2 + $0x5d7] sm:$0x2] %vm1447_vm7, %v1437_v7   ;;  %v3025_v14 = vld [vmem:[#allocation2 + $0x6e8] sm:$0x1] }
 0x1fa   :  { %1453 = vst.msk [vmem:[#allocation2 + $0x9d6] sm:$0x4] %vm1447_vm7, %v1437_v7   ;;  %1455 = vst.msk [vmem:[#allocation2 + $0xdd5] sm:$0x8] %vm1447_vm7, %v1437_v7   ;;  %v3793_v15 = vld [vmem:[#allocation2 + $0xae8] sm:$0x1] }
 0x1fb   :  { %1466 = vst.msk [vmem:[#allocation2 + $0x150] sm:$0x1] %vm1464_vm8, %v1463_v8   ;;  %1468 = vst.msk [vmem:[#allocation2 + $0x54f] sm:$0x2] %vm1464_vm8, %v1463_v8   ;;  %vm1614_vm6 = vcmask 121888   ;;  %vm1629_vm7 = vcmask 23552  }
 0x1fc   :  { %1470 = vst.msk [vmem:[#allocation2 + $0x94e] sm:$0x4] %vm1464_vm8, %v1463_v8   ;;  %1472 = vst.msk [vmem:[#allocation2 + $0xd4d] sm:$0x8] %vm1464_vm8, %v1463_v8   ;;  %v2155_v17 = vld [vmem:[#allocation2 + $0x260] sm:$0x1] }
 0x1fd   :  { %2363 = vst [vmem:[#allocation0 + $0x6e] sm:$0x1] %v2359_v9  ;;  %3131 = vst [vmem:[#allocation0 + $0xee] sm:$0x1] %v3127_v10  ;;  %v2923_v18 = vld [vmem:[#allocation2 + $0x660] sm:$0x1] }
 0x1fe   :  { %3899 = vst [vmem:[#allocation0 + $0x16e] sm:$0x1] %v3895_v11  ;;  %1475 = vst.msk [vmem:[#allocation2 + $0x150] sm:$0x1] %vm1473_vm9, %v1463_v8   ;;  %v3691_v19 = vld [vmem:[#allocation2 + $0xa60] sm:$0x1] }
 0x1ff   :  { %1477 = vst.msk [vmem:[#allocation2 + $0x54f] sm:$0x2] %vm1473_vm9, %v1463_v8   ;;  %1479 = vst.msk [vmem:[#allocation2 + $0x94e] sm:$0x4] %vm1473_vm9, %v1463_v8   ;;  %vm1638_vm8 = vcmask 121880  }
 0x200   :  { %1481 = vst.msk [vmem:[#allocation2 + $0xd4d] sm:$0x8] %vm1473_vm9, %v1463_v8   ;;  %2261 = vst [vmem:[#allocation0 + $0x5d] sm:$0x1] %v2257_v13  ;;  %v2053_v21 = vld [vmem:[#allocation2 + $0x1d8] sm:$0x1] }
 0x201   :  { %1492 = vst.msk [vmem:[#allocation2 + $0xc8] sm:$0x1] %vm1490_vm10, %v1489_v12   ;;  %1494 = vst.msk [vmem:[#allocation2 + $0x4c7] sm:$0x2] %vm1490_vm10, %v1489_v12   ;;  %v2821_v22 = vld [vmem:[#allocation2 + $0x5d8] sm:$0x1] }
 0x202   :  { %1496 = vst.msk [vmem:[#allocation2 + $0x8c6] sm:$0x4] %vm1490_vm10, %v1489_v12   ;;  %1498 = vst.msk [vmem:[#allocation2 + $0xcc5] sm:$0x8] %vm1490_vm10, %v1489_v12   ;;  %v3589_v23 = vld [vmem:[#allocation2 + $0x9d8] sm:$0x1] }
 0x203   :  { %3029 = vst [vmem:[#allocation0 + $0xdd] sm:$0x1] %v3025_v14  ;;  %3797 = vst [vmem:[#allocation0 + $0x15d] sm:$0x1] %v3793_v15  ;;  %v4357_v25 = vld [vmem:[#allocation2 + $0xdd8] sm:$0x1]  ;;  %v1189_v14 = vpop.permute.xlu0 %1188  }
 0x204   :  { %1501 = vst.msk [vmem:[#allocation2 + $0xc8] sm:$0x1] %vm1499_vm11, %v1489_v12   ;;  %1503 = vst.msk [vmem:[#allocation2 + $0x4c7] sm:$0x2] %vm1499_vm11, %v1489_v12   ;;  %vm1655_vm9 = vcmask 15360   ;;  %vm1664_vm10 = vcmask 121872  }
 0x205   :  { %1505 = vst.msk [vmem:[#allocation2 + $0x8c6] sm:$0x4] %vm1499_vm11, %v1489_v12   ;;  %1507 = vst.msk [vmem:[#allocation2 + $0xcc5] sm:$0x8] %vm1499_vm11, %v1489_v12   ;;  %v1951_v26 = vld [vmem:[#allocation2 + $0x150] sm:$0x1] }
 0x206   :  { %1517 = vst.msk [vmem:[#allocation2 + $0x40] sm:$0x1] %vm1515_vm12, %v1514_v16   ;;  %1519 = vst.msk [vmem:[#allocation2 + $0x43f] sm:$0x2] %vm1515_vm12, %v1514_v16   ;;  %v2719_v27 = vld [vmem:[#allocation2 + $0x550] sm:$0x1] }
 0x207   :  { %1521 = vst.msk [vmem:[#allocation2 + $0x83e] sm:$0x4] %vm1515_vm12, %v1514_v16   ;;  %1523 = vst.msk [vmem:[#allocation2 + $0xc3d] sm:$0x8] %vm1515_vm12, %v1514_v16   ;;  %v3487_v28 = vld [vmem:[#allocation2 + $0x950] sm:$0x1] }
 0x208   :  { %2159 = vst [vmem:[#allocation0 + $0x4c] sm:$0x1] %v2155_v17  ;;  %2927 = vst [vmem:[#allocation0 + $0xcc] sm:$0x1] %v2923_v18  ;;  %v4255_v29 = vld [vmem:[#allocation2 + $0xd50] sm:$0x1]  ;;  %v1200_v18 = vpop.permute.xlu1 %1199  }
 0x209   :  { %3695 = vst [vmem:[#allocation0 + $0x14c] sm:$0x1] %v3691_v19  ;;  %1526 = vst.msk [vmem:[#allocation2 + $0x40] sm:$0x1] %vm1524_vm13, %v1514_v16   ;;  %vm1681_vm11 = vcmask 7168   ;;  %vm1690_vm12 = vcmask 121864  }
 0x20a   :  { %1528 = vst.msk [vmem:[#allocation2 + $0x43f] sm:$0x2] %vm1524_vm13, %v1514_v16   ;;  %1530 = vst.msk [vmem:[#allocation2 + $0x83e] sm:$0x4] %vm1524_vm13, %v1514_v16  }
 0x20b   :  { %1532 = vst.msk [vmem:[#allocation2 + $0xc3d] sm:$0x8] %vm1524_vm13, %v1514_v16   ;;  %2057 = vst [vmem:[#allocation0 + $0x3b] sm:$0x1] %v2053_v21  ;;  %v1849_v31 = vld [vmem:[#allocation2 + $0xc8] sm:$0x1] }
 0x20c   :  { %1543 = vst.msk [vmem:[#allocation2 + $0x3b8] sm:$0x1] %vm1541_vm14, %v1540_v20   ;;  %1545 = vst.msk [vmem:[#allocation2 + $0x7b7] sm:$0x2] %vm1541_vm14, %v1540_v20   ;;  %v2617_v32 = vld [vmem:[#allocation2 + $0x4c8] sm:$0x1] }
 0x20d   :  { %1547 = vst.msk [vmem:[#allocation2 + $0xbb6] sm:$0x4] %vm1541_vm14, %v1540_v20   ;;  %2825 = vst [vmem:[#allocation0 + $0xbb] sm:$0x1] %v2821_v22  ;;  %v3385_v33 = vld [vmem:[#allocation2 + $0x8c8] sm:$0x1] }
 0x20e   :  { %3593 = vst [vmem:[#allocation0 + $0x13b] sm:$0x1] %v3589_v23  ;;  %1550 = vst.msk [vmem:[#allocation2 + $0x3b8] sm:$0x1] %vm1548_vm15, %v1540_v20   ;;  %v4153_v35 = vld [vmem:[#allocation2 + $0xcc8] sm:$0x1] }
 0x20f   :  { %1552 = vst.msk [vmem:[#allocation2 + $0x7b7] sm:$0x2] %vm1548_vm15, %v1540_v20   ;;  %1554 = vst.msk [vmem:[#allocation2 + $0xbb6] sm:$0x4] %vm1548_vm15, %v1540_v20  }
 0x210   :  { %1565 = vst.msk [vmem:[#allocation2 + $0x330] sm:$0x1] %vm1563_vm1, %v1562_v24   ;;  %1567 = vst.msk [vmem:[#allocation2 + $0x72f] sm:$0x2] %vm1563_vm1, %v1562_v24   ;;  %v1747_v36 = vld [vmem:[#allocation2 + $0x40] sm:$0x1] }
 0x211   :  { %1569 = vst.msk [vmem:[#allocation2 + $0xb2e] sm:$0x4] %vm1563_vm1, %v1562_v24   ;;  %4361 = vst [vmem:[#allocation0 + $0x1bb] sm:$0x1] %v4357_v25  ;;  %v2515_v37 = vld [vmem:[#allocation2 + $0x440] sm:$0x1] }
 0x212   :  { %1955 = vst [vmem:[#allocation0 + $0x2a] sm:$0x1] %v1951_v26  ;;  %2723 = vst [vmem:[#allocation0 + $0xaa] sm:$0x1] %v2719_v27  ;;  %v3283_v38 = vld [vmem:[#allocation2 + $0x840] sm:$0x1] }
 0x213   :  { %1572 = vst.msk [vmem:[#allocation2 + $0x330] sm:$0x1] %vm1570_vm2, %v1562_v24   ;;  %1574 = vst.msk [vmem:[#allocation2 + $0x72f] sm:$0x2] %vm1570_vm2, %v1562_v24   ;;  %v4051_v39 = vld [vmem:[#allocation2 + $0xc40] sm:$0x1] }
 0x214   :  { %1576 = vst.msk [vmem:[#allocation2 + $0xb2e] sm:$0x4] %vm1570_vm2, %v1562_v24   ;;  %3491 = vst [vmem:[#allocation0 + $0x12a] sm:$0x1] %v3487_v28  ;;  %v1211_v24 = vpop.permute.xlu0 %1210   ;;  %v1222_v28 = vpop.permute.xlu1 %1221  }
 0x215   :  { %4259 = vst [vmem:[#allocation0 + $0x1aa] sm:$0x1] %v4255_v29  ;;  %1587 = vst.msk [vmem:[#allocation2 + $0x2a8] sm:$0x1] %vm1585_vm3, %v1584_v30   ;;  %v2413_v41 = vld [vmem:[#allocation2 + $0x3b8] sm:$0x1] }
 0x216   :  { %1589 = vst.msk [vmem:[#allocation2 + $0x6a7] sm:$0x2] %vm1585_vm3, %v1584_v30   ;;  %1591 = vst.msk [vmem:[#allocation2 + $0xaa6] sm:$0x4] %vm1585_vm3, %v1584_v30   ;;  %v3181_v42 = vld [vmem:[#allocation2 + $0x7b8] sm:$0x1] }
 0x217   :  { %1853 = vst [vmem:[#allocation0 + $0x19] sm:$0x1] %v1849_v31  ;;  %2621 = vst [vmem:[#allocation0 + $0x99] sm:$0x1] %v2617_v32  ;;  %v3949_v43 = vld [vmem:[#allocation2 + $0xbb8] sm:$0x1] }
 0x218   :  { %3389 = vst [vmem:[#allocation0 + $0x119] sm:$0x1] %v3385_v33  ;;  %1594 = vst.msk [vmem:[#allocation2 + $0x2a8] sm:$0x1] %vm1592_vm4, %v1584_v30   ;;  %v1235_v33 = vpop.permute.xlu0 %1234  }
 0x219   :  { %1596 = vst.msk [vmem:[#allocation2 + $0x6a7] sm:$0x2] %vm1592_vm4, %v1584_v30   ;;  %1598 = vst.msk [vmem:[#allocation2 + $0xaa6] sm:$0x4] %vm1592_vm4, %v1584_v30  }
 0x21a   :  { %1609 = vst.msk [vmem:[#allocation2 + $0x220] sm:$0x1] %vm1607_vm5, %v1606_v34   ;;  %1611 = vst.msk [vmem:[#allocation2 + $0x61f] sm:$0x2] %vm1607_vm5, %v1606_v34   ;;  %v2311_v45 = vld [vmem:[#allocation2 + $0x330] sm:$0x1] }
 0x21b   :  { %1613 = vst.msk [vmem:[#allocation2 + $0xa1e] sm:$0x4] %vm1607_vm5, %v1606_v34   ;;  %4157 = vst [vmem:[#allocation0 + $0x199] sm:$0x1] %v4153_v35  ;;  %v3079_v46 = vld [vmem:[#allocation2 + $0x730] sm:$0x1] }
 0x21c   :  { %1751 = vst [vmem:[#allocation0 + $0x8] sm:$0x1] %v1747_v36  ;;  %2519 = vst [vmem:[#allocation0 + $0x88] sm:$0x1] %v2515_v37  ;;  %v3847_v47 = vld [vmem:[#allocation2 + $0xb30] sm:$0x1]  ;;  %v1248_v37 = vpop.permute.xlu1 %1247  }
 0x21d   :  { %1616 = vst.msk [vmem:[#allocation2 + $0x220] sm:$0x1] %vm1614_vm6, %v1606_v34   ;;  %1618 = vst.msk [vmem:[#allocation2 + $0x61f] sm:$0x2] %vm1614_vm6, %v1606_v34  }
 0x21e   :  { %1620 = vst.msk [vmem:[#allocation2 + $0xa1e] sm:$0x4] %vm1614_vm6, %v1606_v34   ;;  %3287 = vst [vmem:[#allocation0 + $0x108] sm:$0x1] %v3283_v38 }
 0x21f   :  { %4055 = vst [vmem:[#allocation0 + $0x188] sm:$0x1] %v4051_v39  ;;  %1631 = vst.msk [vmem:[#allocation2 + $0x198] sm:$0x1] %vm1629_vm7, %v1628_v40   ;;  %v2209_v49 = vld [vmem:[#allocation2 + $0x2a8] sm:$0x1] }
 0x220   :  { %1633 = vst.msk [vmem:[#allocation2 + $0x597] sm:$0x2] %vm1629_vm7, %v1628_v40   ;;  %1635 = vst.msk [vmem:[#allocation2 + $0x996] sm:$0x4] %vm1629_vm7, %v1628_v40   ;;  %v2977_v50 = vld [vmem:[#allocation2 + $0x6a8] sm:$0x1] }
 0x221   :  { %1637 = vst.msk [vmem:[#allocation2 + $0xd95] sm:$0x8] %vm1629_vm7, %v1628_v40   ;;  %2417 = vst [vmem:[#allocation0 + $0x77] sm:$0x1] %v2413_v41  ;;  %v3745_v51 = vld [vmem:[#allocation2 + $0xaa8] sm:$0x1]  ;;  %v1260_v41 = vpop.permute.xlu0 %1259  }
 0x222   :  { %3185 = vst [vmem:[#allocation0 + $0xf7] sm:$0x1] %v3181_v42  ;;  %3953 = vst [vmem:[#allocation0 + $0x177] sm:$0x1] %v3949_v43 }
 0x223   :  { %1640 = vst.msk [vmem:[#allocation2 + $0x198] sm:$0x1] %vm1638_vm8, %v1628_v40   ;;  %1642 = vst.msk [vmem:[#allocation2 + $0x597] sm:$0x2] %vm1638_vm8, %v1628_v40  }
 0x224   :  { %1644 = vst.msk [vmem:[#allocation2 + $0x996] sm:$0x4] %vm1638_vm8, %v1628_v40   ;;  %1646 = vst.msk [vmem:[#allocation2 + $0xd95] sm:$0x8] %vm1638_vm8, %v1628_v40   ;;  %v2107_v53 = vld [vmem:[#allocation2 + $0x220] sm:$0x1] }
 0x225   :  { %1657 = vst.msk [vmem:[#allocation2 + $0x110] sm:$0x1] %vm1655_vm9, %v1654_v44   ;;  %1659 = vst.msk [vmem:[#allocation2 + $0x50f] sm:$0x2] %vm1655_vm9, %v1654_v44   ;;  %v2875_v54 = vld [vmem:[#allocation2 + $0x620] sm:$0x1] }
 0x226   :  { %1661 = vst.msk [vmem:[#allocation2 + $0x90e] sm:$0x4] %vm1655_vm9, %v1654_v44   ;;  %1663 = vst.msk [vmem:[#allocation2 + $0xd0d] sm:$0x8] %vm1655_vm9, %v1654_v44   ;;  %v3643_v55 = vld [vmem:[#allocation2 + $0xa20] sm:$0x1] }
 0x227   :  { %2315 = vst [vmem:[#allocation0 + $0x66] sm:$0x1] %v2311_v45  ;;  %3083 = vst [vmem:[#allocation0 + $0xe6] sm:$0x1] %v3079_v46  ;;  %v1273_v45 = vpop.permute.xlu1 %1272  }
 0x228   :  { %3851 = vst [vmem:[#allocation0 + $0x166] sm:$0x1] %v3847_v47  ;;  %1666 = vst.msk [vmem:[#allocation2 + $0x110] sm:$0x1] %vm1664_vm10, %v1654_v44  }
 0x229   :  { %1668 = vst.msk [vmem:[#allocation2 + $0x50f] sm:$0x2] %vm1664_vm10, %v1654_v44   ;;  %1670 = vst.msk [vmem:[#allocation2 + $0x90e] sm:$0x4] %vm1664_vm10, %v1654_v44  }
 0x22a   :  { %1672 = vst.msk [vmem:[#allocation2 + $0xd0d] sm:$0x8] %vm1664_vm10, %v1654_v44   ;;  %2213 = vst [vmem:[#allocation0 + $0x55] sm:$0x1] %v2209_v49  ;;  %v2005_v57 = vld [vmem:[#allocation2 + $0x198] sm:$0x1] }
 0x22b   :  { %1683 = vst.msk [vmem:[#allocation2 + $0x88] sm:$0x1] %vm1681_vm11, %v1680_v48   ;;  %1685 = vst.msk [vmem:[#allocation2 + $0x487] sm:$0x2] %vm1681_vm11, %v1680_v48   ;;  %v2773_v58 = vld [vmem:[#allocation2 + $0x598] sm:$0x1] }
 0x22c   :  { %1687 = vst.msk [vmem:[#allocation2 + $0x886] sm:$0x4] %vm1681_vm11, %v1680_v48   ;;  %1689 = vst.msk [vmem:[#allocation2 + $0xc85] sm:$0x8] %vm1681_vm11, %v1680_v48   ;;  %v3541_v59 = vld [vmem:[#allocation2 + $0x998] sm:$0x1] }
 0x22d   :  { %2981 = vst [vmem:[#allocation0 + $0xd5] sm:$0x1] %v2977_v50  ;;  %3749 = vst [vmem:[#allocation0 + $0x155] sm:$0x1] %v3745_v51  ;;  %v4309_v61 = vld [vmem:[#allocation2 + $0xd98] sm:$0x1]  ;;  %v1284_v50 = vpop.permute.xlu0 %1283  }
 0x22e   :  { %1692 = vst.msk [vmem:[#allocation2 + $0x88] sm:$0x1] %vm1690_vm12, %v1680_v48   ;;  %1694 = vst.msk [vmem:[#allocation2 + $0x487] sm:$0x2] %vm1690_vm12, %v1680_v48  }
 0x22f   :  { %1696 = vst.msk [vmem:[#allocation2 + $0x886] sm:$0x4] %vm1690_vm12, %v1680_v48   ;;  %1698 = vst.msk [vmem:[#allocation2 + $0xc85] sm:$0x8] %vm1690_vm12, %v1680_v48   ;;  %v1903_v62 = vld [vmem:[#allocation2 + $0x110] sm:$0x1] }
 0x230   :  { %1131 = vst.msk [vmem:[#allocation2 + $0x210] sm:$0x1] %vm4_vm0, %v1128_v52   ;;  %1133 = vst.msk [vmem:[#allocation2 + $0x60f] sm:$0x2] %vm4_vm0, %v1128_v52   ;;  %v2671_v63 = vld [vmem:[#allocation2 + $0x510] sm:$0x1] }
 0x231   :  { %1135 = vst.msk [vmem:[#allocation2 + $0xa0e] sm:$0x4] %vm4_vm0, %v1128_v52   ;;  %2111 = vst [vmem:[#allocation0 + $0x44] sm:$0x1] %v2107_v53  ;;  %v3439_v0 = vld [vmem:[#allocation2 + $0x910] sm:$0x1] }
 0x232   :  { %2879 = vst [vmem:[#allocation0 + $0xc4] sm:$0x1] %v2875_v54  ;;  %3647 = vst [vmem:[#allocation0 + $0x144] sm:$0x1] %v3643_v55  ;;  %v4207_v1 = vld [vmem:[#allocation2 + $0xd10] sm:$0x1]  ;;  %v1295_v54 = vpop.permute.xlu1 %1294  }
 0x233   :  { %1142 = vst.msk [vmem:[#allocation2 + $0x188] sm:$0x1] %vm4_vm0, %v1139_v56   ;;  %1144 = vst.msk [vmem:[#allocation2 + $0x587] sm:$0x2] %vm4_vm0, %v1139_v56  }
 0x234   :  { %1146 = vst.msk [vmem:[#allocation2 + $0x986] sm:$0x4] %vm4_vm0, %v1139_v56   ;;  %1148 = vst.msk [vmem:[#allocation2 + $0xd85] sm:$0x8] %vm4_vm0, %v1139_v56  }
 0x235   :  { %2009 = vst [vmem:[#allocation0 + $0x33] sm:$0x1] %v2005_v57  ;;  %2777 = vst [vmem:[#allocation0 + $0xb3] sm:$0x1] %v2773_v58  ;;  %v1801_v3 = vld [vmem:[#allocation2 + $0x88] sm:$0x1] }
 0x236   :  { %3545 = vst [vmem:[#allocation0 + $0x133] sm:$0x1] %v3541_v59  ;;  %1155 = vst.msk [vmem:[#allocation2 + $0x100] sm:$0x1] %vm4_vm0, %v1152_v60   ;;  %v2569_v4 = vld [vmem:[#allocation2 + $0x488] sm:$0x1] }
 0x237   :  { %1157 = vst.msk [vmem:[#allocation2 + $0x4ff] sm:$0x2] %vm4_vm0, %v1152_v60   ;;  %1159 = vst.msk [vmem:[#allocation2 + $0x8fe] sm:$0x4] %vm4_vm0, %v1152_v60   ;;  %v3337_v5 = vld [vmem:[#allocation2 + $0x888] sm:$0x1] }
 0x238   :  { %1161 = vst.msk [vmem:[#allocation2 + $0xcfd] sm:$0x8] %vm4_vm0, %v1152_v60   ;;  %4313 = vst [vmem:[#allocation0 + $0x1b3] sm:$0x1] %v4309_v61  ;;  %v4105_v7 = vld [vmem:[#allocation2 + $0xc88] sm:$0x1]  ;;  %v1306_v60 = vpop.permute.xlu0 %1305  }
 0x239   :  { %1907 = vst [vmem:[#allocation0 + $0x22] sm:$0x1] %v1903_v62  ;;  %2675 = vst [vmem:[#allocation0 + $0xa2] sm:$0x1] %v2671_v63  ;;  %v2095_v8 = vld [vmem:[#allocation2 + $0x210] sm:$0x1] }
 0x23a   :  { %3443 = vst [vmem:[#allocation0 + $0x122] sm:$0x1] %v3439_v0  ;;  %4211 = vst [vmem:[#allocation0 + $0x1a2] sm:$0x1] %v4207_v1  ;;  %v2863_v9 = vld [vmem:[#allocation2 + $0x610] sm:$0x1]  ;;  %v1317_v0 = vpop.permute.xlu1 %1316  }
 0x23b   :  { %1168 = vst.msk [vmem:[#allocation2 + $0x78] sm:$0x1] %vm4_vm0, %v1165_v2   ;;  %1170 = vst.msk [vmem:[#allocation2 + $0x477] sm:$0x2] %vm4_vm0, %v1165_v2   ;;  %v3631_v10 = vld [vmem:[#allocation2 + $0xa10] sm:$0x1] }
 0x23c   :  { %1172 = vst.msk [vmem:[#allocation2 + $0x876] sm:$0x4] %vm4_vm0, %v1165_v2   ;;  %1174 = vst.msk [vmem:[#allocation2 + $0xc75] sm:$0x8] %vm4_vm0, %v1165_v2   ;;  %v1993_v11 = vld [vmem:[#allocation2 + $0x188] sm:$0x1] }
 0x23d   :  { %1805 = vst [vmem:[#allocation0 + $0x11] sm:$0x1] %v1801_v3  ;;  %2573 = vst [vmem:[#allocation0 + $0x91] sm:$0x1] %v2569_v4  ;;  %v2761_v12 = vld [vmem:[#allocation2 + $0x588] sm:$0x1] }
 0x23e   :  { %3341 = vst [vmem:[#allocation0 + $0x111] sm:$0x1] %v3337_v5  ;;  %1181 = vst.msk [vmem:[#allocation2 + $0x3f0] sm:$0x1] %vm4_vm0, %v1178_v6   ;;  %v3529_v13 = vld [vmem:[#allocation2 + $0x988] sm:$0x1]  ;;  %v1330_v5 = vpop.permute.xlu0 %1329  }
 0x23f   :  { %1183 = vst.msk [vmem:[#allocation2 + $0x7ef] sm:$0x2] %vm4_vm0, %v1178_v6   ;;  %1185 = vst.msk [vmem:[#allocation2 + $0xbee] sm:$0x4] %vm4_vm0, %v1178_v6   ;;  %v4297_v15 = vld [vmem:[#allocation2 + $0xd88] sm:$0x1] }
 0x240   :  { %4109 = vst [vmem:[#allocation0 + $0x191] sm:$0x1] %v4105_v7  ;;  %2099 = vst [vmem:[#allocation0 + $0x42] sm:$0x1] %v2095_v8  ;;  %v1891_v16 = vld [vmem:[#allocation2 + $0x100] sm:$0x1] }
 0x241   :  { %2867 = vst [vmem:[#allocation0 + $0xc2] sm:$0x1] %v2863_v9  ;;  %3635 = vst [vmem:[#allocation0 + $0x142] sm:$0x1] %v3631_v10  ;;  %v2659_v17 = vld [vmem:[#allocation2 + $0x500] sm:$0x1]  ;;  %v1343_v9 = vpop.permute.xlu1 %1342  }
 0x242   :  { %1997 = vst [vmem:[#allocation0 + $0x31] sm:$0x1] %v1993_v11  ;;  %2765 = vst [vmem:[#allocation0 + $0xb1] sm:$0x1] %v2761_v12  ;;  %v3427_v19 = vld [vmem:[#allocation2 + $0x900] sm:$0x1] }
 0x243   :  { %3533 = vst [vmem:[#allocation0 + $0x131] sm:$0x1] %v3529_v13  ;;  %1192 = vst.msk [vmem:[#allocation2 + $0x368] sm:$0x1] %vm4_vm0, %v1189_v14   ;;  %v4195_v20 = vld [vmem:[#allocation2 + $0xd00] sm:$0x1]  ;;  %v1356_v13 = vpop.permute.xlu0 %1355  }
 0x244   :  { %1194 = vst.msk [vmem:[#allocation2 + $0x767] sm:$0x2] %vm4_vm0, %v1189_v14   ;;  %1196 = vst.msk [vmem:[#allocation2 + $0xb66] sm:$0x4] %vm4_vm0, %v1189_v14   ;;  %v1789_v21 = vld [vmem:[#allocation2 + $0x78] sm:$0x1] }
 0x245   :  { %4301 = vst [vmem:[#allocation0 + $0x1b1] sm:$0x1] %v4297_v15  ;;  %1895 = vst [vmem:[#allocation0 + $0x20] sm:$0x1] %v1891_v16  ;;  %v2557_v22 = vld [vmem:[#allocation2 + $0x478] sm:$0x1] }
 0x246   :  { %2663 = vst [vmem:[#allocation0 + $0xa0] sm:$0x1] %v2659_v17  ;;  %1203 = vst.msk [vmem:[#allocation2 + $0x2e0] sm:$0x1] %vm4_vm0, %v1200_v18   ;;  %v3325_v23 = vld [vmem:[#allocation2 + $0x878] sm:$0x1] }
 0x247   :  { %1205 = vst.msk [vmem:[#allocation2 + $0x6df] sm:$0x2] %vm4_vm0, %v1200_v18   ;;  %1207 = vst.msk [vmem:[#allocation2 + $0xade] sm:$0x4] %vm4_vm0, %v1200_v18   ;;  %v4093_v25 = vld [vmem:[#allocation2 + $0xc78] sm:$0x1] }
 0x248   :  { %3431 = vst [vmem:[#allocation0 + $0x120] sm:$0x1] %v3427_v19  ;;  %4199 = vst [vmem:[#allocation0 + $0x1a0] sm:$0x1] %v4195_v20  ;;  %v2455_v26 = vld [vmem:[#allocation2 + $0x3f0] sm:$0x1] }
 0x249   :  { %1793 = vst [vmem:[#allocation0 + $0xf] sm:$0x1] %v1789_v21  ;;  %2561 = vst [vmem:[#allocation0 + $0x8f] sm:$0x1] %v2557_v22  ;;  %v3223_v27 = vld [vmem:[#allocation2 + $0x7f0] sm:$0x1] }
 0x24a   :  { %3329 = vst [vmem:[#allocation0 + $0x10f] sm:$0x1] %v3325_v23  ;;  %1214 = vst.msk [vmem:[#allocation2 + $0x258] sm:$0x1] %vm4_vm0, %v1211_v24   ;;  %v3991_v29 = vld [vmem:[#allocation2 + $0xbf0] sm:$0x1] }
 0x24b   :  { %1216 = vst.msk [vmem:[#allocation2 + $0x657] sm:$0x2] %vm4_vm0, %v1211_v24   ;;  %1218 = vst.msk [vmem:[#allocation2 + $0xa56] sm:$0x4] %vm4_vm0, %v1211_v24   ;;  %v2353_v30 = vld [vmem:[#allocation2 + $0x368] sm:$0x1] }
 0x24c   :  { %4097 = vst [vmem:[#allocation0 + $0x18f] sm:$0x1] %v4093_v25  ;;  %2459 = vst [vmem:[#allocation0 + $0x7e] sm:$0x1] %v2455_v26  ;;  %v3121_v31 = vld [vmem:[#allocation2 + $0x768] sm:$0x1] }
 0x24d   :  { %3227 = vst [vmem:[#allocation0 + $0xfe] sm:$0x1] %v3223_v27  ;;  %1225 = vst.msk [vmem:[#allocation2 + $0x1d0] sm:$0x1] %vm4_vm0, %v1222_v28   ;;  %v3889_v32 = vld [vmem:[#allocation2 + $0xb68] sm:$0x1] }
 0x24e   :  { %1227 = vst.msk [vmem:[#allocation2 + $0x5cf] sm:$0x2] %vm4_vm0, %v1222_v28   ;;  %1229 = vst.msk [vmem:[#allocation2 + $0x9ce] sm:$0x4] %vm4_vm0, %v1222_v28   ;;  %v2251_v34 = vld [vmem:[#allocation2 + $0x2e0] sm:$0x1] }
 0x24f   :  { %1231 = vst.msk [vmem:[#allocation2 + $0xdcd] sm:$0x8] %vm4_vm0, %v1222_v28   ;;  %3995 = vst [vmem:[#allocation0 + $0x17e] sm:$0x1] %v3991_v29  ;;  %v3019_v35 = vld [vmem:[#allocation2 + $0x6e0] sm:$0x1] }
 0x250   :  { %2357 = vst [vmem:[#allocation0 + $0x6d] sm:$0x1] %v2353_v30  ;;  %3125 = vst [vmem:[#allocation0 + $0xed] sm:$0x1] %v3121_v31  ;;  %v3787_v36 = vld [vmem:[#allocation2 + $0xae0] sm:$0x1] }
 0x251   :  { %3893 = vst [vmem:[#allocation0 + $0x16d] sm:$0x1] %v3889_v32  ;;  %1238 = vst.msk [vmem:[#allocation2 + $0x148] sm:$0x1] %vm4_vm0, %v1235_v33   ;;  %v2149_v38 = vld [vmem:[#allocation2 + $0x258] sm:$0x1] }
 0x252   :  { %1240 = vst.msk [vmem:[#allocation2 + $0x547] sm:$0x2] %vm4_vm0, %v1235_v33   ;;  %1242 = vst.msk [vmem:[#allocation2 + $0x946] sm:$0x4] %vm4_vm0, %v1235_v33   ;;  %v2917_v39 = vld [vmem:[#allocation2 + $0x658] sm:$0x1] }
 0x253   :  { %1244 = vst.msk [vmem:[#allocation2 + $0xd45] sm:$0x8] %vm4_vm0, %v1235_v33   ;;  %2255 = vst [vmem:[#allocation0 + $0x5c] sm:$0x1] %v2251_v34  ;;  %v3685_v40 = vld [vmem:[#allocation2 + $0xa58] sm:$0x1] }
 0x254   :  { %3023 = vst [vmem:[#allocation0 + $0xdc] sm:$0x1] %v3019_v35  ;;  %3791 = vst [vmem:[#allocation0 + $0x15c] sm:$0x1] %v3787_v36  ;;  %v2047_v42 = vld [vmem:[#allocation2 + $0x1d0] sm:$0x1] }
 0x255   :  { %1251 = vst.msk [vmem:[#allocation2 + $0xc0] sm:$0x1] %vm4_vm0, %v1248_v37   ;;  %1253 = vst.msk [vmem:[#allocation2 + $0x4bf] sm:$0x2] %vm4_vm0, %v1248_v37   ;;  %v2815_v43 = vld [vmem:[#allocation2 + $0x5d0] sm:$0x1] }
 0x256   :  { %1255 = vst.msk [vmem:[#allocation2 + $0x8be] sm:$0x4] %vm4_vm0, %v1248_v37   ;;  %1257 = vst.msk [vmem:[#allocation2 + $0xcbd] sm:$0x8] %vm4_vm0, %v1248_v37   ;;  %v3583_v44 = vld [vmem:[#allocation2 + $0x9d0] sm:$0x1] }
 0x257   :  { %2153 = vst [vmem:[#allocation0 + $0x4b] sm:$0x1] %v2149_v38  ;;  %2921 = vst [vmem:[#allocation0 + $0xcb] sm:$0x1] %v2917_v39  ;;  %v4351_v46 = vld [vmem:[#allocation2 + $0xdd0] sm:$0x1] }
 0x258   :  { %3689 = vst [vmem:[#allocation0 + $0x14b] sm:$0x1] %v3685_v40  ;;  %1263 = vst.msk [vmem:[#allocation2 + $0x38] sm:$0x1] %vm4_vm0, %v1260_v41   ;;  %v1945_v47 = vld [vmem:[#allocation2 + $0x148] sm:$0x1] }
 0x259   :  { %1265 = vst.msk [vmem:[#allocation2 + $0x437] sm:$0x2] %vm4_vm0, %v1260_v41   ;;  %1267 = vst.msk [vmem:[#allocation2 + $0x836] sm:$0x4] %vm4_vm0, %v1260_v41   ;;  %v2713_v48 = vld [vmem:[#allocation2 + $0x548] sm:$0x1] }
 0x25a   :  { %1269 = vst.msk [vmem:[#allocation2 + $0xc35] sm:$0x8] %vm4_vm0, %v1260_v41   ;;  %2051 = vst [vmem:[#allocation0 + $0x3a] sm:$0x1] %v2047_v42  ;;  %v3481_v49 = vld [vmem:[#allocation2 + $0x948] sm:$0x1] }
 0x25b   :  { %2819 = vst [vmem:[#allocation0 + $0xba] sm:$0x1] %v2815_v43  ;;  %3587 = vst [vmem:[#allocation0 + $0x13a] sm:$0x1] %v3583_v44  ;;  %v4249_v51 = vld [vmem:[#allocation2 + $0xd48] sm:$0x1] }
 0x25c   :  { %1276 = vst.msk [vmem:[#allocation2 + $0x3b0] sm:$0x1] %vm4_vm0, %v1273_v45   ;;  %1278 = vst.msk [vmem:[#allocation2 + $0x7af] sm:$0x2] %vm4_vm0, %v1273_v45   ;;  %v1843_v52 = vld [vmem:[#allocation2 + $0xc0] sm:$0x1] }
 0x25d   :  { %1280 = vst.msk [vmem:[#allocation2 + $0xbae] sm:$0x4] %vm4_vm0, %v1273_v45   ;;  %4355 = vst [vmem:[#allocation0 + $0x1ba] sm:$0x1] %v4351_v46  ;;  %v2611_v53 = vld [vmem:[#allocation2 + $0x4c0] sm:$0x1] }
 0x25e   :  { %1949 = vst [vmem:[#allocation0 + $0x29] sm:$0x1] %v1945_v47  ;;  %2717 = vst [vmem:[#allocation0 + $0xa9] sm:$0x1] %v2713_v48  ;;  %v3379_v55 = vld [vmem:[#allocation2 + $0x8c0] sm:$0x1] }
 0x25f   :  { %3485 = vst [vmem:[#allocation0 + $0x129] sm:$0x1] %v3481_v49  ;;  %1287 = vst.msk [vmem:[#allocation2 + $0x328] sm:$0x1] %vm4_vm0, %v1284_v50   ;;  %v4147_v56 = vld [vmem:[#allocation2 + $0xcc0] sm:$0x1] }
 0x260   :  { %1289 = vst.msk [vmem:[#allocation2 + $0x727] sm:$0x2] %vm4_vm0, %v1284_v50   ;;  %1291 = vst.msk [vmem:[#allocation2 + $0xb26] sm:$0x4] %vm4_vm0, %v1284_v50   ;;  %v1741_v57 = vld [vmem:[#allocation2 + $0x38] sm:$0x1] }
 0x261   :  { %4253 = vst [vmem:[#allocation0 + $0x1a9] sm:$0x1] %v4249_v51  ;;  %1847 = vst [vmem:[#allocation0 + $0x18] sm:$0x1] %v1843_v52  ;;  %v2509_v58 = vld [vmem:[#allocation2 + $0x438] sm:$0x1] }
 0x262   :  { %2615 = vst [vmem:[#allocation0 + $0x98] sm:$0x1] %v2611_v53  ;;  %1298 = vst.msk [vmem:[#allocation2 + $0x2a0] sm:$0x1] %vm4_vm0, %v1295_v54   ;;  %v3277_v59 = vld [vmem:[#allocation2 + $0x838] sm:$0x1] }
 0x263   :  { %1300 = vst.msk [vmem:[#allocation2 + $0x69f] sm:$0x2] %vm4_vm0, %v1295_v54   ;;  %1302 = vst.msk [vmem:[#allocation2 + $0xa9e] sm:$0x4] %vm4_vm0, %v1295_v54   ;;  %v4045_v61 = vld [vmem:[#allocation2 + $0xc38] sm:$0x1] }
 0x264   :  { %3383 = vst [vmem:[#allocation0 + $0x118] sm:$0x1] %v3379_v55  ;;  %4151 = vst [vmem:[#allocation0 + $0x198] sm:$0x1] %v4147_v56  ;;  %v2407_v62 = vld [vmem:[#allocation2 + $0x3b0] sm:$0x1] }
 0x265   :  { %1745 = vst [vmem:[#allocation0 + $0x7] sm:$0x1] %v1741_v57  ;;  %2513 = vst [vmem:[#allocation0 + $0x87] sm:$0x1] %v2509_v58  ;;  %v3175_v63 = vld [vmem:[#allocation2 + $0x7b0] sm:$0x1] }
 0x266   :  { %3281 = vst [vmem:[#allocation0 + $0x107] sm:$0x1] %v3277_v59  ;;  %1309 = vst.msk [vmem:[#allocation2 + $0x218] sm:$0x1] %vm4_vm0, %v1306_v60   ;;  %v3943_v1 = vld [vmem:[#allocation2 + $0xbb0] sm:$0x1] }
 0x267   :  { %1311 = vst.msk [vmem:[#allocation2 + $0x617] sm:$0x2] %vm4_vm0, %v1306_v60   ;;  %1313 = vst.msk [vmem:[#allocation2 + $0xa16] sm:$0x4] %vm4_vm0, %v1306_v60   ;;  %v2305_v2 = vld [vmem:[#allocation2 + $0x328] sm:$0x1] }
 0x268   :  { %4049 = vst [vmem:[#allocation0 + $0x187] sm:$0x1] %v4045_v61  ;;  %2411 = vst [vmem:[#allocation0 + $0x76] sm:$0x1] %v2407_v62  ;;  %v3073_v3 = vld [vmem:[#allocation2 + $0x728] sm:$0x1] }
 0x269   :  { %3179 = vst [vmem:[#allocation0 + $0xf6] sm:$0x1] %v3175_v63  ;;  %1320 = vst.msk [vmem:[#allocation2 + $0x190] sm:$0x1] %vm4_vm0, %v1317_v0   ;;  %v3841_v4 = vld [vmem:[#allocation2 + $0xb28] sm:$0x1] }
 0x26a   :  { %1322 = vst.msk [vmem:[#allocation2 + $0x58f] sm:$0x2] %vm4_vm0, %v1317_v0   ;;  %1324 = vst.msk [vmem:[#allocation2 + $0x98e] sm:$0x4] %vm4_vm0, %v1317_v0   ;;  %v2203_v6 = vld [vmem:[#allocation2 + $0x2a0] sm:$0x1] }
 0x26b   :  { %1326 = vst.msk [vmem:[#allocation2 + $0xd8d] sm:$0x8] %vm4_vm0, %v1317_v0   ;;  %3947 = vst [vmem:[#allocation0 + $0x176] sm:$0x1] %v3943_v1  ;;  %v2971_v7 = vld [vmem:[#allocation2 + $0x6a0] sm:$0x1] }
 0x26c   :  { %2309 = vst [vmem:[#allocation0 + $0x65] sm:$0x1] %v2305_v2  ;;  %3077 = vst [vmem:[#allocation0 + $0xe5] sm:$0x1] %v3073_v3  ;;  %v3739_v8 = vld [vmem:[#allocation2 + $0xaa0] sm:$0x1] }
 0x26d   :  { %3845 = vst [vmem:[#allocation0 + $0x165] sm:$0x1] %v3841_v4  ;;  %1333 = vst.msk [vmem:[#allocation2 + $0x108] sm:$0x1] %vm4_vm0, %v1330_v5   ;;  %v2101_v10 = vld [vmem:[#allocation2 + $0x218] sm:$0x1] }
 0x26e   :  { %1335 = vst.msk [vmem:[#allocation2 + $0x507] sm:$0x2] %vm4_vm0, %v1330_v5   ;;  %1337 = vst.msk [vmem:[#allocation2 + $0x906] sm:$0x4] %vm4_vm0, %v1330_v5   ;;  %v2869_v11 = vld [vmem:[#allocation2 + $0x618] sm:$0x1] }
 0x26f   :  { %1339 = vst.msk [vmem:[#allocation2 + $0xd05] sm:$0x8] %vm4_vm0, %v1330_v5   ;;  %2207 = vst [vmem:[#allocation0 + $0x54] sm:$0x1] %v2203_v6  ;;  %v3637_v12 = vld [vmem:[#allocation2 + $0xa18] sm:$0x1] }
 0x270   :  { %2975 = vst [vmem:[#allocation0 + $0xd4] sm:$0x1] %v2971_v7  ;;  %3743 = vst [vmem:[#allocation0 + $0x154] sm:$0x1] %v3739_v8  ;;  %v1999_v14 = vld [vmem:[#allocation2 + $0x190] sm:$0x1] }
 0x271   :  { %1346 = vst.msk [vmem:[#allocation2 + $0x80] sm:$0x1] %vm4_vm0, %v1343_v9   ;;  %1348 = vst.msk [vmem:[#allocation2 + $0x47f] sm:$0x2] %vm4_vm0, %v1343_v9   ;;  %v2767_v15 = vld [vmem:[#allocation2 + $0x590] sm:$0x1] }
 0x272   :  { %1350 = vst.msk [vmem:[#allocation2 + $0x87e] sm:$0x4] %vm4_vm0, %v1343_v9   ;;  %1352 = vst.msk [vmem:[#allocation2 + $0xc7d] sm:$0x8] %vm4_vm0, %v1343_v9   ;;  %v3535_v16 = vld [vmem:[#allocation2 + $0x990] sm:$0x1] }
 0x273   :  { %2105 = vst [vmem:[#allocation0 + $0x43] sm:$0x1] %v2101_v10  ;;  %2873 = vst [vmem:[#allocation0 + $0xc3] sm:$0x1] %v2869_v11  ;;  %v4303_v17 = vld [vmem:[#allocation2 + $0xd90] sm:$0x1] }
 0x274   :  { %3641 = vst [vmem:[#allocation0 + $0x143] sm:$0x1] %v3637_v12  ;;  %1359 = vst.msk [vmem:[#allocation2 + $0x3f8] sm:$0x1] %vm4_vm0, %v1356_v13   ;;  %v1897_v18 = vld [vmem:[#allocation2 + $0x108] sm:$0x1] }
 0x275   :  { %1361 = vst.msk [vmem:[#allocation2 + $0x7f7] sm:$0x2] %vm4_vm0, %v1356_v13   ;;  %1363 = vst.msk [vmem:[#allocation2 + $0xbf6] sm:$0x4] %vm4_vm0, %v1356_v13   ;;  %v2665_v19 = vld [vmem:[#allocation2 + $0x508] sm:$0x1] }
 0x276   :  { %2003 = vst [vmem:[#allocation0 + $0x32] sm:$0x1] %v1999_v14  ;;  %2771 = vst [vmem:[#allocation0 + $0xb2] sm:$0x1] %v2767_v15  ;;  %v3433_v20 = vld [vmem:[#allocation2 + $0x908] sm:$0x1] }
 0x277   :  { %3539 = vst [vmem:[#allocation0 + $0x132] sm:$0x1] %v3535_v16  ;;  %4307 = vst [vmem:[#allocation0 + $0x1b2] sm:$0x1] %v4303_v17  ;;  %v4201_v21 = vld [vmem:[#allocation2 + $0xd08] sm:$0x1] }
 0x278   :  { %1901 = vst [vmem:[#allocation0 + $0x21] sm:$0x1] %v1897_v18  ;;  %2669 = vst [vmem:[#allocation0 + $0xa1] sm:$0x1] %v2665_v19  ;;  %v1795_v22 = vld [vmem:[#allocation2 + $0x80] sm:$0x1] }
 0x279   :  { %3437 = vst [vmem:[#allocation0 + $0x121] sm:$0x1] %v3433_v20  ;;  %v2563_v23 = vld [vmem:[#allocation2 + $0x480] sm:$0x1]  ;;  %4205 = vst [vmem:[#allocation0 + $0x1a1] sm:$0x1] %v4201_v21 }
 0x27a   :  { %1799 = vst [vmem:[#allocation0 + $0x10] sm:$0x1] %v1795_v22  ;;  %2567 = vst [vmem:[#allocation0 + $0x90] sm:$0x1] %v2563_v23  ;;  %v3331_v24 = vld [vmem:[#allocation2 + $0x880] sm:$0x1] }
 0x27b   :  { %v4099_v25 = vld [vmem:[#allocation2 + $0xc80] sm:$0x1]  ;;  %3335 = vst [vmem:[#allocation0 + $0x110] sm:$0x1] %v3331_v24  ;;  %v2461_v26 = vld [vmem:[#allocation2 + $0x3f8] sm:$0x1] }
 0x27c   :  { %4103 = vst [vmem:[#allocation0 + $0x190] sm:$0x1] %v4099_v25  ;;  %v3229_v27 = vld [vmem:[#allocation2 + $0x7f8] sm:$0x1]  ;;  %2465 = vst [vmem:[#allocation0 + $0x7f] sm:$0x1] %v2461_v26 }
 0x27d   :  { %v3997_v28 = vld [vmem:[#allocation2 + $0xbf8] sm:$0x1]  ;;  %3233 = vst [vmem:[#allocation0 + $0xff] sm:$0x1] %v3229_v27 }
 0x27e   :  { %4001 = vst [vmem:[#allocation0 + $0x17f] sm:$0x1] %v3997_v28 }
 0x27f   :  { %5128 = shalt.err (!%p5125_p4)
}
 0x280   :  { %s5129_s15 = scalar_lea.hbm %s6231_s1, 7200 }
 0x281   :  { %p5130_p5 = scmp.ne.s32.totalorder %s6231_s1, %s5129_s15  ;;  %p5133_p6 = scmp.lt.u32.totalorder %s5129_s15, %s6231_s1 }
 0x283   :  { %p5135_p7 = pnand %p5133_p6, %p5130_p5 }
 0x285   :  { %5138 = shalt.err (!%p5135_p7)
}
 0x286   :  { %4405 = dma.vmem_to_hbm [thread:$0]  %s4403_s11, 7200, %s6231_s1, [#allocation1]  }
 0x287   :  { %5139 = dma.done.wait [#allocation1], 7200  }
 0x288   :  { %5140 = vsyncadd [#allocation1], 4294960096 }
 0x289   :  { %4407 = vsyncpa [#allocation1], 1 }

// kernel: _forward_impl.1
= control target key start
LH: loop header
LB: loop body
LE: loop exit
PB: predicated region body
PF: predicated region fallthrough
CT: control target
= control target key end

     0   :  { %s5621_s0 = inlined_call_operand.vmem [shape: bf16[16,81], index: 0, kind: input, shape index: {}]   ;;  %s5622_s1 = inlined_call_operand.vmem [shape: bf16[81,7168], index: 1, kind: input, shape index: {}]   ;;  %s5623_s2 = inlined_call_operand.vmem [shape: f32[16,1], index: 2, kind: input, shape index: {}]   ;;  %s5624_s3 = inlined_call_operand.<no memory space> [shape: f32[1,1], index: 3, kind: input, shape index: {}]   ;;  %s5625_s4 = inlined_call_operand.vmem [shape: f32[1,7168], index: 4, kind: output, shape index: {}]  }
   0x1   :  { %v9_v0 = vstv %s5624_s3 }
   0x2   :  { %10 = vst [vmem:[#allocation2] sm:$0x1] %v9_v0 }
   0x3   :  { %s4271_s17 = smov 0   ;;  %s4273_s18 = smov 0  }
   0x4   :  { %s4275_s19 = smov 0  }
   0x5 LB: > { %s3476_s3 = sadd.s32 4294967295, %s4239_s19   ;;  %s4288_s20 = sadd.s32 1, %s4239_s19   ;;  %s4239_s19 = sphi %s4275_s19, %s5638_s19   ;;  %s4235_s18 = sphi %s4273_s18, %s5637_s18   ;;  %s4231_s17 = sphi %s4271_s17, %s5636_s17  }
   0x6   : > { %s41_s21 = ssub.s32 %s4239_s19, %s4288_s20  ;;  %s44_s22 = sadd.s32 1, %s4235_s18 }
   0x7   : > { %p42_p0 = scmp.eq.s32.totalorder %s41_s21, 0  ;;  %p51_p1 = scmp.ne.s32.totalorder %s4235_s18, %s4231_s17 }
   0x8   : > { %p52_p2 = scmp.eq.s32.totalorder %s4239_s19, 0  ;;  %p3479_p4 = scmp.ge.s32.totalorder %s4239_s19, 2 }
   0x9   : > { %s4297_s23 = scalar_select %p42_p0, %s4235_s18, %s44_s22  }
   0xa   : > { %p53_p3 = por %p52_p2, %p51_p1  ;;  %154 = sbr.rel (%p3479_p4) target bundleno = 99 (0x63), region = 28 }
  0x11   : > { %157 = sbr.rel (!%p53_p3) target bundleno = 99 (0x63), region = 32  ;;  %s159_s24 = sand.u32 (%p53_p3), 1, %s4235_s18  }
  0x12   : > { %s3723_s25 = smul.u32 (%p53_p3), 112, %s4239_s19 }
  0x13   : > { %s3724_s26 = smul.u32 (%p53_p3), 1232, %s159_s24 }
  0x14   : > { %s4305_s29 = scalar_lea.vmem (%p53_p3), %s5622_s1, %s3723_s25 }
  0x15   : > { %v177_v1 = vld [vmem:[%s4305_s29] sm:$0xff] (%p53_p3)  ;;  %v179_v2 = vld [vmem:[%s4305_s29 + $0x8] sm:$0xff] (%p53_p3)  ;;  %v181_v3 = vld [vmem:[%s4305_s29 + $0x10] sm:$0xff] (%p53_p3)  ;;  %s4310_s30 = scalar_lea.vmem (%p53_p3), [#allocation3], %s3724_s26 }
  0x16   : > { %178 = vst [vmem:[%s4310_s30] sm:$0xff] (%p53_p3), %v177_v1  ;;  %180 = vst [vmem:[%s4310_s30 + $0x8] sm:$0xff] (%p53_p3), %v179_v2  ;;  %v183_v4 = vld [vmem:[%s4305_s29 + $0x18] sm:$0xff] (%p53_p3)  ;;  %v185_v5 = vld [vmem:[%s4305_s29 + $0x20] sm:$0xff] (%p53_p3) }
  0x17   : > { %182 = vst [vmem:[%s4310_s30 + $0x10] sm:$0xff] (%p53_p3), %v181_v3  ;;  %v187_v6 = vld [vmem:[%s4305_s29 + $0x28] sm:$0xff] (%p53_p3)  ;;  %184 = vst [vmem:[%s4310_s30 + $0x18] sm:$0xff] (%p53_p3), %v183_v4  ;;  %v189_v7 = vld [vmem:[%s4305_s29 + $0x30] sm:$0xff] (%p53_p3) }
  0x18   : > { %186 = vst [vmem:[%s4310_s30 + $0x20] sm:$0xff] %v185_v5  ;;  %188 = vst [vmem:[%s4310_s30 + $0x28] sm:$0xff] %v187_v6  ;;  %v191_v8 = vld [vmem:[%s4305_s29 + $0x38] sm:$0xff]  ;;  %v193_v9 = vld [vmem:[%s4305_s29 + $0x40] sm:$0xff] }
  0x19   : > { %190 = vst [vmem:[%s4310_s30 + $0x30] sm:$0xff] %v189_v7  ;;  %192 = vst [vmem:[%s4310_s30 + $0x38] sm:$0xff] %v191_v8  ;;  %v195_v10 = vld [vmem:[%s4305_s29 + $0x48] sm:$0xff]  ;;  %v197_v11 = vld [vmem:[%s4305_s29 + $0x50] sm:$0xff] }
  0x1a   : > { %194 = vst [vmem:[%s4310_s30 + $0x40] sm:$0xff] %v193_v9  ;;  %v199_v12 = vld [vmem:[%s4305_s29 + $0x58] sm:$0xff]  ;;  %196 = vst [vmem:[%s4310_s30 + $0x48] sm:$0xff] %v195_v10  ;;  %v201_v13 = vld [vmem:[%s4305_s29 + $0x60] sm:$0xff] }
  0x1b   : > { %198 = vst [vmem:[%s4310_s30 + $0x50] sm:$0xff] %v197_v11  ;;  %200 = vst [vmem:[%s4310_s30 + $0x58] sm:$0xff] %v199_v12  ;;  %v203_v14 = vld [vmem:[%s4305_s29 + $0x68] sm:$0xff]  ;;  %v205_v15 = vld [vmem:[%s4305_s29 + $0xe0] sm:$0xff] }
  0x1c   : > { %202 = vst [vmem:[%s4310_s30 + $0x60] sm:$0xff] %v201_v13  ;;  %204 = vst [vmem:[%s4310_s30 + $0x68] sm:$0xff] %v203_v14  ;;  %v207_v16 = vld [vmem:[%s4305_s29 + $0xe8] sm:$0xff]  ;;  %v209_v17 = vld [vmem:[%s4305_s29 + $0xf0] sm:$0xff] }
  0x1d   : > { %206 = vst [vmem:[%s4310_s30 + $0x70] sm:$0xff] %v205_v15  ;;  %v211_v18 = vld [vmem:[%s4305_s29 + $0xf8] sm:$0xff]  ;;  %208 = vst [vmem:[%s4310_s30 + $0x78] sm:$0xff] %v207_v16  ;;  %v213_v19 = vld [vmem:[%s4305_s29 + $0x100] sm:$0xff] }
  0x1e   : > { %210 = vst [vmem:[%s4310_s30 + $0x80] sm:$0xff] %v209_v17  ;;  %212 = vst [vmem:[%s4310_s30 + $0x88] sm:$0xff] %v211_v18  ;;  %v215_v20 = vld [vmem:[%s4305_s29 + $0x108] sm:$0xff]  ;;  %v217_v21 = vld [vmem:[%s4305_s29 + $0x110] sm:$0xff] }
  0x1f   : > { %214 = vst [vmem:[%s4310_s30 + $0x90] sm:$0xff] %v213_v19  ;;  %216 = vst [vmem:[%s4310_s30 + $0x98] sm:$0xff] %v215_v20  ;;  %v219_v22 = vld [vmem:[%s4305_s29 + $0x118] sm:$0xff]  ;;  %v221_v23 = vld [vmem:[%s4305_s29 + $0x120] sm:$0xff] }
  0x20   : > { %218 = vst [vmem:[%s4310_s30 + $0xa0] sm:$0xff] %v217_v21  ;;  %v223_v24 = vld [vmem:[%s4305_s29 + $0x128] sm:$0xff]  ;;  %220 = vst [vmem:[%s4310_s30 + $0xa8] sm:$0xff] %v219_v22  ;;  %v225_v25 = vld [vmem:[%s4305_s29 + $0x130] sm:$0xff] }
  0x21   : > { %222 = vst [vmem:[%s4310_s30 + $0xb0] sm:$0xff] %v221_v23  ;;  %224 = vst [vmem:[%s4310_s30 + $0xb8] sm:$0xff] %v223_v24  ;;  %v227_v26 = vld [vmem:[%s4305_s29 + $0x138] sm:$0xff]  ;;  %v229_v27 = vld [vmem:[%s4305_s29 + $0x140] sm:$0xff] }
  0x22   : > { %226 = vst [vmem:[%s4310_s30 + $0xc0] sm:$0xff] %v225_v25  ;;  %228 = vst [vmem:[%s4310_s30 + $0xc8] sm:$0xff] %v227_v26  ;;  %v231_v28 = vld [vmem:[%s4305_s29 + $0x148] sm:$0xff]  ;;  %v233_v29 = vld [vmem:[%s4305_s29 + $0x1c0] sm:$0xff] }
  0x23   : > { %230 = vst [vmem:[%s4310_s30 + $0xd0] sm:$0xff] %v229_v27  ;;  %v235_v30 = vld [vmem:[%s4305_s29 + $0x1c8] sm:$0xff]  ;;  %232 = vst [vmem:[%s4310_s30 + $0xd8] sm:$0xff] %v231_v28  ;;  %v237_v31 = vld [vmem:[%s4305_s29 + $0x1d0] sm:$0xff] }
  0x24   : > { %234 = vst [vmem:[%s4310_s30 + $0xe0] sm:$0xff] %v233_v29  ;;  %236 = vst [vmem:[%s4310_s30 + $0xe8] sm:$0xff] %v235_v30  ;;  %v239_v32 = vld [vmem:[%s4305_s29 + $0x1d8] sm:$0xff]  ;;  %v241_v33 = vld [vmem:[%s4305_s29 + $0x1e0] sm:$0xff] }
  0x25   : > { %238 = vst [vmem:[%s4310_s30 + $0xf0] sm:$0xff] %v237_v31  ;;  %240 = vst [vmem:[%s4310_s30 + $0xf8] sm:$0xff] %v239_v32  ;;  %v243_v34 = vld [vmem:[%s4305_s29 + $0x1e8] sm:$0xff]  ;;  %v245_v35 = vld [vmem:[%s4305_s29 + $0x1f0] sm:$0xff] }
  0x26   : > { %242 = vst [vmem:[%s4310_s30 + $0x100] sm:$0xff] %v241_v33  ;;  %v247_v36 = vld [vmem:[%s4305_s29 + $0x1f8] sm:$0xff]  ;;  %244 = vst [vmem:[%s4310_s30 + $0x108] sm:$0xff] %v243_v34  ;;  %v249_v37 = vld [vmem:[%s4305_s29 + $0x200] sm:$0xff] }
  0x27   : > { %246 = vst [vmem:[%s4310_s30 + $0x110] sm:$0xff] %v245_v35  ;;  %248 = vst [vmem:[%s4310_s30 + $0x118] sm:$0xff] %v247_v36  ;;  %v251_v38 = vld [vmem:[%s4305_s29 + $0x208] sm:$0xff]  ;;  %v253_v39 = vld [vmem:[%s4305_s29 + $0x210] sm:$0xff] }
  0x28   : > { %250 = vst [vmem:[%s4310_s30 + $0x120] sm:$0xff] %v249_v37  ;;  %252 = vst [vmem:[%s4310_s30 + $0x128] sm:$0xff] %v251_v38  ;;  %v255_v40 = vld [vmem:[%s4305_s29 + $0x218] sm:$0xff]  ;;  %v257_v41 = vld [vmem:[%s4305_s29 + $0x220] sm:$0xff] }
  0x29   : > { %254 = vst [vmem:[%s4310_s30 + $0x130] sm:$0xff] %v253_v39  ;;  %v259_v42 = vld [vmem:[%s4305_s29 + $0x228] sm:$0xff]  ;;  %256 = vst [vmem:[%s4310_s30 + $0x138] sm:$0xff] %v255_v40  ;;  %v261_v43 = vld [vmem:[%s4305_s29 + $0x2a0] sm:$0xff] }
  0x2a   : > { %258 = vst [vmem:[%s4310_s30 + $0x140] sm:$0xff] %v257_v41  ;;  %260 = vst [vmem:[%s4310_s30 + $0x148] sm:$0xff] %v259_v42  ;;  %v263_v44 = vld [vmem:[%s4305_s29 + $0x2a8] sm:$0xff]  ;;  %v265_v45 = vld [vmem:[%s4305_s29 + $0x2b0] sm:$0xff] }
  0x2b   : > { %262 = vst [vmem:[%s4310_s30 + $0x150] sm:$0xff] %v261_v43  ;;  %264 = vst [vmem:[%s4310_s30 + $0x158] sm:$0xff] %v263_v44  ;;  %v267_v46 = vld [vmem:[%s4305_s29 + $0x2b8] sm:$0xff]  ;;  %v269_v47 = vld [vmem:[%s4305_s29 + $0x2c0] sm:$0xff] }
  0x2c   : > { %266 = vst [vmem:[%s4310_s30 + $0x160] sm:$0xff] %v265_v45  ;;  %v271_v48 = vld [vmem:[%s4305_s29 + $0x2c8] sm:$0xff]  ;;  %268 = vst [vmem:[%s4310_s30 + $0x168] sm:$0xff] %v267_v46  ;;  %v273_v49 = vld [vmem:[%s4305_s29 + $0x2d0] sm:$0xff] }
  0x2d   : > { %270 = vst [vmem:[%s4310_s30 + $0x170] sm:$0xff] %v269_v47  ;;  %272 = vst [vmem:[%s4310_s30 + $0x178] sm:$0xff] %v271_v48  ;;  %v275_v50 = vld [vmem:[%s4305_s29 + $0x2d8] sm:$0xff]  ;;  %v277_v51 = vld [vmem:[%s4305_s29 + $0x2e0] sm:$0xff] }
  0x2e   : > { %274 = vst [vmem:[%s4310_s30 + $0x180] sm:$0xff] %v273_v49  ;;  %276 = vst [vmem:[%s4310_s30 + $0x188] sm:$0xff] %v275_v50  ;;  %v279_v52 = vld [vmem:[%s4305_s29 + $0x2e8] sm:$0xff]  ;;  %v281_v53 = vld [vmem:[%s4305_s29 + $0x2f0] sm:$0xff] }
  0x2f   : > { %278 = vst [vmem:[%s4310_s30 + $0x190] sm:$0xff] %v277_v51  ;;  %v283_v54 = vld [vmem:[%s4305_s29 + $0x2f8] sm:$0xff]  ;;  %280 = vst [vmem:[%s4310_s30 + $0x198] sm:$0xff] %v279_v52  ;;  %v285_v55 = vld [vmem:[%s4305_s29 + $0x300] sm:$0xff] }
  0x30   : > { %282 = vst [vmem:[%s4310_s30 + $0x1a0] sm:$0xff] %v281_v53  ;;  %284 = vst [vmem:[%s4310_s30 + $0x1a8] sm:$0xff] %v283_v54  ;;  %v287_v56 = vld [vmem:[%s4305_s29 + $0x308] sm:$0xff]  ;;  %v289_v57 = vld [vmem:[%s4305_s29 + $0x380] sm:$0xff] }
  0x31   : > { %286 = vst [vmem:[%s4310_s30 + $0x1b0] sm:$0xff] %v285_v55  ;;  %288 = vst [vmem:[%s4310_s30 + $0x1b8] sm:$0xff] %v287_v56  ;;  %v291_v58 = vld [vmem:[%s4305_s29 + $0x388] sm:$0xff]  ;;  %v293_v59 = vld [vmem:[%s4305_s29 + $0x390] sm:$0xff] }
  0x32   : > { %290 = vst [vmem:[%s4310_s30 + $0x1c0] sm:$0xff] %v289_v57  ;;  %v295_v60 = vld [vmem:[%s4305_s29 + $0x398] sm:$0xff]  ;;  %292 = vst [vmem:[%s4310_s30 + $0x1c8] sm:$0xff] %v291_v58  ;;  %v297_v61 = vld [vmem:[%s4305_s29 + $0x3a0] sm:$0xff] }
  0x33   : > { %294 = vst [vmem:[%s4310_s30 + $0x1d0] sm:$0xff] %v293_v59  ;;  %296 = vst [vmem:[%s4310_s30 + $0x1d8] sm:$0xff] %v295_v60  ;;  %v299_v62 = vld [vmem:[%s4305_s29 + $0x3a8] sm:$0xff]  ;;  %v301_v63 = vld [vmem:[%s4305_s29 + $0x3b0] sm:$0xff] }
  0x34   : > { %298 = vst [vmem:[%s4310_s30 + $0x1e0] sm:$0xff] %v297_v61  ;;  %300 = vst [vmem:[%s4310_s30 + $0x1e8] sm:$0xff] %v299_v62  ;;  %v303_v0 = vld [vmem:[%s4305_s29 + $0x3b8] sm:$0xff]  ;;  %v305_v1 = vld [vmem:[%s4305_s29 + $0x3c0] sm:$0xff] }
  0x35   : > { %302 = vst [vmem:[%s4310_s30 + $0x1f0] sm:$0xff] %v301_v63  ;;  %v307_v2 = vld [vmem:[%s4305_s29 + $0x3c8] sm:$0xff]  ;;  %304 = vst [vmem:[%s4310_s30 + $0x1f8] sm:$0xff] %v303_v0  ;;  %v309_v3 = vld [vmem:[%s4305_s29 + $0x3d0] sm:$0xff] }
  0x36   : > { %306 = vst [vmem:[%s4310_s30 + $0x200] sm:$0xff] %v305_v1  ;;  %308 = vst [vmem:[%s4310_s30 + $0x208] sm:$0xff] %v307_v2  ;;  %v311_v4 = vld [vmem:[%s4305_s29 + $0x3d8] sm:$0xff]  ;;  %v313_v5 = vld [vmem:[%s4305_s29 + $0x3e0] sm:$0xff] }
  0x37   : > { %310 = vst [vmem:[%s4310_s30 + $0x210] sm:$0xff] %v309_v3  ;;  %312 = vst [vmem:[%s4310_s30 + $0x218] sm:$0xff] %v311_v4  ;;  %v315_v6 = vld [vmem:[%s4305_s29 + $0x3e8] sm:$0xff]  ;;  %v317_v7 = vld [vmem:[%s4305_s29 + $0x460] sm:$0xff] }
  0x38   : > { %314 = vst [vmem:[%s4310_s30 + $0x220] sm:$0xff] %v313_v5  ;;  %v319_v8 = vld [vmem:[%s4305_s29 + $0x468] sm:$0xff]  ;;  %316 = vst [vmem:[%s4310_s30 + $0x228] sm:$0xff] %v315_v6  ;;  %v321_v9 = vld [vmem:[%s4305_s29 + $0x470] sm:$0xff] }
  0x39   : > { %318 = vst [vmem:[%s4310_s30 + $0x230] sm:$0xff] %v317_v7  ;;  %320 = vst [vmem:[%s4310_s30 + $0x238] sm:$0xff] %v319_v8  ;;  %v323_v10 = vld [vmem:[%s4305_s29 + $0x478] sm:$0xff]  ;;  %v325_v11 = vld [vmem:[%s4305_s29 + $0x480] sm:$0xff] }
  0x3a   : > { %322 = vst [vmem:[%s4310_s30 + $0x240] sm:$0xff] %v321_v9  ;;  %324 = vst [vmem:[%s4310_s30 + $0x248] sm:$0xff] %v323_v10  ;;  %v327_v12 = vld [vmem:[%s4305_s29 + $0x488] sm:$0xff]  ;;  %v329_v13 = vld [vmem:[%s4305_s29 + $0x490] sm:$0xff] }
  0x3b   : > { %326 = vst [vmem:[%s4310_s30 + $0x250] sm:$0xff] %v325_v11  ;;  %v331_v14 = vld [vmem:[%s4305_s29 + $0x498] sm:$0xff]  ;;  %328 = vst [vmem:[%s4310_s30 + $0x258] sm:$0xff] %v327_v12  ;;  %v333_v15 = vld [vmem:[%s4305_s29 + $0x4a0] sm:$0xff] }
  0x3c   : > { %330 = vst [vmem:[%s4310_s30 + $0x260] sm:$0xff] %v329_v13  ;;  %332 = vst [vmem:[%s4310_s30 + $0x268] sm:$0xff] %v331_v14  ;;  %v335_v16 = vld [vmem:[%s4305_s29 + $0x4a8] sm:$0xff]  ;;  %v337_v17 = vld [vmem:[%s4305_s29 + $0x4b0] sm:$0xff] }
  0x3d   : > { %334 = vst [vmem:[%s4310_s30 + $0x270] sm:$0xff] %v333_v15  ;;  %336 = vst [vmem:[%s4310_s30 + $0x278] sm:$0xff] %v335_v16  ;;  %v339_v18 = vld [vmem:[%s4305_s29 + $0x4b8] sm:$0xff]  ;;  %v341_v19 = vld [vmem:[%s4305_s29 + $0x4c0] sm:$0xff] }
  0x3e   : > { %338 = vst [vmem:[%s4310_s30 + $0x280] sm:$0xff] %v337_v17  ;;  %v343_v20 = vld [vmem:[%s4305_s29 + $0x4c8] sm:$0xff]  ;;  %340 = vst [vmem:[%s4310_s30 + $0x288] sm:$0xff] %v339_v18  ;;  %v345_v21 = vld [vmem:[%s4305_s29 + $0x540] sm:$0xff] }
  0x3f   : > { %342 = vst [vmem:[%s4310_s30 + $0x290] sm:$0xff] %v341_v19  ;;  %344 = vst [vmem:[%s4310_s30 + $0x298] sm:$0xff] %v343_v20  ;;  %v347_v22 = vld [vmem:[%s4305_s29 + $0x548] sm:$0xff]  ;;  %v349_v23 = vld [vmem:[%s4305_s29 + $0x550] sm:$0xff] }
  0x40   : > { %346 = vst [vmem:[%s4310_s30 + $0x2a0] sm:$0xff] %v345_v21  ;;  %348 = vst [vmem:[%s4310_s30 + $0x2a8] sm:$0xff] %v347_v22  ;;  %v351_v24 = vld [vmem:[%s4305_s29 + $0x558] sm:$0xff]  ;;  %v353_v25 = vld [vmem:[%s4305_s29 + $0x560] sm:$0xff] }
  0x41   : > { %350 = vst [vmem:[%s4310_s30 + $0x2b0] sm:$0xff] %v349_v23  ;;  %v355_v26 = vld [vmem:[%s4305_s29 + $0x568] sm:$0xff]  ;;  %352 = vst [vmem:[%s4310_s30 + $0x2b8] sm:$0xff] %v351_v24  ;;  %v357_v27 = vld [vmem:[%s4305_s29 + $0x570] sm:$0xff] }
  0x42   : > { %354 = vst [vmem:[%s4310_s30 + $0x2c0] sm:$0xff] %v353_v25  ;;  %356 = vst [vmem:[%s4310_s30 + $0x2c8] sm:$0xff] %v355_v26  ;;  %v359_v28 = vld [vmem:[%s4305_s29 + $0x578] sm:$0xff]  ;;  %v361_v29 = vld [vmem:[%s4305_s29 + $0x580] sm:$0xff] }
  0x43   : > { %358 = vst [vmem:[%s4310_s30 + $0x2d0] sm:$0xff] %v357_v27  ;;  %360 = vst [vmem:[%s4310_s30 + $0x2d8] sm:$0xff] %v359_v28  ;;  %v363_v30 = vld [vmem:[%s4305_s29 + $0x588] sm:$0xff]  ;;  %v365_v31 = vld [vmem:[%s4305_s29 + $0x590] sm:$0xff] }
  0x44   : > { %362 = vst [vmem:[%s4310_s30 + $0x2e0] sm:$0xff] %v361_v29  ;;  %v367_v32 = vld [vmem:[%s4305_s29 + $0x598] sm:$0xff]  ;;  %364 = vst [vmem:[%s4310_s30 + $0x2e8] sm:$0xff] %v363_v30  ;;  %v369_v33 = vld [vmem:[%s4305_s29 + $0x5a0] sm:$0xff] }
  0x45   : > { %366 = vst [vmem:[%s4310_s30 + $0x2f0] sm:$0xff] %v365_v31  ;;  %368 = vst [vmem:[%s4310_s30 + $0x2f8] sm:$0xff] %v367_v32  ;;  %v371_v34 = vld [vmem:[%s4305_s29 + $0x5a8] sm:$0xff]  ;;  %v373_v35 = vld [vmem:[%s4305_s29 + $0x620] sm:$0xff] }
  0x46   : > { %370 = vst [vmem:[%s4310_s30 + $0x300] sm:$0xff] %v369_v33  ;;  %372 = vst [vmem:[%s4310_s30 + $0x308] sm:$0xff] %v371_v34  ;;  %v375_v36 = vld [vmem:[%s4305_s29 + $0x628] sm:$0xff]  ;;  %v377_v37 = vld [vmem:[%s4305_s29 + $0x630] sm:$0xff] }
  0x47   : > { %374 = vst [vmem:[%s4310_s30 + $0x310] sm:$0xff] %v373_v35  ;;  %v379_v38 = vld [vmem:[%s4305_s29 + $0x638] sm:$0xff]  ;;  %376 = vst [vmem:[%s4310_s30 + $0x318] sm:$0xff] %v375_v36  ;;  %v381_v39 = vld [vmem:[%s4305_s29 + $0x640] sm:$0xff] }
  0x48   : > { %378 = vst [vmem:[%s4310_s30 + $0x320] sm:$0xff] %v377_v37  ;;  %380 = vst [vmem:[%s4310_s30 + $0x328] sm:$0xff] %v379_v38  ;;  %v383_v40 = vld [vmem:[%s4305_s29 + $0x648] sm:$0xff]  ;;  %v385_v41 = vld [vmem:[%s4305_s29 + $0x650] sm:$0xff] }
  0x49   : > { %382 = vst [vmem:[%s4310_s30 + $0x330] sm:$0xff] %v381_v39  ;;  %384 = vst [vmem:[%s4310_s30 + $0x338] sm:$0xff] %v383_v40  ;;  %v387_v42 = vld [vmem:[%s4305_s29 + $0x658] sm:$0xff]  ;;  %v389_v43 = vld [vmem:[%s4305_s29 + $0x660] sm:$0xff] }
  0x4a   : > { %386 = vst [vmem:[%s4310_s30 + $0x340] sm:$0xff] %v385_v41  ;;  %v391_v44 = vld [vmem:[%s4305_s29 + $0x668] sm:$0xff]  ;;  %388 = vst [vmem:[%s4310_s30 + $0x348] sm:$0xff] %v387_v42  ;;  %v393_v45 = vld [vmem:[%s4305_s29 + $0x670] sm:$0xff] }
  0x4b   : > { %390 = vst [vmem:[%s4310_s30 + $0x350] sm:$0xff] %v389_v43  ;;  %392 = vst [vmem:[%s4310_s30 + $0x358] sm:$0xff] %v391_v44  ;;  %v395_v46 = vld [vmem:[%s4305_s29 + $0x678] sm:$0xff]  ;;  %v397_v47 = vld [vmem:[%s4305_s29 + $0x680] sm:$0xff] }
  0x4c   : > { %394 = vst [vmem:[%s4310_s30 + $0x360] sm:$0xff] %v393_v45  ;;  %396 = vst [vmem:[%s4310_s30 + $0x368] sm:$0xff] %v395_v46  ;;  %v399_v48 = vld [vmem:[%s4305_s29 + $0x688] sm:$0xff]  ;;  %v401_v49 = vld [vmem:[%s4305_s29 + $0x700] sm:$0xff] }
  0x4d   : > { %398 = vst [vmem:[%s4310_s30 + $0x370] sm:$0xff] %v397_v47  ;;  %v403_v50 = vld [vmem:[%s4305_s29 + $0x708] sm:$0xff]  ;;  %400 = vst [vmem:[%s4310_s30 + $0x378] sm:$0xff] %v399_v48  ;;  %v405_v51 = vld [vmem:[%s4305_s29 + $0x710] sm:$0xff] }
  0x4e   : > { %402 = vst [vmem:[%s4310_s30 + $0x380] sm:$0xff] %v401_v49  ;;  %404 = vst [vmem:[%s4310_s30 + $0x388] sm:$0xff] %v403_v50  ;;  %v407_v52 = vld [vmem:[%s4305_s29 + $0x718] sm:$0xff]  ;;  %v409_v53 = vld [vmem:[%s4305_s29 + $0x720] sm:$0xff] }
  0x4f   : > { %406 = vst [vmem:[%s4310_s30 + $0x390] sm:$0xff] %v405_v51  ;;  %408 = vst [vmem:[%s4310_s30 + $0x398] sm:$0xff] %v407_v52  ;;  %v411_v54 = vld [vmem:[%s4305_s29 + $0x728] sm:$0xff]  ;;  %v413_v55 = vld [vmem:[%s4305_s29 + $0x730] sm:$0xff] }
  0x50   : > { %410 = vst [vmem:[%s4310_s30 + $0x3a0] sm:$0xff] %v409_v53  ;;  %v415_v56 = vld [vmem:[%s4305_s29 + $0x738] sm:$0xff]  ;;  %412 = vst [vmem:[%s4310_s30 + $0x3a8] sm:$0xff] %v411_v54  ;;  %v417_v57 = vld [vmem:[%s4305_s29 + $0x740] sm:$0xff] }
  0x51   : > { %414 = vst [vmem:[%s4310_s30 + $0x3b0] sm:$0xff] %v413_v55  ;;  %416 = vst [vmem:[%s4310_s30 + $0x3b8] sm:$0xff] %v415_v56  ;;  %v419_v58 = vld [vmem:[%s4305_s29 + $0x748] sm:$0xff]  ;;  %v421_v59 = vld [vmem:[%s4305_s29 + $0x750] sm:$0xff] }
  0x52   : > { %418 = vst [vmem:[%s4310_s30 + $0x3c0] sm:$0xff] %v417_v57  ;;  %420 = vst [vmem:[%s4310_s30 + $0x3c8] sm:$0xff] %v419_v58  ;;  %v423_v60 = vld [vmem:[%s4305_s29 + $0x758] sm:$0xff]  ;;  %v425_v61 = vld [vmem:[%s4305_s29 + $0x760] sm:$0xff] }
  0x53   : > { %422 = vst [vmem:[%s4310_s30 + $0x3d0] sm:$0xff] %v421_v59  ;;  %v427_v62 = vld [vmem:[%s4305_s29 + $0x768] sm:$0xff]  ;;  %424 = vst [vmem:[%s4310_s30 + $0x3d8] sm:$0xff] %v423_v60  ;;  %v429_v63 = vld [vmem:[%s4305_s29 + $0x7e0] sm:$0xff] }
  0x54   : > { %426 = vst [vmem:[%s4310_s30 + $0x3e0] sm:$0xff] %v425_v61  ;;  %428 = vst [vmem:[%s4310_s30 + $0x3e8] sm:$0xff] %v427_v62  ;;  %v431_v0 = vld [vmem:[%s4305_s29 + $0x7e8] sm:$0xff]  ;;  %v433_v1 = vld [vmem:[%s4305_s29 + $0x7f0] sm:$0xff] }
  0x55   : > { %430 = vst [vmem:[%s4310_s30 + $0x3f0] sm:$0xff] %v429_v63  ;;  %432 = vst [vmem:[%s4310_s30 + $0x3f8] sm:$0xff] %v431_v0  ;;  %v435_v2 = vld [vmem:[%s4305_s29 + $0x7f8] sm:$0xff]  ;;  %v437_v3 = vld [vmem:[%s4305_s29 + $0x800] sm:$0xff] }
  0x56   : > { %434 = vst [vmem:[%s4310_s30 + $0x400] sm:$0xff] %v433_v1  ;;  %v439_v4 = vld [vmem:[%s4305_s29 + $0x808] sm:$0xff]  ;;  %436 = vst [vmem:[%s4310_s30 + $0x408] sm:$0xff] %v435_v2  ;;  %v441_v5 = vld [vmem:[%s4305_s29 + $0x810] sm:$0xff] }
  0x57   : > { %438 = vst [vmem:[%s4310_s30 + $0x410] sm:$0xff] %v437_v3  ;;  %440 = vst [vmem:[%s4310_s30 + $0x418] sm:$0xff] %v439_v4  ;;  %v443_v6 = vld [vmem:[%s4305_s29 + $0x818] sm:$0xff]  ;;  %v445_v7 = vld [vmem:[%s4305_s29 + $0x820] sm:$0xff] }
  0x58   : > { %442 = vst [vmem:[%s4310_s30 + $0x420] sm:$0xff] %v441_v5  ;;  %444 = vst [vmem:[%s4310_s30 + $0x428] sm:$0xff] %v443_v6  ;;  %v447_v8 = vld [vmem:[%s4305_s29 + $0x828] sm:$0xff]  ;;  %v449_v9 = vld [vmem:[%s4305_s29 + $0x830] sm:$0xff] }
  0x59   : > { %446 = vst [vmem:[%s4310_s30 + $0x430] sm:$0xff] %v445_v7  ;;  %v451_v10 = vld [vmem:[%s4305_s29 + $0x838] sm:$0xff]  ;;  %448 = vst [vmem:[%s4310_s30 + $0x438] sm:$0xff] %v447_v8  ;;  %v453_v11 = vld [vmem:[%s4305_s29 + $0x840] sm:$0xff] }
  0x5a   : > { %450 = vst [vmem:[%s4310_s30 + $0x440] sm:$0xff] %v449_v9  ;;  %452 = vst [vmem:[%s4310_s30 + $0x448] sm:$0xff] %v451_v10  ;;  %v455_v12 = vld [vmem:[%s4305_s29 + $0x848] sm:$0xff]  ;;  %v457_v13 = vld [vmem:[%s4305_s29 + $0x8c0] sm:$0xff] }
  0x5b   : > { %454 = vst [vmem:[%s4310_s30 + $0x450] sm:$0xff] %v453_v11  ;;  %456 = vst [vmem:[%s4310_s30 + $0x458] sm:$0xff] %v455_v12  ;;  %v459_v14 = vld [vmem:[%s4305_s29 + $0x8c8] sm:$0xff]  ;;  %v461_v15 = vld [vmem:[%s4305_s29 + $0x8d0] sm:$0xff] }
  0x5c   : > { %458 = vst [vmem:[%s4310_s30 + $0x460] sm:$0xff] %v457_v13  ;;  %v463_v16 = vld [vmem:[%s4305_s29 + $0x8d8] sm:$0xff]  ;;  %460 = vst [vmem:[%s4310_s30 + $0x468] sm:$0xff] %v459_v14  ;;  %v465_v17 = vld [vmem:[%s4305_s29 + $0x8e0] sm:$0xff] }
  0x5d   : > { %462 = vst [vmem:[%s4310_s30 + $0x470] sm:$0xff] %v461_v15  ;;  %464 = vst [vmem:[%s4310_s30 + $0x478] sm:$0xff] %v463_v16  ;;  %v467_v18 = vld [vmem:[%s4305_s29 + $0x8e8] sm:$0xff]  ;;  %v469_v19 = vld [vmem:[%s4305_s29 + $0x8f0] sm:$0xff] }
  0x5e   : > { %466 = vst [vmem:[%s4310_s30 + $0x480] sm:$0xff] %v465_v17  ;;  %468 = vst [vmem:[%s4310_s30 + $0x488] sm:$0xff] %v467_v18  ;;  %v471_v20 = vld [vmem:[%s4305_s29 + $0x8f8] sm:$0xff]  ;;  %v473_v21 = vld [vmem:[%s4305_s29 + $0x900] sm:$0xff] }
  0x5f   : > { %470 = vst [vmem:[%s4310_s30 + $0x490] sm:$0xff] %v469_v19  ;;  %v475_v22 = vld [vmem:[%s4305_s29 + $0x908] sm:$0xff]  ;;  %472 = vst [vmem:[%s4310_s30 + $0x498] sm:$0xff] %v471_v20  ;;  %v477_v23 = vld [vmem:[%s4305_s29 + $0x910] sm:$0xff] }
  0x60   : > { %474 = vst [vmem:[%s4310_s30 + $0x4a0] sm:$0xff] %v473_v21  ;;  %476 = vst [vmem:[%s4310_s30 + $0x4a8] sm:$0xff] %v475_v22  ;;  %v479_v24 = vld [vmem:[%s4305_s29 + $0x918] sm:$0xff]  ;;  %v481_v25 = vld [vmem:[%s4305_s29 + $0x920] sm:$0xff] }
  0x61   : > { %478 = vst [vmem:[%s4310_s30 + $0x4b0] sm:$0xff] %v477_v23  ;;  %480 = vst [vmem:[%s4310_s30 + $0x4b8] sm:$0xff] %v479_v24  ;;  %v483_v26 = vld [vmem:[%s4305_s29 + $0x928] sm:$0xff] }
  0x62   : > { %482 = vst [vmem:[%s4310_s30 + $0x4c0] sm:$0xff] %v481_v25  ;;  %484 = vst [vmem:[%s4310_s30 + $0x4c8] sm:$0xff] %v483_v26 }
  0x63 PF: > { %p3481_p5 = scmp.ge.s32.totalorder %s4239_s19, 1  ;;  %p489_p6 = scmp.lt.s32.totalorder %s4239_s19, 3 }
  0x65   : > { %p490_p7 = pnand %p3481_p5, %p489_p6 }
  0x67   : > { %493 = sbr.rel (%p490_p7) target bundleno = 690 (0x2b2), region = 55 }
  0x6e   : > { %s496_s5 = sand.u32 1, %s4231_s17   ;;  %v4241_v27 = vmov 0   ;;  %v683_v28 = vld [vmem:[%s5623_s2] sm:$0xff]  ;;  %v684_v29 = vld [vmem:[%s5623_s2 + $0x8] sm:$0xff]  ;;  %vm1474_vm0 = vcmask 1040384   ;;  %vm1470_vm1 = vcmask 662528  }
  0x6f   : > { %s3725_s6 = smul.u32 1232, %s496_s5  ;;  %1593 = vmatprep.mubr.bf16.mxu0 %v4241_v27  ;;  %1636 = vmatprep.mubr.bf16.mxu1 %v4241_v27  ;;  %v4653_v51 = vsel %vm1474_vm0, 65535, %v4241_v27  ;;  %v4666_v63 = vld [vmem:[%s5621_s0] sm:$0xff]  }
  0x70   : > { %3752 = vset.pattern.permute.xlu0 %v4241_v27  ;;  %3753 = vset.pattern.permute.xlu1 %v4241_v27  ;;  %s5449_s14 = smul.u32 28, %s3476_s3 }
  0x71   : > { %687 = vperm.xlu0 %3752, %v683_v28   ;;  %s4630_s11 = scalar_lea.vmem [#allocation3], %s3725_s6 }
  0x72   : > { %v3754_v30 = vld [vmem:[%s4630_s11 + $0x4] ss:$112 sps:$4 sm:$0xff]   ;;  %v3756_v31 = vld [vmem:[%s4630_s11 + $0xc] ss:$112 sps:$4 sm:$0xff]   ;;  %v3758_v32 = vld [vmem:[%s4630_s11] ss:$112 sps:$4 sm:$0xff]  }
  0x73   : > { %1561 = vmatprep.subr.bf16.mxu0 %v3754_v30  ;;  %v3759_v33 = vld [vmem:[%s4630_s11 + $0x8] ss:$112 sps:$4 sm:$0xff]   ;;  %1604 = vmatprep.subr.bf16.mxu1 %v3756_v31  ;;  %v3760_v34 = vld [vmem:[%s4630_s11 + $0xe4] ss:$112 sps:$4 sm:$0xff]   ;;  %v3762_v35 = vld [vmem:[%s4630_s11 + $0xec] ss:$112 sps:$4 sm:$0xff]  }
  0x74   : > { %1562 = vmatpush1.bf16.msra.mxu0 %v3758_v32  ;;  %1605 = vmatpush1.bf16.msra.mxu1 %v3759_v33  ;;  %v3764_v36 = vld [vmem:[%s4630_s11 + $0xe0] ss:$112 sps:$4 sm:$0xff]   ;;  %v3765_v37 = vld [vmem:[%s4630_s11 + $0xe8] ss:$112 sps:$4 sm:$0xff]   ;;  %v3766_v38 = vld [vmem:[%s4630_s11 + $0x1c4] ss:$112 sps:$4 sm:$0xff]  }
  0x75   : > { %692 = vperm.xlu0 %3752, %v684_v29   ;;  %1563 = vmatprep.subr.bf16.mxu0 %v3760_v34  ;;  %v3768_v39 = vld [vmem:[%s4630_s11 + $0x1cc] ss:$112 sps:$4 sm:$0xff]   ;;  %v3770_v40 = vld [vmem:[%s4630_s11 + $0x1c0] ss:$112 sps:$4 sm:$0xff]   ;;  %v3771_v41 = vld [vmem:[%s4630_s11 + $0x1c8] ss:$112 sps:$4 sm:$0xff]  }
  0x76   : > { %1606 = vmatprep.subr.bf16.mxu1 %v3762_v35  ;;  %v3772_v42 = vld [vmem:[%s4630_s11 + $0x2a4] ss:$112 sps:$4 sm:$0xff]   ;;  %v3774_v43 = vld [vmem:[%s4630_s11 + $0x2ac] ss:$112 sps:$4 sm:$0xff]   ;;  %v3776_v44 = vld [vmem:[%s4630_s11 + $0x2a0] ss:$112 sps:$4 sm:$0xff]  }
  0x77   : > { %v3777_v45 = vld [vmem:[%s4630_s11 + $0x2a8] ss:$112 sps:$4 sm:$0xff]   ;;  %v3778_v46 = vld [vmem:[%s4630_s11 + $0x384] ss:$112 sps:$4 sm:$0xff]   ;;  %v3780_v47 = vld [vmem:[%s4630_s11 + $0x38c] ss:$112 sps:$4 sm:$0xff]  }
  0x78   : > { %1564 = vmatpush1.bf16.msra.mxu0 %v3764_v36  ;;  %1607 = vmatpush1.bf16.msra.mxu1 %v3765_v37  ;;  %v669_v48 = vld [vmem:[%s4630_s11 + $0x460] sm:$0x11]  ;;  %v670_v49 = vld [vmem:[%s4630_s11 + $0x468] sm:$0x11]  ;;  %v671_v12 = vld [vmem:[%s4630_s11 + $0x470] sm:$0x11] }
  0x79   : > { %1565 = vmatprep.subr.bf16.mxu0 %v3766_v38  ;;  %1608 = vmatprep.subr.bf16.mxu1 %v3768_v39  ;;  %v3624_v50 = vcombine.high %v669_v48, %v669_v48  ;;  %v3626_v52 = vcombine.high %v670_v49, %v670_v49  ;;  %v3782_v53 = vld [vmem:[%s4630_s11 + $0x380] ss:$112 sps:$4 sm:$0xff]   ;;  %v3783_v54 = vld [vmem:[%s4630_s11 + $0x388] ss:$112 sps:$4 sm:$0xff]   ;;  %v3623_v55 = vcombine.low %v669_v48, %v669_v48  ;;  %v3791_v61 = vld [vmem:[%s4630_s11 + $0x14] ss:$112 sps:$4 sm:$0xff]  }
  0x7a   : > { %v3625_v56 = vcombine.low %v670_v49, %v670_v49  ;;  %v3794_v62 = vld [vmem:[%s4630_s11 + $0x1c] ss:$112 sps:$4 sm:$0xff]   ;;  %v3789_v0 = vld [vmem:[%s4630_s11 + $0x10] ss:$112 sps:$4 sm:$0xff]   ;;  %v3792_v1 = vld [vmem:[%s4630_s11 + $0x18] ss:$112 sps:$4 sm:$0xff]   ;;  %v3628_v18 = vcombine.high %v671_v12, %v671_v12  ;;  %v3627_v22 = vcombine.low %v671_v12, %v671_v12 }
  0x7b   : > { %v1481_v57 = vand.u32 %v3624_v50, %v4653_v51  ;;  %v1487_v58 = vand.u32 %v3626_v52, %v4653_v51  ;;  %v1478_v59 = vand.u32 %v3623_v55, %v4653_v51  ;;  %v3797_v2 = vld [vmem:[%s4630_s11 + $0xf4] ss:$112 sps:$4 sm:$0xff]   ;;  %v3800_v3 = vld [vmem:[%s4630_s11 + $0xfc] ss:$112 sps:$4 sm:$0xff]   ;;  %v3795_v4 = vld [vmem:[%s4630_s11 + $0xf0] ss:$112 sps:$4 sm:$0xff]  }
  0x7c   : > { %1566 = vmatpush1.bf16.msra.mxu0 %v3770_v40  ;;  %1609 = vmatpush1.bf16.msra.mxu1 %v3771_v41  ;;  %v1484_v60 = vand.u32 %v3625_v56, %v4653_v51  ;;  %v3798_v5 = vld [vmem:[%s4630_s11 + $0xf8] ss:$112 sps:$4 sm:$0xff]   ;;  %v3803_v6 = vld [vmem:[%s4630_s11 + $0x1d4] ss:$112 sps:$4 sm:$0xff]   ;;  %v3806_v7 = vld [vmem:[%s4630_s11 + $0x1dc] ss:$112 sps:$4 sm:$0xff]   ;;  %v1493_v24 = vand.u32 %v3628_v18, %v4653_v51  ;;  %v1490_v26 = vand.u32 %v3627_v22, %v4653_v51 }
  0x7d   : > { %1567 = vmatprep.subr.bf16.mxu0 %v3772_v42  ;;  %1610 = vmatprep.subr.bf16.mxu1 %v3774_v43  ;;  %v3801_v8 = vld [vmem:[%s4630_s11 + $0x1d0] ss:$112 sps:$4 sm:$0xff]   ;;  %v3804_v9 = vld [vmem:[%s4630_s11 + $0x1d8] ss:$112 sps:$4 sm:$0xff]   ;;  %v3809_v10 = vld [vmem:[%s4630_s11 + $0x2b4] ss:$112 sps:$4 sm:$0xff]  }
  0x7e   : > { %v3812_v11 = vld [vmem:[%s4630_s11 + $0x2bc] ss:$112 sps:$4 sm:$0xff]   ;;  %v3807_v14 = vld [vmem:[%s4630_s11 + $0x2b0] ss:$112 sps:$4 sm:$0xff]   ;;  %v3810_v15 = vld [vmem:[%s4630_s11 + $0x2b8] ss:$112 sps:$4 sm:$0xff]  }
  0x7f   : > { %v672_v13 = vld [vmem:[%s4630_s11 + $0x478] sm:$0x11]  ;;  %v3815_v16 = vld [vmem:[%s4630_s11 + $0x394] ss:$112 sps:$4 sm:$0xff]   ;;  %v3813_v20 = vld [vmem:[%s4630_s11 + $0x390] ss:$112 sps:$4 sm:$0xff]  }
  0x80   : > { %1568 = vmatpush1.bf16.msra.mxu0 %v3776_v44  ;;  %1611 = vmatpush1.bf16.msra.mxu1 %v3777_v45  ;;  %v3818_v17 = vld [vmem:[%s4630_s11 + $0x39c] ss:$112 sps:$4 sm:$0xff]   ;;  %v3630_v19 = vcombine.high %v672_v13, %v672_v13  ;;  %v3816_v21 = vld [vmem:[%s4630_s11 + $0x398] ss:$112 sps:$4 sm:$0xff]   ;;  %v3629_v23 = vcombine.low %v672_v13, %v672_v13  ;;  %v3825_v29 = vld [vmem:[%s4630_s11 + $0x24] ss:$112 sps:$4 sm:$0xff]  }
  0x81   : > { %1569 = vmatprep.subr.bf16.mxu0 %v3778_v46  ;;  %1612 = vmatprep.subr.bf16.mxu1 %v3780_v47  ;;  %v3828_v30 = vld [vmem:[%s4630_s11 + $0x2c] ss:$112 sps:$4 sm:$0xff]   ;;  %v3823_v31 = vld [vmem:[%s4630_s11 + $0x20] ss:$112 sps:$4 sm:$0xff]   ;;  %v3826_v32 = vld [vmem:[%s4630_s11 + $0x28] ss:$112 sps:$4 sm:$0xff]  }
  0x82   : > { %v1499_v25 = vand.u32 %v3630_v19, %v4653_v51  ;;  %v1496_v28 = vand.u32 %v3629_v23, %v4653_v51  ;;  %v3831_v33 = vld [vmem:[%s4630_s11 + $0x104] ss:$112 sps:$4 sm:$0xff]   ;;  %v3834_v34 = vld [vmem:[%s4630_s11 + $0x10c] ss:$112 sps:$4 sm:$0xff]   ;;  %v3829_v35 = vld [vmem:[%s4630_s11 + $0x100] ss:$112 sps:$4 sm:$0xff]  }
  0x83   : > { %v3832_v36 = vld [vmem:[%s4630_s11 + $0x108] ss:$112 sps:$4 sm:$0xff]   ;;  %v3837_v37 = vld [vmem:[%s4630_s11 + $0x1e4] ss:$112 sps:$4 sm:$0xff]   ;;  %v3840_v38 = vld [vmem:[%s4630_s11 + $0x1ec] ss:$112 sps:$4 sm:$0xff]  }
  0x84   : > { %1570 = vmatpush1.bf16.msra.mxu0 %v3782_v53  ;;  %1613 = vmatpush1.bf16.msra.mxu1 %v3783_v54  ;;  %v3835_v39 = vld [vmem:[%s4630_s11 + $0x1e0] ss:$112 sps:$4 sm:$0xff]   ;;  %v3838_v40 = vld [vmem:[%s4630_s11 + $0x1e8] ss:$112 sps:$4 sm:$0xff]   ;;  %v3843_v41 = vld [vmem:[%s4630_s11 + $0x2c4] ss:$112 sps:$4 sm:$0xff]  }
  0x85   : > { %1571 = vmatprep.subr.bf16.mxu0 %v1481_v57  ;;  %1614 = vmatprep.subr.bf16.mxu1 %v1487_v58  ;;  %v3846_v42 = vld [vmem:[%s4630_s11 + $0x2cc] ss:$112 sps:$4 sm:$0xff]   ;;  %v673_v43 = vld [vmem:[%s4630_s11 + $0x480] sm:$0x11]  ;;  %v3844_v46 = vld [vmem:[%s4630_s11 + $0x2c8] ss:$112 sps:$4 sm:$0xff]  }
  0x86   : > { %v674_v44 = vld [vmem:[%s4630_s11 + $0x488] sm:$0x11]  ;;  %v3841_v45 = vld [vmem:[%s4630_s11 + $0x2c0] ss:$112 sps:$4 sm:$0xff]   ;;  %v3849_v47 = vld [vmem:[%s4630_s11 + $0x3a4] ss:$112 sps:$4 sm:$0xff]   ;;  %v3632_v49 = vcombine.high %v673_v43, %v673_v43  ;;  %v3631_v54 = vcombine.low %v673_v43, %v673_v43 }
  0x87   : > { %v3852_v48 = vld [vmem:[%s4630_s11 + $0x3ac] ss:$112 sps:$4 sm:$0xff]   ;;  %v3634_v50 = vcombine.high %v674_v44, %v674_v44  ;;  %v3847_v52 = vld [vmem:[%s4630_s11 + $0x3a0] ss:$112 sps:$4 sm:$0xff]   ;;  %v3850_v53 = vld [vmem:[%s4630_s11 + $0x3a8] ss:$112 sps:$4 sm:$0xff]   ;;  %v3633_v55 = vcombine.low %v674_v44, %v674_v44 }
  0x88   : > { %1572 = vmatpush1.bf16.msra.mxu0 %v1478_v59  ;;  %1615 = vmatpush1.bf16.msra.mxu1 %v1484_v60  ;;  %v1505_v56 = vand.u32 %v3632_v49, %v4653_v51  ;;  %v1502_v58 = vand.u32 %v3631_v54, %v4653_v51  ;;  %v3859_v60 = vld [vmem:[%s4630_s11 + $0x34] ss:$112 sps:$4 sm:$0xff]   ;;  %v676_v12 = vld [vmem:[%s4630_s11 + $0x498] sm:$0x11]  ;;  %v3875_v13 = vld [vmem:[%s4630_s11 + $0x2d0] ss:$112 sps:$4 sm:$0xff]  }
  0x89   : > { %1647 = vmatprep.subr.bf16.mxu0 %v3791_v61  ;;  %1690 = vmatprep.subr.bf16.mxu1 %v3794_v62  ;;  %v1511_v57 = vand.u32 %v3634_v50, %v4653_v51  ;;  %v1508_v59 = vand.u32 %v3633_v55, %v4653_v51  ;;  %v3862_v61 = vld [vmem:[%s4630_s11 + $0x3c] ss:$112 sps:$4 sm:$0xff]   ;;  %v3857_v62 = vld [vmem:[%s4630_s11 + $0x30] ss:$112 sps:$4 sm:$0xff]   ;;  %v3638_v18 = vcombine.high %v676_v12, %v676_v12  ;;  %p522_p8 = scmp.lt.s32.totalorder %s5449_s14, 55 }
  0x8a   : > { %v3881_v19 = vld [vmem:[%s4630_s11 + $0x3b0] ss:$112 sps:$4 sm:$0xff]   ;;  %v3637_v22 = vcombine.low %v676_v12, %v676_v12  ;;  %v678_v44 = vld [vmem:[%s4630_s11 + $0x4a8] sm:$0x11]  ;;  %v680_v12 = vld [vmem:[%s4630_s11 + $0x4b8] sm:$0x11] }
  0x8b   : > { %3651 = vmatmul.mubr.msk.bf16.vlgmr.msra.gmra.mrb[0].mxu0 %vm1470_vm1, %v4666_v63  ;;  %3652 = vmatmul.mubr.msk.bf16.vlgmr.msra.gmra.mrb[0].mxu1 %vm1470_vm1, %v4666_v63  ;;  %v677_v43 = vld [vmem:[%s4630_s11 + $0x4a0] sm:$0x11]  ;;  %v3642_v50 = vcombine.high %v678_v44, %v678_v44  ;;  %v3641_v55 = vcombine.low %v678_v44, %v678_v44  ;;  %s5640_s14 = smov (!%p522_p8, %s5449_s14), 55 }
  0x8c   : > { %1648 = vmatpush1.bf16.msra.mxu0 %v3789_v0  ;;  %1691 = vmatpush1.bf16.msra.mxu1 %v3792_v1  ;;  %v3860_v0 = vld [vmem:[%s4630_s11 + $0x38] ss:$112 sps:$4 sm:$0xff]   ;;  %v3865_v1 = vld [vmem:[%s4630_s11 + $0x114] ss:$112 sps:$4 sm:$0xff]   ;;  %v3640_v49 = vcombine.high %v677_v43, %v677_v43  ;;  %v3639_v54 = vcombine.low %v677_v43, %v677_v43  ;;  %v3977_v44 = vld [vmem:[%s4630_s11 + $0x300] ss:$112 sps:$4 sm:$0xff]   ;;  %s5480_s17 = scalar_lea.vmem %s5625_s4, %s5640_s14 }
  0x8d   : > { %1649 = vmatprep.subr.bf16.mxu0 %v3797_v2  ;;  %1692 = vmatprep.subr.bf16.mxu1 %v3800_v3  ;;  %v3868_v2 = vld [vmem:[%s4630_s11 + $0x11c] ss:$112 sps:$4 sm:$0xff]   ;;  %v3863_v3 = vld [vmem:[%s4630_s11 + $0x110] ss:$112 sps:$4 sm:$0xff]  }
  0x8e   : > { %1679 = vmatprep.mubr.bf16.mxu0 %v4241_v27  ;;  %1722 = vmatprep.mubr.bf16.mxu1 %v4241_v27  ;;  %v682_v43 = vld [vmem:[%s4630_s11 + $0x4c8] sm:$0x11] }
  0x90   : > { %1650 = vmatpush1.bf16.msra.mxu0 %v3795_v4  ;;  %1693 = vmatpush1.bf16.msra.mxu1 %v3798_v5  ;;  %v3866_v4 = vld [vmem:[%s4630_s11 + $0x118] ss:$112 sps:$4 sm:$0xff]   ;;  %v3871_v5 = vld [vmem:[%s4630_s11 + $0x1f4] ss:$112 sps:$4 sm:$0xff]  }
  0x91   : > { %1651 = vmatprep.subr.bf16.mxu0 %v3803_v6  ;;  %1694 = vmatprep.subr.bf16.mxu1 %v3806_v7  ;;  %v3874_v6 = vld [vmem:[%s4630_s11 + $0x1fc] ss:$112 sps:$4 sm:$0xff]   ;;  %v3869_v7 = vld [vmem:[%s4630_s11 + $0x1f0] ss:$112 sps:$4 sm:$0xff]  }
  0x94   : > { %1652 = vmatpush1.bf16.msra.mxu0 %v3801_v8  ;;  %1695 = vmatpush1.bf16.msra.mxu1 %v3804_v9  ;;  %v3872_v8 = vld [vmem:[%s4630_s11 + $0x1f8] ss:$112 sps:$4 sm:$0xff]   ;;  %v3877_v9 = vld [vmem:[%s4630_s11 + $0x2d4] ss:$112 sps:$4 sm:$0xff]  }
  0x95   : > { %1653 = vmatprep.subr.bf16.mxu0 %v3809_v10  ;;  %1696 = vmatprep.subr.bf16.mxu1 %v3812_v11  ;;  %v3880_v10 = vld [vmem:[%s4630_s11 + $0x2dc] ss:$112 sps:$4 sm:$0xff]   ;;  %v675_v11 = vld [vmem:[%s4630_s11 + $0x490] sm:$0x11] }
  0x98   : > { %1654 = vmatpush1.bf16.msra.mxu0 %v3807_v14  ;;  %1697 = vmatpush1.bf16.msra.mxu1 %v3810_v15  ;;  %v3878_v14 = vld [vmem:[%s4630_s11 + $0x2d8] ss:$112 sps:$4 sm:$0xff]   ;;  %v3883_v15 = vld [vmem:[%s4630_s11 + $0x3b4] ss:$112 sps:$4 sm:$0xff]  }
  0x99   : > { %1655 = vmatprep.subr.bf16.mxu0 %v3815_v16  ;;  %1698 = vmatprep.subr.bf16.mxu1 %v3818_v17  ;;  %v3886_v16 = vld [vmem:[%s4630_s11 + $0x3bc] ss:$112 sps:$4 sm:$0xff]   ;;  %v3636_v17 = vcombine.high %v675_v11, %v675_v11 }
  0x9b   : > { %v1517_v23 = vand.u32 %v3636_v17, %v4653_v51 }
  0x9c   : > { %1656 = vmatpush1.bf16.msra.mxu0 %v3813_v20  ;;  %1699 = vmatpush1.bf16.msra.mxu1 %v3816_v21  ;;  %v3884_v20 = vld [vmem:[%s4630_s11 + $0x3b8] ss:$112 sps:$4 sm:$0xff]   ;;  %v3635_v21 = vcombine.low %v675_v11, %v675_v11  ;;  %v679_v11 = vld [vmem:[%s4630_s11 + $0x4b0] sm:$0x11] }
  0x9d   : > { %1657 = vmatprep.subr.bf16.mxu0 %v1493_v24  ;;  %1700 = vmatprep.subr.bf16.mxu1 %v1499_v25  ;;  %v1523_v24 = vand.u32 %v3638_v18, %v4653_v51  ;;  %v3644_v17 = vcombine.high %v679_v11, %v679_v11  ;;  %v3646_v18 = vcombine.high %v680_v12, %v680_v12 }
  0x9e   : > { %v1514_v25 = vand.u32 %v3635_v21, %v4653_v51  ;;  %v3643_v21 = vcombine.low %v679_v11, %v679_v11 }
  0xa0   : > { %1658 = vmatpush1.bf16.msra.mxu0 %v1490_v26  ;;  %1701 = vmatpush1.bf16.msra.mxu1 %v1496_v28  ;;  %v1520_v26 = vand.u32 %v3637_v22, %v4653_v51  ;;  %v3893_v28 = vld [vmem:[%s4630_s11 + $0x44] ss:$112 sps:$4 sm:$0xff]   ;;  %v3645_v22 = vcombine.low %v680_v12, %v680_v12 }
  0xa1   : > { %1733 = vmatprep.subr.bf16.mxu0 %v3825_v29  ;;  %1776 = vmatprep.subr.bf16.mxu1 %v3828_v30  ;;  %v3896_v29 = vld [vmem:[%s4630_s11 + $0x4c] ss:$112 sps:$4 sm:$0xff]   ;;  %v3891_v30 = vld [vmem:[%s4630_s11 + $0x40] ss:$112 sps:$4 sm:$0xff]  }
  0xa3   : > { %3653 = vmatmul.mubr.msk.bf16.vlgmr.msra.gmra.mrb[4].mxu0 %vm1470_vm1, %v4666_v63  ;;  %3654 = vmatmul.mubr.msk.bf16.vlgmr.msra.gmra.mrb[4].mxu1 %vm1470_vm1, %v4666_v63 }
  0xa4   : > { %1734 = vmatpush1.bf16.msra.mxu0 %v3823_v31  ;;  %1777 = vmatpush1.bf16.msra.mxu1 %v3826_v32  ;;  %v3894_v31 = vld [vmem:[%s4630_s11 + $0x48] ss:$112 sps:$4 sm:$0xff]   ;;  %v3899_v32 = vld [vmem:[%s4630_s11 + $0x124] ss:$112 sps:$4 sm:$0xff]  }
  0xa5   : > { %1735 = vmatprep.subr.bf16.mxu0 %v3831_v33  ;;  %1778 = vmatprep.subr.bf16.mxu1 %v3834_v34  ;;  %v3902_v33 = vld [vmem:[%s4630_s11 + $0x12c] ss:$112 sps:$4 sm:$0xff]   ;;  %v3897_v34 = vld [vmem:[%s4630_s11 + $0x120] ss:$112 sps:$4 sm:$0xff]  }
  0xa6   : > { %1765 = vmatprep.mubr.bf16.mxu0 %v4241_v27  ;;  %1808 = vmatprep.mubr.bf16.mxu1 %v4241_v27 }
  0xa8   : > { %1736 = vmatpush1.bf16.msra.mxu0 %v3829_v35  ;;  %1779 = vmatpush1.bf16.msra.mxu1 %v3832_v36  ;;  %v3900_v35 = vld [vmem:[%s4630_s11 + $0x128] ss:$112 sps:$4 sm:$0xff]   ;;  %v3115_v36 = vld [vmem:[#allocation2] sm:$0x1] }
  0xa9   : > { %1737 = vmatprep.subr.bf16.mxu0 %v3837_v37  ;;  %1780 = vmatprep.subr.bf16.mxu1 %v3840_v38  ;;  %v3905_v37 = vld [vmem:[%s4630_s11 + $0x204] ss:$112 sps:$4 sm:$0xff]   ;;  %v3908_v38 = vld [vmem:[%s4630_s11 + $0x20c] ss:$112 sps:$4 sm:$0xff]  }
  0xaa   : > { %3118 = vperm.xlu1 %3753, %v3115_v36   ;;  %v3973_v36 = vld [vmem:[%s4630_s11 + $0x224] ss:$112 sps:$4 sm:$0xff]  }
  0xac   : > { %1738 = vmatpush1.bf16.msra.mxu0 %v3835_v39  ;;  %1781 = vmatpush1.bf16.msra.mxu1 %v3838_v40  ;;  %v3903_v39 = vld [vmem:[%s4630_s11 + $0x200] ss:$112 sps:$4 sm:$0xff]   ;;  %v3906_v40 = vld [vmem:[%s4630_s11 + $0x208] ss:$112 sps:$4 sm:$0xff]  }
  0xad   : > { %1739 = vmatprep.subr.bf16.mxu0 %v3843_v41  ;;  %1782 = vmatprep.subr.bf16.mxu1 %v3846_v42  ;;  %v3911_v41 = vld [vmem:[%s4630_s11 + $0x2e4] ss:$112 sps:$4 sm:$0xff]   ;;  %v3914_v42 = vld [vmem:[%s4630_s11 + $0x2ec] ss:$112 sps:$4 sm:$0xff]  }
  0xb0   : > { %1740 = vmatpush1.bf16.msra.mxu0 %v3841_v45  ;;  %1783 = vmatpush1.bf16.msra.mxu1 %v3844_v46  ;;  %v3909_v45 = vld [vmem:[%s4630_s11 + $0x2e0] ss:$112 sps:$4 sm:$0xff]   ;;  %v3912_v46 = vld [vmem:[%s4630_s11 + $0x2e8] ss:$112 sps:$4 sm:$0xff]  }
  0xb1   : > { %1741 = vmatprep.subr.bf16.mxu0 %v3849_v47  ;;  %1784 = vmatprep.subr.bf16.mxu1 %v3852_v48  ;;  %v3917_v47 = vld [vmem:[%s4630_s11 + $0x3c4] ss:$112 sps:$4 sm:$0xff]   ;;  %v3920_v48 = vld [vmem:[%s4630_s11 + $0x3cc] ss:$112 sps:$4 sm:$0xff]  }
  0xb4   : > { %1742 = vmatpush1.bf16.msra.mxu0 %v3847_v52  ;;  %1785 = vmatpush1.bf16.msra.mxu1 %v3850_v53  ;;  %v3915_v52 = vld [vmem:[%s4630_s11 + $0x3c0] ss:$112 sps:$4 sm:$0xff]   ;;  %v3918_v53 = vld [vmem:[%s4630_s11 + $0x3c8] ss:$112 sps:$4 sm:$0xff]  }
  0xb5   : > { %1743 = vmatprep.subr.bf16.mxu0 %v1505_v56  ;;  %1786 = vmatprep.subr.bf16.mxu1 %v1511_v57  ;;  %v1529_v56 = vand.u32 %v3640_v49, %v4653_v51  ;;  %v1535_v57 = vand.u32 %v3642_v50, %v4653_v51  ;;  %v3983_v49 = vld [vmem:[%s4630_s11 + $0x3e0] ss:$112 sps:$4 sm:$0xff]   ;;  %v3986_v50 = vld [vmem:[%s4630_s11 + $0x3e8] ss:$112 sps:$4 sm:$0xff]  }
  0xb8   : > { %1744 = vmatpush1.bf16.msra.mxu0 %v1502_v58  ;;  %1787 = vmatpush1.bf16.msra.mxu1 %v1508_v59  ;;  %v1526_v58 = vand.u32 %v3639_v54, %v4653_v51  ;;  %v1532_v59 = vand.u32 %v3641_v55, %v4653_v51 }
  0xb9   : > { %1819 = vmatprep.subr.bf16.mxu0 %v3859_v60  ;;  %1862 = vmatprep.subr.bf16.mxu1 %v3862_v61  ;;  %v3927_v60 = vld [vmem:[%s4630_s11 + $0x54] ss:$112 sps:$4 sm:$0xff]   ;;  %v3930_v61 = vld [vmem:[%s4630_s11 + $0x5c] ss:$112 sps:$4 sm:$0xff]  }
  0xbb   : > { %3655 = vmatmul.mubr.msk.bf16.vlgmr.msra.gmra.mrb[8].mxu0 %vm1470_vm1, %v4666_v63  ;;  %3656 = vmatmul.mubr.msk.bf16.vlgmr.msra.gmra.mrb[8].mxu1 %vm1470_vm1, %v4666_v63 }
  0xbc   : > { %1820 = vmatpush1.bf16.msra.mxu0 %v3857_v62  ;;  %1863 = vmatpush1.bf16.msra.mxu1 %v3860_v0  ;;  %v3925_v62 = vld [vmem:[%s4630_s11 + $0x50] ss:$112 sps:$4 sm:$0xff]   ;;  %v3928_v0 = vld [vmem:[%s4630_s11 + $0x58] ss:$112 sps:$4 sm:$0xff]  }
  0xbd   : > { %1821 = vmatprep.subr.bf16.mxu0 %v3865_v1  ;;  %1864 = vmatprep.subr.bf16.mxu1 %v3868_v2  ;;  %v3933_v1 = vld [vmem:[%s4630_s11 + $0x134] ss:$112 sps:$4 sm:$0xff]   ;;  %v3936_v2 = vld [vmem:[%s4630_s11 + $0x13c] ss:$112 sps:$4 sm:$0xff]  }
  0xbe   : > { %1851 = vmatprep.mubr.bf16.mxu0 %v4241_v27  ;;  %1894 = vmatprep.mubr.bf16.mxu1 %v4241_v27 }
  0xc0   : > { %1822 = vmatpush1.bf16.msra.mxu0 %v3863_v3  ;;  %1865 = vmatpush1.bf16.msra.mxu1 %v3866_v4  ;;  %v3931_v3 = vld [vmem:[%s4630_s11 + $0x130] ss:$112 sps:$4 sm:$0xff]   ;;  %v3934_v4 = vld [vmem:[%s4630_s11 + $0x138] ss:$112 sps:$4 sm:$0xff]  }
  0xc1   : > { %1823 = vmatprep.subr.bf16.mxu0 %v3871_v5  ;;  %1866 = vmatprep.subr.bf16.mxu1 %v3874_v6  ;;  %v3939_v5 = vld [vmem:[%s4630_s11 + $0x214] ss:$112 sps:$4 sm:$0xff]   ;;  %v3942_v6 = vld [vmem:[%s4630_s11 + $0x21c] ss:$112 sps:$4 sm:$0xff]  }
  0xc4   : > { %1824 = vmatpush1.bf16.msra.mxu0 %v3869_v7  ;;  %1867 = vmatpush1.bf16.msra.mxu1 %v3872_v8  ;;  %v3937_v7 = vld [vmem:[%s4630_s11 + $0x210] ss:$112 sps:$4 sm:$0xff]   ;;  %v3940_v8 = vld [vmem:[%s4630_s11 + $0x218] ss:$112 sps:$4 sm:$0xff]  }
  0xc5   : > { %1825 = vmatprep.subr.bf16.mxu0 %v3877_v9  ;;  %1868 = vmatprep.subr.bf16.mxu1 %v3880_v10  ;;  %v3945_v9 = vld [vmem:[%s4630_s11 + $0x2f4] ss:$112 sps:$4 sm:$0xff]   ;;  %v3948_v10 = vld [vmem:[%s4630_s11 + $0x2fc] ss:$112 sps:$4 sm:$0xff]  }
  0xc8   : > { %1826 = vmatpush1.bf16.msra.mxu0 %v3875_v13  ;;  %1869 = vmatpush1.bf16.msra.mxu1 %v3878_v14  ;;  %v3943_v13 = vld [vmem:[%s4630_s11 + $0x2f0] ss:$112 sps:$4 sm:$0xff]   ;;  %v3946_v14 = vld [vmem:[%s4630_s11 + $0x2f8] ss:$112 sps:$4 sm:$0xff]  }
  0xc9   : > { %1827 = vmatprep.subr.bf16.mxu0 %v3883_v15  ;;  %1870 = vmatprep.subr.bf16.mxu1 %v3886_v16  ;;  %v3951_v15 = vld [vmem:[%s4630_s11 + $0x3d4] ss:$112 sps:$4 sm:$0xff]   ;;  %v3954_v16 = vld [vmem:[%s4630_s11 + $0x3dc] ss:$112 sps:$4 sm:$0xff]  }
  0xcc   : > { %1828 = vmatpush1.bf16.msra.mxu0 %v3881_v19  ;;  %1871 = vmatpush1.bf16.msra.mxu1 %v3884_v20  ;;  %v3949_v19 = vld [vmem:[%s4630_s11 + $0x3d0] ss:$112 sps:$4 sm:$0xff]   ;;  %v3952_v20 = vld [vmem:[%s4630_s11 + $0x3d8] ss:$112 sps:$4 sm:$0xff]  }
  0xcd   : > { %1829 = vmatprep.subr.bf16.mxu0 %v1517_v23  ;;  %1872 = vmatprep.subr.bf16.mxu1 %v1523_v24  ;;  %v1541_v23 = vand.u32 %v3644_v17, %v4653_v51  ;;  %v1547_v24 = vand.u32 %v3646_v18, %v4653_v51 }
  0xd0   : > { %1830 = vmatpush1.bf16.msra.mxu0 %v1514_v25  ;;  %1873 = vmatpush1.bf16.msra.mxu1 %v1520_v26  ;;  %v1538_v25 = vand.u32 %v3643_v21, %v4653_v51  ;;  %v1544_v26 = vand.u32 %v3645_v22, %v4653_v51 }
  0xd1   : > { %1905 = vmatprep.subr.bf16.mxu0 %v3893_v28  ;;  %1948 = vmatprep.subr.bf16.mxu1 %v3896_v29  ;;  %v3961_v28 = vld [vmem:[%s4630_s11 + $0x64] ss:$112 sps:$4 sm:$0xff]   ;;  %v3964_v29 = vld [vmem:[%s4630_s11 + $0x6c] ss:$112 sps:$4 sm:$0xff]  }
  0xd3   : > { %3657 = vmatmul.mubr.msk.bf16.vlgmr.msra.gmra.mrb[12].mxu0 %vm1470_vm1, %v4666_v63  ;;  %3658 = vmatmul.mubr.msk.bf16.vlgmr.msra.gmra.mrb[12].mxu1 %vm1470_vm1, %v4666_v63 }
  0xd4   : > { %1906 = vmatpush1.bf16.msra.mxu0 %v3891_v30  ;;  %1949 = vmatpush1.bf16.msra.mxu1 %v3894_v31  ;;  %v3959_v30 = vld [vmem:[%s4630_s11 + $0x60] ss:$112 sps:$4 sm:$0xff]   ;;  %v3962_v31 = vld [vmem:[%s4630_s11 + $0x68] ss:$112 sps:$4 sm:$0xff]  }
  0xd5   : > { %1907 = vmatprep.subr.bf16.mxu0 %v3899_v32  ;;  %1950 = vmatprep.subr.bf16.mxu1 %v3902_v33  ;;  %v3967_v32 = vld [vmem:[%s4630_s11 + $0x144] ss:$112 sps:$4 sm:$0xff]   ;;  %v3970_v33 = vld [vmem:[%s4630_s11 + $0x14c] ss:$112 sps:$4 sm:$0xff]  }
  0xd6   : > { %1937 = vmatprep.mubr.bf16.mxu0 %v4241_v27  ;;  %1980 = vmatprep.mubr.bf16.mxu1 %v4241_v27 }
  0xd8   : > { %1908 = vmatpush1.bf16.msra.mxu0 %v3897_v34  ;;  %1951 = vmatpush1.bf16.msra.mxu1 %v3900_v35  ;;  %v3965_v34 = vld [vmem:[%s4630_s11 + $0x140] ss:$112 sps:$4 sm:$0xff]   ;;  %v3968_v35 = vld [vmem:[%s4630_s11 + $0x148] ss:$112 sps:$4 sm:$0xff]  }
  0xd9   : > { %1909 = vmatprep.subr.bf16.mxu0 %v3905_v37  ;;  %1952 = vmatprep.subr.bf16.mxu1 %v3908_v38  ;;  %v3976_v37 = vld [vmem:[%s4630_s11 + $0x22c] ss:$112 sps:$4 sm:$0xff]   ;;  %v3971_v38 = vld [vmem:[%s4630_s11 + $0x220] ss:$112 sps:$4 sm:$0xff]  }
  0xdc   : > { %1910 = vmatpush1.bf16.msra.mxu0 %v3903_v39  ;;  %1953 = vmatpush1.bf16.msra.mxu1 %v3906_v40  ;;  %v3974_v39 = vld [vmem:[%s4630_s11 + $0x228] ss:$112 sps:$4 sm:$0xff]   ;;  %v3979_v40 = vld [vmem:[%s4630_s11 + $0x304] ss:$112 sps:$4 sm:$0xff]  }
  0xdd   : > { %1911 = vmatprep.subr.bf16.mxu0 %v3911_v41  ;;  %1954 = vmatprep.subr.bf16.mxu1 %v3914_v42  ;;  %v3982_v41 = vld [vmem:[%s4630_s11 + $0x30c] ss:$112 sps:$4 sm:$0xff]   ;;  %v681_v42 = vld [vmem:[%s4630_s11 + $0x4c0] sm:$0x11] }
  0xe0   : > { %1912 = vmatpush1.bf16.msra.mxu0 %v3909_v45  ;;  %1955 = vmatpush1.bf16.msra.mxu1 %v3912_v46  ;;  %v3980_v45 = vld [vmem:[%s4630_s11 + $0x308] ss:$112 sps:$4 sm:$0xff]   ;;  %v3988_v46 = vld [vmem:[%s4630_s11 + $0x3ec] ss:$112 sps:$4 sm:$0xff]  }
  0xe1   : > { %1913 = vmatprep.subr.bf16.mxu0 %v3917_v47  ;;  %1956 = vmatprep.subr.bf16.mxu1 %v3920_v48  ;;  %v3648_v47 = vcombine.high %v681_v42, %v681_v42  ;;  %v3650_v48 = vcombine.high %v682_v43, %v682_v43 }
  0xe3   : > { %v1553_v54 = vand.u32 %v3648_v47, %v4653_v51  ;;  %v1559_v55 = vand.u32 %v3650_v48, %v4653_v51 }
  0xe4   : > { %1914 = vmatpush1.bf16.msra.mxu0 %v3915_v52  ;;  %1957 = vmatpush1.bf16.msra.mxu1 %v3918_v53  ;;  %v3647_v52 = vcombine.low %v681_v42, %v681_v42  ;;  %v3649_v53 = vcombine.low %v682_v43, %v682_v43 }
  0xe5   : > { %1915 = vmatprep.subr.bf16.mxu0 %v1529_v56  ;;  %1958 = vmatprep.subr.bf16.mxu1 %v1535_v57 }
  0xe6   : > { %v1550_v56 = vand.u32 %v3647_v52, %v4653_v51  ;;  %v1556_v57 = vand.u32 %v3649_v53, %v4653_v51 }
  0xe8   : > { %1916 = vmatpush1.bf16.msra.mxu0 %v1526_v58  ;;  %1959 = vmatpush1.bf16.msra.mxu1 %v1532_v59 }
  0xe9   : > { %1991 = vmatprep.subr.bf16.mxu0 %v3927_v60  ;;  %2034 = vmatprep.subr.bf16.mxu1 %v3930_v61 }
  0xeb   : > { %3659 = vmatmul.mubr.msk.bf16.vlgmr.msra.gmra.mrb[16].mxu0 %vm1470_vm1, %v4666_v63  ;;  %3660 = vmatmul.mubr.msk.bf16.vlgmr.msra.gmra.mrb[16].mxu1 %vm1470_vm1, %v4666_v63 }
  0xec   : > { %1992 = vmatpush1.bf16.msra.mxu0 %v3925_v62  ;;  %2035 = vmatpush1.bf16.msra.mxu1 %v3928_v0 }
  0xed   : > { %1993 = vmatprep.subr.bf16.mxu0 %v3933_v1  ;;  %2036 = vmatprep.subr.bf16.mxu1 %v3936_v2 }
  0xee   : > { %2023 = vmatprep.mubr.bf16.mxu0 %v4241_v27  ;;  %2066 = vmatprep.mubr.bf16.mxu1 %v4241_v27 }
  0xf0   : > { %1994 = vmatpush1.bf16.msra.mxu0 %v3931_v3  ;;  %2037 = vmatpush1.bf16.msra.mxu1 %v3934_v4  ;;  %v4862_v58 = vpop.permute.xlu0 %687 }
  0xf1   : > { %1995 = vmatprep.subr.bf16.mxu0 %v3939_v5  ;;  %2038 = vmatprep.subr.bf16.mxu1 %v3942_v6 }
  0xf4   : > { %1996 = vmatpush1.bf16.msra.mxu0 %v3937_v7  ;;  %2039 = vmatpush1.bf16.msra.mxu1 %v3940_v8  ;;  %v4864_v59 = vpop.permute.xlu0 %692 }
  0xf5   : > { %1997 = vmatprep.subr.bf16.mxu0 %v3945_v9  ;;  %2040 = vmatprep.subr.bf16.mxu1 %v3948_v10 }
  0xf8   : > { %1998 = vmatpush1.bf16.msra.mxu0 %v3943_v13  ;;  %2041 = vmatpush1.bf16.msra.mxu1 %v3946_v14 }
  0xf9   : > { %1999 = vmatprep.subr.bf16.mxu0 %v3951_v15  ;;  %2042 = vmatprep.subr.bf16.mxu1 %v3954_v16 }
  0xfc   : > { %2000 = vmatpush1.bf16.msra.mxu0 %v3949_v19  ;;  %2043 = vmatpush1.bf16.msra.mxu1 %v3952_v20 }
  0xfd   : > { %2001 = vmatprep.subr.bf16.mxu0 %v1541_v23  ;;  %2044 = vmatprep.subr.bf16.mxu1 %v1547_v24 }
 0x100   : > { %2002 = vmatpush1.bf16.msra.mxu0 %v1538_v25  ;;  %2045 = vmatpush1.bf16.msra.mxu1 %v1544_v26 }
 0x101   : > { %2077 = vmatprep.subr.bf16.mxu0 %v3961_v28  ;;  %2120 = vmatprep.subr.bf16.mxu1 %v3964_v29 }
 0x103   : > { %3661 = vmatmul.mubr.msk.bf16.vlgmr.msra.gmra.mrb[20].mxu0 %vm1470_vm1, %v4666_v63  ;;  %3662 = vmatmul.mubr.msk.bf16.vlgmr.msra.gmra.mrb[20].mxu1 %vm1470_vm1, %v4666_v63 }
 0x104   : > { %2078 = vmatpush1.bf16.msra.mxu0 %v3959_v30  ;;  %2121 = vmatpush1.bf16.msra.mxu1 %v3962_v31 }
 0x105   : > { %2079 = vmatprep.subr.bf16.mxu0 %v3967_v32  ;;  %2122 = vmatprep.subr.bf16.mxu1 %v3970_v33 }
 0x106   : > { %2109 = vmatprep.mubr.bf16.mxu0 %v4241_v27  ;;  %2152 = vmatprep.mubr.bf16.mxu1 %v4241_v27  ;;  %v3985_v27 = vld [vmem:[%s4630_s11 + $0x3e4] ss:$112 sps:$4 sm:$0xff]  }
 0x108   : > { %2080 = vmatpush1.bf16.msra.mxu0 %v3965_v34  ;;  %2123 = vmatpush1.bf16.msra.mxu1 %v3968_v35 }
 0x109   : > { %2081 = vmatprep.subr.bf16.mxu0 %v3973_v36  ;;  %2124 = vmatprep.subr.bf16.mxu1 %v3976_v37 }
 0x10c   : > { %2082 = vmatpush1.bf16.msra.mxu0 %v3971_v38  ;;  %2125 = vmatpush1.bf16.msra.mxu1 %v3974_v39 }
 0x10d   : > { %2083 = vmatprep.subr.bf16.mxu0 %v3979_v40  ;;  %2126 = vmatprep.subr.bf16.mxu1 %v3982_v41 }
 0x110   : > { %2084 = vmatpush1.bf16.msra.mxu0 %v3977_v44  ;;  %2127 = vmatpush1.bf16.msra.mxu1 %v3980_v45 }
 0x111   : > { %2085 = vmatprep.subr.bf16.mxu0 %v3985_v27  ;;  %2128 = vmatprep.subr.bf16.mxu1 %v3988_v46 }
 0x114   : > { %2086 = vmatpush1.bf16.msra.mxu0 %v3983_v49  ;;  %2129 = vmatpush1.bf16.msra.mxu1 %v3986_v50 }
 0x115   : > { %2087 = vmatprep.subr.bf16.mxu0 %v1553_v54  ;;  %2130 = vmatprep.subr.bf16.mxu1 %v1559_v55 }
 0x118   : > { %2088 = vmatpush1.bf16.msra.mxu0 %v1550_v56  ;;  %2131 = vmatpush1.bf16.msra.mxu1 %v1556_v57 }
 0x11b   : > { %3663 = vmatmul.mubr.msk.bf16.vlgmr.msra.gmra.mrb[24].mxu0 %vm1470_vm1, %v4666_v63  ;;  %3664 = vmatmul.mubr.msk.bf16.vlgmr.msra.gmra.mrb[24].mxu1 %vm1470_vm1, %v4666_v63 }
 0x15e   : > { %v1595_v60 = vpop.f32.mrb[0].mxu0  ;;  %v1638_v61 = vpop.f32.mrb[0].mxu1 }
 0x15f   : > { %v1596_v62 = vadd.f32 %v1595_v60, %v4862_v58  ;;  %v1639_v51 = vadd.f32 %v1638_v61, %v4862_v58  ;;  %v1597_v0 = vpop.f32.mrb[1].mxu0  ;;  %v1640_v1 = vpop.f32.mrb[1].mxu1 }
 0x160   : > { %v1599_v2 = vpop.f32.mrb[2].mxu0  ;;  %v1642_v3 = vpop.f32.mrb[2].mxu1  ;;  %v1598_v7 = vadd.f32 %v1597_v0, %v4862_v58  ;;  %v1641_v8 = vadd.f32 %v1640_v1, %v4862_v58 }
 0x161   : > { %v1600_v4 = vadd.f32 %v1599_v2, %v4864_v59  ;;  %v1643_v5 = vadd.f32 %v1642_v3, %v4864_v59  ;;  %v1601_v6 = vpop.f32.mrb[3].mxu0  ;;  %v1644_v63 = vpop.f32.mrb[3].mxu1 }
 0x162   : > { %v1602_v9 = vadd.f32 %v1601_v6, %v4864_v59  ;;  %v1645_v10 = vadd.f32 %v1644_v63, %v4864_v59 }
 0x163   : > { %v2163_v11 = vmax.f32 %v1596_v62, %v1600_v4  ;;  %v2177_v12 = vmax.f32 %v1639_v51, %v1643_v5 }
 0x164   : > { %v2170_v13 = vmax.f32 %v1598_v7, %v1602_v9  ;;  %v2184_v14 = vmax.f32 %v1641_v8, %v1645_v10 }
 0x165   : > { %v2164_v15 = vrot.slane %v2163_v11, 4  ;;  %v2178_v16 = vrot.slane %v2177_v12, 4 }
 0x166   : > { %v2171_v17 = vrot.slane %v2170_v13, 4  ;;  %v2185_v18 = vrot.slane %v2184_v14, 4 }
 0x167   : > { %v2165_v19 = vmax.f32 %v2163_v11, %v2164_v15  ;;  %v2179_v20 = vmax.f32 %v2177_v12, %v2178_v16 }
 0x168   : > { %v2172_v21 = vmax.f32 %v2170_v13, %v2171_v17  ;;  %v2186_v22 = vmax.f32 %v2184_v14, %v2185_v18 }
 0x169   : > { %v2166_v23 = vrot.slane %v2165_v19, 2  ;;  %v2180_v24 = vrot.slane %v2179_v20, 2 }
 0x16a   : > { %v2173_v25 = vrot.slane %v2172_v21, 2  ;;  %v2187_v26 = vrot.slane %v2186_v22, 2 }
 0x16b   : > { %v2167_v28 = vmax.f32 %v2165_v19, %v2166_v23  ;;  %v2181_v29 = vmax.f32 %v2179_v20, %v2180_v24 }
 0x16c   : > { %v2174_v30 = vmax.f32 %v2172_v21, %v2173_v25  ;;  %v2188_v31 = vmax.f32 %v2186_v22, %v2187_v26  ;;  %v5626_v26 = vlaneseq }
 0x16d   : > { %v2168_v32 = vrot.slane %v2167_v28, 1  ;;  %v2182_v33 = vrot.slane %v2181_v29, 1 }
 0x16e   : > { %v2175_v34 = vrot.slane %v2174_v30, 1  ;;  %v2189_v35 = vrot.slane %v2188_v31, 1 }
 0x16f   : > { %v4874_v36 = vmax.f32 %v2167_v28, %v2168_v32  ;;  %v4876_v37 = vmax.f32 %v2181_v29, %v2182_v33 }
 0x170   : > { %v4878_v38 = vmax.f32 %v2174_v30, %v2175_v34  ;;  %v4880_v39 = vmax.f32 %v2188_v31, %v2189_v35 }
 0x171   : > { %v2359_v40 = vsub.f32 %v1596_v62, %v4874_v36  ;;  %v2387_v41 = vsub.f32 %v1600_v4, %v4874_v36  ;;  %v2361_v42 = vsub.f32 %v1639_v51, %v4876_v37  ;;  %v2389_v43 = vsub.f32 %v1643_v5, %v4876_v37 }
 0x172   : > { %v2360_v44 = vsub.f32 %v1598_v7, %v4878_v38  ;;  %v2388_v45 = vsub.f32 %v1602_v9, %v4878_v38  ;;  %v2362_v27 = vsub.f32 %v1641_v8, %v4880_v39  ;;  %v2390_v46 = vsub.f32 %v1645_v10, %v4880_v39 }
 0x173   : > { %v2415_v47 = vpack.c.bf16 %v2387_v41, %v2359_v40  ;;  %v2417_v48 = vpack.c.bf16 %v2389_v43, %v2361_v42 }
 0x174   : > { %v2416_v49 = vpack.c.bf16 %v2388_v45, %v2360_v44  ;;  %v2418_v50 = vpack.c.bf16 %v2390_v46, %v2362_v27 }
 0x175   : > { %v2444_v52 = vmul.bf16 1069105081, %v2415_v47  ;;  %v2450_v53 = vmul.bf16 1069105081, %v2417_v48 }
 0x176   : > { %v2447_v54 = vmul.bf16 1069105081, %v2416_v49  ;;  %v2453_v55 = vmul.bf16 1069105081, %v2418_v50  ;;  %v1681_v56 = vpop.f32.mrb[4].mxu0  ;;  %v1724_v57 = vpop.f32.mrb[4].mxu1 }
 0x177   : > { %3993 = vpow.bf16 %v2444_v52  ;;  %v4891_v60 = vadd.f32 %v1681_v56, %v4862_v58  ;;  %v4894_v61 = vadd.f32 %v1724_v57, %v4862_v58  ;;  %v1683_v62 = vpop.f32.mrb[5].mxu0  ;;  %v1726_v51 = vpop.f32.mrb[5].mxu1 }
 0x178   : > { %3995 = vpow.bf16 %v2450_v53  ;;  %v1685_v0 = vpop.f32.mrb[6].mxu0  ;;  %v1728_v1 = vpop.f32.mrb[6].mxu1  ;;  %v4897_v2 = vadd.f32 %v1683_v62, %v4862_v58  ;;  %v4906_v63 = vadd.f32 %v1726_v51, %v4862_v58 }
 0x179   : > { %3997 = vpow.bf16 %v2447_v54  ;;  %v4900_v3 = vadd.f32 %v1685_v0, %v4864_v59  ;;  %v4903_v4 = vadd.f32 %v1728_v1, %v4864_v59  ;;  %v1687_v5 = vpop.f32.mrb[7].mxu0  ;;  %v1730_v6 = vpop.f32.mrb[7].mxu1 }
 0x17a   : > { %3999 = vpow.bf16 %v2453_v55  ;;  %v4909_v7 = vadd.f32 %v1687_v5, %v4864_v59  ;;  %v4912_v8 = vadd.f32 %v1730_v6, %v4864_v59 }
 0x17b   : > { %v2191_v9 = vmax.f32 %v4891_v60, %v4900_v3  ;;  %v2205_v10 = vmax.f32 %v4894_v61, %v4903_v4 }
 0x17c   : > { %v2198_v11 = vmax.f32 %v4897_v2, %v4909_v7  ;;  %v2212_v12 = vmax.f32 %v4906_v63, %v4912_v8 }
 0x17d   : > { %v2192_v13 = vrot.slane %v2191_v9, 4  ;;  %v2206_v14 = vrot.slane %v2205_v10, 4 }
 0x17e   : > { %v2199_v15 = vrot.slane %v2198_v11, 4  ;;  %v2213_v16 = vrot.slane %v2212_v12, 4 }
 0x17f   : > { %v2193_v17 = vmax.f32 %v2191_v9, %v2192_v13  ;;  %v2207_v18 = vmax.f32 %v2205_v10, %v2206_v14 }
 0x180   : > { %v2200_v19 = vmax.f32 %v2198_v11, %v2199_v15  ;;  %v2214_v20 = vmax.f32 %v2212_v12, %v2213_v16 }
 0x181   : > { %v2194_v21 = vrot.slane %v2193_v17, 2  ;;  %v2208_v22 = vrot.slane %v2207_v18, 2 }
 0x182   : > { %v3994_v23 = vpop.eup %3993  ;;  %v2201_v24 = vrot.slane %v2200_v19, 2  ;;  %v2215_v25 = vrot.slane %v2214_v20, 2 }
 0x183   : > { %v3996_v28 = vpop.eup %3995  ;;  %v2527_v29 = vunpack.c.l.bf16 %v3994_v23  ;;  %v2555_v30 = vunpack.c.h.bf16 %v3994_v23  ;;  %v2195_v31 = vmax.f32 %v2193_v17, %v2194_v21  ;;  %v2209_v32 = vmax.f32 %v2207_v18, %v2208_v22 }
 0x184   : > { %v3998_v33 = vpop.eup %3997  ;;  %v2529_v34 = vunpack.c.l.bf16 %v3996_v28  ;;  %v2557_v35 = vunpack.c.h.bf16 %v3996_v28  ;;  %v2202_v40 = vmax.f32 %v2200_v19, %v2201_v24  ;;  %v2216_v41 = vmax.f32 %v2214_v20, %v2215_v25 }
 0x185   : > { %v4000_v42 = vpop.eup %3999  ;;  %v2583_v43 = vadd.f32 %v2555_v30, %v2527_v29  ;;  %v2528_v44 = vunpack.c.l.bf16 %v3998_v33  ;;  %v2556_v45 = vunpack.c.h.bf16 %v3998_v33  ;;  %v2196_v27 = vrot.slane %v2195_v31, 1 }
 0x186   : > { %v2597_v46 = vadd.f32 %v2557_v35, %v2529_v34  ;;  %v2530_v47 = vunpack.c.l.bf16 %v4000_v42  ;;  %v2558_v48 = vunpack.c.h.bf16 %v4000_v42  ;;  %v2210_v49 = vrot.slane %v2209_v32, 1 }
 0x187   : > { %v2584_v50 = vrot.slane %v2583_v43, 4  ;;  %v2590_v52 = vadd.f32 %v2556_v45, %v2528_v44  ;;  %v4922_v53 = vmax.f32 %v2195_v31, %v2196_v27  ;;  %v2203_v54 = vrot.slane %v2202_v40, 1 }
 0x188   : > { %v2598_v55 = vrot.slane %v2597_v46, 4  ;;  %v2604_v56 = vadd.f32 %v2558_v48, %v2530_v47  ;;  %v4924_v57 = vmax.f32 %v2209_v32, %v2210_v49  ;;  %v2217_v62 = vrot.slane %v2216_v41, 1 }
 0x189   : > { %v2585_v51 = vadd.f32 %v2584_v50, %v2583_v43  ;;  %v2591_v0 = vrot.slane %v2590_v52, 4  ;;  %v2363_v1 = vsub.f32 %v4891_v60, %v4922_v53  ;;  %v2391_v5 = vsub.f32 %v4900_v3, %v4922_v53 }
 0x18a   : > { %v2599_v6 = vadd.f32 %v2598_v55, %v2597_v46  ;;  %v2605_v9 = vrot.slane %v2604_v56, 4  ;;  %v2365_v10 = vsub.f32 %v4894_v61, %v4924_v57  ;;  %v2393_v11 = vsub.f32 %v4903_v4, %v4924_v57 }
 0x18b   : > { %v2586_v12 = vrot.slane %v2585_v51, 2  ;;  %v2592_v13 = vadd.f32 %v2591_v0, %v2590_v52  ;;  %v2419_v14 = vpack.c.bf16 %v2391_v5, %v2363_v1  ;;  %v4934_v15 = vmax.f32 %v2202_v40, %v2203_v54 }
 0x18c   : > { %v2600_v16 = vrot.slane %v2599_v6, 2  ;;  %v2606_v17 = vadd.f32 %v2605_v9, %v2604_v56  ;;  %v2421_v18 = vpack.c.bf16 %v2393_v11, %v2365_v10  ;;  %v4936_v60 = vmax.f32 %v2216_v41, %v2217_v62 }
 0x18d   : > { %v2587_v19 = vadd.f32 %v2586_v12, %v2585_v51  ;;  %v2593_v3 = vrot.slane %v2592_v13, 2  ;;  %v2456_v20 = vmul.bf16 1069105081, %v2419_v14  ;;  %v2364_v21 = vsub.f32 %v4897_v2, %v4934_v15 }
 0x18e   : > { %v2601_v61 = vadd.f32 %v2600_v16, %v2599_v6  ;;  %v2607_v22 = vrot.slane %v2606_v17, 2  ;;  %v2462_v23 = vmul.bf16 1069105081, %v2421_v18  ;;  %v2392_v4 = vsub.f32 %v4909_v7, %v4934_v15  ;;  %v1767_v24 = vpop.f32.mrb[8].mxu0  ;;  %v1810_v25 = vpop.f32.mrb[8].mxu1 }
 0x18f   : > { %v2588_v28 = vrot.slane %v2587_v19, 1  ;;  %v2594_v29 = vadd.f32 %v2593_v3, %v2592_v13  ;;  %4001 = vpow.bf16 %v2456_v20  ;;  %v2366_v30 = vsub.f32 %v4906_v63, %v4936_v60  ;;  %v1769_v31 = vpop.f32.mrb[9].mxu0  ;;  %v1812_v32 = vpop.f32.mrb[9].mxu1 }
 0x190   : > { %v2602_v33 = vrot.slane %v2601_v61, 1  ;;  %v2608_v34 = vadd.f32 %v2607_v22, %v2606_v17  ;;  %4003 = vpow.bf16 %v2462_v23  ;;  %v2420_v2 = vpack.c.bf16 %v2392_v4, %v2364_v21  ;;  %v1771_v35 = vpop.f32.mrb[10].mxu0  ;;  %v1814_v40 = vpop.f32.mrb[10].mxu1 }
 0x191   : > { %v2589_v41 = vadd.f32 %v2588_v28, %v2587_v19  ;;  %v2595_v42 = vrot.slane %v2594_v29, 1  ;;  %v2394_v7 = vsub.f32 %v4912_v8, %v4936_v60  ;;  %v1773_v43 = vpop.f32.mrb[11].mxu0  ;;  %v1816_v44 = vpop.f32.mrb[11].mxu1  ;;  %v4947_v45 = vshrl.u32 %v5626_v26, 7 }
 0x192   : > { %v2603_v27 = vadd.f32 %v2602_v33, %v2601_v61  ;;  %v2609_v63 = vrot.slane %v2608_v34, 1  ;;  %v2459_v46 = vmul.bf16 1069105081, %v2420_v2  ;;  %v4950_v47 = vadd.f32 %v1767_v24, %v4862_v58 }
 0x193   : > { %4005 = vlog2.f32 %v2589_v41  ;;  %v2596_v48 = vadd.f32 %v2595_v42, %v2594_v29  ;;  %v2422_v49 = vpack.c.bf16 %v2394_v7, %v2366_v30  ;;  %v4953_v50 = vadd.f32 %v1810_v25, %v4862_v58 }
 0x194   : > { %4007 = vlog2.f32 %v2603_v27  ;;  %v2610_v52 = vadd.f32 %v2609_v63, %v2608_v34  ;;  %v4956_v8 = vadd.f32 %v1769_v31, %v4862_v58  ;;  %v4959_v54 = vadd.f32 %v1771_v35, %v4864_v59 }
 0x195   : > { %4009 = vlog2.f32 %v2596_v48  ;;  %v2465_v55 = vmul.bf16 1069105081, %v2422_v49  ;;  %v4962_v56 = vadd.f32 %v1814_v40, %v4864_v59  ;;  %v4965_v62 = vadd.f32 %v1773_v43, %v4864_v59 }
 0x196   : > { %4011 = vlog2.f32 %v2610_v52  ;;  %v4968_v51 = vadd.f32 %v1812_v32, %v4862_v58  ;;  %v2219_v0 = vmax.f32 %v4950_v47, %v4959_v54  ;;  %v4973_v1 = vadd.f32 %v1816_v44, %v4864_v59 }
 0x197   : > { %4013 = vpow.bf16 %v2459_v46  ;;  %v2233_v5 = vmax.f32 %v4953_v50, %v4962_v56  ;;  %v2226_v6 = vmax.f32 %v4956_v8, %v4965_v62  ;;  %v3123_v17 = vsub.s32 0, %v4947_v45 }
 0x198   : > { %4015 = vpow.bf16 %v2465_v55  ;;  %v2220_v9 = vrot.slane %v2219_v0, 4  ;;  %v2240_v10 = vmax.f32 %v4968_v51, %v4973_v1  ;;  %v4242_v30 = vmov 1966171168  }
 0x199   : > { %v2234_v11 = vrot.slane %v2233_v5, 4  ;;  %v2227_v12 = vrot.slane %v2226_v6, 4  ;;  %v4984_v31 = vunpack.c.l.s4 %v4242_v30 }
 0x19a   : > { %v4002_v13 = vpop.eup %4001  ;;  %v2221_v14 = vmax.f32 %v2219_v0, %v2220_v9  ;;  %v2241_v16 = vrot.slane %v2240_v10, 4 }
 0x19b   : > { %v4004_v18 = vpop.eup %4003  ;;  %v2531_v19 = vunpack.c.l.bf16 %v4002_v13  ;;  %v2559_v3 = vunpack.c.h.bf16 %v4002_v13  ;;  %v2235_v20 = vmax.f32 %v2233_v5, %v2234_v11  ;;  %v2228_v21 = vmax.f32 %v2226_v6, %v2227_v12 }
 0x19c   : > { %v2533_v61 = vunpack.c.l.bf16 %v4004_v18  ;;  %v2561_v22 = vunpack.c.h.bf16 %v4004_v18  ;;  %v2222_v23 = vrot.slane %v2221_v14, 2  ;;  %v4982_v4 = vmax.f32 %v2240_v10, %v2241_v16 }
 0x19d   : > { %v4006_v24 = vpop.eup %4005  ;;  %v2611_v25 = vadd.f32 %v2559_v3, %v2531_v19  ;;  %v2236_v28 = vrot.slane %v2235_v20, 2  ;;  %v2229_v29 = vrot.slane %v2228_v21, 2 }
 0x19e   : > { %v4008_v32 = vpop.eup %4007  ;;  %v2780_v33 = vmul.f32 0.6931472, %v4006_v24  ;;  %v2625_v34 = vadd.f32 %v2561_v22, %v2533_v61  ;;  %v2223_v2 = vmax.f32 %v2221_v14, %v2222_v23  ;;  %v2243_v35 = vrot.slane %v4982_v4, 2 }
 0x19f   : > { %v4010_v40 = vpop.eup %4009  ;;  %v2784_v41 = vmul.f32 0.6931472, %v4008_v32  ;;  %v2612_v42 = vrot.slane %v2611_v25, 4  ;;  %v2237_v7 = vmax.f32 %v2235_v20, %v2236_v28  ;;  %v4987_v43 = vmax.f32 %v2228_v21, %v2229_v29 }
 0x1a0   : > { %v4012_v44 = vpop.eup %4011  ;;  %v4990_v27 = vadd.f32 %v2780_v33, %v4874_v36  ;;  %v2782_v63 = vmul.f32 0.6931472, %v4010_v40  ;;  %v2626_v46 = vrot.slane %v2625_v34, 4  ;;  %v2224_v48 = vrot.slane %v2223_v2, 1 }
 0x1a1   : > { %v4993_v49 = vadd.f32 %v2784_v41, %v4876_v37  ;;  %v2786_v52 = vmul.f32 0.6931472, %v4012_v44  ;;  %v2613_v55 = vadd.f32 %v2612_v42, %v2611_v25  ;;  %v2238_v0 = vrot.slane %v2237_v7, 1 }
 0x1a2   : > { %v4014_v5 = vpop.eup %4013  ;;  %v2863_v6 = vadd.f32 3.0, %v4990_v27  ;;  %v4997_v9 = vadd.f32 %v2782_v63, %v4878_v38  ;;  %v2627_v10 = vadd.f32 %v2626_v46, %v2625_v34  ;;  %v4999_v11 = vmax.f32 %v2223_v2, %v2224_v48 }
 0x1a3   : > { %v4016_v36 = vpop.eup %4015  ;;  %v2865_v12 = vadd.f32 3.0, %v4993_v49  ;;  %v5003_v13 = vadd.f32 %v2786_v52, %v4880_v39  ;;  %v2614_v37 = vrot.slane %v2613_v55, 2  ;;  %v2532_v14 = vunpack.c.l.bf16 %v4014_v5 }
 0x1a4   : > { %v3665_v16 = vmul.f32 -1.442695, %v2863_v6  ;;  %v2864_v18 = vadd.f32 3.0, %v4997_v9  ;;  %v2628_v19 = vrot.slane %v2627_v10, 2  ;;  %v2560_v3 = vunpack.c.h.bf16 %v4014_v5 }
 0x1a5   : > { %v3667_v20 = vmul.f32 -1.442695, %v2865_v12  ;;  %v2866_v38 = vadd.f32 3.0, %v5003_v13  ;;  %v2615_v21 = vadd.f32 %v2614_v37, %v2613_v55  ;;  %v2534_v61 = vunpack.c.l.bf16 %v4016_v36 }
 0x1a6   : > { %4017 = vpow2.f32 %v3665_v16  ;;  %v3666_v22 = vmul.f32 -1.442695, %v2864_v18  ;;  %v2629_v23 = vadd.f32 %v2628_v19, %v2627_v10  ;;  %v2618_v24 = vadd.f32 %v2560_v3, %v2532_v14  ;;  %v1853_v25 = vpop.f32.mrb[12].mxu0  ;;  %v1896_v28 = vpop.f32.mrb[12].mxu1 }
 0x1a7   : > { %4019 = vpow2.f32 %v3667_v20  ;;  %v3668_v39 = vmul.f32 -1.442695, %v2866_v38  ;;  %v2616_v29 = vrot.slane %v2615_v21, 1  ;;  %v2562_v30 = vunpack.c.h.bf16 %v4016_v36  ;;  %v1855_v32 = vpop.f32.mrb[13].mxu0  ;;  %v5007_v33 = vpop.f32.mrb[13].mxu1 }
 0x1a8   : > { %4021 = vpow2.f32 %v3666_v22  ;;  %v2630_v34 = vrot.slane %v2629_v23, 1  ;;  %v2619_v2 = vrot.slane %v2618_v24, 4  ;;  %v2367_v40 = vsub.f32 %v4950_v47, %v4999_v11  ;;  %v1857_v41 = vpop.f32.mrb[14].mxu0  ;;  %v1900_v42 = vpop.f32.mrb[14].mxu1 }
 0x1a9   : > { %4023 = vpow2.f32 %v3668_v39  ;;  %v2617_v44 = vadd.f32 %v2616_v29, %v2615_v21  ;;  %v2632_v63 = vadd.f32 %v2562_v30, %v2534_v61  ;;  %v2395_v46 = vsub.f32 %v4959_v54, %v4999_v11  ;;  %v1859_v48 = vpop.f32.mrb[15].mxu0  ;;  %v5013_v52 = vpop.f32.mrb[15].mxu1 }
 0x1aa   : > { %v2631_v55 = vadd.f32 %v2630_v34, %v2629_v23  ;;  %v2620_v5 = vadd.f32 %v2619_v2, %v2618_v24  ;;  %v5015_v6 = vmax.f32 %v2237_v7, %v2238_v0  ;;  %v2231_v10 = vrot.slane %v4987_v43, 1 }
 0x1ab   : > { %4025 = vlog2.f32 %v2617_v44  ;;  %v2633_v36 = vrot.slane %v2632_v63, 4  ;;  %v2423_v47 = vpack.c.bf16 %v2395_v46, %v2367_v40  ;;  %v2244_v12 = vmax.f32 %v4982_v4, %v2243_v35 }
 0x1ac   : > { %4027 = vlog2.f32 %v2631_v55  ;;  %v2621_v37 = vrot.slane %v2620_v5, 2  ;;  %v2369_v54 = vsub.f32 %v4953_v50, %v5015_v6  ;;  %v2397_v14 = vsub.f32 %v4962_v56, %v5015_v6 }
 0x1ad   : > { %v2634_v16 = vadd.f32 %v2633_v36, %v2632_v63  ;;  %v2468_v7 = vmul.bf16 1069105081, %v2423_v47  ;;  %v5026_v0 = vmax.f32 %v4987_v43, %v2231_v10  ;;  %v2245_v18 = vrot.slane %v2244_v12, 1 }
 0x1ae   : > { %v2622_v19 = vadd.f32 %v2621_v37, %v2620_v5  ;;  %v2425_v3 = vpack.c.bf16 %v2397_v14, %v2369_v54  ;;  %v5029_v20 = vadd.f32 %v1853_v25, %v4862_v58  ;;  %v3243_v4 = vunpack.c.0.s8 %v4984_v31 }
 0x1af   : > { %v2635_v35 = vrot.slane %v2634_v16, 2  ;;  %4029 = vpow.bf16 %v2468_v7  ;;  %v2368_v50 = vsub.f32 %v4956_v8, %v5026_v0  ;;  %v2396_v56 = vsub.f32 %v4965_v62, %v5026_v0 }
 0x1b0   : > { %v4018_v38 = vpop.eup %4017  ;;  %v2623_v21 = vrot.slane %v2622_v19, 1  ;;  %v2474_v43 = vmul.bf16 1069105081, %v2425_v3  ;;  %v5036_v61 = vmax.f32 %v2244_v12, %v2245_v18  ;;  %v5039_v22 = vadd.f32 %v1896_v28, %v4862_v58 }
 0x1b1   : > { %v4020_v23 = vpop.eup %4019  ;;  %v2975_v24 = vadd.f32 1.0, %v4018_v38  ;;  %v2636_v25 = vadd.f32 %v2635_v35, %v2634_v16  ;;  %v2424_v39 = vpack.c.bf16 %v2396_v56, %v2368_v50  ;;  %v5042_v29 = vadd.f32 %v1855_v32, %v4862_v58  ;;  %v3119_v50 = vpop.permute.xlu1 %3118 }
 0x1b2   : > { %v4022_v30 = vpop.eup %4021  ;;  %v2977_v8 = vadd.f32 1.0, %v4020_v23  ;;  %v2624_v34 = vadd.f32 %v2623_v21, %v2622_v19  ;;  %4031 = vpow.bf16 %v2474_v43  ;;  %v2370_v62 = vsub.f32 %v4968_v51, %v5036_v61 }
 0x1b3   : > { %v4024_v2 = vpop.eup %4023  ;;  %4033 = vrcp.f32 %v2975_v24  ;;  %v2976_v40 = vadd.f32 1.0, %v4022_v30  ;;  %v2637_v44 = vrot.slane %v2636_v25, 1  ;;  %v2471_v28 = vmul.bf16 1069105081, %v2424_v39 }
 0x1b4   : > { %4035 = vrcp.f32 %v2977_v8  ;;  %v2978_v63 = vadd.f32 1.0, %v4024_v2  ;;  %v2398_v46 = vsub.f32 %v4973_v1, %v5036_v61  ;;  %v5049_v32 = vadd.f32 %v1857_v41, %v4864_v59 }
 0x1b5   : > { %v4026_v55 = vpop.eup %4025  ;;  %4037 = vrcp.f32 %v2976_v40  ;;  %v2638_v5 = vadd.f32 %v2637_v44, %v2636_v25  ;;  %v5052_v10 = vadd.f32 %v1900_v42, %v4864_v59  ;;  %v5055_v51 = vadd.f32 %v1859_v48, %v4864_v59 }
 0x1b6   : > { %v4028_v36 = vpop.eup %4027  ;;  %4039 = vrcp.f32 %v2978_v63  ;;  %v2788_v47 = vmul.f32 0.6931472, %v4026_v55  ;;  %v2426_v12 = vpack.c.bf16 %v2398_v46, %v2370_v62  ;;  %v2247_v37 = vmax.f32 %v5029_v20, %v5049_v32 }
 0x1b7   : > { %v2792_v1 = vmul.f32 0.6931472, %v4028_v36  ;;  %4041 = vlog2.f32 %v2624_v34  ;;  %v2261_v41 = vmax.f32 %v5039_v22, %v5052_v10  ;;  %v2254_v54 = vmax.f32 %v5042_v29, %v5055_v51 }
 0x1b8   : > { %v5064_v42 = vadd.f32 %v2788_v47, %v4922_v53  ;;  %4043 = vlog2.f32 %v2638_v5  ;;  %v2477_v48 = vmul.bf16 1069105081, %v2426_v12  ;;  %v2248_v14 = vrot.slane %v2247_v37, 4 }
 0x1b9   : > { %v5067_v16 = vadd.f32 %v2792_v1, %v4924_v57  ;;  %4045 = vpow.bf16 %v2471_v28  ;;  %v5071_v7 = vadd.f32 %v5007_v33, %v4862_v58  ;;  %v2262_v18 = vrot.slane %v2261_v41, 4 }
 0x1ba   : > { %v4030_v19 = vpop.eup %4029  ;;  %v2867_v3 = vadd.f32 3.0, %v5064_v42  ;;  %4047 = vpow.bf16 %v2477_v48  ;;  %v2249_v35 = vmax.f32 %v2247_v37, %v2248_v14  ;;  %v5076_v53 = vadd.f32 %v5013_v52, %v4864_v59 }
 0x1bb   : > { %v2869_v56 = vadd.f32 3.0, %v5067_v16  ;;  %v2535_v57 = vunpack.c.l.bf16 %v4030_v19  ;;  %v2563_v38 = vunpack.c.h.bf16 %v4030_v19  ;;  %v2263_v21 = vmax.f32 %v2261_v41, %v2262_v18 }
 0x1bc   : > { %v3669_v43 = vmul.f32 -1.442695, %v2867_v3  ;;  %v2250_v23 = vrot.slane %v2249_v35, 2  ;;  %v2255_v33 = vrot.slane %v2254_v54, 4  ;;  %v5081_v24 = vmax.f32 %v5071_v7, %v5076_v53 }
 0x1bd   : > { %v4032_v25 = vpop.eup %4031  ;;  %v3671_v30 = vmul.f32 -1.442695, %v2869_v56  ;;  %v2639_v8 = vadd.f32 %v2563_v38, %v2535_v57  ;;  %v2264_v34 = vrot.slane %v2263_v21, 2  ;;  %v5085_v52 = vrot.slane %v3119_v50, %v3123_v17 }
 0x1be   : > { %v4034_v39 = vpop.eup %4033  ;;  %4049 = vpow2.f32 %v3669_v43  ;;  %v2537_v40 = vunpack.c.l.bf16 %v4032_v25  ;;  %v2565_v44 = vunpack.c.h.bf16 %v4032_v25  ;;  %v5088_v28 = vpop.f32.mrb[16].mxu0  ;;  %v2251_v36 = vmax.f32 %v2249_v35, %v2250_v23 }
 0x1bf   : > { %v4036_v62 = vpop.eup %4035  ;;  %v3059_v2 = vmul.f32 %v4034_v39, %v4990_v27  ;;  %v5090_v63 = vpop.f32.mrb[16].mxu1  ;;  %4051 = vpow2.f32 %v3671_v30  ;;  %v2640_v5 = vrot.slane %v2639_v8, 4  ;;  %v2265_v27 = vmax.f32 %v2263_v21, %v2264_v34 }
 0x1c0   : > { %v4038_v46 = vpop.eup %4037  ;;  %v3061_v55 = vmul.f32 %v4036_v62, %v4993_v49  ;;  %v5093_v47 = vpop.f32.mrb[17].mxu0  ;;  %v2653_v37 = vadd.f32 %v2565_v44, %v2537_v40  ;;  %v5097_v1 = vmax.f32 %v2254_v54, %v2255_v33  ;;  %v5102_v41 = vsub.s32 %v3243_v4, %v4947_v45 }
 0x1c1   : > { %v5095_v17 = vpop.f32.mrb[17].mxu1  ;;  %v4040_v12 = vpop.eup %4039  ;;  %v5108_v18 = vmul.f32 0.16666667, %v3059_v2  ;;  %v3060_v19 = vmul.f32 %v4038_v46, %v4997_v9  ;;  %v2641_v3 = vadd.f32 %v2640_v5, %v2639_v8  ;;  %v2252_v35 = vrot.slane %v2251_v36, 1 }
 0x1c2   : > { %v5104_v48 = vpop.f32.mrb[18].mxu0  ;;  %v5106_v49 = vpop.f32.mrb[18].mxu1  ;;  %v5115_v57 = vmul.f32 0.16666667, %v3061_v55  ;;  %v2654_v31 = vrot.slane %v2653_v37, 4  ;;  %v2266_v4 = vrot.slane %v2265_v27, 1  ;;  %v3062_v38 = vmul.f32 %v4040_v12, %v5003_v13 }
 0x1c3   : > { %v4042_v14 = vpop.eup %4041  ;;  %v5111_v50 = vpop.f32.mrb[19].mxu0  ;;  %v2642_v43 = vrot.slane %v2641_v3, 2  ;;  %v5118_v23 = vmax.f32 %v2251_v36, %v2252_v35  ;;  %v2257_v30 = vrot.slane %v5097_v1, 2 }
 0x1c4   : > { %v5113_v54 = vpop.f32.mrb[19].mxu1  ;;  %v4044_v56 = vpop.eup %4043  ;;  %v2790_v45 = vmul.f32 0.6931472, %v4042_v14  ;;  %v2655_v25 = vadd.f32 %v2654_v31, %v2653_v37  ;;  %v5123_v39 = vmax.f32 %v2265_v27, %v2266_v4 }
 0x1c5   : > { %v2794_v21 = vmul.f32 0.6931472, %v4044_v56  ;;  %v4046_v33 = vpop.eup %4045  ;;  %v2643_v62 = vadd.f32 %v2642_v43, %v2641_v3  ;;  %v2371_v12 = vsub.f32 %v5029_v20, %v5118_v23  ;;  %v2399_v3 = vsub.f32 %v5049_v32, %v5118_v23 }
 0x1c6   : > { %v5121_v9 = vadd.f32 %v2790_v45, %v4934_v15  ;;  %v4048_v8 = vpop.eup %4047  ;;  %v2536_v2 = vunpack.c.l.bf16 %v4046_v33  ;;  %v2564_v13 = vunpack.c.h.bf16 %v4046_v33  ;;  %v2656_v44 = vrot.slane %v2655_v25, 2 }
 0x1c7   : > { %v5127_v34 = vadd.f32 %v2794_v21, %v4936_v60  ;;  %v2538_v46 = vunpack.c.l.bf16 %v4048_v8  ;;  %v2566_v55 = vunpack.c.h.bf16 %v4048_v8  ;;  %v2644_v5 = vrot.slane %v2643_v62, 1 }
 0x1c8   : > { %v2868_v40 = vadd.f32 3.0, %v5121_v9  ;;  %v2646_v36 = vadd.f32 %v2564_v13, %v2536_v2  ;;  %v4050_v37 = vpop.eup %4049  ;;  %v2657_v14 = vadd.f32 %v2656_v44, %v2655_v25  ;;  %v2427_v2 = vpack.c.bf16 %v2399_v3, %v2371_v12 }
 0x1c9   : > { %v2870_v15 = vadd.f32 3.0, %v5127_v34  ;;  %v2660_v60 = vadd.f32 %v2566_v55, %v2538_v46  ;;  %v4052_v35 = vpop.eup %4051  ;;  %v2979_v56 = vadd.f32 1.0, %v4050_v37  ;;  %v2645_v31 = vadd.f32 %v2644_v5, %v2643_v62 }
 0x1ca   : > { %v3670_v27 = vmul.f32 -1.442695, %v2868_v40  ;;  %v2647_v4 = vrot.slane %v2646_v36, 4  ;;  %v2981_v21 = vadd.f32 1.0, %v4052_v35  ;;  %v2658_v43 = vrot.slane %v2657_v14, 1 }
 0x1cb   : > { %v3672_v45 = vmul.f32 -1.442695, %v2870_v15  ;;  %v2661_v33 = vrot.slane %v2660_v60, 4  ;;  %v2373_v20 = vsub.f32 %v5039_v22, %v5123_v39  ;;  %v2401_v32 = vsub.f32 %v5052_v10, %v5123_v39 }
 0x1cc   : > { %4053 = vpow2.f32 %v3670_v27  ;;  %v2648_v8 = vadd.f32 %v2647_v4, %v2646_v36  ;;  %v2659_v25 = vadd.f32 %v2658_v43, %v2657_v14  ;;  %v2480_v62 = vmul.bf16 1069105081, %v2427_v2 }
 0x1cd   : > { %4055 = vrcp.f32 %v2979_v56  ;;  %v2662_v13 = vadd.f32 %v2661_v33, %v2660_v60  ;;  %v2258_v44 = vmax.f32 %v5097_v1, %v2257_v30  ;;  %v2429_v55 = vpack.c.bf16 %v2401_v32, %v2373_v20 }
 0x1ce   : > { %4057 = vrcp.f32 %v2981_v21  ;;  %v2649_v40 = vrot.slane %v2648_v8, 2  ;;  %v2269_v15 = vrot.slane %v5081_v24, 4  ;;  %v5141_v5 = vmul.f32 0.16666667, %v3060_v19 }
 0x1cf   : > { %4059 = vpow2.f32 %v3672_v45  ;;  %v2663_v46 = vrot.slane %v2662_v13, 2  ;;  %v2259_v36 = vrot.slane %v2258_v44, 1  ;;  %v2486_v37 = vmul.bf16 1069105081, %v2429_v55 }
 0x1d0   : > { %4061 = vlog2.f32 %v2645_v31  ;;  %v2650_v22 = vadd.f32 %v2649_v40, %v2648_v8  ;;  %v2270_v10 = vmax.f32 %v5081_v24, %v2269_v15  ;;  %v5144_v27 = vmul.f32 0.16666667, %v3062_v38 }
 0x1d1   : > { %4063 = vlog2.f32 %v2659_v25  ;;  %v2664_v12 = vadd.f32 %v2663_v46, %v2662_v13  ;;  %v5146_v60 = vmax.f32 %v2258_v44, %v2259_v36  ;;  %v5150_v1 = vadd.f32 %v5088_v28, %v4862_v58 }
 0x1d2   : > { %4065 = vpow.bf16 %v2480_v62  ;;  %v2651_v14 = vrot.slane %v2650_v22, 1  ;;  %v2271_v19 = vrot.slane %v2270_v10, 2  ;;  %v5154_v3 = vadd.f32 %v5090_v63, %v4862_v58 }
 0x1d3   : > { %v2665_v30 = vrot.slane %v2664_v12, 1  ;;  %4067 = vpow.bf16 %v2486_v37  ;;  %v2372_v24 = vsub.f32 %v5042_v29, %v5146_v60  ;;  %v2400_v38 = vsub.f32 %v5055_v51, %v5146_v60 }
 0x1d4   : > { %v2652_v35 = vadd.f32 %v2651_v14, %v2650_v22  ;;  %v5162_v56 = vadd.f32 %v5104_v48, %v4864_v59  ;;  %v2272_v31 = vmax.f32 %v2270_v10, %v2271_v19  ;;  %v5166_v4 = vadd.f32 %v5093_v47, %v4862_v58 }
 0x1d5   : > { %v2666_v45 = vadd.f32 %v2665_v30, %v2664_v12  ;;  %v5170_v63 = vadd.f32 %v5106_v49, %v4864_v59  ;;  %v2428_v43 = vpack.c.bf16 %v2400_v38, %v2372_v24  ;;  %v5176_v8 = vadd.f32 %v5095_v17, %v4862_v58 }
 0x1d6   : > { %v4054_v28 = vpop.eup %4053  ;;  %4069 = vlog2.f32 %v2652_v35  ;;  %v2275_v51 = vmax.f32 %v5150_v1, %v5162_v56  ;;  %v2273_v33 = vrot.slane %v2272_v31, 1  ;;  %v5180_v2 = vpop.f32.mrb[20].mxu0  ;;  %v5187_v40 = vadd.f32 %v5111_v50, %v4864_v59 }
 0x1d7   : > { %v4056_v21 = vpop.eup %4055  ;;  %v2980_v29 = vadd.f32 1.0, %v4054_v28  ;;  %4071 = vlog2.f32 %v2666_v45  ;;  %v2289_v47 = vmax.f32 %v5154_v3, %v5170_v63  ;;  %v5182_v49 = vpop.f32.mrb[20].mxu1  ;;  %v2483_v13 = vmul.bf16 1069105081, %v2428_v43 }
 0x1d8   : > { %v4058_v48 = vpop.eup %4057  ;;  %v3063_v25 = vmul.f32 %v4056_v21, %v5064_v42  ;;  %v2276_v32 = vrot.slane %v2275_v51, 4  ;;  %v5189_v62 = vpop.f32.mrb[21].mxu0  ;;  %v5193_v55 = vmax.f32 %v2272_v31, %v2273_v33  ;;  %v5213_v45 = vmax.f32 %v5166_v4, %v5187_v40 }
 0x1d9   : > { %v4060_v20 = vpop.eup %4059  ;;  %v5191_v17 = vpop.f32.mrb[21].mxu1  ;;  %4073 = vrcp.f32 %v2980_v29  ;;  %v2290_v15 = vrot.slane %v2289_v47, 4  ;;  %v3065_v12 = vmul.f32 %v4058_v48, %v5067_v16 }
 0x1da   : > { %v4062_v44 = vpop.eup %4061  ;;  %v2982_v46 = vadd.f32 1.0, %v4060_v20  ;;  %v5195_v22 = vpop.f32.mrb[22].mxu0  ;;  %4075 = vpow.bf16 %v2483_v13  ;;  %v2277_v50 = vmax.f32 %v2275_v51, %v2276_v32  ;;  %v2374_v19 = vsub.f32 %v5071_v7, %v5193_v55 }
 0x1db   : > { %v5197_v36 = vpop.f32.mrb[22].mxu1  ;;  %v4064_v42 = vpop.eup %4063  ;;  %v2796_v37 = vmul.f32 0.6931472, %v4062_v44  ;;  %v2402_v35 = vsub.f32 %v5076_v53, %v5193_v55  ;;  %v2291_v28 = vmax.f32 %v2289_v47, %v2290_v15  ;;  %v5218_v51 = vmul.f32 0.16666667, %v3063_v25 }
 0x1dc   : > { %v5200_v10 = vpop.f32.mrb[23].mxu0  ;;  %v5202_v14 = vpop.f32.mrb[23].mxu1  ;;  %4077 = vrcp.f32 %v2982_v46  ;;  %v2800_v30 = vmul.f32 0.6931472, %v4064_v42  ;;  %v2278_v16 = vrot.slane %v2277_v50, 2 }
 0x1dd   : > { %v4066_v24 = vpop.eup %4065  ;;  %v5209_v38 = vadd.f32 %v2796_v37, %v4999_v11  ;;  %v2430_v43 = vpack.c.bf16 %v2402_v35, %v2374_v19  ;;  %v2292_v11 = vrot.slane %v2291_v28, 2  ;;  %v5222_v35 = vmul.f32 0.16666667, %v3065_v12 }
 0x1de   : > { %v5216_v31 = vadd.f32 %v2800_v30, %v5015_v6  ;;  %v2539_v21 = vunpack.c.l.bf16 %v4066_v24  ;;  %v2567_v29 = vunpack.c.h.bf16 %v4066_v24  ;;  %v4068_v7 = vpop.eup %4067  ;;  %v2279_v48 = vmax.f32 %v2277_v50, %v2278_v16 }
 0x1df   : > { %v2871_v53 = vadd.f32 3.0, %v5209_v38  ;;  %v2541_v20 = vunpack.c.l.bf16 %v4068_v7  ;;  %v2569_v13 = vunpack.c.h.bf16 %v4068_v7  ;;  %v2489_v46 = vmul.bf16 1069105081, %v2430_v43 }
 0x1e0   : > { %v2873_v33 = vadd.f32 3.0, %v5216_v31  ;;  %v2667_v47 = vadd.f32 %v2567_v29, %v2539_v21  ;;  %v4070_v32 = vpop.eup %4069  ;;  %v2280_v6 = vrot.slane %v2279_v48, 1  ;;  %v2293_v15 = vmax.f32 %v2291_v28, %v2292_v11 }
 0x1e1   : > { %v3673_v44 = vmul.f32 -1.442695, %v2871_v53  ;;  %v4072_v42 = vpop.eup %4071  ;;  %v2798_v30 = vmul.f32 0.6931472, %v4070_v32  ;;  %v2681_v25 = vadd.f32 %v2569_v13, %v2541_v20 }
 0x1e2   : > { %v3675_v37 = vmul.f32 -1.442695, %v2873_v33  ;;  %v2668_v19 = vrot.slane %v2667_v47, 4  ;;  %v2802_v50 = vmul.f32 0.6931472, %v4072_v42  ;;  %v5224_v24 = vmax.f32 %v2279_v48, %v2280_v6 }
 0x1e3   : > { %4079 = vpow2.f32 %v3673_v44  ;;  %v4074_v16 = vpop.eup %4073  ;;  %v5227_v21 = vadd.f32 %v2798_v30, %v5026_v0  ;;  %v2294_v43 = vrot.slane %v2293_v15, 1  ;;  %v2682_v7 = vrot.slane %v2681_v25, 4 }
 0x1e4   : > { %4081 = vpow2.f32 %v3675_v37  ;;  %v2669_v29 = vadd.f32 %v2668_v19, %v2667_v47  ;;  %v5230_v28 = vadd.f32 %v2802_v50, %v5036_v61  ;;  %v2375_v12 = vsub.f32 %v5150_v1, %v5224_v24 }
 0x1e5   : > { %4083 = vpow.bf16 %v2489_v46  ;;  %v4076_v53 = vpop.eup %4075  ;;  %v2872_v48 = vadd.f32 3.0, %v5227_v21  ;;  %v2403_v20 = vsub.f32 %v5162_v56, %v5224_v24  ;;  %v2283_v0 = vrot.slane %v5213_v45, 4 }
 0x1e6   : > { %v4078_v11 = vpop.eup %4077  ;;  %v2670_v33 = vrot.slane %v2669_v29, 2  ;;  %v3064_v47 = vmul.f32 %v4074_v16, %v5121_v9  ;;  %v2874_v61 = vadd.f32 3.0, %v5230_v28  ;;  %v2683_v13 = vadd.f32 %v2682_v7, %v2681_v25 }
 0x1e7   : > { %v2540_v32 = vunpack.c.l.bf16 %v4076_v53  ;;  %v3674_v44 = vmul.f32 -1.442695, %v2872_v48  ;;  %v2568_v6 = vunpack.c.h.bf16 %v4076_v53  ;;  %v2431_v1 = vpack.c.bf16 %v2403_v20, %v2375_v12 }
 0x1e8   : > { %v2671_v46 = vadd.f32 %v2670_v33, %v2669_v29  ;;  %v3066_v42 = vmul.f32 %v4078_v11, %v5127_v34  ;;  %v3676_v37 = vmul.f32 -1.442695, %v2874_v61  ;;  %v2684_v30 = vrot.slane %v2683_v13, 2 }
 0x1e9   : > { %v5241_v19 = vmax.f32 %v2293_v15, %v2294_v43  ;;  %4085 = vpow2.f32 %v3674_v44  ;;  %v2674_v50 = vadd.f32 %v2568_v6, %v2540_v32  ;;  %v2492_v26 = vmul.bf16 1069105081, %v2431_v1 }
 0x1ea   : > { %v2672_v56 = vrot.slane %v2671_v46, 1  ;;  %4087 = vpow2.f32 %v3676_v37  ;;  %v2685_v9 = vadd.f32 %v2684_v30, %v2683_v13  ;;  %v2284_v34 = vmax.f32 %v5213_v45, %v2283_v0 }
 0x1eb   : > { %v2377_v25 = vsub.f32 %v5154_v3, %v5241_v19  ;;  %v2405_v16 = vsub.f32 %v5170_v63, %v5241_v19  ;;  %v2675_v7 = vrot.slane %v2674_v50, 4  ;;  %4089 = vpow.bf16 %v2492_v26 }
 0x1ec   : > { %v2673_v29 = vadd.f32 %v2672_v56, %v2671_v46  ;;  %v5248_v15 = vmul.f32 0.16666667, %v3064_v47  ;;  %v2686_v43 = vrot.slane %v2685_v9, 1  ;;  %v5252_v11 = vadd.f32 %v5113_v54, %v4864_v59 }
 0x1ed   : > { %v4080_v12 = vpop.eup %4079  ;;  %v2433_v53 = vpack.c.bf16 %v2405_v16, %v2377_v25  ;;  %v2676_v3 = vadd.f32 %v2675_v7, %v2674_v50  ;;  %v2285_v20 = vrot.slane %v2284_v34, 2  ;;  %v5256_v0 = vmul.f32 0.16666667, %v3066_v42 }
 0x1ee   : > { %v4082_v48 = vpop.eup %4081  ;;  %v2983_v33 = vadd.f32 1.0, %v4080_v12  ;;  %4091 = vlog2.f32 %v2673_v29  ;;  %v2687_v61 = vadd.f32 %v2686_v43, %v2685_v9  ;;  %v2296_v26 = vmax.f32 %v5176_v8, %v5252_v11  ;;  %v5258_v44 = vpop.f32.mrb[24].mxu0 }
 0x1ef   : > { %v2985_v63 = vadd.f32 1.0, %v4082_v48  ;;  %v2498_v13 = vmul.bf16 1069105081, %v2433_v53  ;;  %v2677_v47 = vrot.slane %v2676_v3, 2  ;;  %v2286_v32 = vmax.f32 %v2284_v34, %v2285_v20  ;;  %v5260_v54 = vpop.f32.mrb[24].mxu1  ;;  %v5262_v37 = vpop.f32.mrb[25].mxu0 }
 0x1f0   : > { %v4084_v45 = vpop.eup %4083  ;;  %4093 = vrcp.f32 %v2983_v33  ;;  %v2297_v1 = vrot.slane %v2296_v26, 4  ;;  %v5264_v30 = vpop.f32.mrb[25].mxu1  ;;  %v5268_v42 = vadd.f32 %v5180_v2, %v4862_v58  ;;  %v5276_v7 = vadd.f32 %v5182_v49, %v4862_v58 }
 0x1f1   : > { %4095 = vrcp.f32 %v2985_v63  ;;  %v2542_v46 = vunpack.c.l.bf16 %v4084_v45  ;;  %v2570_v6 = vunpack.c.h.bf16 %v4084_v45  ;;  %5627 = vst [vmem:[#allocation4_spill] sm:$0xff] %v5264_v30  ;;  %v2678_v56 = vadd.f32 %v2677_v47, %v2676_v3  ;;  %v5270_v9 = vpop.f32.mrb[26].mxu0  ;;  %v5272_v25 = vpop.f32.mrb[26].mxu1 }
 0x1f2   : > { %4097 = vlog2.f32 %v2687_v61  ;;  %v2287_v50 = vrot.slane %v2286_v32, 1  ;;  %5628 = vst [vmem:[#allocation5_spill] sm:$0xff] %v5272_v25  ;;  %v2298_v29 = vmax.f32 %v2296_v26, %v2297_v1  ;;  %v5278_v34 = vpop.f32.mrb[27].mxu0  ;;  %v5280_v12 = vpop.f32.mrb[27].mxu1  ;;  %v5286_v2 = vadd.f32 %v5189_v62, %v4862_v58 }
 0x1f3   : > { %v2688_v16 = vadd.f32 %v2570_v6, %v2542_v46  ;;  %4099 = vpow.bf16 %v2498_v13  ;;  %5629 = vst [vmem:[#allocation6_spill] sm:$0xff] %v5278_v34  ;;  %5630 = vst [vmem:[#allocation7_spill] sm:$0xff] %v5280_v12  ;;  %v4086_v43 = vpop.eup %4085  ;;  %v2679_v53 = vrot.slane %v2678_v56, 1  ;;  %v5290_v33 = vadd.f32 %v5195_v22, %v4864_v59 }
 0x1f4   : > { %v5282_v48 = vmax.f32 %v2286_v32, %v2287_v50  ;;  %v4088_v3 = vpop.eup %4087  ;;  %v2984_v20 = vadd.f32 1.0, %v4086_v43  ;;  %v2299_v63 = vrot.slane %v2298_v29, 2  ;;  %v5294_v61 = vadd.f32 %v5197_v36, %v4864_v59 }
 0x1f5   : > { %v2689_v49 = vrot.slane %v2688_v16, 4  ;;  %v2986_v13 = vadd.f32 1.0, %v4088_v3  ;;  %v2680_v26 = vadd.f32 %v2679_v53, %v2678_v56  ;;  %v2303_v46 = vmax.f32 %v5268_v42, %v5290_v33 }
 0x1f6   : > { %v2376_v45 = vsub.f32 %v5166_v4, %v5282_v48  ;;  %v2404_v62 = vsub.f32 %v5187_v40, %v5282_v48  ;;  %v4090_v47 = vpop.eup %4089  ;;  %4101 = vrcp.f32 %v2984_v20  ;;  %v2300_v32 = vmax.f32 %v2298_v29, %v2299_v63 }
 0x1f7   : > { %v2690_v22 = vadd.f32 %v2689_v49, %v2688_v16  ;;  %4103 = vrcp.f32 %v2986_v13  ;;  %v2543_v1 = vunpack.c.l.bf16 %v4090_v47  ;;  %v2571_v36 = vunpack.c.h.bf16 %v4090_v47 }
 0x1f8   : > { %v4092_v6 = vpop.eup %4091  ;;  %v2432_v50 = vpack.c.bf16 %v2404_v62, %v2376_v45  ;;  %4105 = vlog2.f32 %v2680_v26  ;;  %v2301_v53 = vrot.slane %v2300_v32, 1  ;;  %v2304_v40 = vrot.slane %v2303_v46, 4 }
 0x1f9   : > { %v2804_v43 = vmul.f32 0.6931472, %v4092_v6  ;;  %v2691_v56 = vrot.slane %v2690_v22, 2  ;;  %v2695_v3 = vadd.f32 %v2571_v36, %v2543_v1  ;;  %v2317_v16 = vmax.f32 %v5276_v7, %v5294_v61 }
 0x1fa   : > { %v4094_v4 = vpop.eup %4093  ;;  %v2495_v12 = vmul.bf16 1069105081, %v2432_v50  ;;  %v5307_v63 = vmax.f32 %v2300_v32, %v2301_v53  ;;  %v5311_v13 = vadd.f32 %v5191_v17, %v4862_v58  ;;  %v2305_v62 = vmax.f32 %v2303_v46, %v2304_v40 }
 0x1fb   : > { %v4096_v29 = vpop.eup %4095  ;;  %v5305_v20 = vadd.f32 %v2804_v43, %v5118_v23  ;;  %v2692_v49 = vadd.f32 %v2691_v56, %v2690_v22  ;;  %v2696_v45 = vrot.slane %v2695_v3, 4  ;;  %v5315_v47 = vadd.f32 %v5200_v10, %v4864_v59 }
 0x1fc   : > { %v4098_v26 = vpop.eup %4097  ;;  %4107 = vpow.bf16 %v2495_v12  ;;  %v3067_v6 = vmul.f32 %v4094_v4, %v5209_v38  ;;  %v3069_v36 = vmul.f32 %v4096_v29, %v5216_v31  ;;  %v2378_v17 = vsub.f32 %v5176_v8, %v5307_v63 }
 0x1fd   : > { %v2875_v23 = vadd.f32 3.0, %v5305_v20  ;;  %v2808_v1 = vmul.f32 0.6931472, %v4098_v26  ;;  %v2693_v22 = vrot.slane %v2692_v49, 1  ;;  %v2697_v50 = vadd.f32 %v2696_v45, %v2695_v3 }
 0x1fe   : > { %v4100_v32 = vpop.eup %4099  ;;  %v2406_v12 = vsub.f32 %v5252_v11, %v5307_v63  ;;  %v2306_v40 = vrot.slane %v2305_v62, 2  ;;  %v2318_v3 = vrot.slane %v2317_v16, 4  ;;  %v2310_v8 = vmax.f32 %v5286_v2, %v5315_v47 }
 0x1ff   : > { %v3677_v46 = vmul.f32 -1.442695, %v2875_v23  ;;  %v5325_v10 = vadd.f32 %v2808_v1, %v5123_v39  ;;  %v2694_v43 = vadd.f32 %v2693_v22, %v2692_v49  ;;  %v2545_v38 = vunpack.c.l.bf16 %v4100_v32 }
 0x200   : > { %v2698_v56 = vrot.slane %v2697_v50, 2  ;;  %v2573_v53 = vunpack.c.h.bf16 %v4100_v32  ;;  %v2434_v4 = vpack.c.bf16 %v2406_v12, %v2378_v17  ;;  %v4102_v26 = vpop.eup %4101  ;;  %v5330_v11 = vmul.f32 0.16666667, %v3067_v6 }
 0x201   : > { %4109 = vpow2.f32 %v3677_v46  ;;  %v2877_v31 = vadd.f32 3.0, %v5325_v10  ;;  %v4104_v29 = vpop.eup %4103  ;;  %v5332_v23 = vmul.f32 0.16666667, %v3069_v36  ;;  %v2307_v32 = vmax.f32 %v2305_v62, %v2306_v40 }
 0x202   : > { %4111 = vlog2.f32 %v2694_v43  ;;  %v2699_v39 = vadd.f32 %v2698_v56, %v2697_v50  ;;  %v2709_v45 = vadd.f32 %v2573_v53, %v2545_v38  ;;  %v4106_v49 = vpop.eup %4105  ;;  %v2501_v22 = vmul.bf16 1069105081, %v2434_v4 }
 0x203   : > { %v3679_v1 = vmul.f32 -1.442695, %v2877_v31  ;;  %v3068_v17 = vmul.f32 %v4102_v26, %v5227_v21  ;;  %v2806_v12 = vmul.f32 0.6931472, %v4106_v49  ;;  %v3070_v34 = vmul.f32 %v4104_v29, %v5230_v28 }
 0x204   : > { %v2700_v46 = vrot.slane %v2699_v39, 1  ;;  %v2710_v30 = vrot.slane %v2709_v45, 4  ;;  %v2308_v25 = vrot.slane %v2307_v32, 1  ;;  %v2319_v6 = vmax.f32 %v2317_v16, %v2318_v3 }
 0x205   : > { %4113 = vpow2.f32 %v3679_v1  ;;  %v5337_v43 = vadd.f32 %v2806_v12, %v5146_v60  ;;  %v2311_v53 = vrot.slane %v2310_v8, 4  ;;  %v5343_v21 = vadd.f32 %v5202_v14, %v4864_v59 }
 0x206   : > { %v2701_v50 = vadd.f32 %v2700_v46, %v2699_v39  ;;  %v2711_v38 = vadd.f32 %v2710_v30, %v2709_v45  ;;  %4115 = vpow.bf16 %v2501_v22  ;;  %v5339_v56 = vmax.f32 %v2307_v32, %v2308_v25 }
 0x207   : > { %v4108_v36 = vpop.eup %4107  ;;  %v2320_v62 = vrot.slane %v2319_v6, 2  ;;  %v2876_v28 = vadd.f32 3.0, %v5337_v43  ;;  %v2312_v3 = vmax.f32 %v2310_v8, %v2311_v53  ;;  %v2324_v14 = vmax.f32 %v5311_v13, %v5343_v21 }
 0x208   : > { %4117 = vlog2.f32 %v2701_v50  ;;  %v2712_v4 = vrot.slane %v2711_v38, 2  ;;  %v2544_v16 = vunpack.c.l.bf16 %v4108_v36  ;;  %v2572_v40 = vunpack.c.h.bf16 %v4108_v36 }
 0x209   : > { %v2379_v60 = vsub.f32 %v5268_v42, %v5339_v56  ;;  %v2407_v30 = vsub.f32 %v5290_v33, %v5339_v56  ;;  %v2321_v25 = vmax.f32 %v2319_v6, %v2320_v62  ;;  %v3678_v26 = vmul.f32 -1.442695, %v2876_v28 }
 0x20a   : > { %v2713_v31 = vadd.f32 %v2712_v4, %v2711_v38  ;;  %v5352_v39 = vmul.f32 0.16666667, %v3068_v17  ;;  %v2702_v45 = vadd.f32 %v2572_v40, %v2544_v16  ;;  %v2313_v12 = vrot.slane %v2312_v3, 2 }
 0x20b   : > { %v4110_v29 = vpop.eup %4109  ;;  %v2435_v49 = vpack.c.bf16 %v2407_v30, %v2379_v60  ;;  %v2322_v1 = vrot.slane %v2321_v25, 1  ;;  %4119 = vpow2.f32 %v3678_v26  ;;  %v2325_v36 = vrot.slane %v2324_v14, 4 }
 0x20c   : > { %v4112_v22 = vpop.eup %4111  ;;  %v2987_v32 = vadd.f32 1.0, %v4110_v29  ;;  %v2714_v42 = vrot.slane %v2713_v31, 1  ;;  %v2703_v33 = vrot.slane %v2702_v45, 4  ;;  %v2314_v38 = vmax.f32 %v2312_v3, %v2313_v12 }
 0x20d   : > { %v2810_v46 = vmul.f32 0.6931472, %v4112_v22  ;;  %v2504_v6 = vmul.bf16 1069105081, %v2435_v49  ;;  %v5354_v50 = vmax.f32 %v2321_v25, %v2322_v1  ;;  %v5363_v30 = vmul.f32 0.16666667, %v3070_v34 }
 0x20e   : > { %4121 = vrcp.f32 %v2987_v32  ;;  %v2715_v8 = vadd.f32 %v2714_v42, %v2713_v31  ;;  %v2704_v53 = vadd.f32 %v2703_v33, %v2702_v45  ;;  %v2315_v40 = vrot.slane %v2314_v38, 1 }
 0x20f   : > { %v4114_v62 = vpop.eup %4113  ;;  %v5357_v17 = vadd.f32 %v2810_v46, %v5193_v55  ;;  %4123 = vpow.bf16 %v2504_v6  ;;  %v2381_v28 = vsub.f32 %v5276_v7, %v5354_v50  ;;  %v2409_v16 = vsub.f32 %v5294_v61, %v5354_v50 }
 0x210   : > { %v2989_v4 = vadd.f32 1.0, %v4114_v62  ;;  %4125 = vlog2.f32 %v2715_v8  ;;  %v2705_v26 = vrot.slane %v2704_v53, 2  ;;  %v2326_v31 = vmax.f32 %v2324_v14, %v2325_v36 }
 0x211   : > { %v4116_v60 = vpop.eup %4115  ;;  %v2878_v25 = vadd.f32 3.0, %v5357_v17  ;;  %v2437_v45 = vpack.c.bf16 %v2409_v16, %v2381_v28  ;;  %v5366_v22 = vmax.f32 %v2314_v38, %v2315_v40  ;;  %v3125_v34 = vsub.f32 %v5108_v18, %v5085_v52 }
 0x212   : > { %v4118_v55 = vpop.eup %4117  ;;  %4127 = vrcp.f32 %v2989_v4  ;;  %v2546_v3 = vunpack.c.l.bf16 %v4116_v60  ;;  %v2574_v29 = vunpack.c.h.bf16 %v4116_v60  ;;  %v2706_v1 = vadd.f32 %v2705_v26, %v2704_v53 }
 0x213   : > { %v3680_v49 = vmul.f32 -1.442695, %v2878_v25  ;;  %v2812_v7 = vmul.f32 0.6931472, %v4118_v55  ;;  %v2510_v61 = vmul.bf16 1069105081, %v2437_v45  ;;  %v2380_v46 = vsub.f32 %v5286_v2, %v5366_v22 }
 0x214   : > { %v2716_v32 = vadd.f32 %v2574_v29, %v2546_v3  ;;  %v2327_v42 = vrot.slane %v2326_v31, 2  ;;  %v2707_v14 = vrot.slane %v2706_v1, 1  ;;  %v2408_v8 = vsub.f32 %v5315_v47, %v5366_v22 }
 0x215   : > { %4129 = vpow2.f32 %v3680_v49  ;;  %v5371_v12 = vadd.f32 %v2812_v7, %v5224_v24  ;;  %v4120_v33 = vpop.eup %4119  ;;  %v3126_v28 = vsub.f32 %v5141_v5, %v5085_v52  ;;  %v3127_v2 = vsub.f32 %v5115_v57, %v5085_v52 }
 0x216   : > { %v2717_v6 = vrot.slane %v2716_v32, 4  ;;  %4131 = vpow.bf16 %v2510_v61  ;;  %v2328_v38 = vmax.f32 %v2326_v31, %v2327_v42  ;;  %v2988_v36 = vadd.f32 1.0, %v4120_v33 }
 0x217   : > { %v2879_v62 = vadd.f32 3.0, %v5371_v12  ;;  %v2708_v53 = vadd.f32 %v2707_v14, %v2706_v1  ;;  %v2436_v16 = vpack.c.bf16 %v2408_v8, %v2380_v46  ;;  %v3128_v47 = vsub.f32 %v5144_v27, %v5085_v52 }
 0x218   : > { %v4122_v24 = vpop.eup %4121  ;;  %v2718_v4 = vadd.f32 %v2717_v6, %v2716_v32  ;;  %v2329_v40 = vrot.slane %v2328_v38, 1  ;;  %4133 = vrcp.f32 %v2988_v36  ;;  %v3129_v7 = vsub.f32 %v5218_v51, %v5085_v52 }
 0x219   : > { %v3071_v60 = vmul.f32 %v4122_v24, %v5305_v20  ;;  %v3681_v25 = vmul.f32 -1.442695, %v2879_v62  ;;  %4135 = vlog2.f32 %v2708_v53  ;;  %v2507_v3 = vmul.bf16 1069105081, %v2436_v16 }
 0x21a   : > { %v4124_v26 = vpop.eup %4123  ;;  %v2719_v55 = vrot.slane %v2718_v4, 2  ;;  %v5385_v29 = vmax.f32 %v2328_v38, %v2329_v40  ;;  %v3130_v33 = vsub.f32 %v5248_v15, %v5085_v52  ;;  %v3131_v38 = vsub.f32 %v5222_v35, %v5085_v52 }
 0x21b   : > { %v4126_v31 = vpop.eup %4125  ;;  %4137 = vpow2.f32 %v3681_v25  ;;  %v2547_v49 = vunpack.c.l.bf16 %v4124_v26  ;;  %v2575_v32 = vunpack.c.h.bf16 %v4124_v26  ;;  %v5399_v6 = vmul.f32 0.16666667, %v3071_v60 }
 0x21c   : > { %v2816_v45 = vmul.f32 0.6931472, %v4126_v31  ;;  %v4128_v1 = vpop.eup %4127  ;;  %v2720_v20 = vadd.f32 %v2719_v55, %v2718_v4  ;;  %4139 = vpow.bf16 %v2507_v3  ;;  %v2382_v61 = vsub.f32 %v5311_v13, %v5385_v29 }
 0x21d   : > { %v3073_v42 = vmul.f32 %v4128_v1, %v5325_v10  ;;  %v2410_v46 = vsub.f32 %v5343_v21, %v5385_v29  ;;  %v2723_v8 = vadd.f32 %v2575_v32, %v2547_v49  ;;  %v3132_v62 = vsub.f32 %v5256_v0, %v5085_v52 }
 0x21e   : > { %v5393_v14 = vadd.f32 %v2816_v45, %v5241_v19  ;;  %v2721_v51 = vrot.slane %v2720_v20, 1  ;;  %v3133_v15 = vsub.f32 %v5330_v11, %v5085_v52  ;;  %v3134_v35 = vsub.f32 %v5352_v39, %v5085_v52 }
 0x21f   : > { %v4130_v36 = vpop.eup %4129  ;;  %v5403_v13 = vmul.f32 0.16666667, %v3073_v42  ;;  %v2438_v19 = vpack.c.bf16 %v2410_v46, %v2382_v61  ;;  %v2724_v24 = vrot.slane %v2723_v8, 4  ;;  %v3135_v60 = vsub.f32 %v5332_v23, %v5085_v52 }
 0x220   : > { %v2881_v10 = vadd.f32 3.0, %v5393_v14  ;;  %v2990_v21 = vadd.f32 1.0, %v4130_v36  ;;  %v2722_v53 = vadd.f32 %v2721_v51, %v2720_v20  ;;  %v3136_v55 = vsub.f32 %v5363_v30, %v5085_v52 }
 0x221   : > { %v4132_v4 = vpop.eup %4131  ;;  %v2513_v40 = vmul.bf16 1069105081, %v2438_v19  ;;  %v2725_v25 = vadd.f32 %v2724_v24, %v2723_v8  ;;  %v3137_v11 = vsub.f32 %v5399_v6, %v5085_v52  ;;  %v3139_v3 = vsub.f32 %v5403_v13, %v5085_v52 }
 0x222   : > { %v3683_v16 = vmul.f32 -1.442695, %v2881_v10  ;;  %4141 = vrcp.f32 %v2990_v21  ;;  %v2549_v26 = vunpack.c.l.bf16 %v4132_v4  ;;  %v2577_v31 = vunpack.c.h.bf16 %v4132_v4  ;;  %v4134_v0 = vpop.eup %4133 }
 0x223   : > { %v4136_v45 = vpop.eup %4135  ;;  %v3072_v39 = vmul.f32 %v4134_v0, %v5337_v43  ;;  %v2726_v23 = vrot.slane %v2725_v25, 2  ;;  %v3693_v32 = vclamps-f32 %v3125_v34, 1.0  ;;  %v3694_v30 = vclamps-f32 %v3126_v28, 1.0 }
 0x224   : > { %4143 = vpow2.f32 %v3683_v16  ;;  %v2737_v49 = vadd.f32 %v2577_v31, %v2549_v26  ;;  %v2814_v20 = vmul.f32 0.6931472, %v4136_v45  ;;  %v3695_v8 = vclamps-f32 %v3127_v2, 1.0 }
 0x225   : > { %4145 = vlog2.f32 %v2722_v53  ;;  %v4138_v1 = vpop.eup %4137  ;;  %v3100_v61 = vmul.f32 0.16666667, %v3072_v39  ;;  %v2727_v46 = vadd.f32 %v2726_v23, %v2725_v25  ;;  %v3696_v18 = vclamps-f32 %v3128_v47, 1.0 }
 0x226   : > { %4147 = vpow.bf16 %v2513_v40  ;;  %v2991_v42 = vadd.f32 1.0, %v4138_v1  ;;  %v2738_v6 = vrot.slane %v2737_v49, 4  ;;  %v5428_v43 = vadd.f32 %v2814_v20, %v5282_v48 }
 0x227   : > { %v4140_v51 = vpop.eup %4139  ;;  %v3697_v34 = vclamps-f32 %v3129_v7, 1.0  ;;  %v2728_v36 = vrot.slane %v2727_v46, 1  ;;  %v3698_v10 = vclamps-f32 %v3130_v33, 1.0  ;;  %v3699_v53 = vclamps-f32 %v3131_v38, 1.0 }
 0x228   : > { %v2739_v5 = vadd.f32 %v2738_v6, %v2737_v49  ;;  %v2548_v28 = vunpack.c.l.bf16 %v4140_v51  ;;  %4149 = vrcp.f32 %v2991_v42  ;;  %v2880_v19 = vadd.f32 3.0, %v5428_v43 }
 0x229   : > { %v2576_v21 = vunpack.c.h.bf16 %v4140_v51  ;;  %v2729_v48 = vadd.f32 %v2728_v36, %v2727_v46  ;;  %v3138_v57 = vsub.f32 %v3100_v61, %v5085_v52  ;;  %v3700_v2 = vclamps-f32 %v3132_v62, 1.0 }
 0x22a   : > { %v2740_v24 = vrot.slane %v2739_v5, 2  ;;  %v3682_v4 = vmul.f32 -1.442695, %v2880_v19  ;;  %v5438_v27 = vclamps-f32 %v3133_v15, 1.0  ;;  %v5440_v47 = vclamps-f32 %v3134_v35, 1.0 }
 0x22b   : > { %v2730_v16 = vadd.f32 %v2576_v21, %v2548_v28  ;;  %4151 = vlog2.f32 %v2729_v48  ;;  %v5442_v40 = vclamps-f32 %v3135_v60, 1.0  ;;  %v5444_v25 = vclamps-f32 %v3136_v55, 1.0 }
 0x22c   : > { %v4142_v7 = vpop.eup %4141  ;;  %v2741_v33 = vadd.f32 %v2740_v24, %v2739_v5  ;;  %4153 = vpow2.f32 %v3682_v4  ;;  %v3705_v62 = vclamps-f32 %v3137_v11, 1.0  ;;  %v3706_v0 = vclamps-f32 %v3138_v57, 1.0 }
 0x22d   : > { %v3074_v26 = vmul.f32 %v4142_v7, %v5357_v17  ;;  %v2731_v31 = vrot.slane %v2730_v16, 4  ;;  %v3237_v45 = vcombine.low %v3693_v32, %v3694_v30  ;;  %v3238_v39 = vcombine.low %v3695_v8, %v3696_v18 }
 0x22e   : > { %v4144_v38 = vpop.eup %4143  ;;  %v2742_v35 = vrot.slane %v2741_v33, 1  ;;  %v3239_v55 = vcombine.low %v3697_v34, %v3698_v10  ;;  %v3240_v17 = vcombine.low %v3699_v53, %v3700_v2  ;;  %v3286_v21 = vcombine.low %v5438_v27, %v5440_v47 }
 0x22f   : > { %v4146_v15 = vpop.eup %4145  ;;  %v3102_v23 = vmul.f32 0.16666667, %v3074_v26  ;;  %v2732_v49 = vadd.f32 %v2731_v31, %v2730_v16  ;;  %v2993_v20 = vadd.f32 1.0, %v4144_v38  ;;  %v3247_v42 = vrot.slane %v3237_v45, %v5102_v41 }
 0x230   : > { %v2818_v60 = vmul.f32 0.6931472, %v4146_v15  ;;  %v2743_v61 = vadd.f32 %v2742_v35, %v2741_v33  ;;  %v3254_v30 = vrot.slane %v3238_v39, %v5102_v41  ;;  %v3261_v8 = vrot.slane %v3239_v55, %v5102_v41 }
 0x231   : > { %v4148_v1 = vpop.eup %4147  ;;  %v2733_v11 = vrot.slane %v2732_v49, 2  ;;  %v3140_v32 = vsub.f32 %v3102_v23, %v5085_v52  ;;  %v3268_v10 = vrot.slane %v3240_v17, %v5102_v41  ;;  %v3287_v4 = vcombine.low %v5442_v40, %v5444_v25 }
 0x232   : > { %v5453_v46 = vadd.f32 %v2818_v60, %v5307_v63  ;;  %v2550_v6 = vunpack.c.l.bf16 %v4148_v1  ;;  %v2578_v51 = vunpack.c.h.bf16 %v4148_v1  ;;  %4155 = vlog2.f32 %v2743_v61  ;;  %v4150_v18 = vpop.eup %4149 }
 0x233   : > { %v2734_v36 = vadd.f32 %v2733_v11, %v2732_v49  ;;  %v3707_v63 = vclamps-f32 %v3139_v3, 1.0  ;;  %v3708_v28 = vclamps-f32 %v3140_v32, 1.0  ;;  %v3269_v19 = vcombine.low %v3247_v42, %v3254_v30 }
 0x234   : > { %v2882_v34 = vadd.f32 3.0, %v5453_v46  ;;  %v2744_v5 = vadd.f32 %v2578_v51, %v2550_v6  ;;  %4157 = vrcp.f32 %v2993_v20  ;;  %v3270_v2 = vcombine.low %v3261_v8, %v3268_v10 }
 0x235   : > { %v2735_v48 = vrot.slane %v2734_v36, 1  ;;  %v4152_v57 = vpop.eup %4151  ;;  %v3288_v13 = vcombine.low %v3705_v62, %v3706_v0  ;;  %v3277_v33 = vrot.slane %v3269_v19, %v5102_v41  ;;  %v3289_v26 = vcombine.low %v3707_v63, %v3708_v28  ;;  %v5634_v28 = vld [vmem:[#allocation7_spill] sm:$0xff] }
 0x236   : > { %v3684_v53 = vmul.f32 -1.442695, %v2882_v34  ;;  %v2745_v24 = vrot.slane %v2744_v5, 4  ;;  %v4154_v3 = vpop.eup %4153  ;;  %v2820_v16 = vmul.f32 0.6931472, %v4152_v57  ;;  %v3284_v47 = vrot.slane %v3270_v2, %v5102_v41 }
 0x237   : > { %v2736_v7 = vadd.f32 %v2735_v48, %v2734_v36  ;;  %v2992_v38 = vadd.f32 1.0, %v4154_v3  ;;  %v3075_v31 = vmul.f32 %v4150_v18, %v5371_v12  ;;  %v3296_v40 = vrot.slane %v3286_v21, %v5102_v41 }
 0x238   : > { %4159 = vpow2.f32 %v3684_v53  ;;  %v2746_v27 = vadd.f32 %v2745_v24, %v2744_v5  ;;  %v5475_v15 = vadd.f32 %v2820_v16, %v5339_v56  ;;  %v3285_v62 = vcombine.low %v3277_v33, %v3284_v47  ;;  %v5633_v5 = vld [vmem:[#allocation4_spill] sm:$0xff] }
 0x239   : > { %4161 = vlog2.f32 %v2736_v7  ;;  %v3303_v35 = vrot.slane %v3287_v4, %v5102_v41  ;;  %v3310_v12 = vrot.slane %v3288_v13, %v5102_v41  ;;  %v3317_v56 = vrot.slane %v3289_v26, %v5102_v41 }
 0x23a   : > { %4163 = vrcp.f32 %v2992_v38  ;;  %v2747_v25 = vrot.slane %v2746_v27, 2  ;;  %v2883_v0 = vadd.f32 3.0, %v5475_v15  ;;  %3412 = vst [vmem:[%s5480_s17] sm:$0xff] %v3285_v62  ;;  %v3103_v60 = vmul.f32 0.16666667, %v3075_v31 }
 0x23b   : > { %v3318_v23 = vcombine.low %v3296_v40, %v3303_v35  ;;  %v3319_v1 = vcombine.low %v3310_v12, %v3317_v56  ;;  %v5491_v17 = vadd.f32 %v5258_v44, %v4862_v58  ;;  %v5495_v42 = vadd.f32 %v5260_v54, %v4862_v58  ;;  %v5631_v54 = vld [vmem:[#allocation5_spill] sm:$0xff] }
 0x23c   : > { %v4156_v45 = vpop.eup %4155  ;;  %v2748_v39 = vadd.f32 %v2747_v25, %v2746_v27  ;;  %v3685_v49 = vmul.f32 -1.442695, %v2883_v0  ;;  %v5503_v51 = vadd.f32 %v5262_v37, %v4862_v58  ;;  %v5507_v44 = vadd.f32 %v5270_v9, %v4864_v59 }
 0x23d   : > { %v2824_v55 = vmul.f32 0.6931472, %v4156_v45  ;;  %v3326_v61 = vrot.slane %v3318_v23, %v5102_v41  ;;  %v3333_v6 = vrot.slane %v3319_v1, %v5102_v41  ;;  %v5511_v8 = vadd.f32 %v5631_v54, %v4864_v59 }
 0x23e   : > { %v2749_v20 = vrot.slane %v2748_v39, 1  ;;  %4165 = vpow2.f32 %v3685_v49  ;;  %v4158_v32 = vpop.eup %4157  ;;  %v5520_v63 = vadd.f32 %v5633_v5, %v4862_v58  ;;  %v5524_v9 = vadd.f32 %v5634_v28, %v4864_v59 }
 0x23f   : > { %v5498_v11 = vadd.f32 %v2824_v55, %v5354_v50  ;;  %v5632_v50 = vld [vmem:[#allocation6_spill] sm:$0xff]  ;;  %v3334_v37 = vcombine.low %v3326_v61, %v3333_v6  ;;  %v2331_v19 = vmax.f32 %v5491_v17, %v5507_v44  ;;  %v2345_v21 = vmax.f32 %v5495_v42, %v5511_v8 }
 0x240   : > { %v2750_v30 = vadd.f32 %v2749_v20, %v2748_v39  ;;  %v5515_v18 = vadd.f32 %v5632_v50, %v4864_v59  ;;  %v3141_v48 = vsub.f32 %v3103_v60, %v5085_v52  ;;  %v2352_v59 = vmax.f32 %v5520_v63, %v5524_v9 }
 0x241   : > { %v2885_v36 = vadd.f32 3.0, %v5498_v11  ;;  %3413 = vst [vmem:[%s5480_s17 + $0x8] sm:$0xff] %v3334_v37  ;;  %v2332_v4 = vrot.slane %v2331_v19, 4  ;;  %v2346_v13 = vrot.slane %v2345_v21, 4  ;;  %v3077_v33 = vmul.f32 %v4158_v32, %v5393_v14 }
 0x242   : > { %v4160_v34 = vpop.eup %4159  ;;  %4167 = vlog2.f32 %v2750_v30  ;;  %v2338_v58 = vmax.f32 %v5503_v51, %v5515_v18  ;;  %v2353_v7 = vrot.slane %v2352_v59, 4  ;;  %v3709_v12 = vclamps-f32 %v3141_v48, 1.0 }
 0x243   : > { %v2994_v10 = vadd.f32 1.0, %v4160_v34  ;;  %v4162_v53 = vpop.eup %4161  ;;  %v3687_v24 = vmul.f32 -1.442695, %v2885_v36  ;;  %v2333_v27 = vmax.f32 %v2331_v19, %v2332_v4  ;;  %v2347_v47 = vmax.f32 %v2345_v21, %v2346_v13 }
 0x244   : > { %v4164_v57 = vpop.eup %4163  ;;  %v2822_v2 = vmul.f32 0.6931472, %v4162_v53  ;;  %v2339_v16 = vrot.slane %v2338_v58, 4  ;;  %v2354_v40 = vmax.f32 %v2352_v59, %v2353_v7  ;;  %v3105_v39 = vmul.f32 0.16666667, %v3077_v33 }
 0x245   : > { %4169 = vrcp.f32 %v2994_v10  ;;  %v3076_v3 = vmul.f32 %v4164_v57, %v5428_v43  ;;  %v2334_v62 = vrot.slane %v2333_v27, 2  ;;  %v2348_v35 = vrot.slane %v2347_v47, 2 }
 0x246   : > { %4171 = vpow2.f32 %v3687_v24  ;;  %v5539_v38 = vadd.f32 %v2822_v2, %v5366_v22  ;;  %v2340_v31 = vmax.f32 %v2338_v58, %v2339_v16  ;;  %v2355_v45 = vrot.slane %v2354_v40, 2 }
 0x247   : > { %v3104_v26 = vmul.f32 0.16666667, %v3076_v3  ;;  %v2335_v23 = vmax.f32 %v2333_v27, %v2334_v62  ;;  %v2349_v22 = vmax.f32 %v2347_v47, %v2348_v35  ;;  %v3143_v34 = vsub.f32 %v3105_v39, %v5085_v52 }
 0x248   : > { %v2884_v25 = vadd.f32 3.0, %v5539_v38  ;;  %v4166_v0 = vpop.eup %4165  ;;  %v2341_v56 = vrot.slane %v2340_v31, 2  ;;  %v2356_v1 = vmax.f32 %v2354_v40, %v2355_v45 }
 0x249   : > { %v3142_v43 = vsub.f32 %v3104_v26, %v5085_v52  ;;  %v2995_v49 = vadd.f32 1.0, %v4166_v0  ;;  %v2336_v61 = vrot.slane %v2335_v23, 1  ;;  %v2350_v6 = vrot.slane %v2349_v22, 1 }
 0x24a   : > { %v3686_v14 = vmul.f32 -1.442695, %v2884_v25  ;;  %v2342_v55 = vmax.f32 %v2340_v31, %v2341_v56  ;;  %v2357_v5 = vrot.slane %v2356_v1, 1  ;;  %v3711_v2 = vclamps-f32 %v3143_v34, 1.0 }
 0x24b   : > { %v3710_v60 = vclamps-f32 %v3142_v43, 1.0  ;;  %v5544_v36 = vmax.f32 %v2335_v23, %v2336_v61  ;;  %v5546_v37 = vmax.f32 %v2349_v22, %v2350_v6 }
 0x24c   : > { %v4168_v20 = vpop.eup %4167  ;;  %4173 = vpow2.f32 %v3686_v14  ;;  %v2343_v54 = vrot.slane %v2342_v55, 1  ;;  %v5567_v13 = vmax.f32 %v2356_v1, %v2357_v5 }
 0x24d   : > { %v3335_v32 = vcombine.low %v3709_v12, %v3710_v60  ;;  %v2826_v30 = vmul.f32 0.6931472, %v4168_v20  ;;  %4175 = vrcp.f32 %v2995_v49  ;;  %v2383_v48 = vsub.f32 %v5491_v17, %v5544_v36 }
 0x24e   : > { %v5552_v21 = vmax.f32 %v2342_v55, %v2343_v54  ;;  %v2411_v24 = vsub.f32 %v5507_v44, %v5544_v36  ;;  %v2385_v58 = vsub.f32 %v5495_v42, %v5546_v37 }
 0x24f   : > { %v4170_v50 = vpop.eup %4169  ;;  %v5550_v19 = vadd.f32 %v2826_v30, %v5385_v29  ;;  %v5575_v31 = vrot.slane %v3335_v32, %v5102_v41 }
 0x250   : > { %v4172_v28 = vpop.eup %4171  ;;  %v3078_v10 = vmul.f32 %v4170_v50, %v5453_v46  ;;  %v2413_v46 = vsub.f32 %v5511_v8, %v5546_v37  ;;  %v2384_v29 = vsub.f32 %v5503_v51, %v5552_v21  ;;  %v2439_v4 = vpack.c.bf16 %v2411_v24, %v2383_v48 }
 0x251   : > { %v2997_v53 = vadd.f32 1.0, %v4172_v28  ;;  %v2886_v57 = vadd.f32 3.0, %v5550_v19  ;;  %v2412_v17 = vsub.f32 %v5515_v18, %v5552_v21  ;;  %v2386_v8 = vsub.f32 %v5520_v63, %v5567_v13 }
 0x252   : > { %v3106_v59 = vmul.f32 0.16666667, %v3078_v10  ;;  %v2441_v3 = vpack.c.bf16 %v2413_v46, %v2385_v58  ;;  %v2516_v16 = vmul.bf16 1069105081, %v2439_v4  ;;  %v2414_v51 = vsub.f32 %v5524_v9, %v5567_v13 }
 0x253   : > { %4177 = vrcp.f32 %v2997_v53  ;;  %v3688_v42 = vmul.f32 -1.442695, %v2886_v57  ;;  %v2440_v7 = vpack.c.bf16 %v2412_v17, %v2384_v29 }
 0x254   : > { %v3144_v44 = vsub.f32 %v3106_v59, %v5085_v52  ;;  %v2522_v27 = vmul.bf16 1069105081, %v2441_v3  ;;  %v2442_v47 = vpack.c.bf16 %v2414_v51, %v2386_v8 }
 0x255   : > { %4179 = vpow2.f32 %v3688_v42  ;;  %v2519_v18 = vmul.bf16 1069105081, %v2440_v7 }
 0x256   : > { %v3712_v33 = vclamps-f32 %v3144_v44, 1.0  ;;  %4181 = vpow.bf16 %v2516_v16  ;;  %v4174_v26 = vpop.eup %4173  ;;  %v2525_v62 = vmul.bf16 1069105081, %v2442_v47 }
 0x257   : > { %4183 = vpow.bf16 %v2522_v27  ;;  %v2996_v25 = vadd.f32 1.0, %v4174_v26  ;;  %v4176_v35 = vpop.eup %4175 }
 0x258   : > { %v3336_v40 = vcombine.low %v3711_v2, %v3712_v33  ;;  %4185 = vpow.bf16 %v2519_v18  ;;  %v3079_v12 = vmul.f32 %v4176_v35, %v5475_v15 }
 0x259   : > { %4187 = vrcp.f32 %v2996_v25 }
 0x25a   : > { %v5578_v63 = vrot.slane %v3336_v40, %v5102_v41  ;;  %4189 = vpow.bf16 %v2525_v62  ;;  %v3107_v39 = vmul.f32 0.16666667, %v3079_v12 }
 0x25c   : > { %v3367_v9 = vcombine.low %v5575_v31, %v5578_v63  ;;  %v3145_v30 = vsub.f32 %v3107_v39, %v5085_v52 }
 0x25d   : > { %v4178_v0 = vpop.eup %4177 }
 0x25e   : > { %v3081_v20 = vmul.f32 %v4178_v0, %v5498_v11  ;;  %v3713_v57 = vclamps-f32 %v3145_v30, 1.0 }
 0x25f   : > { %v4180_v43 = vpop.eup %4179 }
 0x260   : > { %v2998_v56 = vadd.f32 1.0, %v4180_v43  ;;  %v3109_v24 = vmul.f32 0.16666667, %v3081_v20 }
 0x261   : > { %v4182_v45 = vpop.eup %4181 }
 0x262   : > { %v4184_v14 = vpop.eup %4183  ;;  %4191 = vrcp.f32 %v2998_v56  ;;  %v2551_v23 = vunpack.c.l.bf16 %v4182_v45  ;;  %v2579_v22 = vunpack.c.h.bf16 %v4182_v45  ;;  %v3147_v3 = vsub.f32 %v3109_v24, %v5085_v52 }
 0x263   : > { %v4186_v60 = vpop.eup %4185  ;;  %v2553_v49 = vunpack.c.l.bf16 %v4184_v14  ;;  %v2581_v55 = vunpack.c.h.bf16 %v4184_v14 }
 0x264   : > { %v4188_v1 = vpop.eup %4187  ;;  %v2751_v61 = vadd.f32 %v2579_v22, %v2551_v23  ;;  %v2552_v6 = vunpack.c.l.bf16 %v4186_v60  ;;  %v2580_v32 = vunpack.c.h.bf16 %v4186_v60  ;;  %v3715_v0 = vclamps-f32 %v3147_v3, 1.0 }
 0x265   : > { %v3080_v15 = vmul.f32 %v4188_v1, %v5539_v38  ;;  %v2765_v54 = vadd.f32 %v2581_v55, %v2553_v49  ;;  %v4190_v50 = vpop.eup %4189  ;;  %v3375_v55 = vrot.slane %v3367_v9, %v5102_v41 }
 0x266   : > { %v2752_v34 = vrot.slane %v2751_v61, 4  ;;  %v2758_v5 = vadd.f32 %v2580_v32, %v2552_v6  ;;  %v2554_v53 = vunpack.c.l.bf16 %v4190_v50  ;;  %v2582_v48 = vunpack.c.h.bf16 %v4190_v50 }
 0x267   : > { %v3108_v28 = vmul.f32 0.16666667, %v3080_v15  ;;  %v2766_v10 = vrot.slane %v2765_v54, 4 }
 0x268   : > { %v2753_v58 = vadd.f32 %v2752_v34, %v2751_v61  ;;  %v2759_v59 = vrot.slane %v2758_v5, 4  ;;  %v2772_v29 = vadd.f32 %v2582_v48, %v2554_v53 }
 0x269   : > { %v3146_v11 = vsub.f32 %v3108_v28, %v5085_v52  ;;  %v2767_v46 = vadd.f32 %v2766_v10, %v2765_v54 }
 0x26a   : > { %v2754_v2 = vrot.slane %v2753_v58, 2  ;;  %v2760_v4 = vadd.f32 %v2759_v59, %v2758_v5  ;;  %v2773_v44 = vrot.slane %v2772_v29, 4 }
 0x26b   : > { %v3714_v17 = vclamps-f32 %v3146_v11, 1.0  ;;  %v2768_v38 = vrot.slane %v2767_v46, 2 }
 0x26c   : > { %v4192_v42 = vpop.eup %4191  ;;  %v2755_v16 = vadd.f32 %v2754_v2, %v2753_v58  ;;  %v2761_v7 = vrot.slane %v2760_v4, 2  ;;  %v2774_v27 = vadd.f32 %v2773_v44, %v2772_v29 }
 0x26d   : > { %v3337_v8 = vcombine.low %v3713_v57, %v3714_v17  ;;  %v3082_v51 = vmul.f32 %v4192_v42, %v5550_v19  ;;  %v2769_v33 = vadd.f32 %v2768_v38, %v2767_v46 }
 0x26e   : > { %v2756_v18 = vrot.slane %v2755_v16, 1  ;;  %v2762_v47 = vadd.f32 %v2761_v7, %v2760_v4  ;;  %v2775_v25 = vrot.slane %v2774_v27, 2 }
 0x26f   : > { %v3110_v26 = vmul.f32 0.16666667, %v3082_v51  ;;  %v2770_v40 = vrot.slane %v2769_v33, 1  ;;  %v3359_v19 = vrot.slane %v3337_v8, %v5102_v41 }
 0x270   : > { %v2757_v62 = vadd.f32 %v2756_v18, %v2755_v16  ;;  %v2763_v35 = vrot.slane %v2762_v47, 1  ;;  %v2776_v56 = vadd.f32 %v2775_v25, %v2774_v27 }
 0x271   : > { %v3148_v12 = vsub.f32 %v3110_v26, %v5085_v52  ;;  %v2771_v43 = vadd.f32 %v2770_v40, %v2769_v33 }
 0x272   : > { %4193 = vlog2.f32 %v2757_v62  ;;  %v2764_v45 = vadd.f32 %v2763_v35, %v2762_v47  ;;  %v2777_v14 = vrot.slane %v2776_v56, 1 }
 0x273   : > { %v3716_v39 = vclamps-f32 %v3148_v12, 1.0  ;;  %4195 = vlog2.f32 %v2771_v43 }
 0x274   : > { %4197 = vlog2.f32 %v2764_v45  ;;  %v2778_v22 = vadd.f32 %v2777_v14, %v2776_v56  ;;  %v5635_v14 = vlaneseq }
 0x275   : > { %v3338_v23 = vcombine.low %v3715_v0, %v3716_v39 }
 0x276   : > { %4199 = vlog2.f32 %v2778_v22  ;;  %vm3417_vm2 = vcmp.lt.s32.totalorder %v5635_v14, 512 }
 0x277   : > { %v3366_v60 = vrot.slane %v3338_v23, %v5102_v41 }
 0x279   : > { %v3368_v49 = vcombine.low %v3359_v19, %v3366_v60 }
 0x27b   : > { %v3382_v1 = vrot.slane %v3368_v49, %v5102_v41 }
 0x27c   : > { %v4194_v20 = vpop.eup %4193 }
 0x27d   : > { %v4196_v61 = vpop.eup %4195  ;;  %v3383_v6 = vcombine.low %v3375_v55, %v3382_v1  ;;  %v2828_v32 = vmul.f32 0.6931472, %v4194_v20 }
 0x27e   : > { %v4198_v30 = vpop.eup %4197  ;;  %v2832_v15 = vmul.f32 0.6931472, %v4196_v61 }
 0x27f   : > { %3414 = vst [vmem:[%s5480_s17 + $0x10] sm:$0xff] %v3383_v6  ;;  %v2859_v54 = vadd.f32 %v2828_v32, %v5544_v36  ;;  %v2830_v50 = vmul.f32 0.6931472, %v4198_v30 }
 0x280   : > { %v2861_v34 = vadd.f32 %v2832_v15, %v5546_v37  ;;  %v4200_v5 = vpop.eup %4199 }
 0x281   : > { %v2887_v28 = vadd.f32 3.0, %v2859_v54  ;;  %v2860_v10 = vadd.f32 %v2830_v50, %v5552_v21  ;;  %v2834_v63 = vmul.f32 0.6931472, %v4200_v5 }
 0x282   : > { %v2889_v31 = vadd.f32 3.0, %v2861_v34 }
 0x283   : > { %v3689_v9 = vmul.f32 -1.442695, %v2887_v28  ;;  %v2888_v53 = vadd.f32 3.0, %v2860_v10  ;;  %v2862_v24 = vadd.f32 %v2834_v63, %v5567_v13 }
 0x284   : > { %v3691_v48 = vmul.f32 -1.442695, %v2889_v31 }
 0x285   : > { %4201 = vpow2.f32 %v3689_v9  ;;  %v3690_v58 = vmul.f32 -1.442695, %v2888_v53  ;;  %v2890_v59 = vadd.f32 3.0, %v2862_v24 }
 0x286   : > { %4203 = vpow2.f32 %v3691_v48 }
 0x287   : > { %4205 = vpow2.f32 %v3690_v58  ;;  %v3692_v36 = vmul.f32 -1.442695, %v2890_v59 }
 0x289   : > { %4207 = vpow2.f32 %v3692_v36 }
 0x28f   : > { %v4202_v57 = vpop.eup %4201 }
 0x290   : > { %v4204_v37 = vpop.eup %4203  ;;  %v2999_v11 = vadd.f32 1.0, %v4202_v57 }
 0x291   : > { %v4206_v46 = vpop.eup %4205  ;;  %v3001_v29 = vadd.f32 1.0, %v4204_v37 }
 0x292   : > { %4209 = vrcp.f32 %v2999_v11  ;;  %v3000_v21 = vadd.f32 1.0, %v4206_v46 }
 0x293   : > { %4211 = vrcp.f32 %v3001_v29  ;;  %v4208_v2 = vpop.eup %4207 }
 0x294   : > { %4213 = vrcp.f32 %v3000_v21  ;;  %v3002_v4 = vadd.f32 1.0, %v4208_v2 }
 0x296   : > { %4215 = vrcp.f32 %v3002_v4 }
 0x29c   : > { %v4210_v13 = vpop.eup %4209 }
 0x29d   : > { %v4212_v17 = vpop.eup %4211  ;;  %v3083_v38 = vmul.f32 %v4210_v13, %v2859_v54 }
 0x29e   : > { %v4214_v44 = vpop.eup %4213  ;;  %v3085_v42 = vmul.f32 %v4212_v17, %v2861_v34 }
 0x29f   : > { %v3111_v3 = vmul.f32 0.16666667, %v3083_v38  ;;  %v3084_v16 = vmul.f32 %v4214_v44, %v2860_v10 }
 0x2a0   : > { %v3113_v7 = vmul.f32 0.16666667, %v3085_v42  ;;  %v4216_v8 = vpop.eup %4215 }
 0x2a1   : > { %v3149_v51 = vsub.f32 %v3111_v3, %v5085_v52  ;;  %v3112_v33 = vmul.f32 0.16666667, %v3084_v16  ;;  %v3086_v18 = vmul.f32 %v4216_v8, %v2862_v24 }
 0x2a2   : > { %v3151_v27 = vsub.f32 %v3113_v7, %v5085_v52 }
 0x2a3   : > { %v3717_v47 = vclamps-f32 %v3149_v51, 1.0  ;;  %v3150_v26 = vsub.f32 %v3112_v33, %v5085_v52  ;;  %v3114_v40 = vmul.f32 0.16666667, %v3086_v18 }
 0x2a4   : > { %v3719_v62 = vclamps-f32 %v3151_v27, 1.0 }
 0x2a5   : > { %v3718_v25 = vclamps-f32 %v3150_v26, 1.0  ;;  %v3152_v35 = vsub.f32 %v3114_v40, %v5085_v52 }
 0x2a7   : > { %v3384_v0 = vcombine.low %v3717_v47, %v3718_v25  ;;  %v3720_v12 = vclamps-f32 %v3152_v35, 1.0 }
 0x2a9   : > { %v3392_v43 = vrot.slane %v3384_v0, %v5102_v41  ;;  %v3385_v56 = vcombine.low %v3719_v62, %v3720_v12 }
 0x2ab   : > { %v3399_v45 = vrot.slane %v3385_v56, %v5102_v41 }
 0x2ad   : > { %v3400_v39 = vcombine.low %v3392_v43, %v3399_v45 }
 0x2af   : > { %v3407_v19 = vrot.slane %v3400_v39, %v5102_v41 }
 0x2b1   : > { %3419 = vst.msk [vmem:[%s5480_s17 + $0x18] sm:$0xf] %vm3417_vm2, %v3407_v19 }
 0x2b2 PF: > { %p13_p9 = scmp.ge.s32.totalorder %s4288_s20, 4   ;;  %s5636_s17 = smov %s4235_s18 }
 0x2b3   : > { %s5637_s18 = smov %s4297_s23  ;;  %s5638_s19 = smov %s4288_s20 }
 0x2b4   :  { %15 = sbr.rel (!%p13_p9) target bundleno = 5 (0x5), region = 94 }

</bundles_post_ra>
